<compile_context>
chip_gen: v7x
topology: tpu7x:2x2x1
jax: 0.10.0
libtpu: 0.0.40
codegen_flags: <defaults>
</compile_context>

<pallas_src>
import functools

import numpy as np
import jax
import jax.numpy as jnp
from jax import lax
from jax.experimental import pallas as pl
from jax.experimental.pallas import tpu as pltpu

# ---- module hyper-parameters (consistent with the PyTorch module) ----------
NEI_SIZE = 3                      # spatial side = 2*nei_size+1 = 7 -> S = 49
KERNEL_SIZE = 1                   # conv kernel side = 3, conv out ch = 9
N_HEAD = 2
SIDE = 2 * NEI_SIZE + 1           # 7
S = SIDE * SIDE                   # 49
KSIDE = 2 * KERNEL_SIZE + 1       # 3
K2 = KSIDE * KSIDE                # 9 == size**2 (conv out channels)
D_MODEL = K2
while D_MODEL % N_HEAD != 0:      # exactly the __init__ logic -> 10
    D_MODEL += 1
D_HEAD = D_MODEL // N_HEAD        # 5
D_FF = 4 * D_MODEL                # 40
WINDOW = 2 * NEI_SIZE + 1         # local_attn_window_size = 7


def _rup(n, m):
    return ((n + m - 1) // m) * m


S_PAD = _rup(S, 8)                # 56 (sublane-aligned padded sequence length)
PACK_COLS = 128

# ---- fused q/k/vo column layout (inside the packed weight slab) -------------
CQ = 0                            # [q0|q1]  : columns 0..9  (scale folded)
CK = N_HEAD * D_HEAD              # [k0|k1]  : columns 10..19
CVO = 2 * N_HEAD * D_HEAD         # [vo0|vo1]: columns 20..39 (Wv@Wo folded)
QKV_COLS = CVO + N_HEAD * D_MODEL  # 40

# ---- weight-pack row layout (bf16 slab; 16-row aligned segments) -----------
R_WC = 0
R_WL = R_WC + _rup(K2, 16)          # 16
R_WQKV = R_WL + _rup(K2, 16)        # 32
R_WF1 = R_WQKV + _rup(D_MODEL, 16)  # 48
R_WF2 = R_WF1 + _rup(D_MODEL, 16)   # 64
R_WP1 = R_WF2 + _rup(D_FF, 16)      # 112
R_WP2 = R_WP1 + _rup(D_MODEL, 16)   # 128
W_ROWS = R_WP2 + _rup(D_MODEL, 16)  # 144

# ---- vector-pack row layout (f32 slab) --------------------------------------
R_POS = 0                          # (S_PAD, D_MODEL)  posemb + folded bl
R_MASK = S_PAD                     # (S_PAD, S_PAD)    additive attention mask
R_BC = 2 * S_PAD                   # conv bias
R_LN1G = R_BC + 1
R_LN1B = R_LN1G + 1
R_BF1 = R_LN1B + 1
R_BF2 = R_BF1 + 1
R_LN2G = R_BF2 + 1
R_LN2B = R_LN2G + 1
R_BP1 = R_LN2B + 1
R_BP2 = R_BP1 + 1
V_ROWS = _rup(R_BP2 + 1, 8)        # 128


def _sincos_pos_emb(n_position, d_model):
    """get_sincos_enc_posEmb re-implemented in numpy."""
    pos = np.arange(n_position, dtype=np.float64)[:, None]
    hid = np.arange(d_model)[None, :]
    table = pos / np.power(10000.0, 2.0 * (hid // 2) / d_model)
    table[:, 0::2] = np.sin(table[:, 0::2])
    table[:, 1::2] = np.cos(table[:, 1::2])
    return jnp.asarray(table, dtype=jnp.float32)


# ----------------------------- Pallas kernel --------------------------------
def att_nlm_kernel(patches_ref, w_ref, v_ref, out_ref, *, tb):
    f32 = jnp.float32
    bf16 = jnp.bfloat16
    n = tb * S_PAD

    # ---- packed weights (bf16) ----
    wc = w_ref[R_WC:R_WC + K2, 0:K2]
    wl = w_ref[R_WL:R_WL + K2, 0:D_MODEL]
    wqkv = w_ref[R_WQKV:R_WQKV + D_MODEL, 0:QKV_COLS]
    wf1 = w_ref[R_WF1:R_WF1 + D_MODEL, 0:D_FF]
    wf2 = w_ref[R_WF2:R_WF2 + D_FF, 0:D_MODEL]
    wp1 = w_ref[R_WP1:R_WP1 + D_MODEL, 0:D_MODEL]
    wp2 = w_ref[R_WP2:R_WP2 + D_MODEL, 0:1]

    # ---- packed vector params (f32) ----
    posemb = v_ref[R_POS:R_POS + S_PAD, 0:D_MODEL]           # includes folded bl
    maskb = v_ref[R_MASK:R_MASK + S_PAD, 0:S_PAD]            # 0 / -1e30 bias
    bc = v_ref[R_BC:R_BC + 1, 0:K2]
    ln1g = v_ref[R_LN1G:R_LN1G + 1, 0:D_MODEL]
    ln1b = v_ref[R_LN1B:R_LN1B + 1, 0:D_MODEL]
    bf1 = v_ref[R_BF1:R_BF1 + 1, 0:D_FF]
    bf2 = v_ref[R_BF2:R_BF2 + 1, 0:D_MODEL]
    ln2g = v_ref[R_LN2G:R_LN2G + 1, 0:D_MODEL]
    ln2b = v_ref[R_LN2B:R_LN2B + 1, 0:D_MODEL]
    bp1 = v_ref[R_BP1:R_BP1 + 1, 0:D_MODEL]
    bp2 = v_ref[R_BP2:R_BP2 + 1, 0:1]

    # ---- conv (im2col matmul) + ReLU + L_transfer + posemb ----
    p = patches_ref[...]                                      # (n, K2) bf16
    h = jnp.dot(p, wc, preferred_element_type=f32) + bc       # (n, K2)
    h = jnp.maximum(h, 0.0)
    x = jnp.dot(h.astype(bf16), wl, preferred_element_type=f32)  # (n, D_MODEL)
    x = (x.reshape(tb, S_PAD, D_MODEL) + posemb[None, :, :]).reshape(n, D_MODEL)

    def layernorm(z, g, b):
        mu = jnp.mean(z, axis=-1, keepdims=True)
        zc = z - mu
        var = jnp.mean(zc * zc, axis=-1, keepdims=True)
        return zc * lax.rsqrt(var + 1e-5) * g + b

    # ---- transformer block (pre-norm, banded multi-head softmax attention) ----
    xn = layernorm(x, ln1g, ln1b)
    xnb = xn.astype(bf16)

    # Fused per-head projections: one (n, D_MODEL) x (D_MODEL, 40) matmul.
    qkv = jnp.dot(xnb, wqkv, preferred_element_type=f32)      # (n, 40)
    qkv3 = qkv.reshape(tb, S_PAD, QKV_COLS)

    p_list = []
    vo_list = []
    for hd in range(N_HEAD):                                  # static unroll (2)
        q = qkv3[:, :, CQ + hd * D_HEAD:CQ + (hd + 1) * D_HEAD]
        k = qkv3[:, :, CK + hd * D_HEAD:CK + (hd + 1) * D_HEAD]
        vo = qkv3[:, :, CVO + hd * D_MODEL:CVO + (hd + 1) * D_MODEL]

        s = jnp.einsum('bqd,bkd->bqk', q.astype(bf16), k.astype(bf16),
                       preferred_element_type=f32)            # (tb, S_PAD, S_PAD)
        s = s + maskb[None, :, :]
        m = jnp.max(s, axis=-1, keepdims=True)
        e = jnp.exp(s - m)
        inv_den = pl.reciprocal(jnp.sum(e, axis=-1, keepdims=True), approx=True)
        p_list.append((e * inv_den).astype(bf16))             # normalized probs
        vo_list.append(vo.astype(bf16))

    # Merged PV stage: one einsum yields the head-summed attention output.
    p_cat = jnp.concatenate(p_list, axis=2)                   # (tb, S_PAD, 2*S_PAD)
    vo_cat = jnp.concatenate(vo_list, axis=1)                 # (tb, 2*S_PAD, D_MODEL)
    attn = jnp.einsum('bqk,bkd->bqd', p_cat, vo_cat,
                      preferred_element_type=f32)             # (tb, S_PAD, D_MODEL)

    x = x + attn.reshape(n, D_MODEL)

    xn2 = layernorm(x, ln2g, ln2b)
    ff = jnp.dot(xn2.astype(bf16), wf1, preferred_element_type=f32) + bf1
    ff = jax.nn.gelu(ff, approximate=True)
    ff = jnp.dot(ff.astype(bf16), wf2, preferred_element_type=f32) + bf2
    x = x + ff

    # ---- PRE head: Linear -> ReLU -> Linear(-> 1) ----
    z = jnp.dot(x.astype(bf16), wp1, preferred_element_type=f32) + bp1
    z = jnp.maximum(z, 0.0)
    z = jnp.dot(z.astype(bf16), wp2, preferred_element_type=f32) + bp2   # (n, 1)

    # Lane-dense store: (n,1) -> (tb, S_PAD).
    out_ref[...] = z.reshape(tb, S_PAD)


# --------------------------- host-side param packing -------------------------
def pack_params(params):
    f = lambda a: np.asarray(a, np.float32)

    wpack = np.zeros((W_ROWS, PACK_COLS), np.float32)

    def put_w(r, w):
        w = f(w)
        wpack[r:r + w.shape[0], :w.shape[1]] = w

    put_w(R_WC, params["wc"])
    put_w(R_WL, params["wl"])

    wq, wk, wv, wo = f(params["wq"]), f(params["wk"]), f(params["wv"]), f(params["wo"])
    scale = 1.0 / np.sqrt(D_HEAD)
    wqkv = np.zeros((D_MODEL, QKV_COLS), np.float32)
    for h in range(N_HEAD):
        sl = slice(h * D_HEAD, (h + 1) * D_HEAD)
        wqkv[:, CQ + h * D_HEAD:CQ + (h + 1) * D_HEAD] = wq[:, sl] * scale
        wqkv[:, CK + h * D_HEAD:CK + (h + 1) * D_HEAD] = wk[:, sl]
        wqkv[:, CVO + h * D_MODEL:CVO + (h + 1) * D_MODEL] = wv[:, sl] @ wo[sl, :]
    put_w(R_WQKV, wqkv)

    put_w(R_WF1, params["wf1"])
    put_w(R_WF2, params["wf2"])
    put_w(R_WP1, params["wp1"])
    put_w(R_WP2, params["wp2"])

    vpack = np.zeros((V_ROWS, PACK_COLS), np.float32)
    pos = np.zeros((S_PAD, D_MODEL), np.float32)
    pos[:S] = f(params["posemb"])
    pos = pos + f(params["bl"])                              # fold L_transfer bias
    vpack[R_POS:R_POS + S_PAD, :D_MODEL] = pos
    r = np.arange(S_PAD)[:, None]
    c = np.arange(S_PAD)[None, :]
    allowed = (np.abs(r - c) <= WINDOW) & (c < S)            # band + key-padding mask
    vpack[R_MASK:R_MASK + S_PAD, :S_PAD] = np.where(allowed, 0.0, -1e30)

    def put_v(row, v):
        v = f(v).reshape(-1)
        vpack[row, :v.shape[0]] = v

    put_v(R_BC, params["bc"])
    put_v(R_LN1G, params["ln1g"]); put_v(R_LN1B, params["ln1b"])
    put_v(R_BF1, params["bf1"]);   put_v(R_BF2, params["bf2"])
    put_v(R_LN2G, params["ln2g"]); put_v(R_LN2B, params["ln2b"])
    put_v(R_BP1, params["bp1"]);   put_v(R_BP2, params["bp2"])

    return jnp.asarray(wpack, jnp.bfloat16), jnp.asarray(vpack, jnp.float32)


# ------------------------------- wrapper -------------------------------------
def _default_tile_and_vmem(B):
    # Conservative caps that fit every generation (v7x: 64 MiB physical VMEM).
    cap_tb, vmem = 128, 32 * 1024 * 1024
    try:
        info = pltpu.get_tpu_info()
        if info.vmem_capacity_bytes >= 96 * 1024 * 1024:     # v5e / v6e (128 MiB)
            cap_tb, vmem = 256, 64 * 1024 * 1024
    except Exception:
        pass
    # grid >= 2 at realistic B so ("parallel",) shards across both TCs on v7x.
    tb = min(cap_tb, max(8, _rup(-(-B // 2), 8)))
    return tb, vmem


def att_nlm_forward(x, params, *, tb=None):
    B, H, W = x.shape
    assert H == SIDE and W == SIDE, "spatial side must equal 2*nei_size+1"

    # im2col glue: pad by KERNEL_SIZE and gather KSIDE x KSIDE shifted views.
    xp = jnp.pad(x.astype(jnp.float32),
                 ((0, 0), (KERNEL_SIZE, KERNEL_SIZE), (KERNEL_SIZE, KERNEL_SIZE)))
    cols = [xp[:, di:di + H, dj:dj + W]
            for di in range(KSIDE) for dj in range(KSIDE)]
    patches = jnp.stack(cols, axis=-1).reshape(B, S, K2)      # (B, S, K2)

    vmem_bytes = 32 * 1024 * 1024
    if tb is None:
        tb, vmem_bytes = _default_tile_and_vmem(B)
    b_pad = _rup(B, tb)

    patches = jnp.pad(patches, ((0, b_pad - B), (0, S_PAD - S), (0, 0)))
    patches = patches.reshape(b_pad * S_PAD, K2).astype(jnp.bfloat16)

    wpack, vpack = pack_params(params)

    n_rows = tb * S_PAD
    grid = (b_pad // tb,)

    out = pl.pallas_call(
        functools.partial(att_nlm_kernel, tb=tb),
        out_shape=jax.ShapeDtypeStruct((b_pad, S_PAD), jnp.float32),
        grid=grid,
        in_specs=[
            pl.BlockSpec((n_rows, K2), lambda t: (t, 0)),
            pl.BlockSpec((W_ROWS, PACK_COLS), lambda t: (0, 0)),
            pl.BlockSpec((V_ROWS, PACK_COLS), lambda t: (0, 0)),
        ],
        out_specs=pl.BlockSpec((tb, S_PAD), lambda t: (t, 0)),
        compiler_params=pltpu.CompilerParams(
            dimension_semantics=("parallel",),
            vmem_limit_bytes=vmem_bytes),
    )(patches, wpack, vpack)

    out = out[:B, :S].reshape(B, SIDE, SIDE)
    return out


# --------------------------- deterministic init -------------------------------
def init_params(key):
    ks = jax.random.split(key, 10)

    def lin(k, fan_in, fan_out):
        return (jax.random.normal(k, (fan_in, fan_out), jnp.float32)
                * (1.0 / np.sqrt(fan_in)))

    return {
        # conv weight in im2col form: (patch_dim=K2, out_ch=K2)
        "wc": lin(ks[0], K2, K2),
        "bc": jnp.zeros((1, K2), jnp.float32),
        "wl": lin(ks[1], K2, D_MODEL),
        "bl": jnp.zeros((1, D_MODEL), jnp.float32),
        "ln1g": jnp.ones((1, D_MODEL), jnp.float32),
        "ln1b": jnp.zeros((1, D_MODEL), jnp.float32),
        "wq": lin(ks[2], D_MODEL, D_MODEL),
        "wk": lin(ks[3], D_MODEL, D_MODEL),
        "wv": lin(ks[4], D_MODEL, D_MODEL),
        "wo": lin(ks[5], D_MODEL, D_MODEL),
        "ln2g": jnp.ones((1, D_MODEL), jnp.float32),
        "ln2b": jnp.zeros((1, D_MODEL), jnp.float32),
        "wf1": lin(ks[6], D_MODEL, D_FF),
        "bf1": jnp.zeros((1, D_FF), jnp.float32),
        "wf2": lin(ks[7], D_FF, D_MODEL),
        "bf2": jnp.zeros((1, D_MODEL), jnp.float32),
        "wp1": lin(ks[8], D_MODEL, D_MODEL),
        "bp1": jnp.zeros((1, D_MODEL), jnp.float32),
        "wp2": lin(ks[9], D_MODEL, 1),
        "bp2": jnp.zeros((1, 1), jnp.float32),
        "posemb": _sincos_pos_emb(S, D_MODEL),
    }


if __name__ == "__main__":
    key = jax.random.PRNGKey(0)
    pkey, xkey = jax.random.split(key)
    params = init_params(pkey)
    x = jax.random.normal(xkey, (2, SIDE, SIDE), jnp.float32)     # (B, 7, 7)
    out = att_nlm_forward(x, params)
    jax.block_until_ready(out)
    assert out.shape == (2, SIDE, SIDE) and out.dtype == jnp.float32
    assert bool(jnp.all(jnp.isfinite(out)))
    print("KERNEL_OK")
</pallas_src>

<mosaic_0001>
module attributes {stable_mosaic.version = 11 : i64} {
  func.func @att_nlm_kernel(%arg0: i32, %arg1: memref<448x9xbf16, #tpu.memory_space<vmem>>, %arg2: memref<144x128xbf16, #tpu.memory_space<vmem>>, %arg3: memref<128x128xf32, #tpu.memory_space<vmem>>, %arg4: memref<8x56xf32, #tpu.memory_space<vmem>>) attributes {dimension_semantics = [#tpu.dimension_semantics<parallel>], iteration_bounds = array<i64: 1>, scalar_prefetch = 0 : i64, scratch_operands = 0 : i64, tpu.core_type = #tpu.core_type<tc>, window_params = [{transform_indices = @transform_0, window_bounds = array<i64: 448, 9>}, {pipeline_mode = #tpu.pipeline_mode<synchronous>, transform_indices = @transform_1, window_bounds = array<i64: 144, 128>}, {pipeline_mode = #tpu.pipeline_mode<synchronous>, transform_indices = @transform_2, window_bounds = array<i64: 128, 128>}, {transform_indices = @transform_3, window_bounds = array<i64: 8, 56>}]} {
    %c0 = arith.constant 0 : index
    %c0_0 = arith.constant 0 : index
    %0 = vector.load %arg2[%c0, %c0_0] : memref<144x128xbf16, #tpu.memory_space<vmem>>, vector<9x9xbf16>
    %c16 = arith.constant 16 : index
    %c0_1 = arith.constant 0 : index
    %1 = vector.load %arg2[%c16, %c0_1] : memref<144x128xbf16, #tpu.memory_space<vmem>>, vector<9x10xbf16>
    %c32 = arith.constant 32 : index
    %c0_2 = arith.constant 0 : index
    %2 = vector.load %arg2[%c32, %c0_2] : memref<144x128xbf16, #tpu.memory_space<vmem>>, vector<10x40xbf16>
    %c48 = arith.constant 48 : index
    %c0_3 = arith.constant 0 : index
    %3 = vector.load %arg2[%c48, %c0_3] : memref<144x128xbf16, #tpu.memory_space<vmem>>, vector<10x40xbf16>
    %c64 = arith.constant 64 : index
    %c0_4 = arith.constant 0 : index
    %4 = vector.load %arg2[%c64, %c0_4] : memref<144x128xbf16, #tpu.memory_space<vmem>>, vector<40x10xbf16>
    %c112 = arith.constant 112 : index
    %c0_5 = arith.constant 0 : index
    %5 = vector.load %arg2[%c112, %c0_5] : memref<144x128xbf16, #tpu.memory_space<vmem>>, vector<10x10xbf16>
    %c128 = arith.constant 128 : index
    %c0_6 = arith.constant 0 : index
    %6 = vector.load %arg2[%c128, %c0_6] : memref<144x128xbf16, #tpu.memory_space<vmem>>, vector<10x1xbf16>
    %c0_7 = arith.constant 0 : index
    %c0_8 = arith.constant 0 : index
    %7 = vector.load %arg3[%c0_7, %c0_8] : memref<128x128xf32, #tpu.memory_space<vmem>>, vector<56x10xf32>
    %c56 = arith.constant 56 : index
    %c0_9 = arith.constant 0 : index
    %8 = vector.load %arg3[%c56, %c0_9] : memref<128x128xf32, #tpu.memory_space<vmem>>, vector<56x56xf32>
    %c112_10 = arith.constant 112 : index
    %c0_11 = arith.constant 0 : index
    %9 = vector.load %arg3[%c112_10, %c0_11] : memref<128x128xf32, #tpu.memory_space<vmem>>, vector<1x9xf32>
    %c113 = arith.constant 113 : index
    %c0_12 = arith.constant 0 : index
    %10 = vector.load %arg3[%c113, %c0_12] : memref<128x128xf32, #tpu.memory_space<vmem>>, vector<1x10xf32>
    %c114 = arith.constant 114 : index
    %c0_13 = arith.constant 0 : index
    %11 = vector.load %arg3[%c114, %c0_13] : memref<128x128xf32, #tpu.memory_space<vmem>>, vector<1x10xf32>
    %c115 = arith.constant 115 : index
    %c0_14 = arith.constant 0 : index
    %12 = vector.load %arg3[%c115, %c0_14] : memref<128x128xf32, #tpu.memory_space<vmem>>, vector<1x40xf32>
    %c116 = arith.constant 116 : index
    %c0_15 = arith.constant 0 : index
    %13 = vector.load %arg3[%c116, %c0_15] : memref<128x128xf32, #tpu.memory_space<vmem>>, vector<1x10xf32>
    %c117 = arith.constant 117 : index
    %c0_16 = arith.constant 0 : index
    %14 = vector.load %arg3[%c117, %c0_16] : memref<128x128xf32, #tpu.memory_space<vmem>>, vector<1x10xf32>
    %c118 = arith.constant 118 : index
    %c0_17 = arith.constant 0 : index
    %15 = vector.load %arg3[%c118, %c0_17] : memref<128x128xf32, #tpu.memory_space<vmem>>, vector<1x10xf32>
    %c119 = arith.constant 119 : index
    %c0_18 = arith.constant 0 : index
    %16 = vector.load %arg3[%c119, %c0_18] : memref<128x128xf32, #tpu.memory_space<vmem>>, vector<1x10xf32>
    %c120 = arith.constant 120 : index
    %c0_19 = arith.constant 0 : index
    %17 = vector.load %arg3[%c120, %c0_19] : memref<128x128xf32, #tpu.memory_space<vmem>>, vector<1x1xf32>
    %c0_20 = arith.constant 0 : index
    %c0_21 = arith.constant 0 : index
    %18 = vector.load %arg1[%c0_20, %c0_21] : memref<448x9xbf16, #tpu.memory_space<vmem>>, vector<448x9xbf16>
    %cst = arith.constant dense<0.000000e+00> : vector<448x9xf32>
    %19 = tpu.matmul %18, %0, %cst {dimension_numbers = #tpu.dot_dimension_numbers<[1], [0], [0], [1], [0, 0, 1, 1], [], []>} : vector<448x9xbf16>, vector<9x9xbf16>, vector<448x9xf32> -> vector<448x9xf32>
    %20 = vector.broadcast %9 : vector<1x9xf32> to vector<448x9xf32>
    %21 = arith.addf %19, %20 : vector<448x9xf32>
    %cst_22 = arith.constant 0.000000e+00 : f32
    %22 = vector.broadcast %cst_22 : f32 to vector<448x9xf32>
    %23 = arith.maximumf %21, %22 : vector<448x9xf32>
    %24 = arith.truncf %23 : vector<448x9xf32> to vector<448x9xbf16>
    %cst_23 = arith.constant dense<0.000000e+00> : vector<448x10xf32>
    %25 = tpu.matmul %24, %1, %cst_23 {dimension_numbers = #tpu.dot_dimension_numbers<[1], [0], [0], [1], [0, 0, 1, 1], [], []>} : vector<448x9xbf16>, vector<9x10xbf16>, vector<448x10xf32> -> vector<448x10xf32>
    %26 = vector.shape_cast %25 : vector<448x10xf32> to vector<8x56x10xf32>
    %27 = vector.shape_cast %7 : vector<56x10xf32> to vector<1x56x10xf32>
    %28 = vector.broadcast %27 : vector<1x56x10xf32> to vector<8x56x10xf32>
    %29 = arith.addf %26, %28 : vector<8x56x10xf32>
    %30 = vector.shape_cast %29 : vector<8x56x10xf32> to vector<448x10xf32>
    %cst_24 = arith.constant dense<0.000000e+00> : vector<448xf32>
    %31 = vector.multi_reduction <add>, %30, %cst_24 [1] : vector<448x10xf32> to vector<448xf32>
    %32 = vector.shape_cast %31 : vector<448xf32> to vector<448x1xf32>
    %cst_25 = arith.constant 1.000000e+01 : f32
    %33 = vector.broadcast %cst_25 : f32 to vector<448x1xf32>
    %34 = arith.divf %32, %33 : vector<448x1xf32>
    %35 = vector.broadcast %34 : vector<448x1xf32> to vector<448x10xf32>
    %36 = arith.subf %30, %35 : vector<448x10xf32>
    %37 = arith.mulf %36, %36 : vector<448x10xf32>
    %cst_26 = arith.constant dense<0.000000e+00> : vector<448xf32>
    %38 = vector.multi_reduction <add>, %37, %cst_26 [1] : vector<448x10xf32> to vector<448xf32>
    %39 = vector.shape_cast %38 : vector<448xf32> to vector<448x1xf32>
    %cst_27 = arith.constant 1.000000e+01 : f32
    %40 = vector.broadcast %cst_27 : f32 to vector<448x1xf32>
    %41 = arith.divf %39, %40 : vector<448x1xf32>
    %cst_28 = arith.constant 9.99999974E-6 : f32
    %42 = vector.broadcast %cst_28 : f32 to vector<448x1xf32>
    %43 = arith.addf %41, %42 : vector<448x1xf32>
    %44 = math.rsqrt %43 : vector<448x1xf32>
    %45 = vector.broadcast %44 : vector<448x1xf32> to vector<448x10xf32>
    %46 = arith.mulf %36, %45 : vector<448x10xf32>
    %47 = vector.broadcast %10 : vector<1x10xf32> to vector<448x10xf32>
    %48 = arith.mulf %46, %47 : vector<448x10xf32>
    %49 = vector.broadcast %11 : vector<1x10xf32> to vector<448x10xf32>
    %50 = arith.addf %48, %49 : vector<448x10xf32>
    %51 = arith.truncf %50 : vector<448x10xf32> to vector<448x10xbf16>
    %cst_29 = arith.constant dense<0.000000e+00> : vector<448x40xf32>
    %52 = tpu.matmul %51, %2, %cst_29 {dimension_numbers = #tpu.dot_dimension_numbers<[1], [0], [0], [1], [0, 0, 1, 1], [], []>} : vector<448x10xbf16>, vector<10x40xbf16>, vector<448x40xf32> -> vector<448x40xf32>
    %53 = vector.shape_cast %52 : vector<448x40xf32> to vector<8x56x40xf32>
    %54 = vector.extract_strided_slice %53 {offsets = [0, 0, 0], sizes = [8, 56, 5], strides = [1, 1, 1]} : vector<8x56x40xf32> to vector<8x56x5xf32>
    %55 = vector.extract_strided_slice %53 {offsets = [0, 0, 10], sizes = [8, 56, 5], strides = [1, 1, 1]} : vector<8x56x40xf32> to vector<8x56x5xf32>
    %56 = vector.extract_strided_slice %53 {offsets = [0, 0, 20], sizes = [8, 56, 10], strides = [1, 1, 1]} : vector<8x56x40xf32> to vector<8x56x10xf32>
    %57 = arith.truncf %54 : vector<8x56x5xf32> to vector<8x56x5xbf16>
    %58 = arith.truncf %55 : vector<8x56x5xf32> to vector<8x56x5xbf16>
    "tpu.trace_start"() <{level = 10 : i32, message = "bqd,bkd->bqk"}> : () -> ()
    %cst_30 = arith.constant dense<0.000000e+00> : vector<8x56x56xf32>
    %59 = tpu.matmul %57, %58, %cst_30 {dimension_numbers = #tpu.dot_dimension_numbers<[2], [2], [1], [1], [0, 0, 0, 1, 1, 1], [0], [0]>} : vector<8x56x5xbf16>, vector<8x56x5xbf16>, vector<8x56x56xf32> -> vector<8x56x56xf32>
    "tpu.trace_stop"() : () -> ()
    %60 = vector.shape_cast %8 : vector<56x56xf32> to vector<1x56x56xf32>
    %61 = vector.broadcast %60 : vector<1x56x56xf32> to vector<8x56x56xf32>
    %62 = arith.addf %59, %61 : vector<8x56x56xf32>
    %cst_31 = arith.constant dense<0xFF800000> : vector<8x56xf32>
    %63 = vector.multi_reduction <maximumf>, %62, %cst_31 [2] : vector<8x56x56xf32> to vector<8x56xf32>
    %64 = vector.shape_cast %63 : vector<8x56xf32> to vector<8x56x1xf32>
    %65 = vector.broadcast %64 : vector<8x56x1xf32> to vector<8x56x56xf32>
    %66 = arith.subf %62, %65 : vector<8x56x56xf32>
    %67 = math.exp %66 : vector<8x56x56xf32>
    %cst_32 = arith.constant dense<0.000000e+00> : vector<8x56xf32>
    %68 = vector.multi_reduction <add>, %67, %cst_32 [2] : vector<8x56x56xf32> to vector<8x56xf32>
    %69 = vector.shape_cast %68 : vector<8x56xf32> to vector<8x56x1xf32>
    %70 = tpu.reciprocal %69 {approx = true} : vector<8x56x1xf32> -> vector<8x56x1xf32>
    %71 = vector.broadcast %70 : vector<8x56x1xf32> to vector<8x56x56xf32>
    %72 = arith.mulf %67, %71 : vector<8x56x56xf32>
    %73 = arith.truncf %72 : vector<8x56x56xf32> to vector<8x56x56xbf16>
    %74 = arith.truncf %56 : vector<8x56x10xf32> to vector<8x56x10xbf16>
    %75 = vector.extract_strided_slice %53 {offsets = [0, 0, 5], sizes = [8, 56, 5], strides = [1, 1, 1]} : vector<8x56x40xf32> to vector<8x56x5xf32>
    %76 = vector.extract_strided_slice %53 {offsets = [0, 0, 15], sizes = [8, 56, 5], strides = [1, 1, 1]} : vector<8x56x40xf32> to vector<8x56x5xf32>
    %77 = vector.extract_strided_slice %53 {offsets = [0, 0, 30], sizes = [8, 56, 10], strides = [1, 1, 1]} : vector<8x56x40xf32> to vector<8x56x10xf32>
    %78 = arith.truncf %75 : vector<8x56x5xf32> to vector<8x56x5xbf16>
    %79 = arith.truncf %76 : vector<8x56x5xf32> to vector<8x56x5xbf16>
    "tpu.trace_start"() <{level = 10 : i32, message = "bqd,bkd->bqk"}> : () -> ()
    %cst_33 = arith.constant dense<0.000000e+00> : vector<8x56x56xf32>
    %80 = tpu.matmul %78, %79, %cst_33 {dimension_numbers = #tpu.dot_dimension_numbers<[2], [2], [1], [1], [0, 0, 0, 1, 1, 1], [0], [0]>} : vector<8x56x5xbf16>, vector<8x56x5xbf16>, vector<8x56x56xf32> -> vector<8x56x56xf32>
    "tpu.trace_stop"() : () -> ()
    %81 = vector.shape_cast %8 : vector<56x56xf32> to vector<1x56x56xf32>
    %82 = vector.broadcast %81 : vector<1x56x56xf32> to vector<8x56x56xf32>
    %83 = arith.addf %80, %82 : vector<8x56x56xf32>
    %cst_34 = arith.constant dense<0xFF800000> : vector<8x56xf32>
    %84 = vector.multi_reduction <maximumf>, %83, %cst_34 [2] : vector<8x56x56xf32> to vector<8x56xf32>
    %85 = vector.shape_cast %84 : vector<8x56xf32> to vector<8x56x1xf32>
    %86 = vector.broadcast %85 : vector<8x56x1xf32> to vector<8x56x56xf32>
    %87 = arith.subf %83, %86 : vector<8x56x56xf32>
    %88 = math.exp %87 : vector<8x56x56xf32>
    %cst_35 = arith.constant dense<0.000000e+00> : vector<8x56xf32>
    %89 = vector.multi_reduction <add>, %88, %cst_35 [2] : vector<8x56x56xf32> to vector<8x56xf32>
    %90 = vector.shape_cast %89 : vector<8x56xf32> to vector<8x56x1xf32>
    %91 = tpu.reciprocal %90 {approx = true} : vector<8x56x1xf32> -> vector<8x56x1xf32>
    %92 = vector.broadcast %91 : vector<8x56x1xf32> to vector<8x56x56xf32>
    %93 = arith.mulf %88, %92 : vector<8x56x56xf32>
    %94 = arith.truncf %93 : vector<8x56x56xf32> to vector<8x56x56xbf16>
    %95 = arith.truncf %77 : vector<8x56x10xf32> to vector<8x56x10xbf16>
    %96 = tpu.concatenate %73, %94 in 2 : vector<8x56x56xbf16>, vector<8x56x56xbf16> -> vector<8x56x112xbf16>
    %97 = tpu.concatenate %74, %95 in 1 : vector<8x56x10xbf16>, vector<8x56x10xbf16> -> vector<8x112x10xbf16>
    "tpu.trace_start"() <{level = 10 : i32, message = "bqk,bkd->bqd"}> : () -> ()
    %cst_36 = arith.constant dense<0.000000e+00> : vector<8x56x10xf32>
    %98 = tpu.matmul %96, %97, %cst_36 {dimension_numbers = #tpu.dot_dimension_numbers<[2], [1], [1], [2], [0, 0, 0, 1, 1, 2], [0], [0]>} : vector<8x56x112xbf16>, vector<8x112x10xbf16>, vector<8x56x10xf32> -> vector<8x56x10xf32>
    "tpu.trace_stop"() : () -> ()
    %99 = vector.shape_cast %98 : vector<8x56x10xf32> to vector<448x10xf32>
    %100 = arith.addf %30, %99 : vector<448x10xf32>
    %cst_37 = arith.constant dense<0.000000e+00> : vector<448xf32>
    %101 = vector.multi_reduction <add>, %100, %cst_37 [1] : vector<448x10xf32> to vector<448xf32>
    %102 = vector.shape_cast %101 : vector<448xf32> to vector<448x1xf32>
    %cst_38 = arith.constant 1.000000e+01 : f32
    %103 = vector.broadcast %cst_38 : f32 to vector<448x1xf32>
    %104 = arith.divf %102, %103 : vector<448x1xf32>
    %105 = vector.broadcast %104 : vector<448x1xf32> to vector<448x10xf32>
    %106 = arith.subf %100, %105 : vector<448x10xf32>
    %107 = arith.mulf %106, %106 : vector<448x10xf32>
    %cst_39 = arith.constant dense<0.000000e+00> : vector<448xf32>
    %108 = vector.multi_reduction <add>, %107, %cst_39 [1] : vector<448x10xf32> to vector<448xf32>
    %109 = vector.shape_cast %108 : vector<448xf32> to vector<448x1xf32>
    %cst_40 = arith.constant 1.000000e+01 : f32
    %110 = vector.broadcast %cst_40 : f32 to vector<448x1xf32>
    %111 = arith.divf %109, %110 : vector<448x1xf32>
    %cst_41 = arith.constant 9.99999974E-6 : f32
    %112 = vector.broadcast %cst_41 : f32 to vector<448x1xf32>
    %113 = arith.addf %111, %112 : vector<448x1xf32>
    %114 = math.rsqrt %113 : vector<448x1xf32>
    %115 = vector.broadcast %114 : vector<448x1xf32> to vector<448x10xf32>
    %116 = arith.mulf %106, %115 : vector<448x10xf32>
    %117 = vector.broadcast %14 : vector<1x10xf32> to vector<448x10xf32>
    %118 = arith.mulf %116, %117 : vector<448x10xf32>
    %119 = vector.broadcast %15 : vector<1x10xf32> to vector<448x10xf32>
    %120 = arith.addf %118, %119 : vector<448x10xf32>
    %121 = arith.truncf %120 : vector<448x10xf32> to vector<448x10xbf16>
    %cst_42 = arith.constant dense<0.000000e+00> : vector<448x40xf32>
    %122 = tpu.matmul %121, %3, %cst_42 {dimension_numbers = #tpu.dot_dimension_numbers<[1], [0], [0], [1], [0, 0, 1, 1], [], []>} : vector<448x10xbf16>, vector<10x40xbf16>, vector<448x40xf32> -> vector<448x40xf32>
    %123 = vector.broadcast %12 : vector<1x40xf32> to vector<448x40xf32>
    %124 = arith.addf %122, %123 : vector<448x40xf32>
    %125 = arith.mulf %124, %124 : vector<448x40xf32>
    %126 = arith.mulf %124, %125 : vector<448x40xf32>
    %cst_43 = arith.constant 4.471500e-02 : f32
    %127 = vector.broadcast %cst_43 : f32 to vector<448x40xf32>
    %128 = arith.mulf %127, %126 : vector<448x40xf32>
    %129 = arith.addf %124, %128 : vector<448x40xf32>
    %cst_44 = arith.constant 0.797884583 : f32
    %130 = vector.broadcast %cst_44 : f32 to vector<448x40xf32>
    %131 = arith.mulf %130, %129 : vector<448x40xf32>
    %132 = math.tanh %131 : vector<448x40xf32>
    %cst_45 = arith.constant 1.000000e+00 : f32
    %133 = vector.broadcast %cst_45 : f32 to vector<448x40xf32>
    %134 = arith.addf %133, %132 : vector<448x40xf32>
    %cst_46 = arith.constant 5.000000e-01 : f32
    %135 = vector.broadcast %cst_46 : f32 to vector<448x40xf32>
    %136 = arith.mulf %135, %134 : vector<448x40xf32>
    %137 = arith.mulf %124, %136 : vector<448x40xf32>
    %138 = arith.truncf %137 : vector<448x40xf32> to vector<448x40xbf16>
    %cst_47 = arith.constant dense<0.000000e+00> : vector<448x10xf32>
    %139 = tpu.matmul %138, %4, %cst_47 {dimension_numbers = #tpu.dot_dimension_numbers<[1], [0], [0], [1], [0, 0, 1, 1], [], []>} : vector<448x40xbf16>, vector<40x10xbf16>, vector<448x10xf32> -> vector<448x10xf32>
    %140 = vector.broadcast %13 : vector<1x10xf32> to vector<448x10xf32>
    %141 = arith.addf %139, %140 : vector<448x10xf32>
    %142 = arith.addf %100, %141 : vector<448x10xf32>
    %143 = arith.truncf %142 : vector<448x10xf32> to vector<448x10xbf16>
    %cst_48 = arith.constant dense<0.000000e+00> : vector<448x10xf32>
    %144 = tpu.matmul %143, %5, %cst_48 {dimension_numbers = #tpu.dot_dimension_numbers<[1], [0], [0], [1], [0, 0, 1, 1], [], []>} : vector<448x10xbf16>, vector<10x10xbf16>, vector<448x10xf32> -> vector<448x10xf32>
    %145 = vector.broadcast %16 : vector<1x10xf32> to vector<448x10xf32>
    %146 = arith.addf %144, %145 : vector<448x10xf32>
    %cst_49 = arith.constant 0.000000e+00 : f32
    %147 = vector.broadcast %cst_49 : f32 to vector<448x10xf32>
    %148 = arith.maximumf %146, %147 : vector<448x10xf32>
    %149 = arith.truncf %148 : vector<448x10xf32> to vector<448x10xbf16>
    %cst_50 = arith.constant dense<0.000000e+00> : vector<448x1xf32>
    %150 = tpu.matmul %149, %6, %cst_50 {dimension_numbers = #tpu.dot_dimension_numbers<[1], [0], [0], [1], [0, 0, 1, 1], [], []>} : vector<448x10xbf16>, vector<10x1xbf16>, vector<448x1xf32> -> vector<448x1xf32>
    %151 = vector.broadcast %17 : vector<1x1xf32> to vector<448x1xf32>
    %152 = arith.addf %150, %151 : vector<448x1xf32>
    %153 = vector.shape_cast %152 : vector<448x1xf32> to vector<8x56xf32>
    %c0_51 = arith.constant 0 : index
    %c0_52 = arith.constant 0 : index
    %154 = vector.load %arg4[%c0_51, %c0_52] : memref<8x56xf32, #tpu.memory_space<vmem>>, vector<8x56xf32>
    tpu.vector_store %arg4[%c0_51, %c0_52], %153 {strides = array<i32>} : memref<8x56xf32, #tpu.memory_space<vmem>>, vector<8x56xf32>,
    return
  }
  func.func @transform_0(%arg0: i32) -> (i32, i32) {
    %c0_i32 = arith.constant 0 : i32
    %c0_i32_0 = arith.constant 0 : i32
    return %arg0, %c0_i32 : i32, i32
  }
  func.func @transform_1(%arg0: i32) -> (i32, i32) {
    %c0_i32 = arith.constant 0 : i32
    %c0_i32_0 = arith.constant 0 : i32
    %c0_i32_1 = arith.constant 0 : i32
    return %c0_i32, %c0_i32_0 : i32, i32
  }
  func.func @transform_2(%arg0: i32) -> (i32, i32) {
    %c0_i32 = arith.constant 0 : i32
    %c0_i32_0 = arith.constant 0 : i32
    %c0_i32_1 = arith.constant 0 : i32
    return %c0_i32, %c0_i32_0 : i32, i32
  }
  func.func @transform_3(%arg0: i32) -> (i32, i32) {
    %c0_i32 = arith.constant 0 : i32
    %c0_i32_0 = arith.constant 0 : i32
    return %arg0, %c0_i32 : i32, i32
  }
}

</mosaic_0001>

<bundles_post_ra>
// kernel: tpu_custom_call.1
= control target key start
LH: loop header
LB: loop body
LE: loop exit
PB: predicated region body
PF: predicated region fallthrough
CT: control target
= control target key end

     0   :  { %vm346_vm0 = vcmask 1043456   ;;  %vm347_vm1 = vcmask 1044480   ;;  %v12502_v3 = vmov 65535   ;;  %vm261_vm2 = vcmask 72704   ;;  %s18524_s0 = inlined_call_operand.vmem [shape: bf16[448,9], index: 0, kind: input, shape index: {}]   ;;  %s18525_s1 = inlined_call_operand.vmem [shape: bf16[144,128], index: 1, kind: input, shape index: {}]   ;;  %s18526_s2 = inlined_call_operand.vmem [shape: f32[128,128], index: 2, kind: input, shape index: {}]   ;;  %s18527_s3 = inlined_call_operand.hbm [shape: f32[8,56], index: 3, kind: output, shape index: {}]  }
   0x1   :  { %v11647_v0 = vld [vmem:[%s18525_s1] sm:$0x1f]   ;;  %v11648_v1 = vld [vmem:[%s18525_s1 + $0x8] sm:$0x1f]   ;;  %v348_v4 = vsel %vm346_vm0, 4294967295, %v12502_v3  ;;  %v11651_v9 = vld [vmem:[%s18524_s0 + $0x10] sm:$0xff]  }
   0x2   :  { %v11649_v2 = vld [vmem:[%s18524_s0] sm:$0xff]   ;;  %v349_v5 = vsel %vm347_vm1, %v348_v4, 0  ;;  %v11650_v8 = vld [vmem:[%s18524_s0 + $0x8] sm:$0xff]   ;;  %v11652_v10 = vld [vmem:[%s18524_s0 + $0x18] sm:$0xff]  }
   0x3   :  { %10726 = vmatprep.mubr.msk.bf16.mxu0 %vm261_vm2, %v11649_v2  ;;  %v351_v6 = vand.u32 %v11647_v0, %v349_v5  ;;  %v784_v7 = vand.u32 %v11648_v1, %v349_v5  ;;  %v11653_v11 = vld [vmem:[%s18524_s0 + $0x20] sm:$0xff]   ;;  %v11654_v12 = vld [vmem:[%s18524_s0 + $0x28] sm:$0xff]   ;;  %v11655_v13 = vld [vmem:[%s18524_s0 + $0x30] sm:$0xff]  }
   0x4   :  { %v11656_v14 = vld [vmem:[%s18524_s0 + $0x38] sm:$0xff]   ;;  %v11657_v15 = vld [vmem:[%s18524_s0 + $0x40] sm:$0xff]  }
   0x5   :  { %10724 = vmatprep.subr.bf16.mxu0 %v351_v6  ;;  %11566 = vmatprep.subr.bf16.mxu1 %v784_v7 }
   0x6   :  { %10725 = vmatpush3.bf16.msra.mxu0 %v351_v6  ;;  %11567 = vmatpush3.bf16.msra.mxu1 %v784_v7 }
   0x7   :  { %10782 = vmatprep.subr.bf16.mxu0 %v784_v7 }
   0x9   :  { %10727 = vmatmul.mubr.msk.bf16.vlgmr.msra.gmra.mrb[0].mxu0 %vm261_vm2, %v11650_v8 }
   0xa   :  { %10730 = vmatprep.mubr.msk.bf16.mxu0 %vm261_vm2, %v11651_v9  ;;  %10783 = vmatpush3.bf16.msra.mxu0 %v784_v7 }
  0x11   :  { %10731 = vmatmul.mubr.msk.bf16.gmra.mrb[4].mxu0 %vm261_vm2, %v11652_v10 }
  0x12   :  { %10734 = vmatprep.mubr.msk.bf16.mxu0 %vm261_vm2, %v11653_v11 }
  0x19   :  { %10735 = vmatmul.mubr.msk.bf16.gmra.mrb[8].mxu0 %vm261_vm2, %v11654_v12 }
  0x1a   :  { %10738 = vmatprep.mubr.msk.bf16.mxu0 %vm261_vm2, %v11655_v13 }
  0x21   :  { %10739 = vmatmul.mubr.msk.bf16.gmra.mrb[12].mxu0 %vm261_vm2, %v11656_v14 }
  0x22   :  { %8 = vsyncpa [#allocation3], 0  ;;  %10742 = vmatprep.mubr.msk.bf16.mxu0 %vm261_vm2, %v11657_v15  ;;  %v11658_v16 = vld [vmem:[%s18524_s0 + $0x48] sm:$0xff]   ;;  %v11659_v17 = vld [vmem:[%s18524_s0 + $0x50] sm:$0xff]   ;;  %vm1099_vm3 = vcmask 80896   ;;  %vm2370_vm4 = vcmask 39936  }
  0x23   :  { %v11660_v18 = vld [vmem:[%s18524_s0 + $0x58] sm:$0xff]   ;;  %v11661_v19 = vld [vmem:[%s18524_s0 + $0x60] sm:$0xff]   ;;  %v11662_v20 = vld [vmem:[%s18524_s0 + $0x68] sm:$0xff]   ;;  %s12503_s12 = smov 118   ;;  %s12504_s13 = smov 113   ;;  %vm3159_vm5 = vcmask 457728  }
  0x24   :  { %v11663_v21 = vld [vmem:[%s18524_s0 + $0x70] sm:$0xff]   ;;  %v11664_v22 = vld [vmem:[%s18524_s0 + $0x78] sm:$0xff]   ;;  %v11665_v23 = vld [vmem:[%s18524_s0 + $0x80] sm:$0xff]   ;;  %s12505_s14 = smov 123   ;;  %s12506_s15 = smov 108   ;;  %vm5639_vm6 = vcmask 916480  }
  0x25   :  { %v11666_v24 = vld [vmem:[%s18524_s0 + $0x88] sm:$0xff]   ;;  %v11667_v25 = vld [vmem:[%s18524_s0 + $0x90] sm:$0xff]   ;;  %v11668_v26 = vld [vmem:[%s18524_s0 + $0x98] sm:$0xff]   ;;  %s12507_s18 = smov 56   ;;  %vm8206_vm7 = vcmask 326656   ;;  %vm9660_vm8 = vcmask 130112  }
  0x26   :  { %v11669_v27 = vld [vmem:[%s18524_s0 + $0xa0] sm:$0xff]   ;;  %v11670_v28 = vld [vmem:[%s18524_s0 + $0xa8] sm:$0xff]   ;;  %v11671_v29 = vld [vmem:[%s18524_s0 + $0xb0] sm:$0xff]   ;;  %vm9667_vm9 = vcmask 195712   ;;  %vm9674_vm10 = vcmask 261312   ;;  %vm9681_vm11 = vcmask 326912  }
  0x27   :  { %v11672_v30 = vld [vmem:[%s18524_s0 + $0xb8] sm:$0xff]   ;;  %v11673_v31 = vld [vmem:[%s18524_s0 + $0xc0] sm:$0xff]   ;;  %v11674_v32 = vld [vmem:[%s18524_s0 + $0xc8] sm:$0xff]   ;;  %vm9688_vm12 = vcmask 392512   ;;  %vm9695_vm13 = vcmask 458112   ;;  %vm9935_vm14 = vcmask 1041409  }
  0x28   :  { %v11675_v33 = vld [vmem:[%s18524_s0 + $0xd0] sm:$0xff]   ;;  %v11676_v34 = vld [vmem:[%s18524_s0 + $0xd8] sm:$0xff]   ;;  %vm9937_vm15 = vcmask 1042434  }
  0x29   :  { %10743 = vmatmul.mubr.msk.bf16.gmra.mrb[16].mxu0 %vm261_vm2, %v11658_v16  ;;  %v12653_v35 = vld [vmem:[%s18526_s2 + $0x70] ss:$0 sm:$0xff] }
  0x2a   :  { %10746 = vmatprep.mubr.msk.bf16.mxu0 %vm261_vm2, %v11659_v17 }
  0x31   :  { %10747 = vmatmul.mubr.msk.bf16.gmra.mrb[20].mxu0 %vm261_vm2, %v11660_v18 }
  0x32   :  { %10750 = vmatprep.mubr.msk.bf16.mxu0 %vm261_vm2, %v11661_v19 }
  0x39   :  { %10751 = vmatmul.mubr.msk.bf16.gmra.mrb[24].mxu0 %vm261_vm2, %v11662_v20 }
  0x3a   :  { %10754 = vmatprep.mubr.msk.bf16.mxu0 %vm261_vm2, %v11663_v21 }
  0x41   :  { %10755 = vmatmul.mubr.msk.bf16.gmra.mrb[28].mxu0 %vm261_vm2, %v11664_v22 }
  0x42   :  { %10758 = vmatprep.mubr.msk.bf16.mxu0 %vm261_vm2, %v11665_v23 }
  0x49   :  { %10759 = vmatmul.mubr.msk.bf16.gmra.mrb[32].mxu0 %vm261_vm2, %v11666_v24 }
  0x4a   :  { %10762 = vmatprep.mubr.msk.bf16.mxu0 %vm261_vm2, %v11667_v25 }
  0x51   :  { %10763 = vmatmul.mubr.msk.bf16.gmra.mrb[36].mxu0 %vm261_vm2, %v11668_v26 }
  0x52   :  { %10766 = vmatprep.mubr.msk.bf16.mxu0 %vm261_vm2, %v11669_v27 }
  0x59   :  { %10767 = vmatmul.mubr.msk.bf16.gmra.mrb[40].mxu0 %vm261_vm2, %v11670_v28 }
  0x5a   :  { %10770 = vmatprep.mubr.msk.bf16.mxu0 %vm261_vm2, %v11671_v29 }
  0x61   :  { %10771 = vmatmul.mubr.msk.bf16.gmra.mrb[44].mxu0 %vm261_vm2, %v11672_v30 }
  0x62   :  { %10774 = vmatprep.mubr.msk.bf16.mxu0 %vm261_vm2, %v11673_v31 }
  0x69   :  { %10775 = vmatmul.mubr.msk.bf16.gmra.mrb[48].mxu0 %vm261_vm2, %v11674_v32 }
  0x6a   :  { %10778 = vmatprep.mubr.msk.bf16.mxu0 %vm261_vm2, %v11675_v33 }
  0x71   :  { %10779 = vmatmul.mubr.msk.bf16.gmra.mrb[52].mxu0 %vm261_vm2, %v11676_v34 }
  0xdc   :  { %v10728_v36 = vpop.f32.mrb[0].mxu0 }
  0xdd   :  { %v396_v37 = vadd.f32 %v10728_v36, %v12653_v35  ;;  %v387_v38 = vpop.f32.mrb[1].mxu0 }
  0xde   :  { %v388_v39 = vadd.f32 %v12653_v35, %v387_v38  ;;  %v10729_v40 = vpop.f32.mrb[2].mxu0 }
  0xdf   :  { %v399_v41 = vadd.f32 %v10729_v40, %v12653_v35  ;;  %v390_v42 = vpop.f32.mrb[3].mxu0  ;;  %v612_v44 = vmax.f32 %v396_v37, 0.0 }
  0xe0   :  { %v391_v43 = vadd.f32 %v12653_v35, %v390_v42  ;;  %v610_v46 = vmax.f32 %v388_v39, 0.0 }
  0xe1   :  { %v613_v45 = vmax.f32 %v399_v41, 0.0 }
  0xe2   :  { %v611_v47 = vmax.f32 %v391_v43, 0.0 }
  0xe3   :  { %v667_v48 = vpack.c.bf16 %v613_v45, %v612_v44 }
  0xe4   :  { %v666_v49 = vpack.c.bf16 %v611_v47, %v610_v46  ;;  %v10732_v50 = vpop.f32.mrb[4].mxu0 }
  0xe5   :  { %v412_v51 = vadd.f32 %v10732_v50, %v12653_v35  ;;  %v403_v52 = vpop.f32.mrb[5].mxu0 }
  0xe6   :  { %v404_v53 = vadd.f32 %v12653_v35, %v403_v52  ;;  %v10733_v54 = vpop.f32.mrb[6].mxu0  ;;  %10784 = vmatprep.mubr.msk.bf16.mxu0 %vm261_vm2, %v666_v49 }
  0xe7   :  { %v616_v55 = vmax.f32 %v412_v51, 0.0  ;;  %v415_v56 = vadd.f32 %v10733_v54, %v12653_v35  ;;  %v406_v57 = vpop.f32.mrb[7].mxu0  ;;  %10785 = vmatmul.mubr.msk.bf16.vlgmr.msra.gmra.mrb[56].mxu0 %vm261_vm2, %v667_v48 }
  0xe8   :  { %v407_v58 = vadd.f32 %v12653_v35, %v406_v57  ;;  %v614_v59 = vmax.f32 %v404_v53, 0.0 }
  0xe9   :  { %v617_v60 = vmax.f32 %v415_v56, 0.0 }
  0xea   :  { %v615_v61 = vmax.f32 %v407_v58, 0.0 }
  0xeb   :  { %v669_v62 = vpack.c.bf16 %v617_v60, %v616_v55 }
  0xec   :  { %v10736_v63 = vpop.f32.mrb[8].mxu0  ;;  %v668_v0 = vpack.c.bf16 %v615_v61, %v614_v59 }
  0xed   :  { %v428_v1 = vadd.f32 %v10736_v63, %v12653_v35  ;;  %v419_v2 = vpop.f32.mrb[9].mxu0 }
  0xee   :  { %v420_v3 = vadd.f32 %v12653_v35, %v419_v2  ;;  %v10737_v4 = vpop.f32.mrb[10].mxu0  ;;  %10788 = vmatprep.mubr.msk.bf16.mxu1 %vm261_vm2, %v668_v0 }
  0xef   :  { %v620_v5 = vmax.f32 %v428_v1, 0.0  ;;  %v431_v6 = vadd.f32 %v10737_v4, %v12653_v35  ;;  %v422_v7 = vpop.f32.mrb[11].mxu0  ;;  %10789 = vmatmul.mubr.msk.bf16.vlgmr.msra.gmra.mrb[0].mxu1 %vm261_vm2, %v669_v62 }
  0xf0   :  { %v618_v8 = vmax.f32 %v420_v3, 0.0  ;;  %v423_v9 = vadd.f32 %v12653_v35, %v422_v7 }
  0xf1   :  { %v621_v10 = vmax.f32 %v431_v6, 0.0 }
  0xf2   :  { %v619_v11 = vmax.f32 %v423_v9, 0.0 }
  0xf3   :  { %v671_v12 = vpack.c.bf16 %v621_v10, %v620_v5 }
  0xf4   :  { %v670_v13 = vpack.c.bf16 %v619_v11, %v618_v8  ;;  %v10740_v14 = vpop.f32.mrb[12].mxu0 }
  0xf5   :  { %v444_v15 = vadd.f32 %v10740_v14, %v12653_v35  ;;  %v435_v16 = vpop.f32.mrb[13].mxu0 }
  0xf6   :  { %v436_v17 = vadd.f32 %v12653_v35, %v435_v16  ;;  %v10741_v18 = vpop.f32.mrb[14].mxu0  ;;  %10792 = vmatprep.mubr.msk.bf16.mxu1 %vm261_vm2, %v670_v13 }
  0xf7   :  { %v624_v19 = vmax.f32 %v444_v15, 0.0  ;;  %v447_v20 = vadd.f32 %v10741_v18, %v12653_v35  ;;  %v438_v21 = vpop.f32.mrb[15].mxu0  ;;  %10793 = vmatmul.mubr.msk.bf16.gmra.mrb[4].mxu1 %vm261_vm2, %v671_v12 }
  0xf8   :  { %v622_v22 = vmax.f32 %v436_v17, 0.0  ;;  %v439_v23 = vadd.f32 %v12653_v35, %v438_v21 }
  0xf9   :  { %v625_v24 = vmax.f32 %v447_v20, 0.0 }
  0xfa   :  { %v623_v25 = vmax.f32 %v439_v23, 0.0 }
  0xfb   :  { %v673_v26 = vpack.c.bf16 %v625_v24, %v624_v19 }
  0xfc   :  { %v672_v27 = vpack.c.bf16 %v623_v25, %v622_v22  ;;  %v10744_v28 = vpop.f32.mrb[16].mxu0 }
  0xfd   :  { %v460_v29 = vadd.f32 %v10744_v28, %v12653_v35  ;;  %v451_v30 = vpop.f32.mrb[17].mxu0 }
  0xfe   :  { %v452_v31 = vadd.f32 %v12653_v35, %v451_v30  ;;  %v10745_v32 = vpop.f32.mrb[18].mxu0  ;;  %10796 = vmatprep.mubr.msk.bf16.mxu1 %vm261_vm2, %v672_v27 }
  0xff   :  { %v628_v33 = vmax.f32 %v460_v29, 0.0  ;;  %v463_v34 = vadd.f32 %v10745_v32, %v12653_v35  ;;  %v454_v36 = vpop.f32.mrb[19].mxu0  ;;  %10797 = vmatmul.mubr.msk.bf16.gmra.mrb[8].mxu1 %vm261_vm2, %v673_v26 }
 0x100   :  { %v626_v37 = vmax.f32 %v452_v31, 0.0  ;;  %v455_v38 = vadd.f32 %v12653_v35, %v454_v36 }
 0x101   :  { %v629_v39 = vmax.f32 %v463_v34, 0.0 }
 0x102   :  { %v627_v40 = vmax.f32 %v455_v38, 0.0 }
 0x103   :  { %v675_v41 = vpack.c.bf16 %v629_v39, %v628_v33 }
 0x104   :  { %v674_v42 = vpack.c.bf16 %v627_v40, %v626_v37  ;;  %v10748_v43 = vpop.f32.mrb[20].mxu0 }
 0x105   :  { %v476_v44 = vadd.f32 %v10748_v43, %v12653_v35  ;;  %v467_v45 = vpop.f32.mrb[21].mxu0 }
 0x106   :  { %v468_v46 = vadd.f32 %v12653_v35, %v467_v45  ;;  %v10749_v47 = vpop.f32.mrb[22].mxu0  ;;  %10800 = vmatprep.mubr.msk.bf16.mxu1 %vm261_vm2, %v674_v42 }
 0x107   :  { %v632_v48 = vmax.f32 %v476_v44, 0.0  ;;  %v479_v49 = vadd.f32 %v10749_v47, %v12653_v35  ;;  %v470_v50 = vpop.f32.mrb[23].mxu0  ;;  %10801 = vmatmul.mubr.msk.bf16.gmra.mrb[12].mxu1 %vm261_vm2, %v675_v41 }
 0x108   :  { %v630_v51 = vmax.f32 %v468_v46, 0.0  ;;  %v471_v52 = vadd.f32 %v12653_v35, %v470_v50 }
 0x109   :  { %v633_v53 = vmax.f32 %v479_v49, 0.0 }
 0x10a   :  { %v631_v54 = vmax.f32 %v471_v52, 0.0 }
 0x10b   :  { %v677_v55 = vpack.c.bf16 %v633_v53, %v632_v48 }
 0x10c   :  { %v676_v56 = vpack.c.bf16 %v631_v54, %v630_v51  ;;  %v10752_v57 = vpop.f32.mrb[24].mxu0 }
 0x10d   :  { %v492_v58 = vadd.f32 %v10752_v57, %v12653_v35  ;;  %v483_v59 = vpop.f32.mrb[25].mxu0 }
 0x10e   :  { %v484_v60 = vadd.f32 %v12653_v35, %v483_v59  ;;  %v10753_v61 = vpop.f32.mrb[26].mxu0  ;;  %10804 = vmatprep.mubr.msk.bf16.mxu1 %vm261_vm2, %v676_v56 }
 0x10f   :  { %v636_v62 = vmax.f32 %v492_v58, 0.0  ;;  %v495_v63 = vadd.f32 %v10753_v61, %v12653_v35  ;;  %v486_v0 = vpop.f32.mrb[27].mxu0  ;;  %10805 = vmatmul.mubr.msk.bf16.gmra.mrb[16].mxu1 %vm261_vm2, %v677_v55 }
 0x110   :  { %v634_v1 = vmax.f32 %v484_v60, 0.0  ;;  %v487_v2 = vadd.f32 %v12653_v35, %v486_v0 }
 0x111   :  { %v637_v3 = vmax.f32 %v495_v63, 0.0 }
 0x112   :  { %v635_v4 = vmax.f32 %v487_v2, 0.0 }
 0x113   :  { %v679_v5 = vpack.c.bf16 %v637_v3, %v636_v62 }
 0x114   :  { %v678_v6 = vpack.c.bf16 %v635_v4, %v634_v1  ;;  %v10756_v7 = vpop.f32.mrb[28].mxu0 }
 0x115   :  { %v508_v8 = vadd.f32 %v10756_v7, %v12653_v35  ;;  %v499_v9 = vpop.f32.mrb[29].mxu0 }
 0x116   :  { %v500_v10 = vadd.f32 %v12653_v35, %v499_v9  ;;  %v10757_v11 = vpop.f32.mrb[30].mxu0  ;;  %10808 = vmatprep.mubr.msk.bf16.mxu1 %vm261_vm2, %v678_v6 }
 0x117   :  { %v640_v12 = vmax.f32 %v508_v8, 0.0  ;;  %v511_v13 = vadd.f32 %v10757_v11, %v12653_v35  ;;  %v502_v14 = vpop.f32.mrb[31].mxu0  ;;  %10809 = vmatmul.mubr.msk.bf16.gmra.mrb[20].mxu1 %vm261_vm2, %v679_v5 }
 0x118   :  { %v638_v15 = vmax.f32 %v500_v10, 0.0  ;;  %v503_v16 = vadd.f32 %v12653_v35, %v502_v14 }
 0x119   :  { %v641_v17 = vmax.f32 %v511_v13, 0.0 }
 0x11a   :  { %v639_v18 = vmax.f32 %v503_v16, 0.0 }
 0x11b   :  { %v681_v19 = vpack.c.bf16 %v641_v17, %v640_v12 }
 0x11c   :  { %v680_v20 = vpack.c.bf16 %v639_v18, %v638_v15  ;;  %v10760_v21 = vpop.f32.mrb[32].mxu0 }
 0x11d   :  { %v524_v22 = vadd.f32 %v10760_v21, %v12653_v35  ;;  %v515_v23 = vpop.f32.mrb[33].mxu0 }
 0x11e   :  { %v516_v24 = vadd.f32 %v12653_v35, %v515_v23  ;;  %v10761_v25 = vpop.f32.mrb[34].mxu0  ;;  %10812 = vmatprep.mubr.msk.bf16.mxu1 %vm261_vm2, %v680_v20 }
 0x11f   :  { %v644_v26 = vmax.f32 %v524_v22, 0.0  ;;  %v527_v27 = vadd.f32 %v10761_v25, %v12653_v35  ;;  %v518_v28 = vpop.f32.mrb[35].mxu0  ;;  %10813 = vmatmul.mubr.msk.bf16.gmra.mrb[24].mxu1 %vm261_vm2, %v681_v19 }
 0x120   :  { %v642_v29 = vmax.f32 %v516_v24, 0.0  ;;  %v519_v30 = vadd.f32 %v12653_v35, %v518_v28 }
 0x121   :  { %v645_v31 = vmax.f32 %v527_v27, 0.0 }
 0x122   :  { %v643_v32 = vmax.f32 %v519_v30, 0.0 }
 0x123   :  { %v683_v33 = vpack.c.bf16 %v645_v31, %v644_v26 }
 0x124   :  { %v682_v34 = vpack.c.bf16 %v643_v32, %v642_v29  ;;  %v10764_v36 = vpop.f32.mrb[36].mxu0 }
 0x125   :  { %v540_v37 = vadd.f32 %v10764_v36, %v12653_v35  ;;  %v531_v38 = vpop.f32.mrb[37].mxu0 }
 0x126   :  { %v532_v39 = vadd.f32 %v12653_v35, %v531_v38  ;;  %v10765_v40 = vpop.f32.mrb[38].mxu0  ;;  %10816 = vmatprep.mubr.msk.bf16.mxu1 %vm261_vm2, %v682_v34 }
 0x127   :  { %v648_v41 = vmax.f32 %v540_v37, 0.0  ;;  %v543_v42 = vadd.f32 %v10765_v40, %v12653_v35  ;;  %v534_v43 = vpop.f32.mrb[39].mxu0  ;;  %10817 = vmatmul.mubr.msk.bf16.gmra.mrb[28].mxu1 %vm261_vm2, %v683_v33 }
 0x128   :  { %v646_v44 = vmax.f32 %v532_v39, 0.0  ;;  %v535_v45 = vadd.f32 %v12653_v35, %v534_v43  ;;  %v12742_v43 = vld [vmem:[%s18526_s2 + $0x10] sm:$0xff] }
 0x129   :  { %v649_v46 = vmax.f32 %v543_v42, 0.0 }
 0x12a   :  { %v647_v47 = vmax.f32 %v535_v45, 0.0 }
 0x12b   :  { %v685_v48 = vpack.c.bf16 %v649_v46, %v648_v41 }
 0x12c   :  { %v684_v49 = vpack.c.bf16 %v647_v47, %v646_v44  ;;  %v10768_v50 = vpop.f32.mrb[40].mxu0  ;;  %v12747_v44 = vld [vmem:[%s18526_s2] sm:$0xff] }
 0x12d   :  { %v556_v51 = vadd.f32 %v10768_v50, %v12653_v35  ;;  %v547_v52 = vpop.f32.mrb[41].mxu0 }
 0x12e   :  { %v548_v53 = vadd.f32 %v12653_v35, %v547_v52  ;;  %v10769_v54 = vpop.f32.mrb[42].mxu0  ;;  %10820 = vmatprep.mubr.msk.bf16.mxu1 %vm261_vm2, %v684_v49 }
 0x12f   :  { %v652_v55 = vmax.f32 %v556_v51, 0.0  ;;  %v559_v56 = vadd.f32 %v10769_v54, %v12653_v35  ;;  %v550_v57 = vpop.f32.mrb[43].mxu0  ;;  %10821 = vmatmul.mubr.msk.bf16.gmra.mrb[32].mxu1 %vm261_vm2, %v685_v48  ;;  %v12760_v48 = vld [vmem:[%s18526_s2 + $0x8] sm:$0xff] }
 0x130   :  { %v650_v58 = vmax.f32 %v548_v53, 0.0  ;;  %v551_v59 = vadd.f32 %v12653_v35, %v550_v57 }
 0x131   :  { %v653_v60 = vmax.f32 %v559_v56, 0.0  ;;  %v12778_v56 = vld [vmem:[%s18526_s2 + $0x30] sm:$0xff] }
 0x132   :  { %v651_v61 = vmax.f32 %v551_v59, 0.0 }
 0x133   :  { %v687_v62 = vpack.c.bf16 %v653_v60, %v652_v55 }
 0x134   :  { %v686_v63 = vpack.c.bf16 %v651_v61, %v650_v58  ;;  %v10772_v0 = vpop.f32.mrb[44].mxu0  ;;  %v12785_v58 = vld [vmem:[%s18526_s2 + $0x20] sm:$0xff] }
 0x135   :  { %v572_v1 = vadd.f32 %v10772_v0, %v12653_v35  ;;  %v563_v2 = vpop.f32.mrb[45].mxu0 }
 0x136   :  { %v564_v3 = vadd.f32 %v12653_v35, %v563_v2  ;;  %v10773_v4 = vpop.f32.mrb[46].mxu0  ;;  %10824 = vmatprep.mubr.msk.bf16.mxu1 %vm261_vm2, %v686_v63  ;;  %v12795_v63 = vld [vmem:[%s18526_s2 + $0x28] sm:$0xff] }
 0x137   :  { %v656_v5 = vmax.f32 %v572_v1, 0.0  ;;  %v575_v6 = vadd.f32 %v10773_v4, %v12653_v35  ;;  %v566_v7 = vpop.f32.mrb[47].mxu0  ;;  %10825 = vmatmul.mubr.msk.bf16.gmra.mrb[36].mxu1 %vm261_vm2, %v687_v62 }
 0x138   :  { %v654_v8 = vmax.f32 %v564_v3, 0.0  ;;  %v567_v9 = vadd.f32 %v12653_v35, %v566_v7 }
 0x139   :  { %v657_v10 = vmax.f32 %v575_v6, 0.0 }
 0x13a   :  { %v655_v11 = vmax.f32 %v567_v9, 0.0 }
 0x13b   :  { %v689_v12 = vpack.c.bf16 %v657_v10, %v656_v5 }
 0x13c   :  { %v688_v13 = vpack.c.bf16 %v655_v11, %v654_v8  ;;  %v10776_v14 = vpop.f32.mrb[48].mxu0 }
 0x13d   :  { %v588_v15 = vadd.f32 %v10776_v14, %v12653_v35  ;;  %v579_v16 = vpop.f32.mrb[49].mxu0 }
 0x13e   :  { %v580_v17 = vadd.f32 %v12653_v35, %v579_v16  ;;  %v10777_v18 = vpop.f32.mrb[50].mxu0  ;;  %10828 = vmatprep.mubr.msk.bf16.mxu1 %vm261_vm2, %v688_v13 }
 0x13f   :  { %v660_v19 = vmax.f32 %v588_v15, 0.0  ;;  %v591_v20 = vadd.f32 %v10777_v18, %v12653_v35  ;;  %v582_v21 = vpop.f32.mrb[51].mxu0  ;;  %10829 = vmatmul.mubr.msk.bf16.gmra.mrb[40].mxu1 %vm261_vm2, %v689_v12 }
 0x140   :  { %v658_v22 = vmax.f32 %v580_v17, 0.0  ;;  %v583_v23 = vadd.f32 %v12653_v35, %v582_v21 }
 0x141   :  { %v661_v24 = vmax.f32 %v591_v20, 0.0 }
 0x142   :  { %v659_v25 = vmax.f32 %v583_v23, 0.0 }
 0x143   :  { %v691_v26 = vpack.c.bf16 %v661_v24, %v660_v19 }
 0x144   :  { %v690_v27 = vpack.c.bf16 %v659_v25, %v658_v22  ;;  %v10780_v28 = vpop.f32.mrb[52].mxu0 }
 0x145   :  { %v604_v29 = vadd.f32 %v10780_v28, %v12653_v35  ;;  %v595_v30 = vpop.f32.mrb[53].mxu0 }
 0x146   :  { %v596_v31 = vadd.f32 %v12653_v35, %v595_v30  ;;  %v10781_v32 = vpop.f32.mrb[54].mxu0  ;;  %10832 = vmatprep.mubr.msk.bf16.mxu1 %vm261_vm2, %v690_v27 }
 0x147   :  { %v664_v33 = vmax.f32 %v604_v29, 0.0  ;;  %v607_v34 = vadd.f32 %v10781_v32, %v12653_v35  ;;  %v598_v36 = vpop.f32.mrb[55].mxu0  ;;  %10833 = vmatmul.mubr.msk.bf16.gmra.mrb[44].mxu1 %vm261_vm2, %v691_v26 }
 0x148   :  { %v662_v37 = vmax.f32 %v596_v31, 0.0  ;;  %v599_v38 = vadd.f32 %v12653_v35, %v598_v36  ;;  %v12752_v35 = vld [vmem:[%s18526_s2 + $0x18] sm:$0xff] }
 0x149   :  { %v665_v39 = vmax.f32 %v607_v34, 0.0 }
 0x14a   :  { %v663_v40 = vmax.f32 %v599_v38, 0.0 }
 0x14b   :  { %v693_v41 = vpack.c.bf16 %v665_v39, %v664_v33 }
 0x14c   :  { %v692_v42 = vpack.c.bf16 %v663_v40, %v662_v37 }
 0x14e   :  { %10836 = vmatprep.mubr.msk.bf16.mxu1 %vm261_vm2, %v692_v42 }
 0x14f   :  { %10837 = vmatmul.mubr.msk.bf16.gmra.mrb[48].mxu1 %vm261_vm2, %v693_v41  ;;  %vm9943_vm2 = vcmask 1045509  }
 0x1ba   :  { %v10786_v45 = vpop.f32.mrb[56].mxu0 }
 0x1bb   :  { %v12755_v46 = vadd.f32 %v10786_v45, %v12742_v43  ;;  %v820_v47 = vpop.f32.mrb[57].mxu0 }
 0x1bc   :  { %v12763_v49 = vadd.f32 %v820_v47, %v12747_v44  ;;  %v10787_v50 = vpop.f32.mrb[58].mxu0 }
 0x1bd   :  { %18838 = vst [vmem:[#allocation5_spill] sm:$0xff] %v12755_v46  ;;  %v12766_v51 = vadd.f32 %v10787_v50, %v12752_v35  ;;  %v823_v52 = vpop.f32.mrb[59].mxu0  ;;  %v1106_v53 = vsel %vm1099_vm3, %v12755_v46, 0.0 }
 0x1be   :  { %18839 = vst [vmem:[#allocation6_spill] sm:$0xff] %v12763_v49  ;;  %v12771_v54 = vadd.f32 %v823_v52, %v12760_v48  ;;  %1107 = vadd.xlane.f32.xlu1 %v1106_v53  ;;  %v1100_v55 = vsel %vm1099_vm3, %v12763_v49, 0.0 }
 0x1bf   :  { %18840 = vst [vmem:[#allocation7_spill] sm:$0xff] %v12766_v51  ;;  %1101 = vadd.xlane.f32.xlu0 %v1100_v55  ;;  %v1109_v57 = vsel %vm1099_vm3, %v12766_v51, 0.0 }
 0x1c0   :  { %18841 = vst [vmem:[#allocation8_spill] sm:$0xff] %v12771_v54  ;;  %v1103_v60 = vsel %vm1099_vm3, %v12771_v54, 0.0 }
 0x1c2   :  { %v10790_v59 = vpop.f32.mrb[0].mxu1  ;;  %1110 = vadd.xlane.f32.xlu1 %v1109_v57 }
 0x1c3   :  { %v12790_v61 = vadd.f32 %v10790_v59, %v12778_v56  ;;  %v836_v62 = vpop.f32.mrb[1].mxu1  ;;  %1104 = vadd.xlane.f32.xlu0 %v1103_v60 }
 0x1c4   :  { %v12798_v0 = vadd.f32 %v836_v62, %v12785_v58  ;;  %v10791_v1 = vpop.f32.mrb[2].mxu1 }
 0x1c5   :  { %18842 = vst [vmem:[#allocation9_spill] sm:$0xff] %v12790_v61  ;;  %v12801_v2 = vadd.f32 %v10791_v1, %v12747_v44  ;;  %v1118_v3 = vsel %vm1099_vm3, %v12790_v61, 0.0  ;;  %v839_v4 = vpop.f32.mrb[3].mxu1 }
 0x1c6   :  { %18843 = vst [vmem:[#allocation10_spill] sm:$0xff] %v12798_v0  ;;  %v12806_v5 = vadd.f32 %v839_v4, %v12795_v63  ;;  %v1112_v7 = vsel %vm1099_vm3, %v12798_v0, 0.0 }
 0x1c7   :  { %18844 = vst [vmem:[#allocation11_spill] sm:$0xff] %v12801_v2  ;;  %1119 = vadd.xlane.f32.xlu0 %v1118_v3  ;;  %v1121_v6 = vsel %vm1099_vm3, %v12801_v2, 0.0 }
 0x1c8   :  { %18845 = vst [vmem:[#allocation12_spill] sm:$0xff] %v12806_v5  ;;  %1122 = vadd.xlane.f32.xlu1 %v1121_v6  ;;  %v1115_v8 = vsel %vm1099_vm3, %v12806_v5, 0.0 }
 0x1ca   :  { %v10794_v9 = vpop.f32.mrb[4].mxu1 }
 0x1cb   :  { %v12815_v10 = vadd.f32 %v10794_v9, %v12752_v35  ;;  %v852_v11 = vpop.f32.mrb[5].mxu1  ;;  %1113 = vadd.xlane.f32.xlu0 %v1112_v7 }
 0x1cc   :  { %v12818_v12 = vadd.f32 %v852_v11, %v12760_v48  ;;  %v10795_v13 = vpop.f32.mrb[6].mxu1  ;;  %1116 = vadd.xlane.f32.xlu1 %v1115_v8 }
 0x1cd   :  { %18846 = vst [vmem:[#allocation13_spill] sm:$0xff] %v12815_v10  ;;  %v12821_v14 = vadd.f32 %v10795_v13, %v12785_v58  ;;  %v1130_v15 = vsel %vm1099_vm3, %v12815_v10, 0.0  ;;  %v855_v16 = vpop.f32.mrb[7].mxu1 }
 0x1ce   :  { %18847 = vst [vmem:[#allocation14_spill] sm:$0xff] %v12818_v12  ;;  %v12826_v17 = vadd.f32 %v855_v16, %v12742_v43  ;;  %v1124_v19 = vsel %vm1099_vm3, %v12818_v12, 0.0 }
 0x1cf   :  { %18848 = vst [vmem:[#allocation15_spill] sm:$0xff] %v12821_v14  ;;  %1131 = vadd.xlane.f32.xlu0 %v1130_v15  ;;  %v1133_v18 = vsel %vm1099_vm3, %v12821_v14, 0.0 }
 0x1d0   :  { %18849 = vst [vmem:[#allocation16_spill] sm:$0xff] %v12826_v17  ;;  %1134 = vadd.xlane.f32.xlu1 %v1133_v18  ;;  %v1127_v20 = vsel %vm1099_vm3, %v12826_v17, 0.0 }
 0x1d2   :  { %v10798_v21 = vpop.f32.mrb[8].mxu1 }
 0x1d3   :  { %v12835_v22 = vadd.f32 %v10798_v21, %v12747_v44  ;;  %v868_v23 = vpop.f32.mrb[9].mxu1  ;;  %1125 = vadd.xlane.f32.xlu0 %v1124_v19 }
 0x1d4   :  { %v12838_v24 = vadd.f32 %v868_v23, %v12795_v63  ;;  %v10799_v25 = vpop.f32.mrb[10].mxu1  ;;  %1128 = vadd.xlane.f32.xlu1 %v1127_v20 }
 0x1d5   :  { %18850 = vst [vmem:[#allocation17_spill] sm:$0xff] %v12835_v22  ;;  %v12841_v26 = vadd.f32 %v10799_v25, %v12760_v48  ;;  %v1142_v27 = vsel %vm1099_vm3, %v12835_v22, 0.0  ;;  %v871_v28 = vpop.f32.mrb[11].mxu1 }
 0x1d6   :  { %18851 = vst [vmem:[#allocation18_spill] sm:$0xff] %v12838_v24  ;;  %v12846_v29 = vadd.f32 %v871_v28, %v12778_v56  ;;  %v1136_v31 = vsel %vm1099_vm3, %v12838_v24, 0.0 }
 0x1d7   :  { %18852 = vst [vmem:[#allocation19_spill] sm:$0xff] %v12841_v26  ;;  %1143 = vadd.xlane.f32.xlu0 %v1142_v27  ;;  %v1145_v30 = vsel %vm1099_vm3, %v12841_v26, 0.0 }
 0x1d8   :  { %18853 = vst [vmem:[#allocation20_spill] sm:$0xff] %v12846_v29  ;;  %1146 = vadd.xlane.f32.xlu1 %v1145_v30  ;;  %v1139_v32 = vsel %vm1099_vm3, %v12846_v29, 0.0 }
 0x1da   :  { %v10802_v33 = vpop.f32.mrb[12].mxu1 }
 0x1db   :  { %v12855_v34 = vadd.f32 %v10802_v33, %v12785_v58  ;;  %v884_v36 = vpop.f32.mrb[13].mxu1  ;;  %1137 = vadd.xlane.f32.xlu0 %v1136_v31 }
 0x1dc   :  { %v12858_v37 = vadd.f32 %v884_v36, %v12742_v43  ;;  %v10803_v38 = vpop.f32.mrb[14].mxu1  ;;  %1140 = vadd.xlane.f32.xlu1 %v1139_v32 }
 0x1dd   :  { %18854 = vst [vmem:[#allocation21_spill] sm:$0xff] %v12855_v34  ;;  %v12861_v39 = vadd.f32 %v10803_v38, %v12795_v63  ;;  %v1154_v40 = vsel %vm1099_vm3, %v12855_v34, 0.0  ;;  %v887_v41 = vpop.f32.mrb[15].mxu1 }
 0x1de   :  { %18855 = vst [vmem:[#allocation22_spill] sm:$0xff] %v12858_v37  ;;  %v12866_v42 = vadd.f32 %v887_v41, %v12752_v35  ;;  %v1148_v47 = vsel %vm1099_vm3, %v12858_v37, 0.0 }
 0x1df   :  { %18856 = vst [vmem:[#allocation23_spill] sm:$0xff] %v12861_v39  ;;  %1155 = vadd.xlane.f32.xlu0 %v1154_v40  ;;  %v1157_v45 = vsel %vm1099_vm3, %v12861_v39, 0.0 }
 0x1e0   :  { %18857 = vst [vmem:[#allocation24_spill] sm:$0xff] %v12866_v42  ;;  %1158 = vadd.xlane.f32.xlu1 %v1157_v45  ;;  %v1151_v50 = vsel %vm1099_vm3, %v12866_v42, 0.0 }
 0x1e2   :  { %v10806_v52 = vpop.f32.mrb[16].mxu1 }
 0x1e3   :  { %v12875_v53 = vadd.f32 %v10806_v52, %v12760_v48  ;;  %v900_v55 = vpop.f32.mrb[17].mxu1  ;;  %1149 = vadd.xlane.f32.xlu0 %v1148_v47 }
 0x1e4   :  { %v12878_v57 = vadd.f32 %v900_v55, %v12778_v56  ;;  %v10807_v59 = vpop.f32.mrb[18].mxu1  ;;  %1152 = vadd.xlane.f32.xlu1 %v1151_v50 }
 0x1e5   :  { %18858 = vst [vmem:[#allocation25_spill] sm:$0xff] %v12875_v53  ;;  %v12881_v60 = vadd.f32 %v10807_v59, %v12742_v43  ;;  %v1166_v62 = vsel %vm1099_vm3, %v12875_v53, 0.0  ;;  %v903_v1 = vpop.f32.mrb[19].mxu1 }
 0x1e6   :  { %18859 = vst [vmem:[#allocation26_spill] sm:$0xff] %v12878_v57  ;;  %v12886_v3 = vadd.f32 %v903_v1, %v12747_v44  ;;  %v1160_v6 = vsel %vm1099_vm3, %v12878_v57, 0.0 }
 0x1e7   :  { %18860 = vst [vmem:[#allocation27_spill] sm:$0xff] %v12881_v60  ;;  %1167 = vadd.xlane.f32.xlu0 %v1166_v62  ;;  %v1169_v4 = vsel %vm1099_vm3, %v12881_v60, 0.0 }
 0x1e8   :  { %18861 = vst [vmem:[#allocation28_spill] sm:$0xff] %v12886_v3  ;;  %1170 = vadd.xlane.f32.xlu1 %v1169_v4  ;;  %v1163_v7 = vsel %vm1099_vm3, %v12886_v3, 0.0 }
 0x1ea   :  { %v10810_v8 = vpop.f32.mrb[20].mxu1 }
 0x1eb   :  { %v12895_v9 = vadd.f32 %v10810_v8, %v12795_v63  ;;  %v916_v11 = vpop.f32.mrb[21].mxu1  ;;  %1161 = vadd.xlane.f32.xlu0 %v1160_v6 }
 0x1ec   :  { %v12898_v13 = vadd.f32 %v916_v11, %v12752_v35  ;;  %v10811_v15 = vpop.f32.mrb[22].mxu1  ;;  %1164 = vadd.xlane.f32.xlu1 %v1163_v7 }
 0x1ed   :  { %18862 = vst [vmem:[#allocation29_spill] sm:$0xff] %v12895_v9  ;;  %v12901_v16 = vadd.f32 %v10811_v15, %v12778_v56  ;;  %v1178_v18 = vsel %vm1099_vm3, %v12895_v9, 0.0  ;;  %v919_v19 = vpop.f32.mrb[23].mxu1 }
 0x1ee   :  { %18863 = vst [vmem:[#allocation30_spill] sm:$0xff] %v12898_v13  ;;  %v12906_v20 = vadd.f32 %v919_v19, %v12785_v58  ;;  %v1172_v23 = vsel %vm1099_vm3, %v12898_v13, 0.0 }
 0x1ef   :  { %18864 = vst [vmem:[#allocation31_spill] sm:$0xff] %v12901_v16  ;;  %1179 = vadd.xlane.f32.xlu0 %v1178_v18  ;;  %v1181_v21 = vsel %vm1099_vm3, %v12901_v16, 0.0 }
 0x1f0   :  { %18865 = vst [vmem:[#allocation32_spill] sm:$0xff] %v12906_v20  ;;  %1182 = vadd.xlane.f32.xlu1 %v1181_v21  ;;  %v1175_v25 = vsel %vm1099_vm3, %v12906_v20, 0.0 }
 0x1f2   :  { %v10814_v27 = vpop.f32.mrb[24].mxu1 }
 0x1f3   :  { %v12915_v28 = vadd.f32 %v10814_v27, %v12742_v43  ;;  %v932_v30 = vpop.f32.mrb[25].mxu1  ;;  %1173 = vadd.xlane.f32.xlu0 %v1172_v23 }
 0x1f4   :  { %v12918_v31 = vadd.f32 %v932_v30, %v12747_v44  ;;  %v10815_v32 = vpop.f32.mrb[26].mxu1  ;;  %1176 = vadd.xlane.f32.xlu1 %v1175_v25 }
 0x1f5   :  { %18866 = vst [vmem:[#allocation33_spill] sm:$0xff] %v12915_v28  ;;  %v12921_v33 = vadd.f32 %v10815_v32, %v12752_v35  ;;  %v1190_v36 = vsel %vm1099_vm3, %v12915_v28, 0.0  ;;  %v935_v38 = vpop.f32.mrb[27].mxu1 }
 0x1f6   :  { %18867 = vst [vmem:[#allocation34_spill] sm:$0xff] %v12918_v31  ;;  %v12926_v40 = vadd.f32 %v935_v38, %v12760_v48  ;;  %v1184_v45 = vsel %vm1099_vm3, %v12918_v31, 0.0 }
 0x1f7   :  { %18868 = vst [vmem:[#allocation35_spill] sm:$0xff] %v12921_v33  ;;  %1191 = vadd.xlane.f32.xlu0 %v1190_v36  ;;  %v1193_v41 = vsel %vm1099_vm3, %v12921_v33, 0.0 }
 0x1f8   :  { %18869 = vst [vmem:[#allocation36_spill] sm:$0xff] %v12926_v40  ;;  %1194 = vadd.xlane.f32.xlu1 %v1193_v41  ;;  %v1187_v47 = vsel %vm1099_vm3, %v12926_v40, 0.0 }
 0x1fa   :  { %v10818_v50 = vpop.f32.mrb[28].mxu1 }
 0x1fb   :  { %v12935_v52 = vadd.f32 %v10818_v50, %v12778_v56  ;;  %v948_v55 = vpop.f32.mrb[29].mxu1  ;;  %1185 = vadd.xlane.f32.xlu0 %v1184_v45 }
 0x1fc   :  { %v12938_v59 = vadd.f32 %v948_v55, %v12785_v58  ;;  %v10819_v62 = vpop.f32.mrb[30].mxu1  ;;  %1188 = vadd.xlane.f32.xlu1 %v1187_v47 }
 0x1fd   :  { %18870 = vst [vmem:[#allocation37_spill] sm:$0xff] %v12935_v52  ;;  %v12941_v1 = vadd.f32 %v10819_v62, %v12747_v44  ;;  %v1202_v4 = vsel %vm1099_vm3, %v12935_v52, 0.0  ;;  %v951_v6 = vpop.f32.mrb[31].mxu1 }
 0x1fe   :  { %18871 = vst [vmem:[#allocation38_spill] sm:$0xff] %v12938_v59  ;;  %v12946_v7 = vadd.f32 %v951_v6, %v12795_v63  ;;  %v1196_v11 = vsel %vm1099_vm3, %v12938_v59, 0.0 }
 0x1ff   :  { %18872 = vst [vmem:[#allocation39_spill] sm:$0xff] %v12941_v1  ;;  %1203 = vadd.xlane.f32.xlu0 %v1202_v4  ;;  %v1205_v8 = vsel %vm1099_vm3, %v12941_v1, 0.0 }
 0x200   :  { %18873 = vst [vmem:[#allocation40_spill] sm:$0xff] %v12946_v7  ;;  %1206 = vadd.xlane.f32.xlu1 %v1205_v8  ;;  %v1199_v15 = vsel %vm1099_vm3, %v12946_v7, 0.0 }
 0x202   :  { %v10822_v18 = vpop.f32.mrb[32].mxu1 }
 0x203   :  { %v12955_v19 = vadd.f32 %v10822_v18, %v12752_v35  ;;  %v964_v21 = vpop.f32.mrb[33].mxu1  ;;  %1197 = vadd.xlane.f32.xlu0 %v1196_v11 }
 0x204   :  { %v12958_v23 = vadd.f32 %v964_v21, %v12760_v48  ;;  %v10823_v25 = vpop.f32.mrb[34].mxu1  ;;  %1200 = vadd.xlane.f32.xlu1 %v1199_v15 }
 0x205   :  { %18874 = vst [vmem:[#allocation41_spill] sm:$0xff] %v12955_v19  ;;  %v12961_v27 = vadd.f32 %v10823_v25, %v12785_v58  ;;  %v1214_v30 = vsel %vm1099_vm3, %v12955_v19, 0.0  ;;  %v967_v32 = vpop.f32.mrb[35].mxu1 }
 0x206   :  { %18875 = vst [vmem:[#allocation42_spill] sm:$0xff] %v12958_v23  ;;  %v12966_v36 = vadd.f32 %v967_v32, %v12742_v43  ;;  %v1208_v41 = vsel %vm1099_vm3, %v12958_v23, 0.0 }
 0x207   :  { %18876 = vst [vmem:[#allocation43_spill] sm:$0xff] %v12961_v27  ;;  %1215 = vadd.xlane.f32.xlu0 %v1214_v30  ;;  %v1217_v38 = vsel %vm1099_vm3, %v12961_v27, 0.0 }
 0x208   :  { %18877 = vst [vmem:[#allocation44_spill] sm:$0xff] %v12966_v36  ;;  %1218 = vadd.xlane.f32.xlu1 %v1217_v38  ;;  %v1211_v45 = vsel %vm1099_vm3, %v12966_v36, 0.0 }
 0x20a   :  { %v10826_v47 = vpop.f32.mrb[36].mxu1 }
 0x20b   :  { %v12975_v50 = vadd.f32 %v10826_v47, %v12747_v44  ;;  %v980_v55 = vpop.f32.mrb[37].mxu1  ;;  %1209 = vadd.xlane.f32.xlu0 %v1208_v41 }
 0x20c   :  { %v12978_v62 = vadd.f32 %v980_v55, %v12795_v63  ;;  %v10827_v4 = vpop.f32.mrb[38].mxu1  ;;  %1212 = vadd.xlane.f32.xlu1 %v1211_v45 }
 0x20d   :  { %18878 = vst [vmem:[#allocation45_spill] sm:$0xff] %v12975_v50  ;;  %v12981_v6 = vadd.f32 %v10827_v4, %v12760_v48  ;;  %v1226_v8 = vsel %vm1099_vm3, %v12975_v50, 0.0  ;;  %v983_v11 = vpop.f32.mrb[39].mxu1 }
 0x20e   :  { %18879 = vst [vmem:[#allocation46_spill] sm:$0xff] %v12978_v62  ;;  %v12986_v15 = vadd.f32 %v983_v11, %v12778_v56  ;;  %v1220_v21 = vsel %vm1099_vm3, %v12978_v62, 0.0 }
 0x20f   :  { %18880 = vst [vmem:[#allocation47_spill] sm:$0xff] %v12981_v6  ;;  %1227 = vadd.xlane.f32.xlu0 %v1226_v8  ;;  %v1229_v18 = vsel %vm1099_vm3, %v12981_v6, 0.0 }
 0x210   :  { %18881 = vst [vmem:[#allocation48_spill] sm:$0xff] %v12986_v15  ;;  %1230 = vadd.xlane.f32.xlu1 %v1229_v18  ;;  %v1223_v25 = vsel %vm1099_vm3, %v12986_v15, 0.0 }
 0x212   :  { %v10830_v30 = vpop.f32.mrb[40].mxu1 }
 0x213   :  { %v12995_v32 = vadd.f32 %v10830_v30, %v12785_v58  ;;  %v996_v38 = vpop.f32.mrb[41].mxu1  ;;  %1221 = vadd.xlane.f32.xlu0 %v1220_v21 }
 0x214   :  { %v12998_v41 = vadd.f32 %v996_v38, %v12742_v43  ;;  %v10831_v45 = vpop.f32.mrb[42].mxu1  ;;  %1224 = vadd.xlane.f32.xlu1 %v1223_v25 }
 0x215   :  { %18882 = vst [vmem:[#allocation49_spill] sm:$0xff] %v12995_v32  ;;  %v13001_v47 = vadd.f32 %v10831_v45, %v12795_v63  ;;  %v1238_v55 = vsel %vm1099_vm3, %v12995_v32, 0.0  ;;  %v999_v4 = vpop.f32.mrb[43].mxu1 }
 0x216   :  { %18883 = vst [vmem:[#allocation50_spill] sm:$0xff] %v12998_v41  ;;  %v13006_v8 = vadd.f32 %v999_v4, %v12752_v35  ;;  %v1232_v18 = vsel %vm1099_vm3, %v12998_v41, 0.0 }
 0x217   :  { %18884 = vst [vmem:[#allocation51_spill] sm:$0xff] %v13001_v47  ;;  %1239 = vadd.xlane.f32.xlu0 %v1238_v55  ;;  %v1241_v11 = vsel %vm1099_vm3, %v13001_v47, 0.0 }
 0x218   :  { %18885 = vst [vmem:[#allocation52_spill] sm:$0xff] %v13006_v8  ;;  %1242 = vadd.xlane.f32.xlu1 %v1241_v11  ;;  %v1235_v21 = vsel %vm1099_vm3, %v13006_v8, 0.0 }
 0x21a   :  { %v10834_v25 = vpop.f32.mrb[44].mxu1 }
 0x21b   :  { %v13015_v30 = vadd.f32 %v10834_v25, %v12760_v48  ;;  %v1012_v38 = vpop.f32.mrb[45].mxu1  ;;  %1233 = vadd.xlane.f32.xlu0 %v1232_v18 }
 0x21c   :  { %v13018_v45 = vadd.f32 %v1012_v38, %v12778_v56  ;;  %v10835_v55 = vpop.f32.mrb[46].mxu1  ;;  %1236 = vadd.xlane.f32.xlu1 %v1235_v21 }
 0x21d   :  { %18886 = vst [vmem:[#allocation53_spill] sm:$0xff] %v13015_v30  ;;  %v13021_v4 = vadd.f32 %v10835_v55, %v12742_v43  ;;  %v1250_v11 = vsel %vm1099_vm3, %v13015_v30, 0.0  ;;  %v1015_v41 = vpop.f32.mrb[47].mxu1 }
 0x21e   :  { %18887 = vst [vmem:[#allocation54_spill] sm:$0xff] %v13018_v45  ;;  %v13026_v8 = vadd.f32 %v1015_v41, %v12747_v44  ;;  %v1244_v18 = vsel %vm1099_vm3, %v13018_v45, 0.0 }
 0x21f   :  { %18888 = vst [vmem:[#allocation55_spill] sm:$0xff] %v13021_v4  ;;  %1251 = vadd.xlane.f32.xlu0 %v1250_v11  ;;  %v1253_v48 = vsel %vm1099_vm3, %v13021_v4, 0.0 }
 0x220   :  { %18889 = vst [vmem:[#allocation56_spill] sm:$0xff] %v13026_v8  ;;  %1254 = vadd.xlane.f32.xlu1 %v1253_v48  ;;  %v1247_v21 = vsel %vm1099_vm3, %v13026_v8, 0.0 }
 0x222   :  { %v10838_v43 = vpop.f32.mrb[48].mxu1 }
 0x223   :  { %v13035_v25 = vadd.f32 %v10838_v43, %v12795_v63  ;;  %v1028_v38 = vpop.f32.mrb[49].mxu1  ;;  %1245 = vadd.xlane.f32.xlu0 %v1244_v18 }
 0x224   :  { %v13038_v44 = vadd.f32 %v1028_v38, %v12752_v35  ;;  %v10839_v41 = vpop.f32.mrb[50].mxu1  ;;  %1248 = vadd.xlane.f32.xlu1 %v1247_v21 }
 0x225   :  { %18890 = vst [vmem:[#allocation57_spill] sm:$0xff] %v13035_v25  ;;  %v13041_v55 = vadd.f32 %v10839_v41, %v12778_v56  ;;  %v1262_v11 = vsel %vm1099_vm3, %v13035_v25, 0.0  ;;  %v1031_v48 = vpop.f32.mrb[51].mxu1 }
 0x226   :  { %18891 = vst [vmem:[#allocation58_spill] sm:$0xff] %v13038_v44  ;;  %v13046_v8 = vadd.f32 %v1031_v48, %v12785_v58  ;;  %v1256_v35 = vsel %vm1099_vm3, %v13038_v44, 0.0 }
 0x227   :  { %18892 = vst [vmem:[#allocation59_spill] sm:$0xff] %v13041_v55  ;;  %1263 = vadd.xlane.f32.xlu0 %v1262_v11  ;;  %v1265_v63 = vsel %vm1099_vm3, %v13041_v55, 0.0 }
 0x228   :  { %18893 = vst [vmem:[#allocation60_spill] sm:$0xff] %v13046_v8  ;;  %1266 = vadd.xlane.f32.xlu1 %v1265_v63  ;;  %v1259_v18 = vsel %vm1099_vm3, %v13046_v8, 0.0 }
 0x22b   :  { %1257 = vadd.xlane.f32.xlu0 %v1256_v35 }
 0x22c   :  { %1260 = vadd.xlane.f32.xlu1 %v1259_v18 }
 0x24b   :  { %v1108_v56 = vpop.xlane.xlu1 %1107 }
 0x24c   :  { %v1271_v21 = vmul.f32 0.1, %v1108_v56  ;;  %v1102_v43 = vpop.xlane.xlu0 %1101 }
 0x24d   :  { %v1269_v38 = vmul.f32 0.1, %v1102_v43 }
 0x24e   :  { %v13055_v58 = vsub.f32 %v12755_v46, %v1271_v21 }
 0x24f   :  { %v13058_v41 = vsub.f32 %v12763_v49, %v1269_v38  ;;  %v1111_v11 = vpop.xlane.xlu1 %1110 }
 0x250   :  { %v1272_v48 = vmul.f32 0.1, %v1111_v11  ;;  %v1105_v63 = vpop.xlane.xlu0 %1104  ;;  %v1383_v44 = vmul.f32 %v13055_v58, %v13055_v58 }
 0x251   :  { %v1270_v55 = vmul.f32 0.1, %v1105_v63  ;;  %v1381_v56 = vmul.f32 %v13058_v41, %v13058_v41 }
 0x252   :  { %v13063_v35 = vsub.f32 %v12766_v51, %v1272_v48  ;;  %v1443_v18 = vsel %vm1099_vm3, %v1383_v44, 0.0 }
 0x253   :  { %v13069_v21 = vsub.f32 %v12771_v54, %v1270_v55  ;;  %1444 = vadd.xlane.f32.xlu0 %v1443_v18  ;;  %v1437_v48 = vsel %vm1099_vm3, %v1381_v56, 0.0 }
 0x254   :  { %v1120_v43 = vpop.xlane.xlu0 %1119  ;;  %v1384_v38 = vmul.f32 %v13063_v35, %v13063_v35 }
 0x255   :  { %18894 = vst [vmem:[#allocation61_spill] sm:$0xff] %v13069_v21  ;;  %v1275_v11 = vmul.f32 0.1, %v1120_v43  ;;  %v1123_v49 = vpop.xlane.xlu1 %1122  ;;  %v1382_v44 = vmul.f32 %v13069_v21, %v13069_v21 }
 0x256   :  { %v1276_v46 = vmul.f32 0.1, %v1123_v49  ;;  %v1446_v63 = vsel %vm1099_vm3, %v1384_v38, 0.0 }
 0x257   :  { %v13078_v51 = vsub.f32 %v12790_v61, %v1275_v11  ;;  %1447 = vadd.xlane.f32.xlu1 %v1446_v63  ;;  %1438 = vadd.xlane.f32.xlu0 %v1437_v48  ;;  %v1440_v56 = vsel %vm1099_vm3, %v1382_v44, 0.0 }
 0x258   :  { %v13081_v55 = vsub.f32 %v12801_v2, %v1276_v46  ;;  %v1114_v18 = vpop.xlane.xlu0 %1113 }
 0x259   :  { %v1273_v54 = vmul.f32 0.1, %v1114_v18  ;;  %v1117_v43 = vpop.xlane.xlu1 %1116  ;;  %v1387_v49 = vmul.f32 %v13078_v51, %v13078_v51 }
 0x25a   :  { %v1274_v38 = vmul.f32 0.1, %v1117_v43  ;;  %v1388_v21 = vmul.f32 %v13081_v55, %v13081_v55 }
 0x25b   :  { %v13089_v11 = vsub.f32 %v12798_v0, %v1273_v54  ;;  %1441 = vadd.xlane.f32.xlu1 %v1440_v56  ;;  %v1455_v63 = vsel %vm1099_vm3, %v1387_v49, 0.0 }
 0x25c   :  { %v13093_v46 = vsub.f32 %v12806_v5, %v1274_v38  ;;  %1456 = vadd.xlane.f32.xlu0 %v1455_v63  ;;  %v1132_v48 = vpop.xlane.xlu0 %1131  ;;  %v1458_v61 = vsel %vm1099_vm3, %v1388_v21, 0.0 }
 0x25d   :  { %v1279_v18 = vmul.f32 0.1, %v1132_v48  ;;  %v1135_v2 = vpop.xlane.xlu1 %1134  ;;  %v1385_v43 = vmul.f32 %v13089_v11, %v13089_v11 }
 0x25e   :  { %v1280_v44 = vmul.f32 0.1, %v1135_v2  ;;  %v1386_v54 = vmul.f32 %v13093_v46, %v13093_v46 }
 0x25f   :  { %v13101_v56 = vsub.f32 %v12815_v10, %v1279_v18  ;;  %1459 = vadd.xlane.f32.xlu1 %v1458_v61  ;;  %v1449_v49 = vsel %vm1099_vm3, %v1385_v43, 0.0 }
 0x260   :  { %v13105_v38 = vsub.f32 %v12821_v14, %v1280_v44  ;;  %1450 = vadd.xlane.f32.xlu0 %v1449_v49  ;;  %v1126_v63 = vpop.xlane.xlu0 %1125  ;;  %v1452_v0 = vsel %vm1099_vm3, %v1386_v54, 0.0 }
 0x261   :  { %v1277_v48 = vmul.f32 0.1, %v1126_v63  ;;  %v1129_v5 = vpop.xlane.xlu1 %1128  ;;  %v1391_v2 = vmul.f32 %v13101_v56, %v13101_v56 }
 0x262   :  { %v1278_v21 = vmul.f32 0.1, %v1129_v5  ;;  %v1392_v18 = vmul.f32 %v13105_v38, %v13105_v38 }
 0x263   :  { %v13113_v61 = vsub.f32 %v12818_v12, %v1277_v48  ;;  %1453 = vadd.xlane.f32.xlu1 %v1452_v0  ;;  %v1467_v43 = vsel %vm1099_vm3, %v1391_v2, 0.0 }
 0x264   :  { %v13117_v44 = vsub.f32 %v12826_v17, %v1278_v21  ;;  %1468 = vadd.xlane.f32.xlu0 %v1467_v43  ;;  %v1144_v49 = vpop.xlane.xlu0 %1143  ;;  %v1470_v10 = vsel %vm1099_vm3, %v1392_v18, 0.0 }
 0x265   :  { %v1283_v63 = vmul.f32 0.1, %v1144_v49  ;;  %v1147_v14 = vpop.xlane.xlu1 %1146  ;;  %v1389_v5 = vmul.f32 %v13113_v61, %v13113_v61 }
 0x266   :  { %v1284_v54 = vmul.f32 0.1, %v1147_v14  ;;  %v1390_v48 = vmul.f32 %v13117_v44, %v13117_v44 }
 0x267   :  { %v13125_v0 = vsub.f32 %v12835_v22, %v1283_v63  ;;  %1471 = vadd.xlane.f32.xlu1 %v1470_v10  ;;  %v1461_v2 = vsel %vm1099_vm3, %v1389_v5, 0.0 }
 0x268   :  { %v13129_v21 = vsub.f32 %v12841_v26, %v1284_v54  ;;  %1462 = vadd.xlane.f32.xlu0 %v1461_v2  ;;  %v1138_v43 = vpop.xlane.xlu0 %1137  ;;  %v1464_v12 = vsel %vm1099_vm3, %v1390_v48, 0.0 }
 0x269   :  { %v1281_v49 = vmul.f32 0.1, %v1138_v43  ;;  %v1141_v17 = vpop.xlane.xlu1 %1140  ;;  %v1395_v14 = vmul.f32 %v13125_v0, %v13125_v0 }
 0x26a   :  { %v1282_v18 = vmul.f32 0.1, %v1141_v17  ;;  %v1396_v63 = vmul.f32 %v13129_v21, %v13129_v21 }
 0x26b   :  { %v13137_v10 = vsub.f32 %v12838_v24, %v1281_v49  ;;  %1465 = vadd.xlane.f32.xlu1 %v1464_v12  ;;  %v1479_v5 = vsel %vm1099_vm3, %v1395_v14, 0.0 }
 0x26c   :  { %v13141_v54 = vsub.f32 %v12846_v29, %v1282_v18  ;;  %1480 = vadd.xlane.f32.xlu0 %v1479_v5  ;;  %v1156_v2 = vpop.xlane.xlu0 %1155  ;;  %v1482_v22 = vsel %vm1099_vm3, %v1396_v63, 0.0 }
 0x26d   :  { %v1287_v43 = vmul.f32 0.1, %v1156_v2  ;;  %v1159_v26 = vpop.xlane.xlu1 %1158  ;;  %v1393_v17 = vmul.f32 %v13137_v10, %v13137_v10 }
 0x26e   :  { %v1288_v48 = vmul.f32 0.1, %v1159_v26  ;;  %v1394_v49 = vmul.f32 %v13141_v54, %v13141_v54 }
 0x26f   :  { %v13149_v12 = vsub.f32 %v12855_v34, %v1287_v43  ;;  %1483 = vadd.xlane.f32.xlu1 %v1482_v22  ;;  %v1473_v14 = vsel %vm1099_vm3, %v1393_v17, 0.0 }
 0x270   :  { %v13153_v18 = vsub.f32 %v12861_v39, %v1288_v48  ;;  %1474 = vadd.xlane.f32.xlu0 %v1473_v14  ;;  %v1150_v5 = vpop.xlane.xlu0 %1149  ;;  %v1476_v24 = vsel %vm1099_vm3, %v1394_v49, 0.0 }
 0x271   :  { %v1285_v2 = vmul.f32 0.1, %v1150_v5  ;;  %v1153_v29 = vpop.xlane.xlu1 %1152  ;;  %v1399_v26 = vmul.f32 %v13149_v12, %v13149_v12 }
 0x272   :  { %v1286_v63 = vmul.f32 0.1, %v1153_v29  ;;  %v1400_v43 = vmul.f32 %v13153_v18, %v13153_v18 }
 0x273   :  { %v13161_v22 = vsub.f32 %v12858_v37, %v1285_v2  ;;  %1477 = vadd.xlane.f32.xlu1 %v1476_v24  ;;  %v1491_v17 = vsel %vm1099_vm3, %v1399_v26, 0.0 }
 0x274   :  { %v13165_v48 = vsub.f32 %v12866_v42, %v1286_v63  ;;  %1492 = vadd.xlane.f32.xlu0 %v1491_v17  ;;  %v1168_v14 = vpop.xlane.xlu0 %1167  ;;  %v1494_v34 = vsel %vm1099_vm3, %v1400_v43, 0.0 }
 0x275   :  { %v1291_v5 = vmul.f32 0.1, %v1168_v14  ;;  %v1171_v39 = vpop.xlane.xlu1 %1170  ;;  %v1397_v29 = vmul.f32 %v13161_v22, %v13161_v22 }
 0x276   :  { %v1292_v49 = vmul.f32 0.1, %v1171_v39  ;;  %v1398_v2 = vmul.f32 %v13165_v48, %v13165_v48 }
 0x277   :  { %v13173_v24 = vsub.f32 %v12875_v53, %v1291_v5  ;;  %1495 = vadd.xlane.f32.xlu1 %v1494_v34  ;;  %v1485_v26 = vsel %vm1099_vm3, %v1397_v29, 0.0 }
 0x278   :  { %v13177_v63 = vsub.f32 %v12881_v60, %v1292_v49  ;;  %1486 = vadd.xlane.f32.xlu0 %v1485_v26  ;;  %v1162_v17 = vpop.xlane.xlu0 %1161  ;;  %v1488_v37 = vsel %vm1099_vm3, %v1398_v2, 0.0 }
 0x279   :  { %v1289_v14 = vmul.f32 0.1, %v1162_v17  ;;  %v1165_v42 = vpop.xlane.xlu1 %1164  ;;  %v1403_v39 = vmul.f32 %v13173_v24, %v13173_v24 }
 0x27a   :  { %v1290_v43 = vmul.f32 0.1, %v1165_v42  ;;  %v1404_v5 = vmul.f32 %v13177_v63, %v13177_v63  ;;  %v11677_v42 = vld [vmem:[%s18525_s1 + $0x10] sm:$0x1f]  }
 0x27b   :  { %v13185_v34 = vsub.f32 %v12878_v57, %v1289_v14  ;;  %1489 = vadd.xlane.f32.xlu1 %v1488_v37  ;;  %v1503_v29 = vsel %vm1099_vm3, %v1403_v39, 0.0  ;;  %11568 = vmatprep.subr.msk.bf16.mxu0 %vm347_vm1, %v11677_v42  ;;  %v2067_v39 = vsel %vm347_vm1, %v11677_v42, 0 }
 0x27c   :  { %v13189_v49 = vsub.f32 %v12886_v3, %v1290_v43  ;;  %1504 = vadd.xlane.f32.xlu0 %v1503_v29  ;;  %v1180_v26 = vpop.xlane.xlu0 %1179  ;;  %v1506_v14 = vsel %vm1099_vm3, %v1404_v5, 0.0  ;;  %10841 = vmatpush3.bf16.msra.mxu0 %v2067_v39 }
 0x27d   :  { %v1295_v17 = vmul.f32 0.1, %v1180_v26  ;;  %v1183_v2 = vpop.xlane.xlu1 %1182  ;;  %v1401_v60 = vmul.f32 %v13185_v34, %v13185_v34 }
 0x27e   :  { %18895 = vst [vmem:[#allocation62_spill] sm:$0xff] %v13189_v49  ;;  %v1296_v53 = vmul.f32 0.1, %v1183_v2  ;;  %v1402_v37 = vmul.f32 %v13189_v49, %v13189_v49 }
 0x27f   :  { %v13202_v43 = vsub.f32 %v12895_v9, %v1295_v17  ;;  %1507 = vadd.xlane.f32.xlu1 %v1506_v14  ;;  %v1497_v29 = vsel %vm1099_vm3, %v1401_v60, 0.0 }
 0x280   :  { %v13206_v26 = vsub.f32 %v12901_v16, %v1296_v53  ;;  %1498 = vadd.xlane.f32.xlu0 %v1497_v29  ;;  %v1174_v2 = vpop.xlane.xlu0 %1173  ;;  %v1500_v42 = vsel %vm1099_vm3, %v1402_v37, 0.0 }
 0x281   :  { %v1293_v5 = vmul.f32 0.1, %v1174_v2  ;;  %v1177_v3 = vpop.xlane.xlu1 %1176  ;;  %v1407_v57 = vmul.f32 %v13202_v43, %v13202_v43 }
 0x282   :  { %v1294_v49 = vmul.f32 0.1, %v1177_v3  ;;  %v1408_v17 = vmul.f32 %v13206_v26, %v13206_v26 }
 0x283   :  { %v13214_v14 = vsub.f32 %v12898_v13, %v1293_v5  ;;  %1501 = vadd.xlane.f32.xlu1 %v1500_v42  ;;  %v1515_v53 = vsel %vm1099_vm3, %v1407_v57, 0.0 }
 0x284   :  { %v13218_v60 = vsub.f32 %v12906_v20, %v1294_v49  ;;  %1516 = vadd.xlane.f32.xlu0 %v1515_v53  ;;  %v1192_v39 = vpop.xlane.xlu0 %1191  ;;  %v1518_v16 = vsel %vm1099_vm3, %v1408_v17, 0.0 }
 0x285   :  { %v1299_v29 = vmul.f32 0.1, %v1192_v39  ;;  %v1195_v2 = vpop.xlane.xlu1 %1194  ;;  %v1405_v3 = vmul.f32 %v13214_v14, %v13214_v14 }
 0x286   :  { %v1300_v37 = vmul.f32 0.1, %v1195_v2  ;;  %v1406_v5 = vmul.f32 %v13218_v60, %v13218_v60 }
 0x287   :  { %v13226_v42 = vsub.f32 %v12915_v28, %v1299_v29  ;;  %1519 = vadd.xlane.f32.xlu1 %v1518_v16  ;;  %v1509_v57 = vsel %vm1099_vm3, %v1405_v3, 0.0 }
 0x288   :  { %v13230_v49 = vsub.f32 %v12921_v33, %v1300_v37  ;;  %1510 = vadd.xlane.f32.xlu0 %v1509_v57  ;;  %v1186_v53 = vpop.xlane.xlu0 %1185  ;;  %v1512_v9 = vsel %vm1099_vm3, %v1406_v5, 0.0 }
 0x289   :  { %v1297_v39 = vmul.f32 0.1, %v1186_v53  ;;  %v1189_v20 = vpop.xlane.xlu1 %1188  ;;  %v1411_v2 = vmul.f32 %v13226_v42, %v13226_v42 }
 0x28a   :  { %v1298_v17 = vmul.f32 0.1, %v1189_v20  ;;  %v1412_v29 = vmul.f32 %v13230_v49, %v13230_v49 }
 0x28b   :  { %v13238_v16 = vsub.f32 %v12918_v31, %v1297_v39  ;;  %1513 = vadd.xlane.f32.xlu1 %v1512_v9  ;;  %v1527_v3 = vsel %vm1099_vm3, %v1411_v2, 0.0 }
 0x28c   :  { %v13242_v37 = vsub.f32 %v12926_v40, %v1298_v17  ;;  %1528 = vadd.xlane.f32.xlu0 %v1527_v3  ;;  %v1204_v57 = vpop.xlane.xlu0 %1203  ;;  %v1530_v28 = vsel %vm1099_vm3, %v1412_v29, 0.0 }
 0x28d   :  { %v1303_v53 = vmul.f32 0.1, %v1204_v57  ;;  %v1207_v33 = vpop.xlane.xlu1 %1206  ;;  %v1409_v20 = vmul.f32 %v13238_v16, %v13238_v16 }
 0x28e   :  { %v1304_v5 = vmul.f32 0.1, %v1207_v33  ;;  %v1410_v39 = vmul.f32 %v13242_v37, %v13242_v37 }
 0x28f   :  { %v13250_v9 = vsub.f32 %v12935_v52, %v1303_v53  ;;  %1531 = vadd.xlane.f32.xlu1 %v1530_v28  ;;  %v1521_v2 = vsel %vm1099_vm3, %v1409_v20, 0.0 }
 0x290   :  { %v13254_v17 = vsub.f32 %v12941_v1, %v1304_v5  ;;  %1522 = vadd.xlane.f32.xlu0 %v1521_v2  ;;  %v1198_v3 = vpop.xlane.xlu0 %1197  ;;  %v1524_v31 = vsel %vm1099_vm3, %v1410_v39, 0.0 }
 0x291   :  { %v1301_v57 = vmul.f32 0.1, %v1198_v3  ;;  %v1201_v40 = vpop.xlane.xlu1 %1200  ;;  %v1415_v33 = vmul.f32 %v13250_v9, %v13250_v9 }
 0x292   :  { %v1302_v29 = vmul.f32 0.1, %v1201_v40  ;;  %v1416_v53 = vmul.f32 %v13254_v17, %v13254_v17 }
 0x293   :  { %v13262_v28 = vsub.f32 %v12938_v59, %v1301_v57  ;;  %1525 = vadd.xlane.f32.xlu1 %v1524_v31  ;;  %v1539_v20 = vsel %vm1099_vm3, %v1415_v33, 0.0 }
 0x294   :  { %v13266_v5 = vsub.f32 %v12946_v7, %v1302_v29  ;;  %1540 = vadd.xlane.f32.xlu0 %v1539_v20  ;;  %v1216_v2 = vpop.xlane.xlu0 %1215  ;;  %v1542_v52 = vsel %vm1099_vm3, %v1416_v53, 0.0 }
 0x295   :  { %v1307_v3 = vmul.f32 0.1, %v1216_v2  ;;  %v1219_v1 = vpop.xlane.xlu1 %1218  ;;  %v1413_v40 = vmul.f32 %v13262_v28, %v13262_v28 }
 0x296   :  { %v1308_v39 = vmul.f32 0.1, %v1219_v1  ;;  %v1414_v57 = vmul.f32 %v13266_v5, %v13266_v5 }
 0x297   :  { %v13274_v31 = vsub.f32 %v12955_v19, %v1307_v3  ;;  %1543 = vadd.xlane.f32.xlu1 %v1542_v52  ;;  %v1533_v33 = vsel %vm1099_vm3, %v1413_v40, 0.0 }
 0x298   :  { %v13278_v29 = vsub.f32 %v12961_v27, %v1308_v39  ;;  %1534 = vadd.xlane.f32.xlu0 %v1533_v33  ;;  %v1210_v20 = vpop.xlane.xlu0 %1209  ;;  %v1536_v59 = vsel %vm1099_vm3, %v1414_v57, 0.0 }
 0x299   :  { %v1305_v2 = vmul.f32 0.1, %v1210_v20  ;;  %v1213_v7 = vpop.xlane.xlu1 %1212  ;;  %v1419_v1 = vmul.f32 %v13274_v31, %v13274_v31 }
 0x29a   :  { %v1306_v53 = vmul.f32 0.1, %v1213_v7  ;;  %v1420_v3 = vmul.f32 %v13278_v29, %v13278_v29 }
 0x29b   :  { %v13286_v52 = vsub.f32 %v12958_v23, %v1305_v2  ;;  %1537 = vadd.xlane.f32.xlu1 %v1536_v59  ;;  %v1551_v40 = vsel %vm1099_vm3, %v1419_v1, 0.0 }
 0x29c   :  { %v13290_v39 = vsub.f32 %v12966_v36, %v1306_v53  ;;  %1552 = vadd.xlane.f32.xlu0 %v1551_v40  ;;  %v1228_v33 = vpop.xlane.xlu0 %1227  ;;  %v1554_v19 = vsel %vm1099_vm3, %v1420_v3, 0.0 }
 0x29d   :  { %v1311_v20 = vmul.f32 0.1, %v1228_v33  ;;  %v1231_v27 = vpop.xlane.xlu1 %1230  ;;  %v1417_v7 = vmul.f32 %v13286_v52, %v13286_v52 }
 0x29e   :  { %v1312_v57 = vmul.f32 0.1, %v1231_v27  ;;  %v1418_v2 = vmul.f32 %v13290_v39, %v13290_v39 }
 0x29f   :  { %v13298_v59 = vsub.f32 %v12975_v50, %v1311_v20  ;;  %1555 = vadd.xlane.f32.xlu1 %v1554_v19  ;;  %v1545_v1 = vsel %vm1099_vm3, %v1417_v7, 0.0 }
 0x2a0   :  { %v13302_v53 = vsub.f32 %v12981_v6, %v1312_v57  ;;  %1546 = vadd.xlane.f32.xlu0 %v1545_v1  ;;  %v1222_v40 = vpop.xlane.xlu0 %1221  ;;  %v1548_v36 = vsel %vm1099_vm3, %v1418_v2, 0.0 }
 0x2a1   :  { %v1309_v33 = vmul.f32 0.1, %v1222_v40  ;;  %v1225_v23 = vpop.xlane.xlu1 %1224  ;;  %v1423_v27 = vmul.f32 %v13298_v59, %v13298_v59 }
 0x2a2   :  { %v1310_v3 = vmul.f32 0.1, %v1225_v23  ;;  %v1424_v20 = vmul.f32 %v13302_v53, %v13302_v53 }
 0x2a3   :  { %v13310_v19 = vsub.f32 %v12978_v62, %v1309_v33  ;;  %1549 = vadd.xlane.f32.xlu1 %v1548_v36  ;;  %v1563_v7 = vsel %vm1099_vm3, %v1423_v27, 0.0 }
 0x2a4   :  { %v13314_v57 = vsub.f32 %v12986_v15, %v1310_v3  ;;  %1564 = vadd.xlane.f32.xlu0 %v1563_v7  ;;  %v1240_v1 = vpop.xlane.xlu0 %1239  ;;  %v1566_v50 = vsel %vm1099_vm3, %v1424_v20, 0.0 }
 0x2a5   :  { %v1315_v40 = vmul.f32 0.1, %v1240_v1  ;;  %v1243_v6 = vpop.xlane.xlu1 %1242  ;;  %v1421_v23 = vmul.f32 %v13310_v19, %v13310_v19 }
 0x2a6   :  { %18896 = vst [vmem:[#allocation63_spill] sm:$0xff] %v13314_v57  ;;  %v1316_v2 = vmul.f32 0.1, %v1243_v6  ;;  %v1422_v33 = vmul.f32 %v13314_v57, %v13314_v57 }
 0x2a7   :  { %v13322_v36 = vsub.f32 %v12995_v32, %v1315_v40  ;;  %1567 = vadd.xlane.f32.xlu1 %v1566_v50  ;;  %v1557_v27 = vsel %vm1099_vm3, %v1421_v23, 0.0  ;;  %v18899_v32 = vld [vmem:[#allocation50_spill] sm:$0xff] }
 0x2a8   :  { %v13326_v3 = vsub.f32 %v13001_v47, %v1316_v2  ;;  %1558 = vadd.xlane.f32.xlu0 %v1557_v27  ;;  %v1234_v7 = vpop.xlane.xlu0 %1233  ;;  %v1560_v62 = vsel %vm1099_vm3, %v1422_v33, 0.0  ;;  %v18901_v2 = vld [vmem:[#allocation52_spill] sm:$0xff] }
 0x2a9   :  { %18897 = vst [vmem:[#allocation64_spill] sm:$0xff] %v13322_v36  ;;  %v1313_v1 = vmul.f32 0.1, %v1234_v7  ;;  %v1237_v15 = vpop.xlane.xlu1 %1236  ;;  %v1427_v6 = vmul.f32 %v13322_v36, %v13322_v36 }
 0x2aa   :  { %18898 = vst [vmem:[#allocation65_spill] sm:$0xff] %v13326_v3  ;;  %v1314_v20 = vmul.f32 0.1, %v1237_v15  ;;  %v1428_v40 = vmul.f32 %v13326_v3, %v13326_v3 }
 0x2ab   :  { %v13334_v50 = vsub.f32 %v18899_v32, %v1313_v1  ;;  %1561 = vadd.xlane.f32.xlu1 %v1560_v62  ;;  %v1575_v23 = vsel %vm1099_vm3, %v1427_v6, 0.0 }
 0x2ac   :  { %v13338_v27 = vsub.f32 %v18901_v2, %v1314_v20  ;;  %1576 = vadd.xlane.f32.xlu0 %v1575_v23  ;;  %v1252_v7 = vpop.xlane.xlu0 %1251  ;;  %v1578_v36 = vsel %vm1099_vm3, %v1428_v40, 0.0 }
 0x2ad   :  { %18900 = vst [vmem:[#allocation66_spill] sm:$0xff] %v13334_v50  ;;  %v1319_v47 = vmul.f32 0.1, %v1252_v7  ;;  %v1255_v13 = vpop.xlane.xlu1 %1254  ;;  %v1425_v15 = vmul.f32 %v13334_v50, %v13334_v50 }
 0x2ae   :  { %18902 = vst [vmem:[#allocation67_spill] sm:$0xff] %v13338_v27  ;;  %v1320_v33 = vmul.f32 0.1, %v1255_v13  ;;  %v1426_v1 = vmul.f32 %v13338_v27, %v13338_v27 }
 0x2af   :  { %v13346_v62 = vsub.f32 %v13015_v30, %v1319_v47  ;;  %1579 = vadd.xlane.f32.xlu1 %v1578_v36  ;;  %v1569_v6 = vsel %vm1099_vm3, %v1425_v15, 0.0 }
 0x2b0   :  { %v13350_v20 = vsub.f32 %v13021_v4, %v1320_v33  ;;  %1570 = vadd.xlane.f32.xlu0 %v1569_v6  ;;  %v1246_v23 = vpop.xlane.xlu0 %1245  ;;  %v1572_v32 = vsel %vm1099_vm3, %v1426_v1, 0.0  ;;  %v18906_v33 = vld [vmem:[#allocation56_spill] sm:$0xff] }
 0x2b1   :  { %18903 = vst [vmem:[#allocation68_spill] sm:$0xff] %v13346_v62  ;;  %v1317_v7 = vmul.f32 0.1, %v1246_v23  ;;  %v1249_v2 = vpop.xlane.xlu1 %1248  ;;  %v1431_v13 = vmul.f32 %v13346_v62, %v13346_v62 }
 0x2b2   :  { %18904 = vst [vmem:[#allocation69_spill] sm:$0xff] %v13350_v20  ;;  %v1318_v40 = vmul.f32 0.1, %v1249_v2  ;;  %v1432_v47 = vmul.f32 %v13350_v20, %v13350_v20 }
 0x2b3   :  { %v13358_v36 = vsub.f32 %v13018_v45, %v1317_v7  ;;  %1573 = vadd.xlane.f32.xlu1 %v1572_v32  ;;  %v1587_v15 = vsel %vm1099_vm3, %v1431_v13, 0.0 }
 0x2b4   :  { %v13362_v6 = vsub.f32 %v18906_v33, %v1318_v40  ;;  %1588 = vadd.xlane.f32.xlu0 %v1587_v15  ;;  %v1264_v23 = vpop.xlane.xlu0 %1263  ;;  %v1590_v62 = vsel %vm1099_vm3, %v1432_v47, 0.0  ;;  %v18909_v40 = vld [vmem:[#allocation59_spill] sm:$0xff] }
 0x2b5   :  { %18905 = vst [vmem:[#allocation70_spill] sm:$0xff] %v13358_v36  ;;  %v1323_v4 = vmul.f32 0.1, %v1264_v23  ;;  %v1267_v30 = vpop.xlane.xlu1 %1266  ;;  %v1429_v2 = vmul.f32 %v13358_v36, %v13358_v36 }
 0x2b6   :  { %18907 = vst [vmem:[#allocation71_spill] sm:$0xff] %v13362_v6  ;;  %v1324_v1 = vmul.f32 0.1, %v1267_v30  ;;  %v1430_v7 = vmul.f32 %v13362_v6, %v13362_v6 }
 0x2b7   :  { %v13370_v32 = vsub.f32 %v13035_v25, %v1323_v4  ;;  %1591 = vadd.xlane.f32.xlu1 %v1590_v62  ;;  %v1581_v13 = vsel %vm1099_vm3, %v1429_v2, 0.0  ;;  %v18911_v25 = vld [vmem:[#allocation58_spill] sm:$0xff] }
 0x2b8   :  { %v13374_v15 = vsub.f32 %v18909_v40, %v1324_v1  ;;  %1582 = vadd.xlane.f32.xlu0 %v1581_v13  ;;  %v1258_v23 = vpop.xlane.xlu0 %1257  ;;  %v1584_v36 = vsel %vm1099_vm3, %v1430_v7, 0.0 }
 0x2b9   :  { %18908 = vst [vmem:[#allocation72_spill] sm:$0xff] %v13370_v32  ;;  %v1321_v33 = vmul.f32 0.1, %v1258_v23  ;;  %v1261_v45 = vpop.xlane.xlu1 %1260  ;;  %v1435_v30 = vmul.f32 %v13370_v32, %v13370_v32 }
 0x2ba   :  { %18910 = vst [vmem:[#allocation73_spill] sm:$0xff] %v13374_v15  ;;  %v1322_v47 = vmul.f32 0.1, %v1261_v45  ;;  %v1436_v4 = vmul.f32 %v13374_v15, %v13374_v15 }
 0x2bb   :  { %v13382_v62 = vsub.f32 %v18911_v25, %v1321_v33  ;;  %1585 = vadd.xlane.f32.xlu1 %v1584_v36  ;;  %v1599_v2 = vsel %vm1099_vm3, %v1435_v30, 0.0 }
 0x2bc   :  { %v13386_v1 = vsub.f32 %v13046_v8, %v1322_v47  ;;  %1600 = vadd.xlane.f32.xlu0 %v1599_v2  ;;  %v1602_v45 = vsel %vm1099_vm3, %v1436_v4, 0.0 }
 0x2bd   :  { %18912 = vst [vmem:[#allocation74_spill] sm:$0xff] %v13382_v62  ;;  %v1433_v13 = vmul.f32 %v13382_v62, %v13382_v62 }
 0x2be   :  { %18913 = vst [vmem:[#allocation75_spill] sm:$0xff] %v13386_v1  ;;  %v1434_v7 = vmul.f32 %v13386_v1, %v13386_v1 }
 0x2bf   :  { %1603 = vadd.xlane.f32.xlu1 %v1602_v45  ;;  %v1593_v23 = vsel %vm1099_vm3, %v1433_v13, 0.0 }
 0x2c0   :  { %1594 = vadd.xlane.f32.xlu0 %v1593_v23  ;;  %v1596_v36 = vsel %vm1099_vm3, %v1434_v7, 0.0 }
 0x2c3   :  { %1597 = vadd.xlane.f32.xlu1 %v1596_v36 }
 0x2e0   :  { %v1445_v33 = vpop.xlane.xlu0 %1444 }
 0x2e1   :  { %v1607_v30 = vmul.f32 0.1, %v1445_v33 }
 0x2e3   :  { %v1663_v47 = vadd.f32 1e-05, %v1607_v30 }
 0x2e4   :  { %v1448_v40 = vpop.xlane.xlu1 %1447  ;;  %v1439_v2 = vpop.xlane.xlu0 %1438 }
 0x2e5   :  { %v1608_v8 = vmul.f32 0.1, %v1448_v40  ;;  %v1605_v25 = vmul.f32 0.1, %v1439_v2  ;;  %11684 = vrsqrt.f32 %v1663_v47 }
 0x2e7   :  { %v1664_v32 = vadd.f32 1e-05, %v1608_v8  ;;  %v1661_v4 = vadd.f32 1e-05, %v1605_v25 }
 0x2e8   :  { %v1442_v62 = vpop.xlane.xlu1 %1441 }
 0x2e9   :  { %11686 = vrsqrt.f32 %v1664_v32  ;;  %v1606_v1 = vmul.f32 0.1, %v1442_v62  ;;  %v1457_v45 = vpop.xlane.xlu0 %1456 }
 0x2ea   :  { %11688 = vrsqrt.f32 %v1661_v4  ;;  %v1611_v13 = vmul.f32 0.1, %v1457_v45  ;;  %v13399_v45 = vld [vmem:[%s18526_s2 + $0x71] ss:$0 sm:$0xff] }
 0x2eb   :  { %v1662_v23 = vadd.f32 1e-05, %v1606_v1 }
 0x2ec   :  { %v1667_v15 = vadd.f32 1e-05, %v1611_v13  ;;  %v1460_v7 = vpop.xlane.xlu1 %1459 }
 0x2ed   :  { %11690 = vrsqrt.f32 %v1662_v23  ;;  %v1612_v36 = vmul.f32 0.1, %v1460_v7  ;;  %v1451_v33 = vpop.xlane.xlu0 %1450 }
 0x2ee   :  { %v1609_v30 = vmul.f32 0.1, %v1451_v33  ;;  %11692 = vrsqrt.f32 %v1667_v15 }
 0x2ef   :  { %v1668_v6 = vadd.f32 1e-05, %v1612_v36  ;;  %v11685_v20 = vpop.eup %11684 }
 0x2f0   :  { %v1665_v40 = vadd.f32 1e-05, %v1609_v30  ;;  %v1454_v47 = vpop.xlane.xlu1 %1453  ;;  %v1775_v2 = vmul.f32 %v11685_v20, %v13055_v58 }
 0x2f1   :  { %11694 = vrsqrt.f32 %v1668_v6  ;;  %v1610_v8 = vmul.f32 0.1, %v1454_v47  ;;  %v1469_v25 = vpop.xlane.xlu0 %1468 }
 0x2f2   :  { %11696 = vrsqrt.f32 %v1665_v40  ;;  %v1615_v32 = vmul.f32 0.1, %v1469_v25  ;;  %v1835_v58 = vmul.f32 %v13399_v45, %v1775_v2  ;;  %v18914_v25 = vld [vmem:[#allocation61_spill] sm:$0xff] }
 0x2f3   :  { %v11687_v62 = vpop.eup %11686  ;;  %v1666_v1 = vadd.f32 1e-05, %v1610_v8 }
 0x2f4   :  { %v11689_v4 = vpop.eup %11688  ;;  %v1776_v13 = vmul.f32 %v11687_v62, %v13063_v35  ;;  %v1671_v15 = vadd.f32 1e-05, %v1615_v32  ;;  %v1472_v23 = vpop.xlane.xlu1 %1471  ;;  %v13408_v35 = vld [vmem:[%s18526_s2 + $0x72] ss:$0 sm:$0xff] }
 0x2f5   :  { %11698 = vrsqrt.f32 %v1666_v1  ;;  %v1616_v6 = vmul.f32 0.1, %v1472_v23  ;;  %v1463_v7 = vpop.xlane.xlu0 %1462  ;;  %v1773_v36 = vmul.f32 %v11689_v4, %v13058_v41 }
 0x2f6   :  { %11700 = vrsqrt.f32 %v1671_v15  ;;  %v1613_v33 = vmul.f32 0.1, %v1463_v7  ;;  %v1836_v20 = vmul.f32 %v13399_v45, %v1776_v13 }
 0x2f7   :  { %v11691_v30 = vpop.eup %11690  ;;  %v1672_v40 = vadd.f32 1e-05, %v1616_v6  ;;  %v1833_v62 = vmul.f32 %v13399_v45, %v1773_v36  ;;  %v1895_v6 = vadd.f32 %v13408_v35, %v1835_v58 }
 0x2f8   :  { %v1669_v47 = vadd.f32 1e-05, %v1613_v33  ;;  %v1466_v8 = vpop.xlane.xlu1 %1465  ;;  %v1774_v32 = vmul.f32 %v11691_v30, %v18914_v25  ;;  %v11693_v4 = vpop.eup %11692  ;;  %v1896_v7 = vadd.f32 %v13408_v35, %v1836_v20 }
 0x2f9   :  { %11702 = vrsqrt.f32 %v1672_v40  ;;  %v1614_v41 = vmul.f32 0.1, %v1466_v8  ;;  %v1481_v1 = vpop.xlane.xlu0 %1480  ;;  %v1893_v30 = vadd.f32 %v13408_v35, %v1833_v62 }
 0x2fa   :  { %11704 = vrsqrt.f32 %v1669_v47  ;;  %v1619_v2 = vmul.f32 0.1, %v1481_v1  ;;  %v1834_v13 = vmul.f32 %v13399_v45, %v1774_v32  ;;  %v1779_v32 = vmul.f32 %v11693_v4, %v13078_v51 }
 0x2fb   :  { %v11695_v15 = vpop.eup %11694  ;;  %v1670_v23 = vadd.f32 1e-05, %v1614_v41  ;;  %v1950_v3 = vpack.c.bf16 %v1896_v7, %v1895_v6 }
 0x2fc   :  { %v11697_v33 = vpop.eup %11696  ;;  %v1675_v27 = vadd.f32 1e-05, %v1619_v2  ;;  %v1484_v50 = vpop.xlane.xlu1 %1483  ;;  %v1894_v36 = vadd.f32 %v13408_v35, %v1834_v13  ;;  %v1780_v40 = vmul.f32 %v11695_v15, %v13081_v55  ;;  %v1839_v4 = vmul.f32 %v13399_v45, %v1779_v32 }
 0x2fd   :  { %11706 = vrsqrt.f32 %v1670_v23  ;;  %v1620_v47 = vmul.f32 0.1, %v1484_v50  ;;  %v1475_v8 = vpop.xlane.xlu0 %1474  ;;  %v1777_v25 = vmul.f32 %v11697_v33, %v13089_v11 }
 0x2fe   :  { %v1617_v41 = vmul.f32 0.1, %v1475_v8  ;;  %v1949_v58 = vpack.c.bf16 %v1894_v36, %v1893_v30  ;;  %v1840_v2 = vmul.f32 %v13399_v45, %v1780_v40  ;;  %11708 = vrsqrt.f32 %v1675_v27 }
 0x2ff   :  { %v11699_v1 = vpop.eup %11698  ;;  %v1676_v20 = vadd.f32 1e-05, %v1620_v47  ;;  %v1837_v50 = vmul.f32 %v13399_v45, %v1777_v25  ;;  %v1899_v32 = vadd.f32 %v13408_v35, %v1839_v4 }
 0x300   :  { %v11701_v57 = vpop.eup %11700  ;;  %v1673_v62 = vadd.f32 1e-05, %v1617_v41  ;;  %v1478_v13 = vpop.xlane.xlu1 %1477  ;;  %10842 = vmatprep.mubr.msk.bf16.mxu0 %vm1099_vm3, %v1949_v58  ;;  %v1778_v55 = vmul.f32 %v11699_v1, %v13093_v46  ;;  %v1900_v7 = vadd.f32 %v13408_v35, %v1840_v2 }
 0x301   :  { %11710 = vrsqrt.f32 %v1676_v20  ;;  %v1618_v11 = vmul.f32 0.1, %v1478_v13  ;;  %10843 = vmatmul.mubr.msk.bf16.vlgmr.msra.gmra.mrb[60].mxu0 %vm1099_vm3, %v1950_v3  ;;  %v1493_v51 = vpop.xlane.xlu0 %1492  ;;  %v1783_v33 = vmul.f32 %v11701_v57, %v13101_v56  ;;  %v1897_v40 = vadd.f32 %v13408_v35, %v1837_v50 }
 0x302   :  { %11712 = vrsqrt.f32 %v1673_v62  ;;  %v1623_v15 = vmul.f32 0.1, %v1493_v51  ;;  %v1838_v23 = vmul.f32 %v13399_v45, %v1778_v55  ;;  %v1952_v20 = vpack.c.bf16 %v1900_v7, %v1899_v32 }
 0x303   :  { %v11703_v27 = vpop.eup %11702  ;;  %v1674_v6 = vadd.f32 1e-05, %v1618_v11  ;;  %v1843_v2 = vmul.f32 %v13399_v45, %v1783_v33 }
 0x304   :  { %v11705_v46 = vpop.eup %11704  ;;  %v1679_v30 = vadd.f32 1e-05, %v1623_v15  ;;  %v1496_v36 = vpop.xlane.xlu1 %1495  ;;  %v1898_v3 = vadd.f32 %v13408_v35, %v1838_v23  ;;  %v1784_v47 = vmul.f32 %v11703_v27, %v13105_v38 }
 0x305   :  { %11714 = vrsqrt.f32 %v1674_v6  ;;  %v1624_v8 = vmul.f32 0.1, %v1496_v36  ;;  %v1487_v25 = vpop.xlane.xlu0 %1486  ;;  %v1781_v41 = vmul.f32 %v11705_v46, %v13113_v61  ;;  %v1903_v6 = vadd.f32 %v13408_v35, %v1843_v2 }
 0x306   :  { %11716 = vrsqrt.f32 %v1679_v30  ;;  %v1621_v58 = vmul.f32 0.1, %v1487_v25  ;;  %v1951_v1 = vpack.c.bf16 %v1898_v3, %v1897_v40  ;;  %v1844_v62 = vmul.f32 %v13399_v45, %v1784_v47 }
 0x307   :  { %v11707_v56 = vpop.eup %11706  ;;  %v1680_v57 = vadd.f32 1e-05, %v1624_v8  ;;  %v1841_v50 = vmul.f32 %v13399_v45, %v1781_v41 }
 0x308   :  { %v1677_v13 = vadd.f32 1e-05, %v1621_v58  ;;  %v1490_v55 = vpop.xlane.xlu1 %1489  ;;  %10846 = vmatprep.mubr.msk.bf16.mxu0 %vm1099_vm3, %v1951_v1  ;;  %v1782_v38 = vmul.f32 %v11707_v56, %v13117_v44  ;;  %v11709_v51 = vpop.eup %11708  ;;  %v1904_v7 = vadd.f32 %v13408_v35, %v1844_v62 }
 0x309   :  { %11718 = vrsqrt.f32 %v1680_v57  ;;  %v1622_v61 = vmul.f32 0.1, %v1490_v55  ;;  %10847 = vmatmul.mubr.msk.bf16.gmra.mrb[64].mxu0 %vm1099_vm3, %v1952_v20  ;;  %v1505_v11 = vpop.xlane.xlu0 %1504  ;;  %v1901_v30 = vadd.f32 %v13408_v35, %v1841_v50  ;;  %v1787_v25 = vmul.f32 %v11709_v51, %v13125_v0 }
 0x30a   :  { %11720 = vrsqrt.f32 %v1677_v13  ;;  %v1627_v4 = vmul.f32 0.1, %v1505_v11  ;;  %v1842_v15 = vmul.f32 %v13399_v45, %v1782_v38  ;;  %v1954_v56 = vpack.c.bf16 %v1904_v7, %v1903_v6 }
 0x30b   :  { %v11711_v23 = vpop.eup %11710  ;;  %v1678_v27 = vadd.f32 1e-05, %v1622_v61  ;;  %v1847_v55 = vmul.f32 %v13399_v45, %v1787_v25 }
 0x30c   :  { %v11713_v33 = vpop.eup %11712  ;;  %v1683_v44 = vadd.f32 1e-05, %v1627_v4  ;;  %v1508_v46 = vpop.xlane.xlu1 %1507  ;;  %v1902_v36 = vadd.f32 %v13408_v35, %v1842_v15  ;;  %v1788_v40 = vmul.f32 %v11711_v23, %v13129_v21 }
 0x30d   :  { %11722 = vrsqrt.f32 %v1678_v27  ;;  %v1628_v3 = vmul.f32 0.1, %v1508_v46  ;;  %v1499_v47 = vpop.xlane.xlu0 %1498  ;;  %v1785_v8 = vmul.f32 %v11713_v33, %v13137_v10  ;;  %v1907_v46 = vadd.f32 %v13408_v35, %v1847_v55 }
 0x30e   :  { %v1625_v32 = vmul.f32 0.1, %v1499_v47  ;;  %v1953_v41 = vpack.c.bf16 %v1902_v36, %v1901_v30  ;;  %v1848_v57 = vmul.f32 %v13399_v45, %v1788_v40  ;;  %11724 = vrsqrt.f32 %v1683_v44 }
 0x30f   :  { %v11715_v58 = vpop.eup %11714  ;;  %v1684_v1 = vadd.f32 1e-05, %v1628_v3  ;;  %v1845_v13 = vmul.f32 %v13399_v45, %v1785_v8 }
 0x310   :  { %v11717_v20 = vpop.eup %11716  ;;  %v1681_v2 = vadd.f32 1e-05, %v1625_v32  ;;  %v1502_v62 = vpop.xlane.xlu1 %1501  ;;  %10850 = vmatprep.mubr.msk.bf16.mxu0 %vm1099_vm3, %v1953_v41  ;;  %v1786_v21 = vmul.f32 %v11715_v58, %v13141_v54  ;;  %v1908_v51 = vadd.f32 %v13408_v35, %v1848_v57 }
 0x311   :  { %11726 = vrsqrt.f32 %v1684_v1  ;;  %v1626_v10 = vmul.f32 0.1, %v1502_v62  ;;  %10851 = vmatmul.mubr.msk.bf16.gmra.mrb[68].mxu0 %vm1099_vm3, %v1954_v56  ;;  %v1517_v0 = vpop.xlane.xlu0 %1516  ;;  %v1791_v4 = vmul.f32 %v11717_v20, %v13149_v12  ;;  %v1905_v27 = vadd.f32 %v13408_v35, %v1845_v13 }
 0x312   :  { %11728 = vrsqrt.f32 %v1681_v2  ;;  %v1631_v38 = vmul.f32 0.1, %v1517_v0  ;;  %v1846_v50 = vmul.f32 %v13399_v45, %v1786_v21  ;;  %v1956_v47 = vpack.c.bf16 %v1908_v51, %v1907_v46 }
 0x313   :  { %v11719_v61 = vpop.eup %11718  ;;  %v1682_v11 = vadd.f32 1e-05, %v1626_v10  ;;  %v1851_v8 = vmul.f32 %v13399_v45, %v1791_v4 }
 0x314   :  { %v11721_v54 = vpop.eup %11720  ;;  %v1687_v15 = vadd.f32 1e-05, %v1631_v38  ;;  %v1520_v23 = vpop.xlane.xlu1 %1519  ;;  %v1906_v6 = vadd.f32 %v13408_v35, %v1846_v50  ;;  %v1792_v7 = vmul.f32 %v11719_v61, %v13153_v18 }
 0x315   :  { %11730 = vrsqrt.f32 %v1682_v11  ;;  %v1632_v33 = vmul.f32 0.1, %v1520_v23  ;;  %v1511_v44 = vpop.xlane.xlu0 %1510  ;;  %v1789_v30 = vmul.f32 %v11721_v54, %v13161_v22  ;;  %v1911_v21 = vadd.f32 %v13408_v35, %v1851_v8 }
 0x316   :  { %11732 = vrsqrt.f32 %v1687_v15  ;;  %v1629_v36 = vmul.f32 0.1, %v1511_v44  ;;  %v1955_v40 = vpack.c.bf16 %v1906_v6, %v1905_v27  ;;  %v1852_v25 = vmul.f32 %v13399_v45, %v1792_v7 }
 0x317   :  { %v11723_v12 = vpop.eup %11722  ;;  %v1688_v3 = vadd.f32 1e-05, %v1632_v33  ;;  %v1849_v58 = vmul.f32 %v13399_v45, %v1789_v30 }
 0x318   :  { %v1685_v32 = vadd.f32 1e-05, %v1629_v36  ;;  %v1514_v41 = vpop.xlane.xlu1 %1513  ;;  %10854 = vmatprep.mubr.msk.bf16.mxu0 %vm1099_vm3, %v1955_v40  ;;  %v1790_v18 = vmul.f32 %v11723_v12, %v13165_v48  ;;  %v11725_v56 = vpop.eup %11724  ;;  %v1912_v13 = vadd.f32 %v13408_v35, %v1852_v25 }
 0x319   :  { %11734 = vrsqrt.f32 %v1688_v3  ;;  %v1630_v22 = vmul.f32 0.1, %v1514_v41  ;;  %10855 = vmatmul.mubr.msk.bf16.gmra.mrb[72].mxu0 %vm1099_vm3, %v1956_v47  ;;  %v1529_v1 = vpop.xlane.xlu0 %1528  ;;  %v1909_v55 = vadd.f32 %v13408_v35, %v1849_v58  ;;  %v1795_v4 = vmul.f32 %v11725_v56, %v13173_v24 }
 0x31a   :  { %11736 = vrsqrt.f32 %v1685_v32  ;;  %v1635_v57 = vmul.f32 0.1, %v1529_v1  ;;  %v1850_v20 = vmul.f32 %v13399_v45, %v1790_v18  ;;  %v1958_v6 = vpack.c.bf16 %v1912_v13, %v1911_v21 }
 0x31b   :  { %v11727_v2 = vpop.eup %11726  ;;  %v1686_v62 = vadd.f32 1e-05, %v1630_v22  ;;  %v1855_v40 = vmul.f32 %v13399_v45, %v1795_v4 }
 0x31c   :  { %v11729_v10 = vpop.eup %11728  ;;  %v1691_v48 = vadd.f32 1e-05, %v1635_v57  ;;  %v1532_v0 = vpop.xlane.xlu1 %1531  ;;  %v1910_v38 = vadd.f32 %v13408_v35, %v1850_v20  ;;  %v1796_v50 = vmul.f32 %v11727_v2, %v13177_v63  ;;  %v18915_v63 = vld [vmem:[#allocation62_spill] sm:$0xff] }
 0x31d   :  { %11738 = vrsqrt.f32 %v1686_v62  ;;  %v1636_v61 = vmul.f32 0.1, %v1532_v0  ;;  %v1523_v11 = vpop.xlane.xlu0 %1522  ;;  %v1793_v51 = vmul.f32 %v11729_v10, %v13185_v34  ;;  %v1915_v2 = vadd.f32 %v13408_v35, %v1855_v40 }
 0x31e   :  { %v1633_v54 = vmul.f32 0.1, %v1523_v11  ;;  %v1957_v15 = vpack.c.bf16 %v1910_v38, %v1909_v55  ;;  %v1856_v7 = vmul.f32 %v13399_v45, %v1796_v50  ;;  %11740 = vrsqrt.f32 %v1691_v48 }
 0x31f   :  { %v11731_v23 = vpop.eup %11730  ;;  %v1692_v27 = vadd.f32 1e-05, %v1636_v61  ;;  %v1853_v36 = vmul.f32 %v13399_v45, %v1793_v51 }
 0x320   :  { %v11733_v33 = vpop.eup %11732  ;;  %v1689_v44 = vadd.f32 1e-05, %v1633_v54  ;;  %v1526_v46 = vpop.xlane.xlu1 %1525  ;;  %10858 = vmatprep.mubr.msk.bf16.mxu0 %vm1099_vm3, %v1957_v15  ;;  %v1794_v30 = vmul.f32 %v11731_v23, %v18915_v63  ;;  %v1916_v25 = vadd.f32 %v13408_v35, %v1856_v7 }
 0x321   :  { %11742 = vrsqrt.f32 %v1692_v27  ;;  %v1634_v34 = vmul.f32 0.1, %v1526_v46  ;;  %10859 = vmatmul.mubr.msk.bf16.gmra.mrb[76].mxu0 %vm1099_vm3, %v1958_v6  ;;  %v1541_v24 = vpop.xlane.xlu0 %1540  ;;  %v1799_v32 = vmul.f32 %v11733_v33, %v13202_v43  ;;  %v1913_v22 = vadd.f32 %v13408_v35, %v1853_v36 }
 0x322   :  { %11744 = vrsqrt.f32 %v1689_v44  ;;  %v1639_v12 = vmul.f32 0.1, %v1541_v24  ;;  %v1854_v3 = vmul.f32 %v13399_v45, %v1794_v30  ;;  %v1960_v48 = vpack.c.bf16 %v1916_v25, %v1915_v2 }
 0x323   :  { %v11735_v47 = vpop.eup %11734  ;;  %v1690_v8 = vadd.f32 1e-05, %v1634_v34  ;;  %v1859_v0 = vmul.f32 %v13399_v45, %v1799_v32 }
 0x324   :  { %v11737_v41 = vpop.eup %11736  ;;  %v1695_v18 = vadd.f32 1e-05, %v1639_v12  ;;  %v1544_v58 = vpop.xlane.xlu1 %1543  ;;  %v1914_v1 = vadd.f32 %v13408_v35, %v1854_v3  ;;  %v1800_v56 = vmul.f32 %v11735_v47, %v13206_v26 }
 0x325   :  { %11746 = vrsqrt.f32 %v1690_v8  ;;  %v1640_v57 = vmul.f32 0.1, %v1544_v58  ;;  %v1535_v20 = vpop.xlane.xlu0 %1534  ;;  %v1797_v62 = vmul.f32 %v11737_v41, %v13214_v14  ;;  %v1919_v27 = vadd.f32 %v13408_v35, %v1859_v0 }
 0x326   :  { %11748 = vrsqrt.f32 %v1695_v18  ;;  %v1637_v21 = vmul.f32 0.1, %v1535_v20  ;;  %v1959_v13 = vpack.c.bf16 %v1914_v1, %v1913_v22  ;;  %v1860_v55 = vmul.f32 %v13399_v45, %v1800_v56 }
 0x327   :  { %v11739_v43 = vpop.eup %11738  ;;  %v1696_v10 = vadd.f32 1e-05, %v1640_v57  ;;  %v1857_v61 = vmul.f32 %v13399_v45, %v1797_v62 }
 0x328   :  { %v1693_v38 = vadd.f32 1e-05, %v1637_v21  ;;  %v1538_v50 = vpop.xlane.xlu1 %1537  ;;  %10862 = vmatprep.mubr.msk.bf16.mxu0 %vm1099_vm3, %v1959_v13  ;;  %v1798_v26 = vmul.f32 %v11739_v43, %v13218_v60  ;;  %v11741_v51 = vpop.eup %11740  ;;  %v1920_v6 = vadd.f32 %v13408_v35, %v1860_v55 }
 0x329   :  { %11750 = vrsqrt.f32 %v1696_v10  ;;  %v1638_v14 = vmul.f32 0.1, %v1538_v50  ;;  %10863 = vmatmul.mubr.msk.bf16.gmra.mrb[80].mxu0 %vm1099_vm3, %v1960_v48  ;;  %v1553_v11 = vpop.xlane.xlu0 %1552  ;;  %v1917_v44 = vadd.f32 %v13408_v35, %v1857_v61  ;;  %v1803_v24 = vmul.f32 %v11741_v51, %v13226_v42 }
 0x32a   :  { %11752 = vrsqrt.f32 %v1693_v38  ;;  %v1643_v4 = vmul.f32 0.1, %v1553_v11  ;;  %v1858_v54 = vmul.f32 %v13399_v45, %v1798_v26  ;;  %v1962_v8 = vpack.c.bf16 %v1920_v6, %v1919_v27 }
 0x32b   :  { %v11743_v15 = vpop.eup %11742  ;;  %v1694_v23 = vadd.f32 1e-05, %v1638_v14  ;;  %v1863_v22 = vmul.f32 %v13399_v45, %v1803_v24 }
 0x32c   :  { %v11745_v7 = vpop.eup %11744  ;;  %v1699_v60 = vadd.f32 1e-05, %v1643_v4  ;;  %v1556_v33 = vpop.xlane.xlu1 %1555  ;;  %v1918_v46 = vadd.f32 %v13408_v35, %v1858_v54  ;;  %v1804_v63 = vmul.f32 %v11743_v15, %v13230_v49 }
 0x32d   :  { %11754 = vrsqrt.f32 %v1694_v23  ;;  %v1644_v30 = vmul.f32 0.1, %v1556_v33  ;;  %v1547_v36 = vpop.xlane.xlu0 %1546  ;;  %v1801_v34 = vmul.f32 %v11745_v7, %v13238_v16  ;;  %v1923_v38 = vadd.f32 %v13408_v35, %v1863_v22 }
 0x32e   :  { %v1641_v40 = vmul.f32 0.1, %v1547_v36  ;;  %v1961_v12 = vpack.c.bf16 %v1918_v46, %v1917_v44  ;;  %v1864_v25 = vmul.f32 %v13399_v45, %v1804_v63  ;;  %11756 = vrsqrt.f32 %v1699_v60 }
 0x32f   :  { %v11747_v3 = vpop.eup %11746  ;;  %v1700_v47 = vadd.f32 1e-05, %v1644_v30  ;;  %v1861_v58 = vmul.f32 %v13399_v45, %v1801_v34 }
 0x330   :  { %v11749_v32 = vpop.eup %11748  ;;  %v1697_v41 = vadd.f32 1e-05, %v1641_v40  ;;  %v1550_v18 = vpop.xlane.xlu1 %1549  ;;  %10866 = vmatprep.mubr.msk.bf16.mxu0 %vm1099_vm3, %v1961_v12  ;;  %v1802_v49 = vmul.f32 %v11747_v3, %v13242_v37  ;;  %v1924_v2 = vadd.f32 %v13408_v35, %v1864_v25 }
 0x331   :  { %11758 = vrsqrt.f32 %v1700_v47  ;;  %v1642_v16 = vmul.f32 0.1, %v1550_v18  ;;  %10867 = vmatmul.mubr.msk.bf16.gmra.mrb[84].mxu0 %vm1099_vm3, %v1962_v8  ;;  %v1565_v42 = vpop.xlane.xlu0 %1564  ;;  %v1807_v62 = vmul.f32 %v11749_v32, %v13250_v9  ;;  %v1921_v43 = vadd.f32 %v13408_v35, %v1861_v58 }
 0x332   :  { %11760 = vrsqrt.f32 %v1697_v41  ;;  %v1647_v1 = vmul.f32 0.1, %v1565_v42  ;;  %v1862_v56 = vmul.f32 %v13399_v45, %v1802_v49  ;;  %v1964_v11 = vpack.c.bf16 %v1924_v2, %v1923_v38 }
 0x333   :  { %v11751_v57 = vpop.eup %11750  ;;  %v1698_v20 = vadd.f32 1e-05, %v1642_v16  ;;  %v1867_v51 = vmul.f32 %v13399_v45, %v1807_v62 }
 0x334   :  { %v11753_v37 = vpop.eup %11752  ;;  %v1703_v21 = vadd.f32 1e-05, %v1647_v1  ;;  %v1568_v13 = vpop.xlane.xlu1 %1567  ;;  %v1922_v10 = vadd.f32 %v13408_v35, %v1862_v56  ;;  %v1808_v48 = vmul.f32 %v11751_v57, %v13254_v17 }
 0x335   :  { %11762 = vrsqrt.f32 %v1698_v20  ;;  %v1648_v0 = vmul.f32 0.1, %v1568_v13  ;;  %v1559_v55 = vpop.xlane.xlu0 %1558  ;;  %v1805_v50 = vmul.f32 %v11753_v37, %v13262_v28  ;;  %v1927_v46 = vadd.f32 %v13408_v35, %v1867_v51 }
 0x336   :  { %11764 = vrsqrt.f32 %v1703_v21  ;;  %v1645_v26 = vmul.f32 0.1, %v1559_v55  ;;  %v1963_v61 = vpack.c.bf16 %v1922_v10, %v1921_v43  ;;  %v1868_v4 = vmul.f32 %v13399_v45, %v1808_v48 }
 0x337   :  { %v11755_v9 = vpop.eup %11754  ;;  %v1704_v14 = vadd.f32 1e-05, %v1648_v0  ;;  %v1865_v23 = vmul.f32 %v13399_v45, %v1805_v50 }
 0x338   :  { %v1701_v54 = vadd.f32 1e-05, %v1645_v26  ;;  %v1562_v15 = vpop.xlane.xlu1 %1561  ;;  %10870 = vmatprep.mubr.msk.bf16.mxu0 %vm1099_vm3, %v1963_v61  ;;  %v1806_v17 = vmul.f32 %v11755_v9, %v13266_v5  ;;  %v11757_v6 = vpop.eup %11756  ;;  %v1928_v63 = vadd.f32 %v13408_v35, %v1868_v4 }
 0x339   :  { %11766 = vrsqrt.f32 %v1704_v14  ;;  %v1646_v28 = vmul.f32 0.1, %v1562_v15  ;;  %10871 = vmatmul.mubr.msk.bf16.gmra.mrb[88].mxu0 %vm1099_vm3, %v1964_v11  ;;  %v1577_v27 = vpop.xlane.xlu0 %1576  ;;  %v1925_v34 = vadd.f32 %v13408_v35, %v1865_v23  ;;  %v1811_v8 = vmul.f32 %v11757_v6, %v13274_v31 }
 0x33a   :  { %11768 = vrsqrt.f32 %v1701_v54  ;;  %v1651_v7 = vmul.f32 0.1, %v1577_v27  ;;  %v1866_v60 = vmul.f32 %v13399_v45, %v1806_v17  ;;  %v1966_v49 = vpack.c.bf16 %v1928_v63, %v1927_v46 }
 0x33b   :  { %v11759_v33 = vpop.eup %11758  ;;  %v1702_v44 = vadd.f32 1e-05, %v1646_v28  ;;  %v1871_v56 = vmul.f32 %v13399_v45, %v1811_v8 }
 0x33c   :  { %v11761_v30 = vpop.eup %11760  ;;  %v1707_v5 = vadd.f32 1e-05, %v1651_v7  ;;  %v1580_v36 = vpop.xlane.xlu1 %1579  ;;  %v1926_v24 = vadd.f32 %v13408_v35, %v1866_v60  ;;  %v1812_v40 = vmul.f32 %v11759_v33, %v13278_v29 }
 0x33d   :  { %11770 = vrsqrt.f32 %v1702_v44  ;;  %v1652_v12 = vmul.f32 0.1, %v1580_v36  ;;  %v1571_v3 = vpop.xlane.xlu0 %1570  ;;  %v1809_v47 = vmul.f32 %v11761_v30, %v13286_v52  ;;  %v1931_v50 = vadd.f32 %v13408_v35, %v1871_v56 }
 0x33e   :  { %v1649_v25 = vmul.f32 0.1, %v1571_v3  ;;  %v1965_v32 = vpack.c.bf16 %v1926_v24, %v1925_v34  ;;  %v1872_v58 = vmul.f32 %v13399_v45, %v1812_v40  ;;  %11772 = vrsqrt.f32 %v1707_v5  ;;  %v18917_v24 = vld [vmem:[#allocation65_spill] sm:$0xff] }
 0x33f   :  { %v11763_v41 = vpop.eup %11762  ;;  %v1708_v18 = vadd.f32 1e-05, %v1652_v12  ;;  %v1869_v1 = vmul.f32 %v13399_v45, %v1809_v47  ;;  %v18918_v47 = vld [vmem:[#allocation66_spill] sm:$0xff] }
 0x340   :  { %v11765_v16 = vpop.eup %11764  ;;  %v1705_v42 = vadd.f32 1e-05, %v1649_v25  ;;  %v1574_v22 = vpop.xlane.xlu1 %1573  ;;  %10874 = vmatprep.mubr.msk.bf16.mxu0 %vm1099_vm3, %v1965_v32  ;;  %v1810_v29 = vmul.f32 %v11763_v41, %v13290_v39  ;;  %v1932_v37 = vadd.f32 %v13408_v35, %v1872_v58  ;;  %v18919_v25 = vld [vmem:[#allocation64_spill] sm:$0xff] }
 0x341   :  { %11774 = vrsqrt.f32 %v1708_v18  ;;  %v1650_v52 = vmul.f32 0.1, %v1574_v22  ;;  %10875 = vmatmul.mubr.msk.bf16.gmra.mrb[92].mxu0 %vm1099_vm3, %v1966_v49  ;;  %v1589_v31 = vpop.xlane.xlu0 %1588  ;;  %v1815_v21 = vmul.f32 %v11765_v16, %v13298_v59  ;;  %v1929_v10 = vadd.f32 %v13408_v35, %v1869_v1  ;;  %v18920_v1 = vld [vmem:[#allocation67_spill] sm:$0xff] }
 0x342   :  { %11776 = vrsqrt.f32 %v1705_v42  ;;  %v1655_v57 = vmul.f32 0.1, %v1589_v31  ;;  %v1870_v20 = vmul.f32 %v13399_v45, %v1810_v29  ;;  %v1968_v11 = vpack.c.bf16 %v1932_v37, %v1931_v50  ;;  %v18923_v50 = vld [vmem:[#allocation68_spill] sm:$0xff] }
 0x343   :  { %v11767_v2 = vpop.eup %11766  ;;  %v1706_v62 = vadd.f32 1e-05, %v1650_v52  ;;  %v1875_v51 = vmul.f32 %v13399_v45, %v1815_v21 }
 0x344   :  { %v11769_v39 = vpop.eup %11768  ;;  %v1711_v13 = vadd.f32 1e-05, %v1655_v57  ;;  %v1592_v43 = vpop.xlane.xlu1 %1591  ;;  %v1930_v48 = vadd.f32 %v13408_v35, %v1870_v20  ;;  %v1816_v0 = vmul.f32 %v11767_v2, %v13302_v53  ;;  %v18916_v53 = vld [vmem:[#allocation63_spill] sm:$0xff] }
 0x345   :  { %11778 = vrsqrt.f32 %v1706_v62  ;;  %v1656_v55 = vmul.f32 0.1, %v1592_v43  ;;  %v1583_v38 = vpop.xlane.xlu0 %1582  ;;  %v1813_v26 = vmul.f32 %v11769_v39, %v13310_v19  ;;  %v1935_v44 = vadd.f32 %v13408_v35, %v1875_v51 }
 0x346   :  { %v1653_v61 = vmul.f32 0.1, %v1583_v38  ;;  %v1967_v9 = vpack.c.bf16 %v1930_v48, %v1929_v10  ;;  %v1876_v4 = vmul.f32 %v13399_v45, %v1816_v0  ;;  %11780 = vrsqrt.f32 %v1711_v13  ;;  %v18921_v10 = vld [vmem:[#allocation69_spill] sm:$0xff] }
 0x347   :  { %v11771_v14 = vpop.eup %11770  ;;  %v1712_v59 = vadd.f32 1e-05, %v1656_v55  ;;  %v1873_v23 = vmul.f32 %v13399_v45, %v1813_v26  ;;  %v18922_v55 = vld [vmem:[#allocation70_spill] sm:$0xff] }
 0x348   :  { %v1709_v54 = vadd.f32 1e-05, %v1653_v61  ;;  %v1586_v15 = vpop.xlane.xlu1 %1585  ;;  %10878 = vmatprep.mubr.msk.bf16.mxu0 %vm1099_vm3, %v1967_v9  ;;  %v1814_v17 = vmul.f32 %v11771_v14, %v18916_v53  ;;  %v11773_v27 = vpop.eup %11772  ;;  %v1936_v46 = vadd.f32 %v13408_v35, %v1876_v4 }
 0x349   :  { %11782 = vrsqrt.f32 %v1712_v59  ;;  %v1654_v19 = vmul.f32 0.1, %v1586_v15  ;;  %10879 = vmatmul.mubr.msk.bf16.gmra.mrb[96].mxu0 %vm1099_vm3, %v1968_v11  ;;  %v1601_v28 = vpop.xlane.xlu0 %1600  ;;  %v1933_v36 = vadd.f32 %v13408_v35, %v1873_v23  ;;  %v1819_v32 = vmul.f32 %v11773_v27, %v18919_v25  ;;  %v18924_v11 = vld [vmem:[#allocation71_spill] sm:$0xff] }
 0x34a   :  { %11784 = vrsqrt.f32 %v1709_v54  ;;  %v1659_v6 = vmul.f32 0.1, %v1601_v28  ;;  %v1874_v7 = vmul.f32 %v13399_v45, %v1814_v17  ;;  %v1970_v16 = vpack.c.bf16 %v1936_v46, %v1935_v44  ;;  %v18927_v46 = vld [vmem:[#allocation72_spill] sm:$0xff] }
 0x34b   :  { %v11775_v60 = vpop.eup %11774  ;;  %v1710_v33 = vadd.f32 1e-05, %v1654_v19  ;;  %v1879_v57 = vmul.f32 %v13399_v45, %v1819_v32 }
 0x34c   :  { %v11777_v63 = vpop.eup %11776  ;;  %v1715_v30 = vadd.f32 1e-05, %v1659_v6  ;;  %v1604_v5 = vpop.xlane.xlu1 %1603  ;;  %v1934_v34 = vadd.f32 %v13408_v35, %v1874_v7  ;;  %v1820_v40 = vmul.f32 %v11775_v60, %v18917_v24  ;;  %v18925_v6 = vld [vmem:[#allocation73_spill] sm:$0xff]  ;;  %v18928_v24 = vld [vmem:[#allocation75_spill] sm:$0xff] }
 0x34d   :  { %11786 = vrsqrt.f32 %v1710_v33  ;;  %v1660_v12 = vmul.f32 0.1, %v1604_v5  ;;  %v1595_v3 = vpop.xlane.xlu0 %1594  ;;  %v1817_v8 = vmul.f32 %v11777_v63, %v18918_v47  ;;  %v1939_v0 = vadd.f32 %v13408_v35, %v1879_v57  ;;  %v18926_v33 = vld [vmem:[#allocation74_spill] sm:$0xff] }
 0x34e   :  { %v1657_v41 = vmul.f32 0.1, %v1595_v3  ;;  %v1969_v18 = vpack.c.bf16 %v1934_v34, %v1933_v36  ;;  %v1880_v42 = vmul.f32 %v13399_v45, %v1820_v40  ;;  %11788 = vrsqrt.f32 %v1715_v30 }
 0x34f   :  { %v11779_v49 = vpop.eup %11778  ;;  %v1716_v58 = vadd.f32 1e-05, %v1660_v12  ;;  %v1877_v31 = vmul.f32 %v13399_v45, %v1817_v8 }
 0x350   :  { %v1713_v22 = vadd.f32 1e-05, %v1657_v41  ;;  %v1598_v29 = vpop.xlane.xlu1 %1597  ;;  %10882 = vmatprep.mubr.msk.bf16.mxu0 %vm1099_vm3, %v1969_v18  ;;  %v1818_v52 = vmul.f32 %v11779_v49, %v18920_v1  ;;  %v11781_v20 = vpop.eup %11780  ;;  %v1940_v21 = vadd.f32 %v13408_v35, %v1880_v42 }
 0x351   :  { %11790 = vrsqrt.f32 %v1716_v58  ;;  %v1658_v56 = vmul.f32 0.1, %v1598_v29  ;;  %10883 = vmatmul.mubr.msk.bf16.gmra.mrb[100].mxu0 %vm1099_vm3, %v1970_v16  ;;  %v1937_v13 = vadd.f32 %v13408_v35, %v1877_v31  ;;  %v1823_v26 = vmul.f32 %v11781_v20, %v18923_v50 }
 0x352   :  { %11792 = vrsqrt.f32 %v1713_v22  ;;  %v1878_v2 = vmul.f32 %v13399_v45, %v1818_v52  ;;  %v1972_v14 = vpack.c.bf16 %v1940_v21, %v1939_v0 }
 0x353   :  { %v11783_v62 = vpop.eup %11782  ;;  %v1714_v37 = vadd.f32 1e-05, %v1658_v56  ;;  %v1883_v54 = vmul.f32 %v13399_v45, %v1823_v26 }
 0x354   :  { %v11785_v39 = vpop.eup %11784  ;;  %v1938_v43 = vadd.f32 %v13408_v35, %v1878_v2  ;;  %v1824_v48 = vmul.f32 %v11783_v62, %v18921_v10 }
 0x355   :  { %11794 = vrsqrt.f32 %v1714_v37  ;;  %v1821_v38 = vmul.f32 %v11785_v39, %v18922_v55  ;;  %v1943_v60 = vadd.f32 %v13408_v35, %v1883_v54 }
 0x356   :  { %v1971_v61 = vpack.c.bf16 %v1938_v43, %v1937_v13  ;;  %v1884_v59 = vmul.f32 %v13399_v45, %v1824_v48 }
 0x357   :  { %v11787_v9 = vpop.eup %11786  ;;  %v1881_v4 = vmul.f32 %v13399_v45, %v1821_v38 }
 0x358   :  { %10886 = vmatprep.mubr.msk.bf16.mxu0 %vm1099_vm3, %v1971_v61  ;;  %v1822_v51 = vmul.f32 %v11787_v9, %v18924_v11  ;;  %v11789_v15 = vpop.eup %11788  ;;  %v1944_v23 = vadd.f32 %v13408_v35, %v1884_v59 }
 0x359   :  { %10887 = vmatmul.mubr.msk.bf16.gmra.mrb[104].mxu0 %vm1099_vm3, %v1972_v14  ;;  %v1941_v28 = vadd.f32 %v13408_v35, %v1881_v4  ;;  %v1827_v63 = vmul.f32 %v11789_v15, %v18927_v46 }
 0x35a   :  { %v1882_v53 = vmul.f32 %v13399_v45, %v1822_v51  ;;  %v1974_v36 = vpack.c.bf16 %v1944_v23, %v1943_v60 }
 0x35b   :  { %v11791_v17 = vpop.eup %11790  ;;  %v1887_v3 = vmul.f32 %v13399_v45, %v1827_v63 }
 0x35c   :  { %v11793_v19 = vpop.eup %11792  ;;  %v1942_v27 = vadd.f32 %v13408_v35, %v1882_v53  ;;  %v1828_v7 = vmul.f32 %v11791_v17, %v18925_v6 }
 0x35d   :  { %v1825_v44 = vmul.f32 %v11793_v19, %v18926_v33  ;;  %v1947_v41 = vadd.f32 %v13408_v35, %v1887_v3 }
 0x35e   :  { %v1973_v30 = vpack.c.bf16 %v1942_v27, %v1941_v28  ;;  %v1888_v34 = vmul.f32 %v13399_v45, %v1828_v7 }
 0x35f   :  { %v11795_v5 = vpop.eup %11794  ;;  %v1885_v12 = vmul.f32 %v13399_v45, %v1825_v44 }
 0x360   :  { %10890 = vmatprep.mubr.msk.bf16.mxu0 %vm1099_vm3, %v1973_v30  ;;  %v1826_v40 = vmul.f32 %v11795_v5, %v18928_v24  ;;  %v1948_v8 = vadd.f32 %v13408_v35, %v1888_v34 }
 0x361   :  { %10891 = vmatmul.mubr.msk.bf16.gmra.mrb[108].mxu0 %vm1099_vm3, %v1974_v36  ;;  %v1945_v25 = vadd.f32 %v13408_v35, %v1885_v12 }
 0x362   :  { %v1886_v47 = vmul.f32 %v13399_v45, %v1826_v40  ;;  %v1976_v49 = vpack.c.bf16 %v1948_v8, %v1947_v41 }
 0x364   :  { %v1946_v32 = vadd.f32 %v13408_v35, %v1886_v47 }
 0x366   :  { %v1975_v18 = vpack.c.bf16 %v1946_v32, %v1945_v25 }
 0x368   :  { %10894 = vmatprep.mubr.msk.bf16.mxu0 %vm1099_vm3, %v1975_v18 }
 0x369   :  { %10895 = vmatmul.mubr.msk.bf16.gmra.mrb[112].mxu0 %vm1099_vm3, %v1976_v49 }
 0x3d4   :  { %v10844_v58 = vpop.f32.mrb[60].mxu0 }
 0x3d5   :  { %v2103_v16 = vpop.f32.mrb[61].mxu0 }
 0x3d6   :  { %v10845_v42 = vpop.f32.mrb[62].mxu0 }
 0x3d7   :  { %v13601_v22 = vpack.c.bf16 %v10845_v42, %v10844_v58  ;;  %v2106_v45 = vpop.f32.mrb[63].mxu0 }
 0x3d8   :  { %v2326_v29 = vpack.c.bf16 %v2106_v45, %v2103_v16 }
 0x3d9   :  { %2364 = vrot.lane.b32.xlu1 %v13601_v22, %s12503_s12  ;;  %v5482_v20 = vrot.slane %v13601_v22, 4 }
 0x3da   :  { %2362 = vrot.lane.b32.xlu0 %v2326_v29, %s12503_s12  ;;  %10906 = vmatprep.mubr.msk.bf16.mxu1 %vm2370_vm4, %v2326_v29  ;;  %v5481_v57 = vrot.slane %v2326_v29, 4 }
 0x3dc   :  { %v10848_v35 = vpop.f32.mrb[64].mxu0  ;;  %v5483_v37 = vsel %vm346_vm0, %v5481_v57, %v5482_v20 }
 0x3dd   :  { %3818 = vrot.lane.b32.xlu1 %v13601_v22, %s12504_s13  ;;  %v2119_v1 = vpop.f32.mrb[65].mxu0  ;;  %v13622_v43 = vpack.c.bf16 %v10848_v35, %v10848_v35 }
 0x3de   :  { %3808 = vrot.lane.b32.xlu0 %v2326_v29, %s12505_s14  ;;  %v10849_v52 = vpop.f32.mrb[66].mxu0 }
 0x3df   :  { %v2122_v31 = vpop.f32.mrb[67].mxu0  ;;  %v5486_v15 = vrot.slane %v13622_v43, 4 }
 0x3e0   :  { %v13610_v56 = vpack.c.bf16 %v2122_v31, %v2119_v1 }
 0x3e1   :  { %3810 = vrot.lane.b32.xlu1 %v13601_v22, %s12505_s14 }
 0x3e2   :  { %5618 = vrot.lane.b32.xlu0 %v2326_v29, %s12506_s15  ;;  %v5484_v14 = vrot.slane %v13610_v56, 4 }
 0x3e4   :  { %v10852_v2 = vpop.f32.mrb[68].mxu0  ;;  %v5485_v54 = vsel %vm346_vm0, %v5482_v20, %v5484_v14  ;;  %v5487_v17 = vsel %vm346_vm0, %v5484_v14, %v5486_v15 }
 0x3e5   :  { %5620 = vrot.lane.b32.xlu1 %v13601_v22, %s12506_s15  ;;  %v2135_v62 = vpop.f32.mrb[69].mxu0 }
 0x3e6   :  { %v13619_v21 = vpack.c.bf16 %v2135_v62, %v10849_v52  ;;  %5539 = vrot.lane.b32.xlu0 %v5483_v37, %s12503_s12  ;;  %v10853_v39 = vpop.f32.mrb[70].mxu0 }
 0x3e7   :  { %v2138_v13 = vpop.f32.mrb[71].mxu0 }
 0x3e8   :  { %v13624_v10 = vpack.c.bf16 %v10852_v2, %v2138_v13  ;;  %v5488_v7 = vrot.slane %v13619_v21, 4 }
 0x3e9   :  { %3816 = vrot.lane.b32.xlu1 %v2326_v29, %s12504_s13 }
 0x3ea   :  { %3822 = vrot.lane.b32.xlu0 %v13622_v43, %s12504_s13  ;;  %v5489_v12 = vrot.slane %v13624_v10, 4 }
 0x3ec   :  { %v10856_v48 = vpop.f32.mrb[72].mxu0  ;;  %v5490_v47 = vsel %vm346_vm0, %v5488_v7, %v5489_v12 }
 0x3ed   :  { %5537 = vrot.lane.b32.xlu1 %v5481_v57, %s12503_s12  ;;  %v2151_v0 = vpop.f32.mrb[73].mxu0 }
 0x3ee   :  { %v13630_v55 = vpack.c.bf16 %v2151_v0, %v10853_v39  ;;  %3820 = vrot.lane.b32.xlu0 %v13610_v56, %s12504_s13  ;;  %v10857_v38 = vpop.f32.mrb[74].mxu0 }
 0x3ef   :  { %v13634_v50 = vpack.c.bf16 %v10857_v38, %v10856_v48  ;;  %v13636_v26 = vpop.f32.mrb[75].mxu0 }
 0x3f0   :  { %v13717_v45 = vpack.c.bf16 %v13636_v26, %v13636_v26  ;;  %v5491_v37 = vrot.slane %v13630_v55, 4 }
 0x3f1   :  { %2368 = vrot.lane.b32.xlu1 %v13622_v43, %s12503_s12  ;;  %v5495_v1 = vrot.slane %v13634_v50, 4 }
 0x3f2   :  { %3812 = vrot.lane.b32.xlu0 %v13610_v56, %s12505_s14  ;;  %v5493_v31 = vrot.slane %v13717_v45, 4  ;;  %v5492_v48 = vsel %vm346_vm0, %v5489_v12, %v5491_v37 }
 0x3f4   :  { %v10860_v61 = vpop.f32.mrb[76].mxu0  ;;  %v5494_v39 = vsel %vm346_vm0, %v5491_v37, %v5493_v31 }
 0x3f5   :  { %3814 = vrot.lane.b32.xlu1 %v13622_v43, %s12505_s14  ;;  %v2167_v9 = vpop.f32.mrb[77].mxu0 }
 0x3f6   :  { %5622 = vrot.lane.b32.xlu0 %v13610_v56, %s12506_s15  ;;  %v10861_v59 = vpop.f32.mrb[78].mxu0 }
 0x3f7   :  { %v13647_v11 = vpack.c.bf16 %v10861_v59, %v10860_v61  ;;  %v2170_v51 = vpop.f32.mrb[79].mxu0 }
 0x3f8   :  { %v13649_v4 = vpack.c.bf16 %v2170_v51, %v2167_v9 }
 0x3f9   :  { %2366 = vrot.lane.b32.xlu1 %v13610_v56, %s12503_s12 }
 0x3fa   :  { %5541 = vrot.lane.b32.xlu0 %v5485_v54, %s12503_s12  ;;  %v5496_v51 = vrot.slane %v13649_v4, 4  ;;  %v5498_v54 = vrot.slane %v13647_v11, 4 }
 0x3fc   :  { %v10864_v53 = vpop.f32.mrb[80].mxu0 }
 0x3fd   :  { %5543 = vrot.lane.b32.xlu1 %v5487_v17, %s12503_s12  ;;  %v13658_v23 = vpop.f32.mrb[81].mxu0 }
 0x3fe   :  { %2463 = vrot.lane.b32.xlu0 %v13619_v21, %s12503_s12  ;;  %v10865_v19 = vpop.f32.mrb[82].mxu0 }
 0x3ff   :  { %v2186_v28 = vpop.f32.mrb[83].mxu0 }
 0x400   :  { %v13662_v27 = vpack.c.bf16 %v10864_v53, %v2186_v28  ;;  %v13769_v28 = vpack.c.bf16 %v13658_v23, %v13658_v23  ;;  %v5497_v23 = vsel %vm346_vm0, %v5495_v1, %v5496_v51 }
 0x401   :  { %3920 = vrot.lane.b32.xlu1 %v13619_v21, %s12504_s13 }
 0x402   :  { %3912 = vrot.lane.b32.xlu0 %v13619_v21, %s12505_s14  ;;  %v5502_v12 = vrot.slane %v13662_v27, 4 }
 0x404   :  { %v10868_v6 = vpop.f32.mrb[84].mxu0 }
 0x405   :  { %5713 = vrot.lane.b32.xlu1 %v13619_v21, %s12506_s15  ;;  %v2199_v60 = vpop.f32.mrb[85].mxu0 }
 0x406   :  { %v13671_v33 = vpack.c.bf16 %v2199_v60, %v10865_v19  ;;  %5545 = vrot.lane.b32.xlu0 %v5488_v7, %s12503_s12  ;;  %v13674_v44 = vpop.f32.mrb[86].mxu0  ;;  %v5499_v19 = vsel %vm346_vm0, %v5496_v51, %v5498_v54 }
 0x407   :  { %v2202_v46 = vpop.f32.mrb[87].mxu0 }
 0x408   :  { %v13676_v63 = vpack.c.bf16 %v10868_v6, %v2202_v46 }
 0x409   :  { %2465 = vrot.lane.b32.xlu1 %v13624_v10, %s12503_s12 }
 0x40a   :  { %18929 = vst [vmem:[#allocation61_spill] sm:$0xff] %v13676_v63  ;;  %5715 = vrot.lane.b32.xlu0 %v13624_v10, %s12506_s15 }
 0x40c   :  { %v10872_v30 = vpop.f32.mrb[88].mxu0 }
 0x40d   :  { %3922 = vrot.lane.b32.xlu1 %v13624_v10, %s12504_s13  ;;  %v2215_v5 = vpop.f32.mrb[89].mxu0 }
 0x40e   :  { %2467 = vrot.lane.b32.xlu0 %v13630_v55, %s12503_s12  ;;  %v10873_v36 = vpop.f32.mrb[90].mxu0 }
 0x40f   :  { %v13686_v34 = vpack.c.bf16 %v10873_v36, %v10872_v30  ;;  %v2218_v24 = vpop.f32.mrb[91].mxu0 }
 0x410   :  { %v13688_v40 = vpack.c.bf16 %v2218_v24, %v2215_v5 }
 0x411   :  { %18930 = vst [vmem:[#allocation62_spill] sm:$0xff] %v13686_v34  ;;  %3914 = vrot.lane.b32.xlu1 %v13624_v10, %s12505_s14 }
 0x412   :  { %18931 = vst [vmem:[#allocation63_spill] sm:$0xff] %v13688_v40  ;;  %2563 = vrot.lane.b32.xlu0 %v13634_v50, %s12503_s12  ;;  %10970 = vmatprep.mubr.msk.bf16.mxu0 %vm2370_vm4, %v13688_v40 }
 0x414   :  { %v13697_v3 = vpop.f32.mrb[92].mxu0 }
 0x415   :  { %5547 = vrot.lane.b32.xlu1 %v5490_v47, %s12503_s12  ;;  %v2231_v8 = vpop.f32.mrb[93].mxu0 }
 0x416   :  { %4024 = vrot.lane.b32.xlu0 %v13634_v50, %s12504_s13  ;;  %v10877_v25 = vpop.f32.mrb[94].mxu0 }
 0x417   :  { %v2234_v32 = vpop.f32.mrb[95].mxu0 }
 0x418   :  { %v13703_v41 = vpack.c.bf16 %v2234_v32, %v2231_v8  ;;  %v5500_v32 = vrot.slane %v13769_v28, 4 }
 0x419   :  { %3924 = vrot.lane.b32.xlu1 %v13630_v55, %s12504_s13 }
 0x41a   :  { %18932 = vst [vmem:[#allocation65_spill] sm:$0xff] %v13703_v41  ;;  %4016 = vrot.lane.b32.xlu0 %v13634_v50, %s12505_s14 }
 0x41c   :  { %v10880_v18 = vpop.f32.mrb[96].mxu0 }
 0x41d   :  { %3916 = vrot.lane.b32.xlu1 %v13630_v55, %s12505_s14  ;;  %v2247_v49 = vpop.f32.mrb[97].mxu0 }
 0x41e   :  { %v13711_v58 = vpack.c.bf16 %v2247_v49, %v10877_v25  ;;  %5807 = vrot.lane.b32.xlu0 %v13634_v50, %s12506_s15  ;;  %v10881_v16 = vpop.f32.mrb[98].mxu0  ;;  %v13813_v49 = vpack.c.bf16 %v13674_v44, %v13674_v44 }
 0x41f   :  { %v2250_v42 = vpop.f32.mrb[99].mxu0 }
 0x420   :  { %18933 = vst [vmem:[#allocation66_spill] sm:$0xff] %v13711_v58  ;;  %v13719_v29 = vpack.c.bf16 %v10880_v18, %v2250_v42  ;;  %18942 = vst [vmem:[#allocation72_spill] sm:$0xff] %v13813_v49  ;;  %v5501_v42 = vsel %vm346_vm0, %v5498_v54, %v5500_v32 }
 0x421   :  { %5717 = vrot.lane.b32.xlu1 %v13630_v55, %s12506_s15 }
 0x422   :  { %18934 = vst [vmem:[#allocation64_spill] sm:$0xff] %v13719_v29  ;;  %3926 = vrot.lane.b32.xlu0 %v13717_v45, %s12504_s13 }
 0x424   :  { %v10884_v35 = vpop.f32.mrb[100].mxu0 }
 0x425   :  { %2469 = vrot.lane.b32.xlu1 %v13717_v45, %s12503_s12  ;;  %v2263_v52 = vpop.f32.mrb[101].mxu0 }
 0x426   :  { %v13729_v57 = vpack.c.bf16 %v2263_v52, %v10881_v16  ;;  %5553 = vrot.lane.b32.xlu0 %v5495_v1, %s12503_s12  ;;  %v10885_v20 = vpop.f32.mrb[102].mxu0 }
 0x427   :  { %v13732_v2 = vpack.c.bf16 %v10885_v20, %v10884_v35  ;;  %v13734_v62 = vpop.f32.mrb[103].mxu0 }
 0x428   :  { %18935 = vst [vmem:[#allocation67_spill] sm:$0xff] %v13729_v57 }
 0x429   :  { %18936 = vst [vmem:[#allocation69_spill] sm:$0xff] %v13732_v2  ;;  %3918 = vrot.lane.b32.xlu1 %v13717_v45, %s12505_s14 }
 0x42a   :  { %5551 = vrot.lane.b32.xlu0 %v5494_v39, %s12503_s12  ;;  %v5505_v39 = vrot.slane %v13676_v63, 4 }
 0x42c   :  { %v10888_v13 = vpop.f32.mrb[104].mxu0 }
 0x42d   :  { %5549 = vrot.lane.b32.xlu1 %v5492_v48, %s12503_s12  ;;  %v2279_v0 = vpop.f32.mrb[105].mxu0  ;;  %v5503_v48 = vrot.slane %v13671_v33, 4 }
 0x42e   :  { %2567 = vrot.lane.b32.xlu0 %v13647_v11, %s12503_s12  ;;  %v10889_v38 = vpop.f32.mrb[106].mxu0 }
 0x42f   :  { %v13745_v26 = vpack.c.bf16 %v10889_v38, %v10888_v13  ;;  %v2282_v61 = vpop.f32.mrb[107].mxu0  ;;  %v5506_v38 = vsel %vm346_vm0, %v5503_v48, %v5505_v39 }
 0x430   :  { %v13747_v9 = vpack.c.bf16 %v2282_v61, %v2279_v0 }
 0x431   :  { %18937 = vst [vmem:[#allocation70_spill] sm:$0xff] %v13745_v26  ;;  %4028 = vrot.lane.b32.xlu1 %v13647_v11, %s12504_s13 }
 0x432   :  { %18938 = vst [vmem:[#allocation68_spill] sm:$0xff] %v13747_v9  ;;  %4020 = vrot.lane.b32.xlu0 %v13647_v11, %s12505_s14 }
 0x434   :  { %v10892_v14 = vpop.f32.mrb[108].mxu0 }
 0x435   :  { %5811 = vrot.lane.b32.xlu1 %v13647_v11, %s12506_s15  ;;  %v13755_v59 = vpop.f32.mrb[109].mxu0 }
 0x436   :  { %4018 = vrot.lane.b32.xlu0 %v13649_v4, %s12505_s14  ;;  %v10893_v15 = vpop.f32.mrb[110].mxu0 }
 0x437   :  { %v2298_v53 = vpop.f32.mrb[111].mxu0 }
 0x438   :  { %v13761_v17 = vpack.c.bf16 %v10892_v14, %v2298_v53 }
 0x439   :  { %2565 = vrot.lane.b32.xlu1 %v13649_v4, %s12503_s12 }
 0x43a   :  { %18939 = vst [vmem:[#allocation71_spill] sm:$0xff] %v13761_v17  ;;  %5557 = vrot.lane.b32.xlu0 %v5499_v19, %s12503_s12  ;;  %v5507_v19 = vrot.slane %v13813_v49, 4 }
 0x43c   :  { %v10896_v6 = vpop.f32.mrb[112].mxu0 }
 0x43d   :  { %4026 = vrot.lane.b32.xlu1 %v13649_v4, %s12504_s13  ;;  %v2311_v7 = vpop.f32.mrb[113].mxu0 }
 0x43e   :  { %v13773_v60 = vpack.c.bf16 %v2311_v7, %v10893_v15  ;;  %4030 = vrot.lane.b32.xlu0 %v13769_v28, %s12504_s13  ;;  %v13777_v46 = vpop.f32.mrb[114].mxu0  ;;  %v5504_v15 = vsel %vm346_vm0, %v5502_v12, %v5503_v48 }
 0x43f   :  { %v2314_v30 = vpop.f32.mrb[115].mxu0 }
 0x440   :  { %18940 = vst [vmem:[#allocation73_spill] sm:$0xff] %v13773_v60  ;;  %v13779_v5 = vpack.c.bf16 %v10896_v6, %v2314_v30  ;;  %v5508_v30 = vsel %vm346_vm0, %v5505_v39, %v5507_v19 }
 0x441   :  { %5809 = vrot.lane.b32.xlu1 %v13649_v4, %s12506_s15 }
 0x442   :  { %18941 = vst [vmem:[#allocation74_spill] sm:$0xff] %v13779_v5  ;;  %2663 = vrot.lane.b32.xlu0 %v13662_v27, %s12503_s12 }
 0x445   :  { %5555 = vrot.lane.b32.xlu1 %v5497_v23, %s12503_s12  ;;  %v5509_v23 = vrot.slane %v13688_v40, 4 }
 0x446   :  { %4128 = vrot.lane.b32.xlu0 %v13662_v27, %s12504_s13 }
 0x449   :  { %2569 = vrot.lane.b32.xlu1 %v13769_v28, %s12503_s12 }
 0x44a   :  { %4120 = vrot.lane.b32.xlu0 %v13662_v27, %s12505_s14 }
 0x44b   :  { %v2365_v36 = vpop.permute.xlu1 %2364 }
 0x44c   :  { %v2363_v24 = vpop.permute.xlu0 %2362  ;;  %v2387_v35 = vsel %vm2370_vm4, %v2365_v36, 0 }
 0x44d   :  { %4022 = vrot.lane.b32.xlu1 %v13769_v28, %s12505_s14  ;;  %11569 = vmatprep.subr.msk.bf16.mxu1 %vm2370_vm4, %v2363_v24  ;;  %v2384_v47 = vsel %vm2370_vm4, %v2363_v24, 0  ;;  %v13882_v24 = vpack.c.bf16 %v13697_v3, %v13697_v3 }
 0x44e   :  { %5561 = vrot.lane.b32.xlu0 %v5502_v12, %s12503_s12  ;;  %10899 = vmatpush3.bf16.xpose.msra.mxu1 %v2384_v47 }
 0x44f   :  { %v13799_v8 = vpop.permute.xlu1 %3818  ;;  %11570 = vmatprep.subr.msk.bf16.mxu1 %vm2370_vm4, %v2365_v36  ;;  %18946 = vst [vmem:[#allocation78_spill] sm:$0xff] %v13882_v24 }
 0x450   :  { %v13802_v25 = vpop.permute.xlu0 %3808 }
 0x451   :  { %5901 = vrot.lane.b32.xlu1 %v13662_v27, %s12506_s15 }
 0x452   :  { %5903 = vrot.lane.b32.xlu0 %v13671_v33, %s12506_s15 }
 0x453   :  { %v13809_v18 = vpop.permute.xlu1 %3810 }
 0x454   :  { %v13815_v16 = vpop.permute.xlu0 %5618 }
 0x455   :  { %18943 = vst [vmem:[#allocation75_spill] sm:$0xff] %v13815_v16  ;;  %5559 = vrot.lane.b32.xlu1 %v5501_v42, %s12503_s12 }
 0x456   :  { %2669 = vrot.lane.b32.xlu0 %v13813_v49, %s12503_s12  ;;  %10901 = vmatpush3.bf16.xpose.msra.mxu1 %v2387_v35 }
 0x457   :  { %v13822_v1 = vpop.permute.xlu1 %5620 }
 0x458   :  { %18944 = vst [vmem:[#allocation76_spill] sm:$0xff] %v13822_v1  ;;  %v13824_v52 = vpop.permute.xlu0 %5539 }
 0x459   :  { %2665 = vrot.lane.b32.xlu1 %v13671_v33, %s12503_s12 }
 0x45a   :  { %4134 = vrot.lane.b32.xlu0 %v13813_v49, %s12504_s13 }
 0x45b   :  { %v13830_v44 = vpop.permute.xlu1 %3816 }
 0x45c   :  { %v13832_v31 = vpop.permute.xlu0 %3822 }
 0x45d   :  { %4130 = vrot.lane.b32.xlu1 %v13671_v33, %s12504_s13 }
 0x45e   :  { %2667 = vrot.lane.b32.xlu0 %v13676_v63, %s12503_s12 }
 0x45f   :  { %v13838_v20 = vpop.permute.xlu1 %5537 }
 0x460   :  { %v13840_v37 = vpop.permute.xlu0 %3820 }
 0x461   :  { %4122 = vrot.lane.b32.xlu1 %v13671_v33, %s12505_s14 }
 0x462   :  { %4124 = vrot.lane.b32.xlu0 %v13676_v63, %s12505_s14 }
 0x463   :  { %v2369_v13 = vpop.permute.xlu1 %2368 }
 0x464   :  { %v13848_v0 = vpop.permute.xlu0 %3812  ;;  %v2393_v47 = vsel %vm2370_vm4, %v2369_v13, 0 }
 0x465   :  { %4126 = vrot.lane.b32.xlu1 %v13813_v49, %s12505_s14 }
 0x466   :  { %5565 = vrot.lane.b32.xlu0 %v5506_v38, %s12503_s12 }
 0x467   :  { %v13854_v61 = vpop.permute.xlu1 %3814 }
 0x468   :  { %v13856_v14 = vpop.permute.xlu0 %5622 }
 0x469   :  { %18945 = vst [vmem:[#allocation77_spill] sm:$0xff] %v13856_v14  ;;  %4132 = vrot.lane.b32.xlu1 %v13676_v63, %s12504_s13 }
 0x46a   :  { %4232 = vrot.lane.b32.xlu0 %v13688_v40, %s12504_s13 }
 0x46b   :  { %v2367_v51 = vpop.permute.xlu1 %2366 }
 0x46c   :  { %11571 = vmatprep.subr.msk.bf16.mxu1 %vm2370_vm4, %v2367_v51  ;;  %v13863_v54 = vpop.permute.xlu0 %5541  ;;  %v2390_v53 = vsel %vm2370_vm4, %v2367_v51, 0 }
 0x46d   :  { %5563 = vrot.lane.b32.xlu1 %v5504_v15, %s12503_s12  ;;  %10903 = vmatpush3.bf16.xpose.msra.mxu1 %v2390_v53 }
 0x46e   :  { %4224 = vrot.lane.b32.xlu0 %v13688_v40, %s12505_s14  ;;  %11572 = vmatprep.subr.msk.bf16.mxu1 %vm2370_vm4, %v2369_v13 }
 0x46f   :  { %v13872_v6 = vpop.permute.xlu1 %5543 }
 0x470   :  { %v2464_v7 = vpop.permute.xlu0 %2463 }
 0x471   :  { %5567 = vrot.lane.b32.xlu1 %v5508_v30, %s12503_s12  ;;  %v2484_v39 = vsel %vm2370_vm4, %v2464_v7, 0 }
 0x472   :  { %5569 = vrot.lane.b32.xlu0 %v5509_v23, %s12503_s12 }
 0x473   :  { %v13878_v36 = vpop.permute.xlu1 %3920 }
 0x474   :  { %v13884_v12 = vpop.permute.xlu0 %3912 }
 0x475   :  { %2765 = vrot.lane.b32.xlu1 %v13686_v34, %s12503_s12  ;;  %10905 = vmatpush3.bf16.xpose.msra.mxu1 %v2393_v47 }
 0x476   :  { %2769 = vrot.lane.b32.xlu0 %v13882_v24, %s12503_s12  ;;  %11573 = vmatprep.subr.msk.bf16.mxu1 %vm2370_vm4, %v2464_v7 }
 0x477   :  { %v13892_v32 = vpop.permute.xlu1 %5713 }
 0x478   :  { %18947 = vst [vmem:[#allocation79_spill] sm:$0xff] %v13892_v32  ;;  %v13894_v42 = vpop.permute.xlu0 %5545  ;;  %v5517_v32 = vrot.slane %v13719_v29, 4 }
 0x479   :  { %4234 = vrot.lane.b32.xlu1 %v13686_v34, %s12504_s13 }
 0x47a   :  { %4238 = vrot.lane.b32.xlu0 %v13882_v24, %s12504_s13 }
 0x47b   :  { %v2466_v3 = vpop.permute.xlu1 %2465 }
 0x47c   :  { %10907 = vmatmul.mubr.msk.bf16.vlgmr.msra.gmra.mrb[52].mxu1 %vm2370_vm4, %v13601_v22  ;;  %v13902_v35 = vpop.permute.xlu0 %5715  ;;  %v5510_v22 = vrot.slane %v13686_v34, 4  ;;  %v2487_v15 = vsel %vm2370_vm4, %v2466_v3, 0 }
 0x47d   :  { %18948 = vst [vmem:[#allocation80_spill] sm:$0xff] %v13902_v35  ;;  %4226 = vrot.lane.b32.xlu1 %v13686_v34, %s12505_s14  ;;  %10910 = vmatprep.mubr.msk.bf16.mxu1 %vm2370_vm4, %v13610_v56 }
 0x47e   :  { %10915 = vmatpush3.bf16.xpose.msra.mxu1 %v2484_v39  ;;  %2767 = vrot.lane.b32.xlu0 %v13703_v41, %s12503_s12  ;;  %v5511_v51 = vsel %vm346_vm0, %v5509_v23, %v5510_v22  ;;  %v5512_v23 = vrot.slane %v13703_v41, 4 }
 0x47f   :  { %11574 = vmatprep.subr.msk.bf16.mxu1 %vm2370_vm4, %v2466_v3  ;;  %v13912_v13 = vpop.permute.xlu1 %3922 }
 0x480   :  { %v2468_v48 = vpop.permute.xlu0 %2467 }
 0x481   :  { %2763 = vrot.lane.b32.xlu1 %v13688_v40, %s12503_s12  ;;  %v2490_v47 = vsel %vm2370_vm4, %v2468_v48, 0 }
 0x482   :  { %4228 = vrot.lane.b32.xlu0 %v13703_v41, %s12505_s14 }
 0x483   :  { %v13919_v56 = vpop.permute.xlu1 %3914 }
 0x484   :  { %10911 = vmatmul.mubr.msk.bf16.gmra.mrb[56].mxu1 %vm2370_vm4, %v13622_v43  ;;  %v2564_v38 = vpop.permute.xlu0 %2563 }
 0x485   :  { %5571 = vrot.lane.b32.xlu1 %v5511_v51, %s12503_s12  ;;  %10922 = vmatprep.mubr.msk.bf16.mxu1 %vm2370_vm4, %v13619_v21  ;;  %v5516_v21 = vrot.slane %v13711_v58, 4  ;;  %v5513_v51 = vsel %vm346_vm0, %v5510_v22, %v5512_v23 }
 0x486   :  { %10917 = vmatpush3.bf16.xpose.msra.mxu1 %v2487_v15  ;;  %4336 = vrot.lane.b32.xlu0 %v13711_v58, %s12504_s13  ;;  %v5514_v15 = vrot.slane %v13882_v24, 4 }
 0x487   :  { %11575 = vmatprep.subr.msk.bf16.mxu1 %vm2370_vm4, %v2468_v48  ;;  %v13931_v53 = vpop.permute.xlu1 %5547 }
 0x488   :  { %v13933_v19 = vpop.permute.xlu0 %4024  ;;  %v5515_v48 = vsel %vm346_vm0, %v5512_v23, %v5514_v15 }
 0x489   :  { %4230 = vrot.lane.b32.xlu1 %v13882_v24, %s12505_s14 }
 0x48a   :  { %4328 = vrot.lane.b32.xlu0 %v13711_v58, %s12505_s14 }
 0x48b   :  { %v13939_v7 = vpop.permute.xlu1 %3924 }
 0x48c   :  { %v13941_v30 = vpop.permute.xlu0 %4016 }
 0x48d   :  { %4236 = vrot.lane.b32.xlu1 %v13703_v41, %s12504_s13 }
 0x48e   :  { %10919 = vmatpush3.bf16.xpose.msra.mxu1 %v2490_v47  ;;  %5577 = vrot.lane.b32.xlu0 %v5516_v21, %s12503_s12 }
 0x48f   :  { %v13949_v3 = vpop.permute.xlu1 %3916 }
 0x490   :  { %v13951_v39 = vpop.permute.xlu0 %5807 }
 0x491   :  { %18949 = vst [vmem:[#allocation81_spill] sm:$0xff] %v13951_v39  ;;  %5573 = vrot.lane.b32.xlu1 %v5513_v51, %s12503_s12 }
 0x492   :  { %2867 = vrot.lane.b32.xlu0 %v13729_v57, %s12503_s12 }
 0x493   :  { %v13958_v40 = vpop.permute.xlu1 %5717 }
 0x494   :  { %18950 = vst [vmem:[#allocation82_spill] sm:$0xff] %v13958_v40  ;;  %v13960_v35 = vpop.permute.xlu0 %3926  ;;  %v2584_v40 = vsel %vm2370_vm4, %v2564_v38, 0 }
 0x495   :  { %5575 = vrot.lane.b32.xlu1 %v5515_v48, %s12503_s12 }
 0x496   :  { %4332 = vrot.lane.b32.xlu0 %v13729_v57, %s12505_s14 }
 0x497   :  { %v2470_v47 = vpop.permute.xlu1 %2469 }
 0x498   :  { %11576 = vmatprep.subr.msk.bf16.mxu1 %vm2370_vm4, %v2470_v47  ;;  %v13967_v22 = vpop.permute.xlu0 %5553  ;;  %v2493_v51 = vsel %vm2370_vm4, %v2470_v47, 0  ;;  %v13987_v47 = vpack.c.bf16 %v13734_v62, %v13734_v62 }
 0x499   :  { %2863 = vrot.lane.b32.xlu1 %v13711_v58, %s12503_s12  ;;  %10921 = vmatpush3.bf16.xpose.msra.mxu1 %v2493_v51 }
 0x49a   :  { %4440 = vrot.lane.b32.xlu0 %v13732_v2, %s12504_s13  ;;  %11577 = vmatprep.subr.msk.bf16.mxu1 %vm2370_vm4, %v2564_v38  ;;  %18952 = vst [vmem:[#allocation84_spill] sm:$0xff] %v13987_v47  ;;  %v5518_v38 = vsel %vm346_vm0, %v5516_v21, %v5517_v32  ;;  %v5521_v21 = vrot.slane %v13987_v47, 4 }
 0x49b   :  { %v13975_v23 = vpop.permute.xlu1 %3918 }
 0x49c   :  { %18951 = vst [vmem:[#allocation83_spill] sm:$0xff] %v13975_v23  ;;  %v13977_v15 = vpop.permute.xlu0 %5551  ;;  %v5523_v23 = vrot.slane %v13732_v2, 4 }
 0x49d   :  { %2865 = vrot.lane.b32.xlu1 %v13719_v29, %s12503_s12 }
 0x49e   :  { %4432 = vrot.lane.b32.xlu0 %v13732_v2, %s12505_s14 }
 0x49f   :  { %v13983_v48 = vpop.permute.xlu1 %5549 }
 0x4a0   :  { %10923 = vmatmul.mubr.msk.bf16.vlgmr.msra.gmra.mrb[60].mxu1 %vm2370_vm4, %v13624_v10  ;;  %v2568_v51 = vpop.permute.xlu0 %2567  ;;  %v5519_v10 = vrot.slane %v13729_v57, 4 }
 0x4a1   :  { %4338 = vrot.lane.b32.xlu1 %v13719_v29, %s12504_s13  ;;  %10926 = vmatprep.mubr.msk.bf16.mxu1 %vm2370_vm4, %v13630_v55 }
 0x4a2   :  { %10931 = vmatpush3.bf16.xpose.msra.mxu1 %v2584_v40  ;;  %2869 = vrot.lane.b32.xlu0 %v13987_v47, %s12503_s12  ;;  %v5520_v14 = vsel %vm346_vm0, %v5517_v32, %v5519_v10 }
 0x4a3   :  { %v13998_v39 = vpop.permute.xlu1 %4028 }
 0x4a4   :  { %v14000_v62 = vpop.permute.xlu0 %4020 }
 0x4a5   :  { %18953 = vst [vmem:[#allocation85_spill] sm:$0xff] %v14000_v62  ;;  %4330 = vrot.lane.b32.xlu1 %v13719_v29, %s12505_s14 }
 0x4a6   :  { %4342 = vrot.lane.b32.xlu0 %v13987_v47, %s12504_s13 }
 0x4a7   :  { %v14008_v55 = vpop.permute.xlu1 %5811 }
 0x4a8   :  { %18954 = vst [vmem:[#allocation86_spill] sm:$0xff] %v14008_v55  ;;  %10927 = vmatmul.mubr.msk.bf16.gmra.mrb[64].mxu1 %vm2370_vm4, %v13717_v45  ;;  %v14012_v40 = vpop.permute.xlu0 %4018 }
 0x4a9   :  { %18955 = vst [vmem:[#allocation87_spill] sm:$0xff] %v14012_v40  ;;  %5579 = vrot.lane.b32.xlu1 %v5518_v38, %s12503_s12  ;;  %10938 = vmatprep.mubr.msk.bf16.mxu1 %vm2370_vm4, %v13634_v50  ;;  %v2590_v38 = vsel %vm2370_vm4, %v2568_v51, 0  ;;  %v14049_v40 = vpack.c.bf16 %v13755_v59, %v13755_v59 }
 0x4aa   :  { %5581 = vrot.lane.b32.xlu0 %v5520_v14, %s12503_s12 }
 0x4ab   :  { %v2566_v1 = vpop.permute.xlu1 %2565  ;;  %18957 = vst [vmem:[#allocation89_spill] sm:$0xff] %v14049_v40 }
 0x4ac   :  { %11578 = vmatprep.subr.msk.bf16.mxu1 %vm2370_vm4, %v2566_v1  ;;  %v14021_v55 = vpop.permute.xlu0 %5557  ;;  %v2587_v16 = vsel %vm2370_vm4, %v2566_v1, 0  ;;  %v5522_v1 = vsel %vm346_vm0, %v5519_v10, %v5521_v21 }
 0x4ad   :  { %4340 = vrot.lane.b32.xlu1 %v13729_v57, %s12504_s13  ;;  %10933 = vmatpush3.bf16.xpose.msra.mxu1 %v2587_v16 }
 0x4ae   :  { %5585 = vrot.lane.b32.xlu0 %v5523_v23, %s12503_s12  ;;  %11579 = vmatprep.subr.msk.bf16.mxu1 %vm2370_vm4, %v2568_v51 }
 0x4af   :  { %v14030_v50 = vpop.permute.xlu1 %4026 }
 0x4b0   :  { %v14032_v14 = vpop.permute.xlu0 %4030 }
 0x4b1   :  { %2963 = vrot.lane.b32.xlu1 %v13732_v2, %s12503_s12 }
 0x4b2   :  { %5583 = vrot.lane.b32.xlu0 %v5522_v1, %s12503_s12 }
 0x4b3   :  { %v14038_v32 = vpop.permute.xlu1 %5809 }
 0x4b4   :  { %18956 = vst [vmem:[#allocation88_spill] sm:$0xff] %v14038_v32  ;;  %v2664_v16 = vpop.permute.xlu0 %2663 }
 0x4b5   :  { %4334 = vrot.lane.b32.xlu1 %v13987_v47, %s12505_s14  ;;  %10935 = vmatpush3.bf16.xpose.msra.mxu1 %v2590_v38 }
 0x4b6   :  { %2967 = vrot.lane.b32.xlu0 %v13745_v26, %s12503_s12 }
 0x4b7   :  { %v14045_v62 = vpop.permute.xlu1 %5555 }
 0x4b8   :  { %v14051_v10 = vpop.permute.xlu0 %4128 }
 0x4b9   :  { %4444 = vrot.lane.b32.xlu1 %v13745_v26, %s12504_s13 }
 0x4ba   :  { %2969 = vrot.lane.b32.xlu0 %v14049_v40, %s12503_s12 }
 0x4bb   :  { %v2570_v51 = vpop.permute.xlu1 %2569 }
 0x4bc   :  { %11580 = vmatprep.subr.msk.bf16.mxu1 %vm2370_vm4, %v2570_v51  ;;  %v14058_v21 = vpop.permute.xlu0 %4120  ;;  %v2593_v1 = vsel %vm2370_vm4, %v2570_v51, 0 }
 0x4bd   :  { %18958 = vst [vmem:[#allocation90_spill] sm:$0xff] %v14058_v21  ;;  %4436 = vrot.lane.b32.xlu1 %v13745_v26, %s12505_s14  ;;  %10937 = vmatpush3.bf16.xpose.msra.mxu1 %v2593_v1 }
 0x4be   :  { %4446 = vrot.lane.b32.xlu0 %v14049_v40, %s12504_s13  ;;  %11581 = vmatprep.subr.msk.bf16.mxu1 %vm2370_vm4, %v2664_v16 }
 0x4bf   :  { %v14066_v59 = vpop.permute.xlu1 %4022 }
 0x4c0   :  { %18959 = vst [vmem:[#allocation91_spill] sm:$0xff] %v14066_v59  ;;  %v14068_v38 = vpop.permute.xlu0 %5561  ;;  %v5524_v59 = vrot.slane %v13747_v9, 4 }
 0x4c1   :  { %18960 = vst [vmem:[#allocation92_spill] sm:$0xff] %v14068_v38  ;;  %2965 = vrot.lane.b32.xlu1 %v13747_v9, %s12503_s12  ;;  %v2684_v38 = vsel %vm2370_vm4, %v2664_v16, 0 }
 0x4c2   :  { %4438 = vrot.lane.b32.xlu0 %v14049_v40, %s12505_s14 }
 0x4c3   :  { %v14074_v51 = vpop.permute.xlu1 %5901 }
 0x4c4   :  { %18961 = vst [vmem:[#allocation93_spill] sm:$0xff] %v14074_v51  ;;  %10939 = vmatmul.mubr.msk.bf16.vlgmr.msra.gmra.mrb[68].mxu1 %vm2370_vm4, %v13649_v4  ;;  %v14078_v1 = vpop.permute.xlu0 %5903 }
 0x4c5   :  { %18962 = vst [vmem:[#allocation94_spill] sm:$0xff] %v14078_v1  ;;  %4442 = vrot.lane.b32.xlu1 %v13747_v9, %s12504_s13  ;;  %10942 = vmatprep.mubr.msk.bf16.mxu1 %vm2370_vm4, %v13647_v11  ;;  %v14096_v11 = vpack.c.bf16 %v13777_v46, %v13777_v46 }
 0x4c6   :  { %10947 = vmatpush3.bf16.xpose.msra.mxu1 %v2684_v38  ;;  %4544 = vrot.lane.b32.xlu0 %v13761_v17, %s12504_s13  ;;  %v5525_v38 = vsel %vm346_vm0, %v5523_v23, %v5524_v59 }
 0x4c7   :  { %v14087_v32 = vpop.permute.xlu1 %5559  ;;  %18964 = vst [vmem:[#allocation96_spill] sm:$0xff] %v14096_v11 }
 0x4c8   :  { %18963 = vst [vmem:[#allocation95_spill] sm:$0xff] %v14087_v32  ;;  %v2670_v51 = vpop.permute.xlu0 %2669  ;;  %v18616_v32 = vrot.slane %v13745_v26, 4 }
 0x4c9   :  { %4434 = vrot.lane.b32.xlu1 %v13747_v9, %s12505_s14 }
 0x4ca   :  { %4536 = vrot.lane.b32.xlu0 %v13761_v17, %s12505_s14  ;;  %v5527_v23 = vsel %vm346_vm0, %v5524_v59, %v18616_v32 }
 0x4cb   :  { %v2666_v4 = vpop.permute.xlu1 %2665 }
 0x4cc   :  { %10943 = vmatmul.mubr.msk.bf16.gmra.mrb[72].mxu1 %vm2370_vm4, %v13769_v28  ;;  %11582 = vmatprep.subr.msk.bf16.mxu1 %vm2370_vm4, %v2666_v4  ;;  %v14101_v16 = vpop.permute.xlu0 %4134  ;;  %v2687_v1 = vsel %vm2370_vm4, %v2666_v4, 0 }
 0x4cd   :  { %5587 = vrot.lane.b32.xlu1 %v5525_v38, %s12503_s12  ;;  %10954 = vmatprep.mubr.msk.bf16.mxu1 %vm2370_vm4, %v13662_v27 }
 0x4ce   :  { %10949 = vmatpush3.bf16.xpose.msra.mxu1 %v2687_v1  ;;  %3069 = vrot.lane.b32.xlu0 %v14096_v11, %s12503_s12 }
 0x4cf   :  { %v14111_v46 = vpop.permute.xlu1 %4130 }
 0x4d0   :  { %v2668_v21 = vpop.permute.xlu0 %2667 }
 0x4d1   :  { %5589 = vrot.lane.b32.xlu1 %v5527_v23, %s12503_s12  ;;  %11583 = vmatprep.subr.msk.bf16.mxu1 %vm2370_vm4, %v2668_v21  ;;  %v2690_v1 = vsel %vm2370_vm4, %v2668_v21, 0  ;;  %v2693_v21 = vsel %vm2370_vm4, %v2670_v51, 0 }
 0x4d2   :  { %3067 = vrot.lane.b32.xlu0 %v13779_v5, %s12503_s12 }
 0x4d3   :  { %v14120_v4 = vpop.permute.xlu1 %4122 }
 0x4d4   :  { %v14122_v27 = vpop.permute.xlu0 %4124 }
 0x4d5   :  { %18965 = vst [vmem:[#allocation97_spill] sm:$0xff] %v14122_v27  ;;  %3063 = vrot.lane.b32.xlu1 %v13761_v17, %s12503_s12 }
 0x4d6   :  { %10951 = vmatpush3.bf16.xpose.msra.mxu1 %v2690_v1  ;;  %4548 = vrot.lane.b32.xlu0 %v13779_v5, %s12504_s13 }
 0x4d7   :  { %11584 = vmatprep.subr.msk.bf16.mxu1 %vm2370_vm4, %v2670_v51  ;;  %v14130_v59 = vpop.permute.xlu1 %4126  ;;  %v5604_v51 = vsel %vm346_vm0, %v13717_v45, %v13894_v42 }
 0x4d8   :  { %18966 = vst [vmem:[#allocation98_spill] sm:$0xff] %v14130_v59  ;;  %v14132_v38 = vpop.permute.xlu0 %5565 }
 0x4d9   :  { %18967 = vst [vmem:[#allocation99_spill] sm:$0xff] %v14132_v38  ;;  %3065 = vrot.lane.b32.xlu1 %v13773_v60, %s12503_s12 }
 0x4da   :  { %4540 = vrot.lane.b32.xlu0 %v13779_v5, %s12505_s14 }
 0x4db   :  { %v14138_v23 = vpop.permute.xlu1 %4132 }
 0x4dc   :  { %v14140_v32 = vpop.permute.xlu0 %4232 }
 0x4dd   :  { %4546 = vrot.lane.b32.xlu1 %v13773_v60, %s12504_s13 }
 0x4de   :  { %10953 = vmatpush3.bf16.xpose.msra.mxu1 %v2693_v21  ;;  %5626 = vrot.lane.b32.xlu0 %v13824_v52, %s12506_s15 }
 0x4df   :  { %v14147_v1 = vpop.permute.xlu1 %5563 }
 0x4e0   :  { %18968 = vst [vmem:[#allocation100_spill] sm:$0xff] %v14147_v1  ;;  %v14149_v38 = vpop.permute.xlu0 %4224 }
 0x4e1   :  { %4538 = vrot.lane.b32.xlu1 %v13773_v60, %s12505_s14 }
 0x4e2   :  { %5628 = vrot.lane.b32.xlu0 %v13863_v54, %s12506_s15 }
 0x4e3   :  { %v14155_v59 = vpop.permute.xlu1 %5567 }
 0x4e4   :  { %18969 = vst [vmem:[#allocation101_spill] sm:$0xff] %v14155_v59  ;;  %v14157_v27 = vpop.permute.xlu0 %5569 }
 0x4e5   :  { %18970 = vst [vmem:[#allocation102_spill] sm:$0xff] %v14157_v27  ;;  %10955 = vmatmul.mubr.msk.bf16.vlgmr.msra.gmra.mrb[76].mxu1 %vm2370_vm4, %v13671_v33  ;;  %4550 = vrot.lane.b32.xlu1 %v14096_v11, %s12504_s13  ;;  %v5602_v33 = vsel %vm346_vm0, %v13622_v43, %v13838_v20 }
 0x4e6   :  { %10958 = vmatprep.mubr.msk.bf16.mxu1 %vm2370_vm4, %v13676_v63  ;;  %5719 = vrot.lane.b32.xlu0 %v5604_v51, %s12506_s15 }
 0x4e7   :  { %v2766_v52 = vpop.permute.xlu1 %2765 }
 0x4e8   :  { %v2770_v54 = vpop.permute.xlu0 %2769 }
 0x4e9   :  { %4542 = vrot.lane.b32.xlu1 %v14096_v11, %s12505_s14 }
 0x4ea   :  { %5725 = vrot.lane.b32.xlu0 %v13977_v15, %s12506_s15 }
 0x4eb   :  { %v14173_v45 = vpop.permute.xlu1 %4234 }
 0x4ec   :  { %v14178_v42 = vpop.permute.xlu0 %4238 }
 0x4ed   :  { %10959 = vmatmul.mubr.msk.bf16.gmra.mrb[80].mxu1 %vm2370_vm4, %v13813_v49  ;;  %5624 = vrot.lane.b32.xlu1 %v5602_v33, %s12506_s15 }
 0x4ee   :  { %10986 = vmatprep.mubr.msk.bf16.mxu1 %vm2370_vm4, %v13711_v58  ;;  %5815 = vrot.lane.b32.xlu0 %v14045_v62, %s12506_s15 }
 0x4ef   :  { %v14187_v15 = vpop.permute.xlu1 %4226 }
 0x4f0   :  { %v2768_v21 = vpop.permute.xlu0 %2767 }
 0x4f1   :  { %5630 = vrot.lane.b32.xlu1 %v13872_v6, %s12506_s15  ;;  %v2790_v27 = vsel %vm2370_vm4, %v2768_v21, 0 }
 0x4f2   :  { %5817 = vrot.lane.b32.xlu0 %v14021_v55, %s12506_s15  ;;  %v5606_v55 = vsel %vm346_vm0, %v13769_v28, %v13967_v22 }
 0x4f3   :  { %v2764_v43 = vpop.permute.xlu1 %2763 }
 0x4f4   :  { %11585 = vmatprep.subr.msk.bf16.mxu0 %vm2370_vm4, %v2764_v43  ;;  %v14194_v20 = vpop.permute.xlu0 %4228  ;;  %v2784_v51 = vsel %vm2370_vm4, %v2764_v43, 0 }
 0x4f5   :  { %10963 = vmatpush3.bf16.xpose.msra.mxu0 %v2784_v51  ;;  %5721 = vrot.lane.b32.xlu1 %v13931_v53, %s12506_s15  ;;  %v2787_v51 = vsel %vm2370_vm4, %v2766_v52, 0 }
 0x4f6   :  { %11586 = vmatprep.subr.msk.bf16.mxu0 %vm2370_vm4, %v2766_v52 }
 0x4f7   :  { %v14200_v62 = vpop.permute.xlu1 %5571 }
 0x4f8   :  { %18971 = vst [vmem:[#allocation103_spill] sm:$0xff] %v14200_v62  ;;  %v14202_v33 = vpop.permute.xlu0 %4336 }
 0x4f9   :  { %5723 = vrot.lane.b32.xlu1 %v13983_v48, %s12506_s15 }
 0x4fb   :  { %v14206_v6 = vpop.permute.xlu1 %4230 }
 0x4fc   :  { %v14211_v43 = vpop.permute.xlu0 %4328 }
 0x4fd   :  { %10965 = vmatpush3.bf16.xpose.msra.mxu0 %v2787_v51  ;;  %5813 = vrot.lane.b32.xlu1 %v5606_v55, %s12506_s15  ;;  %v2793_v51 = vsel %vm2370_vm4, %v2770_v54, 0 }
 0x4fe   :  { %11587 = vmatprep.subr.msk.bf16.mxu0 %vm2370_vm4, %v2768_v21 }
 0x4ff   :  { %v14216_v53 = vpop.permute.xlu1 %4236 }
 0x500   :  { %v14218_v62 = vpop.permute.xlu0 %5577 }
 0x501   :  { %18972 = vst [vmem:[#allocation104_spill] sm:$0xff] %v14218_v62 }
 0x503   :  { %v14220_v48 = vpop.permute.xlu1 %5573 }
 0x504   :  { %18973 = vst [vmem:[#allocation105_spill] sm:$0xff] %v14220_v48  ;;  %v2868_v58 = vpop.permute.xlu0 %2867 }
 0x505   :  { %10967 = vmatpush3.bf16.xpose.msra.mxu0 %v2790_v27  ;;  %v2890_v1 = vsel %vm2370_vm4, %v2868_v58, 0 }
 0x506   :  { %11588 = vmatprep.subr.msk.bf16.mxu0 %vm2370_vm4, %v2770_v54 }
 0x507   :  { %v14224_v28 = vpop.permute.xlu1 %5575 }
 0x508   :  { %18974 = vst [vmem:[#allocation106_spill] sm:$0xff] %v14224_v28  ;;  %v14226_v22 = vpop.permute.xlu0 %4332 }
 0x50b   :  { %v2864_v52 = vpop.permute.xlu1 %2863 }
 0x50c   :  { %11589 = vmatprep.subr.msk.bf16.mxu1 %vm2370_vm4, %v2864_v52  ;;  %v14229_v55 = vpop.permute.xlu0 %4440  ;;  %v2884_v62 = vsel %vm2370_vm4, %v2864_v52, 0 }
 0x50d   :  { %10969 = vmatpush3.bf16.xpose.msra.mxu0 %v2793_v51  ;;  %10979 = vmatpush3.bf16.xpose.msra.mxu1 %v2884_v62 }
 0x50f   :  { %v2866_v48 = vpop.permute.xlu1 %2865 }
 0x510   :  { %11590 = vmatprep.subr.msk.bf16.mxu1 %vm2370_vm4, %v2866_v48  ;;  %v14234_v27 = vpop.permute.xlu0 %4432  ;;  %v2887_v59 = vsel %vm2370_vm4, %v2866_v48, 0 }
 0x513   :  { %v14236_v21 = vpop.permute.xlu1 %4338 }
 0x514   :  { %10971 = vmatmul.mubr.msk.bf16.vlgmr.msra.gmra.mrb[116].mxu0 %vm2370_vm4, %v13686_v34  ;;  %v2870_v28 = vpop.permute.xlu0 %2869 }
 0x515   :  { %10974 = vmatprep.mubr.msk.bf16.mxu0 %vm2370_vm4, %v13703_v41  ;;  %10981 = vmatpush3.bf16.xpose.msra.mxu1 %v2887_v59 }
 0x516   :  { %11591 = vmatprep.subr.msk.bf16.mxu1 %vm2370_vm4, %v2868_v58 }
 0x517   :  { %v14244_v54 = vpop.permute.xlu1 %4330 }
 0x518   :  { %v14246_v62 = vpop.permute.xlu0 %4342 }
 0x51b   :  { %v14248_v52 = vpop.permute.xlu1 %5579 }
 0x51c   :  { %18975 = vst [vmem:[#allocation107_spill] sm:$0xff] %v14248_v52  ;;  %10975 = vmatmul.mubr.msk.bf16.gmra.mrb[120].mxu0 %vm2370_vm4, %v13882_v24  ;;  %v14252_v51 = vpop.permute.xlu0 %5581  ;;  %v2893_v24 = vsel %vm2370_vm4, %v2870_v28, 0 }
 0x51d   :  { %18976 = vst [vmem:[#allocation108_spill] sm:$0xff] %v14252_v51  ;;  %10983 = vmatpush3.bf16.xpose.msra.mxu1 %v2890_v1  ;;  %11002 = vmatprep.mubr.msk.bf16.mxu0 %vm2370_vm4, %v13732_v2 }
 0x51e   :  { %11592 = vmatprep.subr.msk.bf16.mxu1 %vm2370_vm4, %v2870_v28 }
 0x51f   :  { %v14258_v59 = vpop.permute.xlu1 %4340 }
 0x520   :  { %v14260_v48 = vpop.permute.xlu0 %5585 }
 0x521   :  { %18977 = vst [vmem:[#allocation109_spill] sm:$0xff] %v14260_v48 }
 0x523   :  { %v2964_v41 = vpop.permute.xlu1 %2963 }
 0x524   :  { %11593 = vmatprep.subr.msk.bf16.mxu0 %vm2370_vm4, %v2964_v41  ;;  %v14263_v52 = vpop.permute.xlu0 %5583  ;;  %v2984_v51 = vsel %vm2370_vm4, %v2964_v41, 0 }
 0x525   :  { %18978 = vst [vmem:[#allocation110_spill] sm:$0xff] %v14263_v52  ;;  %10985 = vmatpush3.bf16.xpose.msra.mxu1 %v2893_v24  ;;  %10995 = vmatpush3.bf16.xpose.msra.mxu0 %v2984_v51 }
 0x527   :  { %v14267_v58 = vpop.permute.xlu1 %4334 }
 0x528   :  { %18979 = vst [vmem:[#allocation111_spill] sm:$0xff] %v14267_v58  ;;  %v2968_v1 = vpop.permute.xlu0 %2967 }
 0x52b   :  { %v14269_v2 = vpop.permute.xlu1 %4444 }
 0x52c   :  { %10987 = vmatmul.mubr.msk.bf16.vlgmr.msra.gmra.mrb[84].mxu1 %vm2370_vm4, %v13719_v29  ;;  %v2970_v48 = vpop.permute.xlu0 %2969  ;;  %v2990_v29 = vsel %vm2370_vm4, %v2968_v1, 0 }
 0x52d   :  { %10990 = vmatprep.mubr.msk.bf16.mxu1 %vm2370_vm4, %v13729_v57  ;;  %v2993_v49 = vsel %vm2370_vm4, %v2970_v48, 0 }
 0x52f   :  { %v14275_v34 = vpop.permute.xlu1 %4436 }
 0x530   :  { %18980 = vst [vmem:[#allocation112_spill] sm:$0xff] %v14275_v34  ;;  %v14277_v52 = vpop.permute.xlu0 %4446 }
 0x533   :  { %v2966_v28 = vpop.permute.xlu1 %2965 }
 0x534   :  { %10991 = vmatmul.mubr.msk.bf16.gmra.mrb[88].mxu1 %vm2370_vm4, %v13987_v47  ;;  %11594 = vmatprep.subr.msk.bf16.mxu0 %vm2370_vm4, %v2966_v28  ;;  %v2987_v41 = vsel %vm2370_vm4, %v2966_v28, 0  ;;  %v14288_v51 = vpop.permute.xlu0 %4438 }
 0x535   :  { %10997 = vmatpush3.bf16.xpose.msra.mxu0 %v2987_v41  ;;  %11018 = vmatprep.mubr.msk.bf16.mxu1 %vm2370_vm4, %v13761_v17  ;;  %18981 = vst [vmem:[#allocation113_spill] sm:$0xff] %v14288_v51 }
 0x536   :  { %11595 = vmatprep.subr.msk.bf16.mxu0 %vm2370_vm4, %v2968_v1 }
 0x537   :  { %v14286_v24 = vpop.permute.xlu1 %4442 }
 0x538   :  { %v14294_v47 = vpop.permute.xlu0 %4544 }
 0x53b   :  { %v14290_v57 = vpop.permute.xlu1 %4434 }
 0x53c   :  { %18982 = vst [vmem:[#allocation114_spill] sm:$0xff] %v14290_v57  ;;  %v14301_v17 = vpop.permute.xlu0 %4536 }
 0x53d   :  { %10999 = vmatpush3.bf16.xpose.msra.mxu0 %v2990_v29  ;;  %18985 = vst [vmem:[#allocation117_spill] sm:$0xff] %v14301_v17  ;;  %v14338_v17 = vld [vmem:[%s18526_s2 + $0x40] sm:$0xff] }
 0x53e   :  { %11596 = vmatprep.subr.msk.bf16.mxu0 %vm2370_vm4, %v2970_v48  ;;  %v3837_v48 = vsel %vm2370_vm4, %v13830_v44, 0 }
 0x53f   :  { %v14296_v28 = vpop.permute.xlu1 %5587 }
 0x540   :  { %18983 = vst [vmem:[#allocation115_spill] sm:$0xff] %v14296_v28  ;;  %v3070_v1 = vpop.permute.xlu0 %3069 }
 0x543   :  { %v14298_v41 = vpop.permute.xlu1 %5589 }
 0x544   :  { %18984 = vst [vmem:[#allocation116_spill] sm:$0xff] %v14298_v41 }
 0x545   :  { %11001 = vmatpush3.bf16.xpose.msra.mxu0 %v2993_v49  ;;  %v14317_v49 = vld [vmem:[%s18526_s2 + $0x48] sm:$0xff] }
 0x546   :  { %11601 = vmatprep.subr.msk.bf16.mxu0 %vm2370_vm4, %v13830_v44  ;;  %v14329_v44 = vld [vmem:[%s18526_s2 + $0x50] sm:$0xff] }
 0x547   :  { %v3064_v63 = vpop.permute.xlu1 %3063 }
 0x548   :  { %11597 = vmatprep.subr.msk.bf16.mxu1 %vm2370_vm4, %v3064_v63  ;;  %v3084_v29 = vsel %vm2370_vm4, %v3064_v63, 0 }
 0x549   :  { %11011 = vmatpush3.bf16.xpose.msra.mxu1 %v3084_v29  ;;  %v14324_v29 = vld [vmem:[%s18526_s2 + $0x38] sm:$0xff] }
 0x54b   :  { %v3066_v51 = vpop.permute.xlu1 %3065 }
 0x54c   :  { %11003 = vmatmul.mubr.msk.bf16.vlgmr.msra.gmra.mrb[124].mxu0 %vm2370_vm4, %v13747_v9  ;;  %11598 = vmatprep.subr.msk.bf16.mxu1 %vm2370_vm4, %v3066_v51  ;;  %v3087_v28 = vsel %vm2370_vm4, %v3066_v51, 0  ;;  %v3068_v9 = vpop.permute.xlu0 %3067 }
 0x54d   :  { %11006 = vmatprep.mubr.msk.bf16.mxu0 %vm2370_vm4, %v13745_v26  ;;  %11027 = vmatpush3.bf16.xpose.msra.mxu0 %v3837_v48 }
 0x54e   :  { %11602 = vmatprep.subr.msk.bf16.mxu0 %vm2370_vm4, %v13799_v8 }
 0x54f   :  { %v10908_v63 = vpop.f32.mrb[52].mxu1 }
 0x550   :  { %v14332_v48 = vadd.f32 %v10908_v63, %v14317_v49  ;;  %v2429_v41 = vpop.f32.mrb[53].mxu1  ;;  %v14361_v63 = vld [vmem:[%s18526_s2 + $0x68] sm:$0xff] }
 0x551   :  { %v10909_v26 = vpop.f32.mrb[54].mxu1  ;;  %11013 = vmatpush3.bf16.xpose.msra.mxu1 %v3087_v28  ;;  %v14341_v58 = vadd.f32 %v2429_v41, %v14324_v29 }
 0x552   :  { %18986 = vst [vmem:[#allocation118_spill] sm:$0xff] %v14332_v48  ;;  %v14344_v34 = vadd.f32 %v10909_v26, %v14329_v44  ;;  %v2432_v57 = vpop.f32.mrb[55].mxu1  ;;  %11599 = vmatprep.subr.msk.bf16.mxu1 %vm2370_vm4, %v3068_v9  ;;  %v3166_v51 = vsel %vm3159_vm5, %v14332_v48, -inf  ;;  %v3840_v26 = vsel %vm2370_vm4, %v13799_v8, 0  ;;  %v3843_v48 = vsel %vm2370_vm4, %v13840_v37, 0 }
 0x553   :  { %18987 = vst [vmem:[#allocation119_spill] sm:$0xff] %v14341_v58  ;;  %3167 = vmax.xlane.f32.xlu0 %v3166_v51  ;;  %v14350_v28 = vadd.f32 %v2432_v57, %v14338_v17  ;;  %v3160_v57 = vsel %vm3159_vm5, %v14341_v58, -inf }
 0x554   :  { %18988 = vst [vmem:[#allocation120_spill] sm:$0xff] %v14344_v34  ;;  %11007 = vmatmul.mubr.msk.bf16.gmra.mrb[128].mxu0 %vm2370_vm4, %v14049_v40  ;;  %v3169_v41 = vsel %vm3159_vm5, %v14344_v34, -inf  ;;  %v3090_v40 = vsel %vm2370_vm4, %v3068_v9, 0  ;;  %v14383_v34 = vld [vmem:[%s18526_s2 + $0x58] sm:$0xff] }
 0x555   :  { %18989 = vst [vmem:[#allocation121_spill] sm:$0xff] %v14350_v28  ;;  %3170 = vmax.xlane.f32.xlu1 %v3169_v41  ;;  %11029 = vmatpush3.bf16.xpose.msra.mxu0 %v3840_v26  ;;  %v3163_v26 = vsel %vm3159_vm5, %v14350_v28, -inf }
 0x556   :  { %11034 = vmatprep.mubr.msk.bf16.mxu0 %vm2370_vm4, %v13802_v25  ;;  %11603 = vmatprep.subr.msk.bf16.mxu0 %vm2370_vm4, %v13840_v37  ;;  %v14378_v25 = vld [vmem:[%s18526_s2 + $0x60] sm:$0xff]  ;;  %v3846_v37 = vsel %vm2370_vm4, %v13832_v31, 0 }
 0x557   :  { %v10912_v51 = vpop.f32.mrb[56].mxu1  ;;  %3161 = vmax.xlane.f32.xlu0 %v3160_v57 }
 0x558   :  { %v14370_v8 = vadd.f32 %v10912_v51, %v14361_v63  ;;  %v2445_v41 = vpop.f32.mrb[57].mxu1 }
 0x559   :  { %v10913_v57 = vpop.f32.mrb[58].mxu1  ;;  %3164 = vmax.xlane.f32.xlu1 %v3163_v26  ;;  %11015 = vmatpush3.bf16.xpose.msra.mxu1 %v3090_v40  ;;  %v14390_v9 = vadd.f32 %v2445_v41, %v14383_v34  ;;  %v3093_v41 = vsel %vm2370_vm4, %v3070_v1, 0 }
 0x55a   :  { %v2448_v51 = vpop.f32.mrb[59].mxu1  ;;  %11600 = vmatprep.subr.msk.bf16.mxu1 %vm2370_vm4, %v3070_v1  ;;  %v3178_v58 = vsel %vm3159_vm5, %v14370_v8, -inf  ;;  %v4048_v1 = vsel %vm2370_vm4, %v14030_v50, 0 }
 0x55b   :  { %v14387_v28 = vadd.f32 %v2448_v51, %v14378_v25  ;;  %v3172_v26 = vsel %vm3159_vm5, %v14390_v9, -inf  ;;  %v3947_v51 = vsel %vm2370_vm4, %v13939_v7, 0 }
 0x55d   :  { %3179 = vmax.xlane.f32.xlu1 %v3178_v58  ;;  %11031 = vmatpush3.bf16.xpose.msra.mxu0 %v3843_v48  ;;  %v3175_v40 = vsel %vm3159_vm5, %v14387_v28, -inf  ;;  %v3941_v58 = vsel %vm2370_vm4, %v13878_v36, 0 }
 0x55e   :  { %3176 = vmax.xlane.f32.xlu0 %v3175_v40  ;;  %11604 = vmatprep.subr.msk.bf16.mxu0 %vm2370_vm4, %v13832_v31  ;;  %v4045_v31 = vsel %vm2370_vm4, %v13933_v19, 0 }
 0x561   :  { %3173 = vmax.xlane.f32.xlu1 %v3172_v26  ;;  %11017 = vmatpush3.bf16.xpose.msra.mxu1 %v3093_v41 }
 0x562   :  { %11605 = vmatprep.subr.msk.bf16.mxu1 %vm2370_vm4, %v13878_v36  ;;  %v3944_v36 = vsel %vm2370_vm4, %v13912_v13, 0 }
 0x565   :  { %11033 = vmatpush3.bf16.xpose.msra.mxu0 %v3846_v37 }
 0x566   :  { %11609 = vmatprep.subr.msk.bf16.mxu0 %vm2370_vm4, %v13933_v19 }
 0x568   :  { %11019 = vmatmul.mubr.msk.bf16.vlgmr.msra.gmra.mrb[92].mxu1 %vm2370_vm4, %v13773_v60 }
 0x569   :  { %11022 = vmatprep.mubr.msk.bf16.mxu1 %vm2370_vm4, %v13779_v5  ;;  %11043 = vmatpush3.bf16.xpose.msra.mxu1 %v3941_v58 }
 0x56a   :  { %11606 = vmatprep.subr.msk.bf16.mxu1 %vm2370_vm4, %v13912_v13 }
 0x56c   :  { %11035 = vmatmul.mubr.msk.bf16.vlgmr.msra.gmra.mrb[132].mxu0 %vm2370_vm4, %v13809_v18 }
 0x56d   :  { %11038 = vmatprep.mubr.msk.bf16.mxu0 %vm2370_vm4, %v13848_v0  ;;  %11059 = vmatpush3.bf16.xpose.msra.mxu0 %v4045_v31 }
 0x56e   :  { %11610 = vmatprep.subr.msk.bf16.mxu0 %vm2370_vm4, %v14030_v50 }
 0x570   :  { %11023 = vmatmul.mubr.msk.bf16.gmra.mrb[96].mxu1 %vm2370_vm4, %v14096_v11 }
 0x571   :  { %11045 = vmatpush3.bf16.xpose.msra.mxu1 %v3944_v36  ;;  %11050 = vmatprep.mubr.msk.bf16.mxu1 %vm2370_vm4, %v13884_v12 }
 0x572   :  { %11607 = vmatprep.subr.msk.bf16.mxu1 %vm2370_vm4, %v13939_v7  ;;  %v4051_v7 = vsel %vm2370_vm4, %v13998_v39, 0 }
 0x573   :  { %v10924_v18 = vpop.f32.mrb[60].mxu1 }
 0x574   :  { %v14434_v0 = vadd.f32 %v10924_v18, %v14317_v49  ;;  %v2529_v19 = vpop.f32.mrb[61].mxu1  ;;  %11039 = vmatmul.mubr.msk.bf16.gmra.mrb[136].mxu0 %vm2370_vm4, %v13854_v61 }
 0x575   :  { %v10925_v48 = vpop.f32.mrb[62].mxu1  ;;  %11061 = vmatpush3.bf16.xpose.msra.mxu0 %v4048_v1  ;;  %11066 = vmatprep.mubr.msk.bf16.mxu0 %vm2370_vm4, %v13941_v30  ;;  %v14443_v12 = vadd.f32 %v2529_v19, %v14324_v29 }
 0x576   :  { %v14446_v13 = vadd.f32 %v10925_v48, %v14329_v44  ;;  %v2532_v57 = vpop.f32.mrb[63].mxu1  ;;  %11611 = vmatprep.subr.msk.bf16.mxu0 %vm2370_vm4, %v13998_v39  ;;  %v3187_v61 = vsel %vm3159_vm5, %v14434_v0, -inf  ;;  %v3950_v48 = vsel %vm2370_vm4, %v13960_v35, 0 }
 0x577   :  { %3188 = vmax.xlane.f32.xlu0 %v3187_v61  ;;  %v14453_v50 = vadd.f32 %v2532_v57, %v14338_v17  ;;  %v3181_v40 = vsel %vm3159_vm5, %v14443_v12, -inf  ;;  %v4054_v61 = vsel %vm2370_vm4, %v14032_v14, 0 }
 0x578   :  { %v3190_v30 = vsel %vm3159_vm5, %v14446_v13, -inf }
 0x579   :  { %3191 = vmax.xlane.f32.xlu1 %v3190_v30  ;;  %11047 = vmatpush3.bf16.xpose.msra.mxu1 %v3947_v51  ;;  %v3184_v58 = vsel %vm3159_vm5, %v14453_v50, -inf  ;;  %v18990_v30 = vld [vmem:[#allocation87_spill] sm:$0xff]  ;;  %v18991_v51 = vld [vmem:[#allocation85_spill] sm:$0xff] }
 0x57a   :  { %11608 = vmatprep.subr.msk.bf16.mxu1 %vm2370_vm4, %v13960_v35  ;;  %v4149_v35 = vsel %vm2370_vm4, %v14051_v10, 0 }
 0x57b   :  { %v10928_v26 = vpop.f32.mrb[64].mxu1  ;;  %3182 = vmax.xlane.f32.xlu0 %v3181_v40  ;;  %v4256_v40 = vsel %vm2370_vm4, %v14173_v45, 0 }
 0x57c   :  { %v14464_v41 = vadd.f32 %v10928_v26, %v14361_v63  ;;  %v2545_v37 = vpop.f32.mrb[65].mxu1 }
 0x57d   :  { %v10929_v31 = vpop.f32.mrb[66].mxu1  ;;  %3185 = vmax.xlane.f32.xlu1 %v3184_v58  ;;  %11063 = vmatpush3.bf16.xpose.msra.mxu0 %v4051_v7  ;;  %v14476_v19 = vadd.f32 %v2545_v37, %v14383_v34  ;;  %v4155_v37 = vsel %vm2370_vm4, %v14138_v23, 0 }
 0x57e   :  { %v2548_v36 = vpop.f32.mrb[67].mxu1  ;;  %11612 = vmatprep.subr.msk.bf16.mxu0 %vm2370_vm4, %v14032_v14  ;;  %v3199_v1 = vsel %vm3159_vm5, %v14464_v41, -inf  ;;  %v4253_v14 = vsel %vm2370_vm4, %v14140_v32, 0 }
 0x57f   :  { %v14473_v18 = vadd.f32 %v2548_v36, %v14378_v25  ;;  %v3193_v57 = vsel %vm3159_vm5, %v14476_v19, -inf }
 0x581   :  { %3200 = vmax.xlane.f32.xlu1 %v3199_v1  ;;  %11049 = vmatpush3.bf16.xpose.msra.mxu1 %v3950_v48  ;;  %v3196_v39 = vsel %vm3159_vm5, %v14473_v18, -inf  ;;  %v18995_v48 = vld [vmem:[#allocation97_spill] sm:$0xff] }
 0x582   :  { %3197 = vmax.xlane.f32.xlu0 %v3196_v39  ;;  %11613 = vmatprep.subr.msk.bf16.mxu1 %vm2370_vm4, %v14051_v10  ;;  %v18993_v10 = vld [vmem:[#allocation90_spill] sm:$0xff] }
 0x585   :  { %3194 = vmax.xlane.f32.xlu1 %v3193_v57  ;;  %11065 = vmatpush3.bf16.xpose.msra.mxu0 %v4054_v61 }
 0x586   :  { %11617 = vmatprep.subr.msk.bf16.mxu0 %vm2370_vm4, %v14140_v32  ;;  %v18994_v32 = vld [vmem:[#allocation91_spill] sm:$0xff] }
 0x588   :  { %11051 = vmatmul.mubr.msk.bf16.vlgmr.msra.gmra.mrb[100].mxu1 %vm2370_vm4, %v13919_v56  ;;  %v18992_v56 = vld [vmem:[#allocation83_spill] sm:$0xff] }
 0x589   :  { %11054 = vmatprep.mubr.msk.bf16.mxu1 %vm2370_vm4, %v13949_v3  ;;  %11075 = vmatpush3.bf16.xpose.msra.mxu1 %v4149_v35  ;;  %v4152_v3 = vsel %vm2370_vm4, %v14111_v46, 0 }
 0x58a   :  { %11614 = vmatprep.subr.msk.bf16.mxu1 %vm2370_vm4, %v14111_v46 }
 0x58c   :  { %11067 = vmatmul.mubr.msk.bf16.vlgmr.msra.gmra.mrb[140].mxu0 %vm2370_vm4, %v18990_v30  ;;  %v4470_v30 = vsel %vm2370_vm4, %v14277_v52, 0 }
 0x58d   :  { %11070 = vmatprep.mubr.msk.bf16.mxu0 %vm2370_vm4, %v18991_v51  ;;  %11091 = vmatpush3.bf16.xpose.msra.mxu0 %v4253_v14  ;;  %v18997_v14 = vld [vmem:[#allocation75_spill] sm:$0xff] }
 0x58e   :  { %11618 = vmatprep.subr.msk.bf16.mxu0 %vm2370_vm4, %v14173_v45 }
 0x590   :  { %11055 = vmatmul.mubr.msk.bf16.gmra.mrb[104].mxu1 %vm2370_vm4, %v18992_v56  ;;  %v4549_v56 = vpop.permute.xlu0 %4548 }
 0x591   :  { %11077 = vmatpush3.bf16.xpose.msra.mxu1 %v4152_v3  ;;  %11082 = vmatprep.mubr.msk.bf16.mxu1 %vm2370_vm4, %v18993_v10  ;;  %v18998_v3 = vld [vmem:[#allocation114_spill] sm:$0xff] }
 0x592   :  { %11615 = vmatprep.subr.msk.bf16.mxu1 %vm2370_vm4, %v14138_v23  ;;  %v4158_v23 = vsel %vm2370_vm4, %v14101_v16, 0 }
 0x594   :  { %11071 = vmatmul.mubr.msk.bf16.gmra.mrb[144].mxu0 %vm2370_vm4, %v18994_v32  ;;  %v19002_v32 = vld [vmem:[#allocation117_spill] sm:$0xff] }
 0x595   :  { %11093 = vmatpush3.bf16.xpose.msra.mxu0 %v4256_v40  ;;  %11098 = vmatprep.mubr.msk.bf16.mxu0 %vm2370_vm4, %v14149_v38  ;;  %v4259_v38 = vsel %vm2370_vm4, %v14216_v53, 0  ;;  %v4541_v40 = vpop.permute.xlu0 %4540 }
 0x596   :  { %11619 = vmatprep.subr.msk.bf16.mxu0 %vm2370_vm4, %v14216_v53  ;;  %v4262_v53 = vsel %vm2370_vm4, %v14178_v42, 0 }
 0x597   :  { %v14524_v46 = vpop.f32.mrb[68].mxu1 }
 0x598   :  { %v14526_v26 = vpop.f32.mrb[69].mxu1 }
 0x599   :  { %v14530_v58 = vpop.f32.mrb[70].mxu1  ;;  %11079 = vmatpush3.bf16.xpose.msra.mxu1 %v4155_v37  ;;  %v19003_v37 = vld [vmem:[#allocation77_spill] sm:$0xff] }
 0x59a   :  { %v14532_v7 = vpop.f32.mrb[71].mxu1  ;;  %11616 = vmatprep.subr.msk.bf16.mxu1 %vm2370_vm4, %v14101_v16  ;;  %v4357_v16 = vsel %vm2370_vm4, %v14202_v33, 0 }
 0x59d   :  { %11095 = vmatpush3.bf16.xpose.msra.mxu0 %v4259_v38  ;;  %v19004_v38 = vld [vmem:[#allocation113_spill] sm:$0xff] }
 0x59e   :  { %11620 = vmatprep.subr.msk.bf16.mxu0 %vm2370_vm4, %v14178_v42  ;;  %v4461_v42 = vsel %vm2370_vm4, %v14229_v55, 0 }
 0x59f   :  { %v14540_v45 = vpop.f32.mrb[72].mxu1 }
 0x5a0   :  { %v14542_v31 = vpop.f32.mrb[73].mxu1 }
 0x5a1   :  { %v10945_v36 = vpop.f32.mrb[74].mxu1  ;;  %11081 = vmatpush3.bf16.xpose.msra.mxu1 %v4158_v23 }
 0x5a2   :  { %v14546_v1 = vpop.f32.mrb[75].mxu1  ;;  %11621 = vmatprep.subr.msk.bf16.mxu1 %vm2370_vm4, %v14202_v33  ;;  %v4360_v33 = vsel %vm2370_vm4, %v14236_v21, 0  ;;  %v5627_v36 = vpop.permute.xlu0 %5626 }
 0x5a5   :  { %11097 = vmatpush3.bf16.xpose.msra.mxu0 %v4262_v53  ;;  %v4571_v53 = vsel %vm2370_vm4, %v4549_v56, 0 }
 0x5a6   :  { %11625 = vmatprep.subr.msk.bf16.mxu0 %vm2370_vm4, %v14229_v55 }
 0x5a8   :  { %11083 = vmatmul.mubr.msk.bf16.vlgmr.msra.gmra.mrb[108].mxu1 %vm2370_vm4, %v14120_v4  ;;  %v18996_v4 = vld [vmem:[#allocation98_spill] sm:$0xff] }
 0x5a9   :  { %11086 = vmatprep.mubr.msk.bf16.mxu1 %vm2370_vm4, %v18995_v48  ;;  %11107 = vmatpush3.bf16.xpose.msra.mxu1 %v4357_v16  ;;  %v5629_v16 = vpop.permute.xlu0 %5628 }
 0x5aa   :  { %11622 = vmatprep.subr.msk.bf16.mxu1 %vm2370_vm4, %v14236_v21 }
 0x5ac   :  { %11099 = vmatmul.mubr.msk.bf16.vlgmr.msra.gmra.mrb[148].mxu0 %vm2370_vm4, %v14187_v15  ;;  %v4464_v15 = vsel %vm2370_vm4, %v14286_v24, 0 }
 0x5ad   :  { %11102 = vmatprep.mubr.msk.bf16.mxu0 %vm2370_vm4, %v14194_v20  ;;  %11123 = vmatpush3.bf16.xpose.msra.mxu0 %v4461_v42 }
 0x5ae   :  { %11626 = vmatprep.subr.msk.bf16.mxu0 %vm2370_vm4, %v14286_v24  ;;  %v4547_v24 = vpop.permute.xlu1 %4546 }
 0x5b0   :  { %11087 = vmatmul.mubr.msk.bf16.gmra.mrb[112].mxu1 %vm2370_vm4, %v18996_v4  ;;  %v19005_v4 = vld [vmem:[#allocation79_spill] sm:$0xff] }
 0x5b1   :  { %11109 = vmatpush3.bf16.xpose.msra.mxu1 %v4360_v33  ;;  %11114 = vmatprep.mubr.msk.bf16.mxu1 %vm2370_vm4, %v14211_v43  ;;  %v4363_v43 = vsel %vm2370_vm4, %v14258_v59, 0  ;;  %v19006_v33 = vld [vmem:[#allocation81_spill] sm:$0xff] }
 0x5b2   :  { %11623 = vmatprep.subr.msk.bf16.mxu1 %vm2370_vm4, %v14258_v59  ;;  %v4366_v59 = vsel %vm2370_vm4, %v14246_v62, 0 }
 0x5b4   :  { %11103 = vmatmul.mubr.msk.bf16.gmra.mrb[152].mxu0 %vm2370_vm4, %v14206_v6 }
 0x5b5   :  { %11125 = vmatpush3.bf16.xpose.msra.mxu0 %v4464_v15  ;;  %11130 = vmatprep.mubr.msk.bf16.mxu0 %vm2370_vm4, %v14234_v27  ;;  %v4467_v27 = vsel %vm2370_vm4, %v14269_v2, 0 }
 0x5b6   :  { %11627 = vmatprep.subr.msk.bf16.mxu0 %vm2370_vm4, %v14269_v2  ;;  %v4539_v2 = vpop.permute.xlu1 %4538 }
 0x5b8   :  { %v14586_v20 = vpop.f32.mrb[76].mxu1 }
 0x5b9   :  { %v14590_v55 = vpop.f32.mrb[77].mxu1  ;;  %11111 = vmatpush3.bf16.xpose.msra.mxu1 %v4363_v43 }
 0x5ba   :  { %v14592_v21 = vpop.f32.mrb[78].mxu1  ;;  %11624 = vmatprep.subr.msk.bf16.mxu1 %vm2370_vm4, %v14246_v62  ;;  %v4565_v62 = vsel %vm2370_vm4, %v14294_v47, 0  ;;  %v4551_v51 = vpop.permute.xlu1 %4550 }
 0x5bb   :  { %v14596_v6 = vpop.f32.mrb[79].mxu1  ;;  %v4574_v48 = vsel %vm2370_vm4, %v4551_v51, 0 }
 0x5bd   :  { %11127 = vmatpush3.bf16.xpose.msra.mxu0 %v4467_v27 }
 0x5be   :  { %11628 = vmatprep.subr.msk.bf16.mxu0 %vm2370_vm4, %v14277_v52  ;;  %v18999_v52 = vld [vmem:[#allocation112_spill] sm:$0xff]  ;;  %v4543_v10 = vpop.permute.xlu1 %4542 }
 0x5c0   :  { %v14602_v39 = vpop.f32.mrb[80].mxu1 }
 0x5c1   :  { %v14606_v57 = vpop.f32.mrb[81].mxu1  ;;  %11113 = vmatpush3.bf16.xpose.msra.mxu1 %v4366_v59 }
 0x5c2   :  { %v10961_v61 = vpop.f32.mrb[82].mxu1  ;;  %11629 = vmatprep.subr.msk.bf16.mxu1 %vm2370_vm4, %v14294_v47  ;;  %v19001_v47 = vld [vmem:[#allocation111_spill] sm:$0xff]  ;;  %v5625_v23 = vpop.permute.xlu1 %5624 }
 0x5c3   :  { %v14610_v35 = vpop.f32.mrb[83].mxu1  ;;  %v14655_v61 = vadd.f32 %v14524_v46, %v14317_v49 }
 0x5c5   :  { %11129 = vmatpush3.bf16.xpose.msra.mxu0 %v4470_v30  ;;  %v3208_v46 = vsel %vm3159_vm5, %v14655_v61, -inf }
 0x5c6   :  { %11154 = vmatprep.subr.bf16.mxu0 %v18997_v14  ;;  %v5631_v42 = vpop.permute.xlu1 %5630 }
 0x5c8   :  { %11115 = vmatmul.mubr.msk.bf16.vlgmr.msra.gmra.mrb[116].mxu1 %vm2370_vm4, %v14244_v54  ;;  %v19000_v54 = vld [vmem:[#allocation76_spill] sm:$0xff] }
 0x5c9   :  { %11118 = vmatprep.mubr.msk.bf16.mxu1 %vm2370_vm4, %v14226_v22  ;;  %11139 = vmatpush3.bf16.xpose.msra.mxu1 %v4565_v62  ;;  %v4568_v22 = vsel %vm2370_vm4, %v4547_v24, 0 }
 0x5ca   :  { %11630 = vmatprep.subr.msk.bf16.mxu1 %vm2370_vm4, %v4547_v24 }
 0x5cc   :  { %11131 = vmatmul.mubr.msk.bf16.vlgmr.msra.gmra.mrb[156].mxu0 %vm2370_vm4, %v18998_v3 }
 0x5cd   :  { %11134 = vmatprep.mubr.msk.bf16.mxu0 %vm2370_vm4, %v18999_v52  ;;  %11155 = vmatpush3.bf16.msra.mxu0 %v18997_v14  ;;  %v19009_v14 = vld [vmem:[#allocation80_spill] sm:$0xff] }
 0x5ce   :  { %11156 = vmatprep.subr.bf16.mxu0 %v19000_v54 }
 0x5d0   :  { %11119 = vmatmul.mubr.msk.bf16.gmra.mrb[120].mxu1 %vm2370_vm4, %v19001_v47 }
 0x5d1   :  { %11141 = vmatpush3.bf16.xpose.msra.mxu1 %v4568_v22  ;;  %11146 = vmatprep.mubr.msk.bf16.mxu1 %vm2370_vm4, %v19002_v32  ;;  %v5720_v32 = vpop.permute.xlu0 %5719 }
 0x5d2   :  { %11157 = vmatpush3.bf16.msra.mxu0 %v19000_v54  ;;  %11631 = vmatprep.subr.msk.bf16.mxu1 %vm2370_vm4, %v4549_v56  ;;  %v19011_v56 = vld [vmem:[#allocation82_spill] sm:$0xff] }
 0x5d3   :  { %11158 = vmatprep.subr.bf16.mxu0 %v19003_v37 }
 0x5d4   :  { %11135 = vmatmul.mubr.msk.bf16.gmra.mrb[160].mxu0 %vm2370_vm4, %v19004_v38 }
 0x5d6   :  { %11159 = vmatpush3.bf16.msra.mxu0 %v19003_v37  ;;  %v14681_v37 = vadd.f32 %v14526_v26, %v14324_v29 }
 0x5d7   :  { %11160 = vmatprep.subr.bf16.mxu0 %v5625_v23 }
 0x5d8   :  { %v3202_v26 = vsel %vm3159_vm5, %v14681_v37, -inf }
 0x5d9   :  { %11143 = vmatpush3.bf16.xpose.msra.mxu1 %v4571_v53  ;;  %v14687_v53 = vadd.f32 %v14530_v58, %v14329_v44 }
 0x5da   :  { %11161 = vmatpush3.bf16.msra.mxu0 %v5625_v23  ;;  %11632 = vmatprep.subr.msk.bf16.mxu1 %vm2370_vm4, %v4551_v51 }
 0x5db   :  { %11162 = vmatprep.subr.bf16.mxu0 %v5627_v36  ;;  %v3211_v58 = vsel %vm3159_vm5, %v14687_v53, -inf }
 0x5de   :  { %11163 = vmatpush3.bf16.msra.mxu0 %v5627_v36  ;;  %v5722_v36 = vpop.permute.xlu1 %5721 }
 0x5df   :  { %11164 = vmatprep.subr.bf16.mxu0 %v5629_v16 }
 0x5e1   :  { %11145 = vmatpush3.bf16.xpose.msra.mxu1 %v4574_v48  ;;  %v14698_v48 = vadd.f32 %v14532_v7, %v14338_v17 }
 0x5e2   :  { %11165 = vmatpush3.bf16.msra.mxu0 %v5629_v16  ;;  %11176 = vmatprep.subr.bf16.mxu1 %v19005_v4 }
 0x5e3   :  { %11166 = vmatprep.subr.bf16.mxu0 %v5631_v42  ;;  %v3205_v7 = vsel %vm3159_vm5, %v14698_v48, -inf }
 0x5e6   :  { %11167 = vmatpush3.bf16.msra.mxu0 %v5631_v42  ;;  %v5724_v42 = vpop.permute.xlu1 %5723 }
 0x5e7   :  { %11198 = vmatprep.subr.bf16.mxu0 %v19006_v33  ;;  %v10972_v15 = vpop.f32.mrb[116].mxu0 }
 0x5e8   :  { %v14645_v43 = vadd.f32 %v10972_v15, %v14317_v49  ;;  %v2829_v27 = vpop.f32.mrb[117].mxu0  ;;  %11147 = vmatmul.mubr.msk.bf16.vlgmr.msra.gmra.mrb[124].mxu1 %vm2370_vm4, %v4539_v2 }
 0x5e9   :  { %v14649_v24 = vadd.f32 %v2829_v27, %v14324_v29  ;;  %v10973_v59 = vpop.f32.mrb[118].mxu0  ;;  %11150 = vmatprep.mubr.msk.bf16.mxu1 %vm2370_vm4, %v4541_v40  ;;  %11177 = vmatpush3.bf16.msra.mxu1 %v19005_v4  ;;  %v14709_v27 = vadd.f32 %v14540_v45, %v14361_v63 }
 0x5ea   :  { %19007 = vst [vmem:[#allocation87_spill] sm:$0xff] %v14645_v43  ;;  %v2832_v30 = vpop.f32.mrb[119].mxu0  ;;  %11178 = vmatprep.subr.bf16.mxu1 %v19009_v14  ;;  %v3250_v62 = vsel %vm3159_vm5, %v14645_v43, -inf  ;;  %v14661_v2 = vadd.f32 %v10973_v59, %v14329_v44  ;;  %v5726_v59 = vpop.permute.xlu0 %5725 }
 0x5eb   :  { %19008 = vst [vmem:[#allocation85_spill] sm:$0xff] %v14649_v24  ;;  %3251 = vmax.xlane.f32.xlu0 %v3250_v62  ;;  %v3244_v51 = vsel %vm3159_vm5, %v14649_v24, -inf  ;;  %v14670_v3 = vadd.f32 %v2832_v30, %v14338_v17  ;;  %v14715_v30 = vadd.f32 %v14546_v1, %v14378_v25  ;;  %v14721_v62 = vadd.f32 %v14542_v31, %v14383_v34 }
 0x5ec   :  { %19010 = vst [vmem:[#allocation83_spill] sm:$0xff] %v14661_v2  ;;  %3245 = vmax.xlane.f32.xlu1 %v3244_v51  ;;  %v3253_v54 = vsel %vm3159_vm5, %v14661_v2, -inf  ;;  %v3220_v51 = vsel %vm3159_vm5, %v14709_v27, -inf }
 0x5ed   :  { %11179 = vmatpush3.bf16.msra.mxu1 %v19009_v14  ;;  %19012 = vst [vmem:[#allocation90_spill] sm:$0xff] %v14670_v3  ;;  %v3217_v31 = vsel %vm3159_vm5, %v14715_v30, -inf }
 0x5ee   :  { %11180 = vmatprep.subr.bf16.mxu1 %v19011_v56 }
 0x5ef   :  { %3209 = vmax.xlane.f32.xlu0 %v3208_v46  ;;  %v10976_v52 = vpop.f32.mrb[120].mxu0 }
 0x5f0   :  { %v14675_v47 = vadd.f32 %v10976_v52, %v14361_v63  ;;  %v2845_v22 = vpop.f32.mrb[121].mxu0  ;;  %3254 = vmax.xlane.f32.xlu1 %v3253_v54  ;;  %11151 = vmatmul.mubr.msk.bf16.gmra.mrb[128].mxu1 %vm2370_vm4, %v4543_v10  ;;  %v3247_v10 = vsel %vm3159_vm5, %v14670_v3, -inf  ;;  %v19016_v52 = vld [vmem:[#allocation93_spill] sm:$0xff]  ;;  %v3214_v54 = vsel %vm3159_vm5, %v14721_v62, -inf  ;;  %vm9947_vm4 = vcmask 1047559  }
 0x5f1   :  { %v10977_v40 = vpop.f32.mrb[122].mxu0  ;;  %11181 = vmatpush3.bf16.msra.mxu1 %v19011_v56  ;;  %v14692_v16 = vadd.f32 %v2845_v22, %v14383_v34 }
 0x5f2   :  { %19013 = vst [vmem:[#allocation91_spill] sm:$0xff] %v14675_v47  ;;  %v2848_v38 = vpop.f32.mrb[123].mxu0  ;;  %11182 = vmatprep.subr.bf16.mxu1 %v5720_v32  ;;  %v3262_v23 = vsel %vm3159_vm5, %v14675_v47, -inf }
 0x5f3   :  { %3263 = vmax.xlane.f32.xlu0 %v3262_v23  ;;  %19014 = vst [vmem:[#allocation97_spill] sm:$0xff] %v14692_v16  ;;  %v14703_v4 = vadd.f32 %v2848_v38, %v14378_v25  ;;  %v3256_v15 = vsel %vm3159_vm5, %v14692_v16, -inf }
 0x5f4   :  { %3248 = vmax.xlane.f32.xlu1 %v3247_v10 }
 0x5f5   :  { %11183 = vmatpush3.bf16.msra.mxu1 %v5720_v32  ;;  %19015 = vst [vmem:[#allocation98_spill] sm:$0xff] %v14703_v4  ;;  %v3259_v14 = vsel %vm3159_vm5, %v14703_v4, -inf }
 0x5f6   :  { %11184 = vmatprep.subr.bf16.mxu1 %v5722_v36 }
 0x5f7   :  { %3203 = vmax.xlane.f32.xlu0 %v3202_v26 }
 0x5f8   :  { %3212 = vmax.xlane.f32.xlu1 %v3211_v58 }
 0x5f9   :  { %11185 = vmatpush3.bf16.msra.mxu1 %v5722_v36 }
 0x5fa   :  { %11186 = vmatprep.subr.bf16.mxu1 %v5724_v42 }
 0x5fb   :  { %3257 = vmax.xlane.f32.xlu0 %v3256_v15 }
 0x5fc   :  { %3206 = vmax.xlane.f32.xlu1 %v3205_v7 }
 0x5fd   :  { %11187 = vmatpush3.bf16.msra.mxu1 %v5724_v42 }
 0x5fe   :  { %11188 = vmatprep.subr.bf16.mxu1 %v5726_v59 }
 0x5ff   :  { %3260 = vmax.xlane.f32.xlu0 %v3259_v14  ;;  %v14723_v45 = vpop.f32.mrb[84].mxu1 }
 0x600   :  { %3221 = vmax.xlane.f32.xlu1 %v3220_v51  ;;  %v14727_v56 = vpop.f32.mrb[85].mxu1 }
 0x601   :  { %v14729_v46 = vpop.f32.mrb[86].mxu1  ;;  %11189 = vmatpush3.bf16.msra.mxu1 %v5726_v59  ;;  %v14757_v59 = vadd.f32 %v14592_v21, %v14329_v44 }
 0x602   :  { %v14731_v1 = vpop.f32.mrb[87].mxu1  ;;  %11220 = vmatprep.subr.bf16.mxu1 %v19016_v52  ;;  %v14848_v47 = vadd.f32 %v14729_v46, %v14329_v44 }
 0x603   :  { %3218 = vmax.xlane.f32.xlu0 %v3217_v31  ;;  %v3232_v21 = vsel %vm3159_vm5, %v14757_v59, -inf }
 0x604   :  { %3215 = vmax.xlane.f32.xlu1 %v3214_v54  ;;  %19028 = vst [vmem:[#allocation122_spill] sm:$0xff] %v14848_v47  ;;  %v3274_v60 = vsel %vm3159_vm5, %v14848_v47, -inf }
 0x607   :  { %v14738_v22 = vpop.f32.mrb[88].mxu1 }
 0x608   :  { %v14740_v32 = vpop.f32.mrb[89].mxu1 }
 0x609   :  { %v10993_v40 = vpop.f32.mrb[90].mxu1 }
 0x60a   :  { %v14742_v38 = vpop.f32.mrb[91].mxu1  ;;  %v14768_v40 = vadd.f32 %v14596_v6, %v14338_v17 }
 0x60c   :  { %v3226_v6 = vsel %vm3159_vm5, %v14768_v40, -inf }
 0x61f   :  { %v11004_v23 = vpop.f32.mrb[124].mxu0 }
 0x620   :  { %v14745_v36 = vadd.f32 %v11004_v23, %v14317_v49  ;;  %v3029_v10 = vpop.f32.mrb[125].mxu0 }
 0x621   :  { %v11005_v26 = vpop.f32.mrb[126].mxu0  ;;  %v14748_v58 = vadd.f32 %v3029_v10, %v14324_v29 }
 0x622   :  { %19017 = vst [vmem:[#allocation75_spill] sm:$0xff] %v14745_v36  ;;  %v14751_v42 = vadd.f32 %v11005_v26, %v14329_v44  ;;  %v3032_v15 = vpop.f32.mrb[127].mxu0  ;;  %v3292_v7 = vsel %vm3159_vm5, %v14745_v36, -inf  ;;  %v14774_v26 = vadd.f32 %v14586_v20, %v14317_v49  ;;  %v14790_v20 = vadd.f32 %v14602_v39, %v14361_v63 }
 0x623   :  { %19018 = vst [vmem:[#allocation114_spill] sm:$0xff] %v14748_v58  ;;  %3293 = vmax.xlane.f32.xlu1 %v3292_v7  ;;  %v14762_v51 = vadd.f32 %v3032_v15, %v14338_v17  ;;  %v3286_v31 = vsel %vm3159_vm5, %v14748_v58, -inf }
 0x624   :  { %19019 = vst [vmem:[#allocation112_spill] sm:$0xff] %v14751_v42  ;;  %v3295_v14 = vsel %vm3159_vm5, %v14751_v42, -inf  ;;  %19023 = vst [vmem:[#allocation77_spill] sm:$0xff] %v14790_v20 }
 0x625   :  { %3296 = vmax.xlane.f32.xlu0 %v3295_v14  ;;  %19020 = vst [vmem:[#allocation76_spill] sm:$0xff] %v14762_v51  ;;  %v3289_v7 = vsel %vm3159_vm5, %v14762_v51, -inf }
 0x627   :  { %v11008_v54 = vpop.f32.mrb[128].mxu0  ;;  %3287 = vmax.xlane.f32.xlu1 %v3286_v31 }
 0x628   :  { %v3045_v23 = vpop.f32.mrb[129].mxu0  ;;  %v14784_v31 = vadd.f32 %v11008_v54, %v14361_v63 }
 0x629   :  { %3233 = vmax.xlane.f32.xlu0 %v3232_v21  ;;  %v11009_v10 = vpop.f32.mrb[130].mxu0  ;;  %v3229_v21 = vsel %vm3159_vm5, %v14774_v26, -inf }
 0x62a   :  { %v3048_v15 = vpop.f32.mrb[131].mxu0  ;;  %19022 = vst [vmem:[#allocation117_spill] sm:$0xff] %v14784_v31  ;;  %v3304_v54 = vsel %vm3159_vm5, %v14784_v31, -inf }
 0x62b   :  { %3290 = vmax.xlane.f32.xlu1 %v3289_v7  ;;  %v14779_v14 = vadd.f32 %v3048_v15, %v14378_v25  ;;  %v14796_v15 = vadd.f32 %v14590_v55, %v14324_v29  ;;  %v3241_v7 = vsel %vm3159_vm5, %v14790_v20, -inf }
 0x62d   :  { %19021 = vst [vmem:[#allocation111_spill] sm:$0xff] %v14779_v14  ;;  %3227 = vmax.xlane.f32.xlu0 %v3226_v6  ;;  %v3301_v10 = vsel %vm3159_vm5, %v14779_v14, -inf  ;;  %v14803_v6 = vadd.f32 %v3045_v23, %v14383_v34  ;;  %v3223_v39 = vsel %vm3159_vm5, %v14796_v15, -inf  ;;  %v14821_v23 = vadd.f32 %v14610_v35, %v14378_v25 }
 0x62f   :  { %3230 = vmax.xlane.f32.xlu1 %v3229_v21  ;;  %19024 = vst [vmem:[#allocation113_spill] sm:$0xff] %v14803_v6  ;;  %v14809_v21 = vadd.f32 %v14606_v57, %v14383_v34  ;;  %v3298_v55 = vsel %vm3159_vm5, %v14803_v6, -inf  ;;  %19026 = vst [vmem:[#allocation80_spill] sm:$0xff] %v14821_v23  ;;  %v3238_v36 = vsel %vm3159_vm5, %v14821_v23, -inf }
 0x631   :  { %3302 = vmax.xlane.f32.xlu0 %v3301_v10  ;;  %19025 = vst [vmem:[#allocation79_spill] sm:$0xff] %v14809_v21  ;;  %v3235_v57 = vsel %vm3159_vm5, %v14809_v21, -inf  ;;  %v14923_v21 = vadd.f32 %v14742_v38, %v14378_v25 }
 0x633   :  { %3305 = vmax.xlane.f32.xlu1 %v3304_v54 }
 0x635   :  { %3242 = vmax.xlane.f32.xlu0 %v3241_v7 }
 0x637   :  { %3224 = vmax.xlane.f32.xlu1 %v3223_v39 }
 0x63b   :  { %3299 = vmax.xlane.f32.xlu1 %v3298_v55  ;;  %v14813_v10 = vpop.f32.mrb[92].mxu1 }
 0x63c   :  { %v14815_v54 = vpop.f32.mrb[93].mxu1 }
 0x63d   :  { %v14817_v7 = vpop.f32.mrb[94].mxu1 }
 0x63e   :  { %v14823_v31 = vpop.f32.mrb[95].mxu1 }
 0x63f   :  { %v11036_v39 = vpop.f32.mrb[132].mxu0  ;;  %3236 = vmax.xlane.f32.xlu1 %v3235_v57 }
 0x640   :  { %v14828_v6 = vadd.f32 %v11036_v39, %v14317_v49  ;;  %v3882_v55 = vpop.f32.mrb[133].mxu0 }
 0x641   :  { %v11037_v14 = vpop.f32.mrb[134].mxu0  ;;  %v14831_v42 = vadd.f32 %v3882_v55, %v14324_v29 }
 0x642   :  { %v3885_v58 = vpop.f32.mrb[135].mxu0  ;;  %v4646_v35 = vsel %vm3159_vm5, %v14828_v6, -inf  ;;  %v14851_v16 = vadd.f32 %v11037_v14, %v14329_v44 }
 0x643   :  { %v14838_v51 = vadd.f32 %v3885_v58, %v14338_v17  ;;  %4647 = vmax.xlane.f32.xlu0 %v4646_v35  ;;  %3239 = vmax.xlane.f32.xlu1 %v3238_v36  ;;  %v14840_v57 = vpop.f32.mrb[96].mxu1  ;;  %v4640_v36 = vsel %vm3159_vm5, %v14831_v42, -inf  ;;  %v14857_v35 = vpop.permute.xlu0 %5815 }
 0x644   :  { %v14842_v39 = vpop.f32.mrb[97].mxu1  ;;  %19029 = vst [vmem:[#allocation123_spill] sm:$0xff] %v14857_v35  ;;  %v4649_v14 = vsel %vm3159_vm5, %v14851_v16, -inf }
 0x645   :  { %19027 = vst [vmem:[#allocation82_spill] sm:$0xff] %v14838_v51  ;;  %v11025_v11 = vpop.f32.mrb[98].mxu1  ;;  %v4643_v55 = vsel %vm3159_vm5, %v14838_v51, -inf }
 0x646   :  { %v14853_v4 = vpop.f32.mrb[99].mxu1 }
 0x647   :  { %v11040_v58 = vpop.f32.mrb[136].mxu0  ;;  %4641 = vmax.xlane.f32.xlu0 %v4640_v36  ;;  %4644 = vmax.xlane.f32.xlu1 %v4643_v55  ;;  %v14871_v36 = vpop.permute.xlu0 %5817 }
 0x648   :  { %v3898_v11 = vpop.f32.mrb[137].mxu0  ;;  %v14860_v5 = vadd.f32 %v11040_v58, %v14361_v63  ;;  %19032 = vst [vmem:[#allocation126_spill] sm:$0xff] %v14871_v36  ;;  %v14879_v58 = vadd.f32 %v14738_v22, %v14361_v63  ;;  %v14892_v22 = vadd.f32 %v14727_v56, %v14324_v29 }
 0x649   :  { %v11041_v52 = vpop.f32.mrb[138].mxu0 }
 0x64a   :  { %19030 = vst [vmem:[#allocation124_spill] sm:$0xff] %v14860_v5  ;;  %v3901_v46 = vpop.f32.mrb[139].mxu0  ;;  %v14875_v52 = vadd.f32 %v14723_v45, %v14317_v49  ;;  %19034 = vst [vmem:[#allocation128_spill] sm:$0xff] %v14879_v58  ;;  %v4658_v47 = vsel %vm3159_vm5, %v14860_v5, -inf  ;;  %v3283_v45 = vsel %vm3159_vm5, %v14879_v58, -inf  ;;  %v19040_v58 = vld [vmem:[#allocation119_spill] sm:$0xff] }
 0x64b   :  { %v14867_v2 = vadd.f32 %v3901_v46, %v14378_v25  ;;  %4650 = vmax.xlane.f32.xlu0 %v4649_v14  ;;  %3275 = vmax.xlane.f32.xlu1 %v3274_v60  ;;  %v3168_v46 = vpop.xlane.xlu0 %3167  ;;  %v14884_v60 = vadd.f32 %v3898_v11, %v14383_v34  ;;  %19036 = vst [vmem:[#allocation130_spill] sm:$0xff] %v14892_v22  ;;  %v14897_v11 = vpop.permute.xlu1 %5813 }
 0x64c   :  { %19033 = vst [vmem:[#allocation127_spill] sm:$0xff] %v14875_v52  ;;  %v3271_v14 = vsel %vm3159_vm5, %v14875_v52, -inf  ;;  %v14901_v52 = vadd.f32 %v14731_v1, %v14338_v17 }
 0x64d   :  { %19031 = vst [vmem:[#allocation125_spill] sm:$0xff] %v14867_v2  ;;  %v4655_v55 = vsel %vm3159_vm5, %v14867_v2, -inf  ;;  %19035 = vst [vmem:[#allocation129_spill] sm:$0xff] %v14884_v60 }
 0x64e   :  { %19039 = vst [vmem:[#allocation131_spill] sm:$0xff] %v14901_v52 }
 0x64f   :  { %4659 = vmax.xlane.f32.xlu0 %v4658_v47  ;;  %4656 = vmax.xlane.f32.xlu1 %v4655_v55  ;;  %v4652_v47 = vsel %vm3159_vm5, %v14884_v60, -inf  ;;  %v19037_v55 = vld [vmem:[#allocation118_spill] sm:$0xff]  ;;  %v3162_v35 = vpop.xlane.xlu0 %3161  ;;  %v3171_v43 = vpop.xlane.xlu1 %3170 }
 0x650   :  { %v3330_v36 = vsub.f32 %v19037_v55, %v3168_v46  ;;  %19038 = vst [vmem:[#allocation118_spill] sm:$0xff] %v14897_v11  ;;  %v3328_v56 = vsub.f32 %v19040_v58, %v3162_v35  ;;  %v3268_v55 = vsel %vm3159_vm5, %v14901_v52, -inf }
 0x653   :  { %3272 = vmax.xlane.f32.xlu0 %v3271_v14  ;;  %3284 = vmax.xlane.f32.xlu1 %v3283_v45  ;;  %v3265_v14 = vsel %vm3159_vm5, %v14892_v22, -inf  ;;  %v3388_v45 = vmul.f32 1.442695, %v3330_v36  ;;  %v3384_v36 = vmul.f32 1.442695, %v3328_v56  ;;  %v3165_v24 = vpop.xlane.xlu1 %3164 }
 0x655   :  { %11796 = vpow2.f32 %v3388_v45 }
 0x656   :  { %11798 = vpow2.f32 %v3384_v36 }
 0x657   :  { %4653 = vmax.xlane.f32.xlu0 %v4652_v47  ;;  %v14914_v47 = vadd.f32 %v14740_v32, %v14383_v34 }
 0x659   :  { %19041 = vst [vmem:[#allocation119_spill] sm:$0xff] %v14914_v47  ;;  %v3277_v52 = vsel %vm3159_vm5, %v14914_v47, -inf }
 0x65b   :  { %3266 = vmax.xlane.f32.xlu0 %v3265_v14  ;;  %v14906_v33 = vpop.f32.mrb[100].mxu1  ;;  %v19042_v14 = vld [vmem:[#allocation120_spill] sm:$0xff] }
 0x65c   :  { %v14908_v3 = vpop.f32.mrb[101].mxu1  ;;  %v3331_v22 = vsub.f32 %v19042_v14, %v3171_v43  ;;  %19043 = vst [vmem:[#allocation120_spill] sm:$0xff] %v14923_v21 }
 0x65d   :  { %v14910_v46 = vpop.f32.mrb[102].mxu1 }
 0x65e   :  { %v14916_v1 = vpop.f32.mrb[103].mxu1 }
 0x65f   :  { %v11068_v35 = vpop.f32.mrb[140].mxu0  ;;  %3269 = vmax.xlane.f32.xlu0 %v3268_v55  ;;  %v3390_v55 = vmul.f32 1.442695, %v3331_v22  ;;  %v14948_v60 = vpop.eup %11796  ;;  %v19047_v22 = vld [vmem:[#allocation121_spill] sm:$0xff] }
 0x660   :  { %v4090_v58 = vpop.f32.mrb[141].mxu0  ;;  %v14940_v14 = vadd.f32 %v11068_v35, %v14317_v49  ;;  %19046 = vst [vmem:[#allocation134_spill] sm:$0xff] %v14948_v60  ;;  %v14958_v5 = vpop.eup %11798 }
 0x661   :  { %v11069_v11 = vpop.f32.mrb[142].mxu0  ;;  %11800 = vpow2.f32 %v3390_v55  ;;  %v14952_v35 = vadd.f32 %v4090_v58, %v14324_v29  ;;  %19048 = vst [vmem:[#allocation121_spill] sm:$0xff] %v14958_v5  ;;  %v3177_v55 = vpop.xlane.xlu0 %3176 }
 0x662   :  { %v14926_v32 = vadd.f32 %v11069_v11, %v14329_v44  ;;  %v4093_v20 = vpop.f32.mrb[143].mxu0 }
 0x663   :  { %3278 = vmax.xlane.f32.xlu0 %v3277_v52  ;;  %v14930_v45 = vpop.f32.mrb[104].mxu1  ;;  %v14933_v56 = vadd.f32 %v4093_v20, %v14338_v17  ;;  %v3280_v52 = vsel %vm3159_vm5, %v14923_v21, -inf  ;;  %v3180_v20 = vpop.xlane.xlu1 %3179  ;;  %v4688_v21 = vsel %vm3159_vm5, %v14940_v14, -inf }
 0x664   :  { %19044 = vst [vmem:[#allocation132_spill] sm:$0xff] %v14926_v32  ;;  %v14935_v43 = vpop.f32.mrb[105].mxu1  ;;  %v4691_v38 = vsel %vm3159_vm5, %v14926_v32, -inf  ;;  %v3334_v58 = vsub.f32 %v14370_v8, %v3180_v20 }
 0x665   :  { %19045 = vst [vmem:[#allocation133_spill] sm:$0xff] %v14933_v56  ;;  %4692 = vmax.xlane.f32.xlu1 %v4691_v38  ;;  %v11057_v11 = vpop.f32.mrb[106].mxu1  ;;  %v4685_v2 = vsel %vm3159_vm5, %v14933_v56, -inf  ;;  %v3329_v38 = vsub.f32 %v19047_v22, %v3165_v24  ;;  %v3496_v22 = vsel %vm3159_vm5, %v14958_v5, 0.0 }
 0x666   :  { %v14942_v23 = vpop.f32.mrb[107].mxu1  ;;  %v3396_v8 = vmul.f32 1.442695, %v3334_v58 }
 0x667   :  { %v11072_v36 = vpop.f32.mrb[144].mxu0  ;;  %3281 = vmax.xlane.f32.xlu0 %v3280_v52  ;;  %v3502_v52 = vsel %vm3159_vm5, %v14948_v60, 0.0  ;;  %v3386_v56 = vmul.f32 1.442695, %v3329_v38  ;;  %v3174_v51 = vpop.xlane.xlu1 %3173  ;;  %v3333_v38 = vsub.f32 %v14387_v28, %v3177_v55 }
 0x668   :  { %v4106_v47 = vpop.f32.mrb[145].mxu0  ;;  %v14961_v24 = vadd.f32 %v11072_v36, %v14361_v63  ;;  %v3332_v20 = vsub.f32 %v14390_v9, %v3174_v51 }
 0x669   :  { %v11073_v11 = vpop.f32.mrb[146].mxu0  ;;  %4686 = vmax.xlane.f32.xlu1 %v4685_v2  ;;  %v4682_v2 = vsel %vm3159_vm5, %v14952_v35, -inf  ;;  %11802 = vpow2.f32 %v3386_v56  ;;  %v3394_v28 = vmul.f32 1.442695, %v3333_v38  ;;  %v14987_v56 = vadd.f32 %v4106_v47, %v14383_v34 }
 0x66a   :  { %v4109_v32 = vpop.f32.mrb[147].mxu0  ;;  %v4700_v63 = vsel %vm3159_vm5, %v14961_v24, -inf  ;;  %11804 = vpow2.f32 %v3396_v8  ;;  %v3392_v55 = vmul.f32 1.442695, %v3332_v20 }
 0x66b   :  { %4689 = vmax.xlane.f32.xlu0 %v4688_v21  ;;  %v14968_v21 = vadd.f32 %v14813_v10, %v14317_v49  ;;  %v14973_v11 = vpop.xlane.xlu1 %3191  ;;  %v14977_v36 = vpop.eup %11800  ;;  %v14982_v49 = vadd.f32 %v14815_v54, %v14324_v29  ;;  %v14995_v29 = vadd.f32 %v14817_v7, %v14329_v44  ;;  %11806 = vpow2.f32 %v3394_v28 }
 0x66c   :  { %19050 = vst [vmem:[#allocation136_spill] sm:$0xff] %v14977_v36  ;;  %v4694_v34 = vsel %vm3159_vm5, %v14987_v56, -inf  ;;  %11808 = vpow2.f32 %v3392_v55  ;;  %v3189_v7 = vpop.xlane.xlu0 %3188 }
 0x66d   :  { %3503 = vadd.xlane.f32.xlu1 %v3502_v52  ;;  %19049 = vst [vmem:[#allocation135_spill] sm:$0xff] %v14968_v21  ;;  %19051 = vst [vmem:[#allocation137_spill] sm:$0xff] %v14982_v49  ;;  %v3313_v10 = vsel %vm3159_vm5, %v14968_v21, -inf  ;;  %v3505_v52 = vsel %vm3159_vm5, %v14977_v36, 0.0  ;;  %v3307_v51 = vsel %vm3159_vm5, %v14982_v49, -inf  ;;  %v3316_v44 = vsel %vm3159_vm5, %v14995_v29, -inf }
 0x66e   :  { %19052 = vst [vmem:[#allocation138_spill] sm:$0xff] %v14995_v29  ;;  %v3337_v55 = vsub.f32 %v14434_v0, %v3189_v7 }
 0x66f   :  { %4683 = vmax.xlane.f32.xlu0 %v4682_v2  ;;  %v14991_v9 = vpop.xlane.xlu1 %3185  ;;  %v15006_v2 = vadd.f32 %v4109_v32, %v14378_v25 }
 0x670   :  { %v3402_v7 = vmul.f32 1.442695, %v3337_v55  ;;  %v15055_v55 = vld [vmem:[%s18526_s2 + $0x68] sm:$0xff] }
 0x671   :  { %3497 = vadd.xlane.f32.xlu1 %v3496_v22  ;;  %19054 = vst [vmem:[#allocation140_spill] sm:$0xff] %v15006_v2  ;;  %v4697_v28 = vsel %vm3159_vm5, %v15006_v2, -inf }
 0x672   :  { %11810 = vpow2.f32 %v3402_v7  ;;  %v15080_v7 = vld [vmem:[%s18526_s2 + $0x58] sm:$0xff] }
 0x673   :  { %4701 = vmax.xlane.f32.xlu0 %v4700_v63  ;;  %v15001_v54 = vpop.eup %11802  ;;  %v15014_v38 = vpop.xlane.xlu1 %3200  ;;  %v15018_v63 = vadd.f32 %v14823_v31, %v14338_v17 }
 0x674   :  { %19053 = vst [vmem:[#allocation139_spill] sm:$0xff] %v15001_v54  ;;  %v3499_v32 = vsel %vm3159_vm5, %v15001_v54, 0.0 }
 0x675   :  { %3314 = vmax.xlane.f32.xlu1 %v3313_v10  ;;  %19055 = vst [vmem:[#allocation141_spill] sm:$0xff] %v15018_v63  ;;  %v3310_v17 = vsel %vm3159_vm5, %v15018_v63, -inf  ;;  %v15045_v63 = vadd.f32 %v14853_v4, %v14378_v25 }
 0x677   :  { %3506 = vadd.xlane.f32.xlu0 %v3505_v52  ;;  %v15026_v52 = vpop.eup %11804  ;;  %19059 = vst [vmem:[#allocation145_spill] sm:$0xff] %v15045_v63 }
 0x678   :  { %19056 = vst [vmem:[#allocation142_spill] sm:$0xff] %v15026_v52  ;;  %v15031_v31 = vpop.eup %11806  ;;  %v3514_v49 = vsel %vm3159_vm5, %v15026_v52, 0.0 }
 0x679   :  { %3308 = vmax.xlane.f32.xlu1 %v3307_v51  ;;  %19057 = vst [vmem:[#allocation143_spill] sm:$0xff] %v15031_v31  ;;  %v15041_v0 = vpop.eup %11808 }
 0x67a   :  { %19058 = vst [vmem:[#allocation144_spill] sm:$0xff] %v15041_v0 }
 0x67b   :  { %4695 = vmax.xlane.f32.xlu0 %v4694_v34  ;;  %v15003_v47 = vpop.f32.mrb[108].mxu1 }
 0x67c   :  { %v15008_v58 = vpop.f32.mrb[109].mxu1 }
 0x67d   :  { %v15012_v22 = vpop.f32.mrb[110].mxu1  ;;  %3317 = vmax.xlane.f32.xlu1 %v3316_v44  ;;  %v3183_v44 = vpop.xlane.xlu0 %3182 }
 0x67e   :  { %v15020_v8 = vpop.f32.mrb[111].mxu1  ;;  %v3335_v5 = vsub.f32 %v14443_v12, %v3183_v44  ;;  %v15068_v44 = vld [vmem:[%s18526_s2 + $0x48] sm:$0xff] }
 0x67f   :  { %v11100_v20 = vpop.f32.mrb[148].mxu0  ;;  %3500 = vadd.xlane.f32.xlu0 %v3499_v32  ;;  %v15035_v32 = vpop.xlane.xlu1 %3194 }
 0x680   :  { %v4298_v10 = vpop.f32.mrb[149].mxu0  ;;  %v3398_v52 = vmul.f32 1.442695, %v3335_v5  ;;  %v15095_v5 = vld [vmem:[%s18526_s2 + $0x38] sm:$0xff] }
 0x681   :  { %v11101_v51 = vpop.f32.mrb[150].mxu0  ;;  %4698 = vmax.xlane.f32.xlu1 %v4697_v28  ;;  %v3198_v36 = vpop.xlane.xlu0 %3197 }
 0x682   :  { %v4301_v34 = vpop.f32.mrb[151].mxu0  ;;  %11812 = vpow2.f32 %v3398_v52 }
 0x683   :  { %v15033_v29 = vpop.f32.mrb[112].mxu1  ;;  %3311 = vmax.xlane.f32.xlu0 %v3310_v17  ;;  %v3511_v17 = vsel %vm3159_vm5, %v15031_v31, 0.0  ;;  %v15061_v25 = vpop.xlane.xlu1 %3245 }
 0x684   :  { %v15037_v21 = vpop.f32.mrb[113].mxu1  ;;  %19061 = vst [vmem:[#allocation147_spill] sm:$0xff] %v15061_v25 }
 0x685   :  { %v11089_v28 = vpop.f32.mrb[114].mxu1  ;;  %3515 = vadd.xlane.f32.xlu1 %v3514_v49  ;;  %v15059_v49 = vadd.f32 %v15055_v55, %v14840_v57  ;;  %v3322_v57 = vsel %vm3159_vm5, %v15045_v63, -inf  ;;  %v3338_v63 = vsub.f32 %v14446_v13, %v14973_v11  ;;  %v15118_v13 = vpop.eup %11810 }
 0x686   :  { %v15047_v60 = vpop.f32.mrb[115].mxu1  ;;  %v3508_v28 = vsel %vm3159_vm5, %v15041_v0, 0.0  ;;  %19068 = vst [vmem:[#allocation154_spill] sm:$0xff] %v15118_v13 }
 0x687   :  { %v11104_v54 = vpop.f32.mrb[152].mxu0  ;;  %3512 = vadd.xlane.f32.xlu0 %v3511_v17  ;;  %19060 = vst [vmem:[#allocation146_spill] sm:$0xff] %v15059_v49  ;;  %v15071_v17 = vadd.f32 %v15068_v44, %v11100_v20  ;;  %v3325_v20 = vsel %vm3159_vm5, %v15059_v49, -inf  ;;  %v15090_v0 = vpop.xlane.xlu1 %3254  ;;  %v3404_v11 = vmul.f32 1.442695, %v3338_v63  ;;  %v3523_v63 = vsel %vm3159_vm5, %v15118_v13, 0.0 }
 0x688   :  { %v4314_v4 = vpop.f32.mrb[153].mxu0  ;;  %19065 = vst [vmem:[#allocation151_spill] sm:$0xff] %v15090_v0  ;;  %v15134_v25 = vadd.f32 %v15055_v55, %v11104_v54 }
 0x689   :  { %v11105_v12 = vpop.f32.mrb[154].mxu0  ;;  %3509 = vadd.xlane.f32.xlu1 %v3508_v28  ;;  %19062 = vst [vmem:[#allocation148_spill] sm:$0xff] %v15071_v17  ;;  %v15084_v28 = vadd.f32 %v15080_v7, %v14842_v39  ;;  %v4730_v39 = vsel %vm3159_vm5, %v15071_v17, -inf  ;;  %11814 = vpow2.f32 %v3404_v11  ;;  %v15149_v54 = vadd.f32 %v15080_v7, %v4314_v4 }
 0x68a   :  { %v15073_v31 = vpop.f32.mrb[155].mxu0  ;;  %v15086_v12 = vpop.xlane.xlu0 %3251  ;;  %19071 = vst [vmem:[#allocation157_spill] sm:$0xff] %v15134_v25  ;;  %v4742_v11 = vsel %vm3159_vm5, %v15134_v25, -inf }
 0x68b   :  { %3323 = vmax.xlane.f32.xlu0 %v3322_v57  ;;  %19063 = vst [vmem:[#allocation149_spill] sm:$0xff] %v15084_v28  ;;  %19064 = vst [vmem:[#allocation150_spill] sm:$0xff] %v15086_v12  ;;  %v15098_v57 = vadd.f32 %v15095_v5, %v4298_v10  ;;  %v3319_v10 = vsel %vm3159_vm5, %v15084_v28, -inf  ;;  %v15120_v52 = vpop.xlane.xlu1 %3248  ;;  %v3340_v28 = vsub.f32 %v14473_v18, %v3198_v36 }
 0x68c   :  { %19069 = vst [vmem:[#allocation155_spill] sm:$0xff] %v15120_v52  ;;  %19074 = vst [vmem:[#allocation160_spill] sm:$0xff] %v15149_v54 }
 0x68d   :  { %3326 = vmax.xlane.f32.xlu1 %v3325_v20  ;;  %19066 = vst [vmem:[#allocation152_spill] sm:$0xff] %v15098_v57  ;;  %v15107_v20 = vld [vmem:[%s18526_s2 + $0x50] sm:$0xff]  ;;  %v4724_v12 = vsel %vm3159_vm5, %v15098_v57, -inf  ;;  %v3408_v18 = vmul.f32 1.442695, %v3340_v28 }
 0x68e   :  { %v15110_v49 = vadd.f32 %v15107_v20, %v11101_v51  ;;  %v15114_v0 = vpop.xlane.xlu0 %3209  ;;  %v15125_v51 = vld [vmem:[%s18526_s2 + $0x40] sm:$0xff]  ;;  %v15167_v4 = vadd.f32 %v15107_v20, %v14910_v46 }
 0x68f   :  { %4731 = vmax.xlane.f32.xlu0 %v4730_v39  ;;  %v15128_v39 = vadd.f32 %v15125_v51, %v4301_v34  ;;  %v15146_v36 = vpop.xlane.xlu1 %3212  ;;  %11816 = vpow2.f32 %v3408_v18 }
 0x690   :  { %19067 = vst [vmem:[#allocation153_spill] sm:$0xff] %v15110_v49  ;;  %19076 = vst [vmem:[#allocation162_spill] sm:$0xff] %v15167_v4 }
 0x691   :  { %3320 = vmax.xlane.f32.xlu1 %v3319_v10  ;;  %19070 = vst [vmem:[#allocation156_spill] sm:$0xff] %v15128_v39  ;;  %v4733_v10 = vsel %vm3159_vm5, %v15110_v49, -inf  ;;  %v4727_v34 = vsel %vm3159_vm5, %v15128_v39, -inf  ;;  %v15144_v49 = vpop.eup %11812 }
 0x692   :  { %v15140_v52 = vpop.xlane.xlu0 %3263  ;;  %19073 = vst [vmem:[#allocation159_spill] sm:$0xff] %v15144_v49  ;;  %v3517_v28 = vsel %vm3159_vm5, %v15144_v49, 0.0 }
 0x693   :  { %4725 = vmax.xlane.f32.xlu0 %v4724_v12  ;;  %v3336_v12 = vsub.f32 %v14453_v50, %v14991_v9  ;;  %19072 = vst [vmem:[#allocation158_spill] sm:$0xff] %v15140_v52  ;;  %v15157_v9 = vadd.f32 %v15068_v44, %v14906_v33  ;;  %v4736_v33 = vsel %vm3159_vm5, %v15149_v54, -inf  ;;  %v15175_v18 = vpop.xlane.xlu1 %3206  ;;  %v15179_v46 = vpop.eup %11814  ;;  %v15185_v54 = vadd.f32 %v15125_v51, %v14916_v1 }
 0x694   :  { %19077 = vst [vmem:[#allocation163_spill] sm:$0xff] %v15179_v46  ;;  %v3526_v57 = vsel %vm3159_vm5, %v15179_v46, 0.0 }
 0x695   :  { %4734 = vmax.xlane.f32.xlu1 %v4733_v10  ;;  %v3400_v10 = vmul.f32 1.442695, %v3336_v12  ;;  %19075 = vst [vmem:[#allocation161_spill] sm:$0xff] %v15157_v9  ;;  %19078 = vst [vmem:[#allocation164_spill] sm:$0xff] %v15185_v54 }
 0x696   :  { %v3204_v12 = vpop.xlane.xlu0 %3203 }
 0x697   :  { %3524 = vadd.xlane.f32.xlu0 %v3523_v63  ;;  %11818 = vpow2.f32 %v3400_v10 }
 0x699   :  { %4728 = vmax.xlane.f32.xlu1 %v4727_v34 }
 0x69b   :  { %v15153_v50 = vpop.f32.mrb[116].mxu1  ;;  %4743 = vmax.xlane.f32.xlu0 %v4742_v11  ;;  %v3341_v11 = vsub.f32 %v14464_v41, %v15014_v38  ;;  %v4670_v41 = vsel %vm3159_vm5, %v15167_v4, -inf }
 0x69c   :  { %v15159_v63 = vpop.f32.mrb[117].mxu1 }
 0x69d   :  { %v15163_v34 = vpop.f32.mrb[118].mxu1  ;;  %3518 = vadd.xlane.f32.xlu1 %v3517_v28  ;;  %v4667_v28 = vsel %vm3159_vm5, %v15157_v9, -inf  ;;  %v3410_v38 = vmul.f32 1.442695, %v3341_v11  ;;  %v15197_v9 = vadd.f32 %v15095_v5, %v14908_v3  ;;  %v3344_v11 = vsub.f32 %v14655_v61, %v15114_v0 }
 0x69e   :  { %v15169_v52 = vpop.f32.mrb[119].mxu1  ;;  %v4664_v3 = vsel %vm3159_vm5, %v15185_v54, -inf  ;;  %v15225_v54 = vld [vmem:[%s18526_s2 + $0x60] sm:$0xff] }
 0x69f   :  { %v11132_v13 = vpop.f32.mrb[156].mxu0  ;;  %4737 = vmax.xlane.f32.xlu0 %v4736_v33  ;;  %v3339_v33 = vsub.f32 %v14476_v19, %v15035_v32  ;;  %v15207_v19 = vpop.xlane.xlu1 %3221  ;;  %11820 = vpow2.f32 %v3410_v38  ;;  %v4661_v61 = vsel %vm3159_vm5, %v15197_v9, -inf  ;;  %v15229_v38 = vadd.f32 %v15225_v54, %v14942_v23 }
 0x6a0   :  { %v4506_v49 = vpop.f32.mrb[157].mxu0 }
 0x6a1   :  { %v15181_v25 = vpop.f32.mrb[158].mxu0  ;;  %4668 = vmax.xlane.f32.xlu1 %v4667_v28  ;;  %v15199_v28 = vpop.xlane.xlu0 %3257 }
 0x6a2   :  { %v15187_v10 = vpop.f32.mrb[159].mxu0  ;;  %19079 = vst [vmem:[#allocation165_spill] sm:$0xff] %v15199_v28  ;;  %v3406_v28 = vmul.f32 1.442695, %v3339_v33 }
 0x6a3   :  { %v15193_v39 = vpop.f32.mrb[120].mxu1  ;;  %4671 = vmax.xlane.f32.xlu0 %v4670_v41  ;;  %v15213_v41 = vpop.eup %11816 }
 0x6a4   :  { %v15201_v1 = vpop.f32.mrb[121].mxu1  ;;  %19080 = vst [vmem:[#allocation166_spill] sm:$0xff] %v15213_v41  ;;  %v15219_v0 = vpop.eup %11818  ;;  %11822 = vpow2.f32 %v3406_v28 }
 0x6a5   :  { %v11121_v4 = vpop.f32.mrb[122].mxu1  ;;  %3527 = vadd.xlane.f32.xlu1 %v3526_v57  ;;  %19081 = vst [vmem:[#allocation167_spill] sm:$0xff] %v15219_v0  ;;  %v3416_v57 = vmul.f32 1.442695, %v3344_v11  ;;  %v15231_v33 = vpop.xlane.xlu0 %3260  ;;  %v3532_v11 = vsel %vm3159_vm5, %v15213_v41, 0.0  ;;  %v4676_v41 = vsel %vm3159_vm5, %v15229_v38, -inf }
 0x6a6   :  { %v15209_v32 = vpop.f32.mrb[123].mxu1  ;;  %v3342_v4 = vsub.f32 %v14681_v37, %v3204_v12  ;;  %19082 = vst [vmem:[#allocation168_spill] sm:$0xff] %v15231_v33  ;;  %v15239_v37 = vadd.f32 %v15225_v54, %v15073_v31  ;;  %v15241_v12 = vpop.xlane.xlu1 %3215 }
 0x6a7   :  { %v11136_v17 = vpop.f32.mrb[160].mxu0  ;;  %4665 = vmax.xlane.f32.xlu0 %v4664_v3  ;;  %11824 = vpow2.f32 %v3416_v57  ;;  %v3345_v57 = vsub.f32 %v14687_v53, %v15146_v36  ;;  %v15279_v36 = vadd.f32 %v15055_v55, %v14930_v45  ;;  %v15295_v45 = vadd.f32 %v15080_v7, %v14935_v43 }
 0x6a8   :  { %v15215_v2 = vpop.f32.mrb[161].mxu0  ;;  %v3412_v23 = vmul.f32 1.442695, %v3342_v4  ;;  %v4739_v31 = vsel %vm3159_vm5, %v15239_v37, -inf  ;;  %v3343_v43 = vsub.f32 %v14698_v48, %v15175_v18 }
 0x6a9   :  { %v11137_v46 = vpop.f32.mrb[162].mxu0  ;;  %4662 = vmax.xlane.f32.xlu1 %v4661_v61  ;;  %v15246_v61 = vadd.f32 %v15068_v44, %v11132_v13  ;;  %v15250_v28 = vpop.xlane.xlu0 %3218  ;;  %v15261_v13 = vadd.f32 %v15095_v5, %v4506_v49  ;;  %19091 = vst [vmem:[#allocation177_spill] sm:$0xff] %v15279_v36  ;;  %19094 = vst [vmem:[#allocation180_spill] sm:$0xff] %v15295_v45 }
 0x6aa   :  { %v15233_v3 = vpop.f32.mrb[163].mxu0  ;;  %v3520_v46 = vsel %vm3159_vm5, %v15219_v0, 0.0  ;;  %v15256_v33 = vpop.eup %11820  ;;  %11826 = vpow2.f32 %v3412_v23  ;;  %v3418_v23 = vmul.f32 1.442695, %v3345_v57  ;;  %v3414_v18 = vmul.f32 1.442695, %v3343_v43 }
 0x6ab   :  { %3533 = vadd.xlane.f32.xlu0 %v3532_v11  ;;  %19083 = vst [vmem:[#allocation169_spill] sm:$0xff] %v15246_v61  ;;  %19085 = vst [vmem:[#allocation171_spill] sm:$0xff] %v15256_v33  ;;  %v4766_v53 = vsel %vm3159_vm5, %v15261_v13, -inf  ;;  %v15344_v43 = vadd.f32 %v15080_v7, %v15215_v2 }
 0x6ac   :  { %19086 = vst [vmem:[#allocation172_spill] sm:$0xff] %v15261_v13  ;;  %11828 = vpow2.f32 %v3418_v23  ;;  %v4679_v23 = vsel %vm3159_vm5, %v15279_v36, -inf }
 0x6ad   :  { %3521 = vadd.xlane.f32.xlu1 %v3520_v46  ;;  %11830 = vpow2.f32 %v3414_v18 }
 0x6ae   :  { %v15271_v0 = vpop.eup %11822 }
 0x6af   :  { %4677 = vmax.xlane.f32.xlu0 %v4676_v41  ;;  %v4772_v41 = vsel %vm3159_vm5, %v15246_v61, -inf  ;;  %19089 = vst [vmem:[#allocation175_spill] sm:$0xff] %v15271_v0 }
 0x6b0   :  { %v15252_v11 = vpop.xlane.xlu1 %3293 }
 0x6b1   :  { %19084 = vst [vmem:[#allocation170_spill] sm:$0xff] %v15252_v11  ;;  %4740 = vmax.xlane.f32.xlu1 %v4739_v31  ;;  %v3535_v11 = vsel %vm3159_vm5, %v15256_v33, 0.0  ;;  %v15275_v49 = vpop.eup %11824 }
 0x6b2   :  { %v15265_v4 = vpop.xlane.xlu0 %3296  ;;  %19090 = vst [vmem:[#allocation176_spill] sm:$0xff] %v15275_v49 }
 0x6b3   :  { %4773 = vmax.xlane.f32.xlu0 %v4772_v41  ;;  %19087 = vst [vmem:[#allocation173_spill] sm:$0xff] %v15265_v4  ;;  %v3529_v41 = vsel %vm3159_vm5, %v15271_v0, 0.0  ;;  %v15316_v0 = vadd.f32 %v15107_v20, %v15181_v25  ;;  %v15334_v25 = vadd.f32 %v15125_v51, %v15187_v10 }
 0x6b4   :  { %v15267_v46 = vpop.xlane.xlu1 %3287  ;;  %v15289_v57 = vpop.eup %11826 }
 0x6b5   :  { %19088 = vst [vmem:[#allocation174_spill] sm:$0xff] %v15267_v46  ;;  %3536 = vadd.xlane.f32.xlu1 %v3535_v11  ;;  %v3544_v11 = vsel %vm3159_vm5, %v15275_v49, 0.0  ;;  %19093 = vst [vmem:[#allocation179_spill] sm:$0xff] %v15289_v57  ;;  %v15306_v49 = vadd.f32 %v15055_v55, %v11136_v17  ;;  %v4673_v17 = vsel %vm3159_vm5, %v15295_v45, -inf  ;;  %v4769_v2 = vsel %vm3159_vm5, %v15334_v25, -inf }
 0x6b6   :  { %v15285_v4 = vpop.xlane.xlu0 %3233  ;;  %v15328_v48 = vpop.eup %11828 }
 0x6b7   :  { %4767 = vmax.xlane.f32.xlu0 %v4766_v53  ;;  %19095 = vst [vmem:[#allocation181_spill] sm:$0xff] %v15306_v49  ;;  %19097 = vst [vmem:[#allocation183_spill] sm:$0xff] %v15328_v48  ;;  %v3547_v45 = vsel %vm3159_vm5, %v15328_v48, 0.0 }
 0x6b8   :  { %v15281_v31 = vpop.xlane.xlu1 %3290 }
 0x6b9   :  { %19092 = vst [vmem:[#allocation178_spill] sm:$0xff] %v15281_v31  ;;  %3530 = vadd.xlane.f32.xlu1 %v3529_v41 }
 0x6ba   :  { %v15318_v13 = vpop.xlane.xlu0 %3227 }
 0x6bb   :  { %v15291_v46 = vpop.f32.mrb[124].mxu1  ;;  %3545 = vadd.xlane.f32.xlu0 %v3544_v11  ;;  %v3538_v11 = vsel %vm3159_vm5, %v15289_v57, 0.0  ;;  %v4784_v57 = vsel %vm3159_vm5, %v15306_v49, -inf }
 0x6bc   :  { %v15297_v53 = vpop.xlane.xlu1 %3230  ;;  %v15299_v31 = vpop.f32.mrb[125].mxu1 }
 0x6bd   :  { %v15303_v41 = vpop.f32.mrb[126].mxu1  ;;  %4680 = vmax.xlane.f32.xlu1 %v4679_v23  ;;  %v3348_v23 = vsub.f32 %v14709_v27, %v15207_v19  ;;  %v4775_v27 = vsel %vm3159_vm5, %v15316_v0, -inf }
 0x6be   :  { %v15308_v33 = vpop.f32.mrb[127].mxu1 }
 0x6bf   :  { %3539 = vadd.xlane.f32.xlu0 %v3538_v11  ;;  %v3424_v19 = vmul.f32 1.442695, %v3348_v23  ;;  %v3346_v23 = vsub.f32 %v14721_v62, %v15241_v12  ;;  %v4778_v62 = vsel %vm3159_vm5, %v15344_v43, -inf }
 0x6c0   :  { %v15320_v61 = vpop.xlane.xlu1 %3305 }
 0x6c1   :  { %19096 = vst [vmem:[#allocation182_spill] sm:$0xff] %v15320_v61  ;;  %4674 = vmax.xlane.f32.xlu1 %v4673_v17  ;;  %v3347_v17 = vsub.f32 %v14715_v30, %v15250_v28  ;;  %v15356_v30 = vadd.f32 %v15068_v44, %v15003_v47  ;;  %11832 = vpow2.f32 %v3424_v19  ;;  %v3420_v12 = vmul.f32 1.442695, %v3346_v23 }
 0x6c2   :  { %v15370_v47 = vadd.f32 %v15095_v5, %v15008_v58  ;;  %v15379_v19 = vadd.f32 %v15125_v51, %v15020_v8 }
 0x6c3   :  { %v15330_v11 = vpop.f32.mrb[128].mxu1  ;;  %4785 = vmax.xlane.f32.xlu0 %v4784_v57  ;;  %v15346_v57 = vpop.xlane.xlu0 %3302  ;;  %v3422_v28 = vmul.f32 1.442695, %v3347_v17  ;;  %v4709_v18 = vsel %vm3159_vm5, %v15356_v30, -inf }
 0x6c4   :  { %v3225_v61 = vpop.xlane.xlu1 %3224  ;;  %v15336_v36 = vpop.f32.mrb[129].mxu1  ;;  %19098 = vst [vmem:[#allocation184_spill] sm:$0xff] %v15346_v57 }
 0x6c5   :  { %v11153_v49 = vpop.f32.mrb[130].mxu1  ;;  %4776 = vmax.xlane.f32.xlu1 %v4775_v27  ;;  %11834 = vpow2.f32 %v3422_v28 }
 0x6c6   :  { %v15348_v10 = vpop.f32.mrb[131].mxu1  ;;  %v15362_v49 = vadd.f32 %v15107_v20, %v15012_v22  ;;  %v3349_v22 = vsub.f32 %v14796_v15, %v3225_v61  ;;  %11836 = vpow2.f32 %v3420_v12  ;;  %v4706_v15 = vsel %vm3159_vm5, %v15379_v19, -inf }
 0x6c7   :  { %3548 = vadd.xlane.f32.xlu0 %v3547_v45  ;;  %v15372_v45 = vpop.xlane.xlu0 %3242  ;;  %v3351_v61 = vsub.f32 %v14774_v26, %v15297_v53  ;;  %v15397_v12 = vadd.f32 %v15225_v54, %v15233_v3  ;;  %v3350_v3 = vsub.f32 %v14768_v40, %v15318_v13  ;;  %v15425_v40 = vadd.f32 %v15055_v55, %v15033_v29 }
 0x6c8   :  { %v15364_v27 = vpop.xlane.xlu1 %3299  ;;  %v4712_v17 = vsel %vm3159_vm5, %v15362_v49, -inf  ;;  %v3426_v28 = vmul.f32 1.442695, %v3349_v22  ;;  %v3352_v22 = vsub.f32 %v14757_v59, %v15285_v4  ;;  %v15419_v4 = vadd.f32 %v15225_v54, %v15047_v60 }
 0x6c9   :  { %4770 = vmax.xlane.f32.xlu1 %v4769_v2  ;;  %19099 = vst [vmem:[#allocation185_spill] sm:$0xff] %v15364_v27  ;;  %v4703_v2 = vsel %vm3159_vm5, %v15370_v47, -inf  ;;  %v4781_v57 = vsel %vm3159_vm5, %v15397_v12, -inf }
 0x6ca   :  { %11838 = vpow2.f32 %v3426_v28  ;;  %v3432_v59 = vmul.f32 1.442695, %v3352_v22  ;;  %v4718_v60 = vsel %vm3159_vm5, %v15419_v4, -inf }
 0x6cb   :  { %4779 = vmax.xlane.f32.xlu0 %v4778_v62  ;;  %v15387_v62 = vpop.eup %11830 }
 0x6cc   :  { %v15383_v58 = vpop.xlane.xlu1 %3236  ;;  %19100 = vst [vmem:[#allocation186_spill] sm:$0xff] %v15387_v62  ;;  %v15391_v8 = vpop.eup %11832 }
 0x6cd   :  { %4710 = vmax.xlane.f32.xlu1 %v4709_v18  ;;  %19101 = vst [vmem:[#allocation187_spill] sm:$0xff] %v15391_v8  ;;  %v3556_v26 = vsel %vm3159_vm5, %v15391_v8, 0.0 }
 0x6cf   :  { %4713 = vmax.xlane.f32.xlu0 %v4712_v17  ;;  %v3541_v17 = vsel %vm3159_vm5, %v15387_v62, 0.0  ;;  %v15409_v53 = vpop.eup %11834 }
 0x6d0   :  { %v4648_v23 = vpop.xlane.xlu0 %4647  ;;  %19102 = vst [vmem:[#allocation188_spill] sm:$0xff] %v15409_v53  ;;  %v15415_v48 = vpop.eup %11836  ;;  %v3553_v28 = vsel %vm3159_vm5, %v15409_v53, 0.0 }
 0x6d1   :  { %4704 = vmax.xlane.f32.xlu1 %v4703_v2  ;;  %v15405_v2 = vpop.xlane.xlu1 %3239  ;;  %19103 = vst [vmem:[#allocation189_spill] sm:$0xff] %v15415_v48  ;;  %v3550_v22 = vsel %vm3159_vm5, %v15415_v48, 0.0 }
 0x6d3   :  { %4707 = vmax.xlane.f32.xlu0 %v4706_v15  ;;  %v3430_v15 = vmul.f32 1.442695, %v3351_v61 }
 0x6d4   :  { %v15399_v18 = vpop.xlane.xlu0 %4641 }
 0x6d5   :  { %3542 = vadd.xlane.f32.xlu1 %v3541_v17  ;;  %v3428_v17 = vmul.f32 1.442695, %v3350_v3  ;;  %11840 = vpow2.f32 %v3430_v15  ;;  %v4645_v13 = vpop.xlane.xlu1 %4644  ;;  %v4721_v3 = vsel %vm3159_vm5, %v15425_v40, -inf  ;;  %v15443_v15 = vadd.f32 %v15068_v44, %v15153_v50 }
 0x6d6   :  { %11842 = vpow2.f32 %v3432_v59 }
 0x6d7   :  { %3557 = vadd.xlane.f32.xlu0 %v3556_v26  ;;  %11844 = vpow2.f32 %v3428_v17  ;;  %v15435_v26 = vadd.f32 %v15080_v7, %v15037_v21 }
 0x6d8   :  { %v4651_v27 = vpop.xlane.xlu0 %4650 }
 0x6d9   :  { %4782 = vmax.xlane.f32.xlu1 %v4781_v57  ;;  %v15431_v57 = vpop.eup %11838  ;;  %v15445_v59 = vpop.xlane.xlu1 %3275  ;;  %v4715_v21 = vsel %vm3159_vm5, %v15435_v26, -inf  ;;  %v4811_v53 = vsub.f32 %v14851_v16, %v4651_v27  ;;  %v19111_v27 = vld [vmem:[#allocation82_spill] sm:$0xff] }
 0x6da   :  { %19104 = vst [vmem:[#allocation190_spill] sm:$0xff] %v15431_v57  ;;  %19106 = vst [vmem:[#allocation192_spill] sm:$0xff] %v15445_v59 }
 0x6db   :  { %3554 = vadd.xlane.f32.xlu0 %v3553_v28  ;;  %v3559_v28 = vsel %vm3159_vm5, %v15431_v57, 0.0 }
 0x6dc   :  { %v4660_v61 = vpop.xlane.xlu0 %4659 }
 0x6dd   :  { %3551 = vadd.xlane.f32.xlu1 %v3550_v22  ;;  %v4657_v8 = vpop.xlane.xlu1 %4656 }
 0x6df   :  { %4719 = vmax.xlane.f32.xlu0 %v4718_v60  ;;  %v15451_v22 = vpop.eup %11840  ;;  %v4810_v60 = vsub.f32 %v14828_v6, %v4648_v23  ;;  %v4808_v6 = vsub.f32 %v14831_v42, %v15399_v18  ;;  %v15469_v23 = vadd.f32 %v15095_v5, %v15159_v63  ;;  %v19113_v63 = vld [vmem:[#allocation124_spill] sm:$0xff] }
 0x6e0   :  { %v15437_v29 = vpop.xlane.xlu0 %3272  ;;  %19107 = vst [vmem:[#allocation193_spill] sm:$0xff] %v15451_v22  ;;  %v15456_v50 = vpop.eup %11842 }
 0x6e1   :  { %19105 = vst [vmem:[#allocation191_spill] sm:$0xff] %v15437_v29  ;;  %4722 = vmax.xlane.f32.xlu1 %v4721_v3  ;;  %v4751_v3 = vsel %vm3159_vm5, %v15443_v15, -inf  ;;  %19108 = vst [vmem:[#allocation194_spill] sm:$0xff] %v15456_v50  ;;  %v15463_v48 = vpop.eup %11844  ;;  %v4868_v59 = vmul.f32 1.442695, %v4810_v60  ;;  %v3568_v16 = vsel %vm3159_vm5, %v15456_v50, 0.0  ;;  %v15485_v50 = vadd.f32 %v15055_v55, %v15193_v39 }
 0x6e2   :  { %19110 = vst [vmem:[#allocation196_spill] sm:$0xff] %v15463_v48  ;;  %v3562_v42 = vsel %vm3159_vm5, %v15463_v48, 0.0  ;;  %v4864_v18 = vmul.f32 1.442695, %v4808_v6  ;;  %v19116_v6 = vld [vmem:[#allocation129_spill] sm:$0xff] }
 0x6e3   :  { %3560 = vadd.xlane.f32.xlu0 %v3559_v28  ;;  %v3565_v28 = vsel %vm3159_vm5, %v15451_v22, 0.0  ;;  %v15476_v22 = vadd.f32 %v15107_v20, %v15163_v34  ;;  %11846 = vpow2.f32 %v4868_v59  ;;  %v4745_v34 = vsel %vm3159_vm5, %v15469_v23, -inf }
 0x6e4   :  { %v4654_v17 = vpop.xlane.xlu0 %4653 }
 0x6e5   :  { %4716 = vmax.xlane.f32.xlu1 %v4715_v21  ;;  %v4809_v21 = vsub.f32 %v19111_v27, %v4645_v13  ;;  %v4812_v27 = vsub.f32 %v19116_v6, %v4654_v17 }
 0x6e7   :  { %4752 = vmax.xlane.f32.xlu0 %v4751_v3  ;;  %v4870_v3 = vmul.f32 1.442695, %v4811_v53  ;;  %v15487_v53 = vpop.xlane.xlu1 %3284  ;;  %v4866_v13 = vmul.f32 1.442695, %v4809_v21 }
 0x6e8   :  { %v15459_v57 = vpop.xlane.xlu0 %3266  ;;  %19114 = vst [vmem:[#allocation124_spill] sm:$0xff] %v15487_v53 }
 0x6e9   :  { %19109 = vst [vmem:[#allocation195_spill] sm:$0xff] %v15459_v57  ;;  %3566 = vadd.xlane.f32.xlu1 %v3565_v28  ;;  %v4814_v28 = vsub.f32 %v19113_v63, %v4660_v61  ;;  %11848 = vpow2.f32 %v4870_v3  ;;  %v4754_v61 = vsel %vm3159_vm5, %v15476_v22, -inf  ;;  %v19117_v3 = vld [vmem:[#allocation125_spill] sm:$0xff] }
 0x6ea   :  { %11850 = vpow2.f32 %v4864_v18  ;;  %v4813_v63 = vsub.f32 %v19117_v3, %v4657_v8  ;;  %v15511_v18 = vadd.f32 %v15225_v54, %v15209_v32 }
 0x6eb   :  { %3569 = vadd.xlane.f32.xlu0 %v3568_v16  ;;  %v15493_v16 = vadd.f32 %v15125_v51, %v15169_v52  ;;  %v4876_v39 = vmul.f32 1.442695, %v4814_v28  ;;  %v4763_v52 = vsel %vm3159_vm5, %v15485_v50, -inf  ;;  %11852 = vpow2.f32 %v4866_v13 }
 0x6ec   :  { %v15478_v60 = vpop.xlane.xlu0 %3269  ;;  %v4874_v8 = vmul.f32 1.442695, %v4813_v63  ;;  %v4760_v32 = vsel %vm3159_vm5, %v15511_v18, -inf }
 0x6ed   :  { %19112 = vst [vmem:[#allocation82_spill] sm:$0xff] %v15478_v60  ;;  %3563 = vadd.xlane.f32.xlu1 %v3562_v42  ;;  %v15502_v42 = vadd.f32 %v15080_v7, %v15201_v1  ;;  %v4748_v17 = vsel %vm3159_vm5, %v15493_v16, -inf  ;;  %11854 = vpow2.f32 %v4876_v39  ;;  %v4872_v1 = vmul.f32 1.442695, %v4812_v27  ;;  %v15519_v13 = vpop.eup %11846  ;;  %v19121_v60 = vld [vmem:[#allocation133_spill] sm:$0xff] }
 0x6ee   :  { %v4982_v39 = vsel %vm3159_vm5, %v15519_v13, 0.0 }
 0x6ef   :  { %4746 = vmax.xlane.f32.xlu0 %v4745_v34  ;;  %11856 = vpow2.f32 %v4872_v1 }
 0x6f0   :  { %v15495_v59 = vpop.xlane.xlu0 %3278  ;;  %11858 = vpow2.f32 %v4874_v8 }
 0x6f1   :  { %19115 = vst [vmem:[#allocation197_spill] sm:$0xff] %v15495_v59  ;;  %4755 = vmax.xlane.f32.xlu1 %v4754_v61  ;;  %v4757_v61 = vsel %vm3159_vm5, %v15502_v42, -inf  ;;  %v15543_v59 = vadd.f32 %v15068_v44, %v15291_v46 }
 0x6f2   :  { %v15504_v21 = vpop.xlane.xlu1 %4692 }
 0x6f3   :  { %4764 = vmax.xlane.f32.xlu0 %v4763_v52  ;;  %v15523_v52 = vpop.eup %11848  ;;  %v4793_v44 = vsel %vm3159_vm5, %v15543_v59, -inf }
 0x6f4   :  { %v15513_v28 = vpop.xlane.xlu0 %3281  ;;  %v15529_v27 = vpop.eup %11850  ;;  %v4985_v63 = vsel %vm3159_vm5, %v15523_v52, 0.0 }
 0x6f5   :  { %19118 = vst [vmem:[#allocation129_spill] sm:$0xff] %v15513_v28  ;;  %4749 = vmax.xlane.f32.xlu1 %v4748_v17  ;;  %v4976_v1 = vsel %vm3159_vm5, %v15529_v27, 0.0 }
 0x6f6   :  { %v4687_v34 = vpop.xlane.xlu1 %4686 }
 0x6f7   :  { %4758 = vmax.xlane.f32.xlu0 %v4757_v61  ;;  %v15533_v61 = vpop.eup %11852 }
 0x6f8   :  { %v4690_v6 = vpop.xlane.xlu0 %4689 }
 0x6f9   :  { %4761 = vmax.xlane.f32.xlu1 %v4760_v32  ;;  %v15539_v32 = vpop.eup %11854 }
 0x6fa   :  { %v15525_v3 = vpop.xlane.xlu1 %3503  ;;  %v4994_v28 = vsel %vm3159_vm5, %v15539_v32, 0.0  ;;  %v15552_v57 = vpop.eup %11856 }
 0x6fb   :  { %19119 = vst [vmem:[#allocation125_spill] sm:$0xff] %v15525_v3  ;;  %4983 = vadd.xlane.f32.xlu0 %v4982_v39  ;;  %v4979_v39 = vsel %vm3159_vm5, %v15533_v61, 0.0  ;;  %v15559_v46 = vpop.eup %11858  ;;  %v15574_v3 = vadd.f32 %v15125_v51, %v15308_v33  ;;  %v15589_v33 = vadd.f32 %v15055_v55, %v15330_v11  ;;  %v19125_v55 = vld [vmem:[#allocation140_spill] sm:$0xff] }
 0x6fc   :  { %v4684_v17 = vpop.xlane.xlu0 %4683 }
 0x6fd   :  { %4986 = vadd.xlane.f32.xlu1 %v4985_v63  ;;  %v4822_v53 = vsub.f32 %v14952_v35, %v4684_v17  ;;  %v4823_v35 = vsub.f32 %v19121_v60, %v4687_v34  ;;  %v15581_v34 = vadd.f32 %v15107_v20, %v15303_v41 }
 0x6fe   :  { %v15535_v48 = vpop.xlane.xlu1 %3497 }
 0x6ff   :  { %4977 = vadd.xlane.f32.xlu0 %v4976_v1  ;;  %v4824_v1 = vsub.f32 %v14940_v14, %v4690_v6  ;;  %v4892_v17 = vmul.f32 1.442695, %v4822_v53  ;;  %v4988_v14 = vsel %vm3159_vm5, %v15552_v57, 0.0  ;;  %v4991_v53 = vsel %vm3159_vm5, %v15559_v46, 0.0 }
 0x700   :  { %v4702_v8 = vpop.xlane.xlu0 %4701 }
 0x701   :  { %4980 = vadd.xlane.f32.xlu1 %v4979_v39  ;;  %v15564_v39 = vadd.f32 %v15095_v5, %v15299_v31  ;;  %v4896_v62 = vmul.f32 1.442695, %v4824_v1  ;;  %v4894_v5 = vmul.f32 1.442695, %v4823_v35  ;;  %11860 = vpow2.f32 %v4892_v17 }
 0x702   :  { %v15548_v63 = vpop.xlane.xlu1 %3314  ;;  %v4828_v31 = vsub.f32 %v14961_v24, %v4702_v8  ;;  %v4790_v24 = vsel %vm3159_vm5, %v15574_v3, -inf  ;;  %v15598_v8 = vadd.f32 %v15225_v54, %v15348_v10  ;;  %v4796_v35 = vsel %vm3159_vm5, %v15581_v34, -inf }
 0x703   :  { %19120 = vst [vmem:[#allocation198_spill] sm:$0xff] %v15548_v63  ;;  %4995 = vadd.xlane.f32.xlu0 %v4994_v28  ;;  %v19123_v28 = vld [vmem:[#allocation132_spill] sm:$0xff]  ;;  %v4787_v1 = vsel %vm3159_vm5, %v15564_v39, -inf  ;;  %11862 = vpow2.f32 %v4896_v62  ;;  %v15605_v17 = vadd.f32 %v15080_v7, %v15336_v36 }
 0x704   :  { %v15555_v29 = vpop.xlane.xlu0 %3506  ;;  %v4825_v6 = vsub.f32 %v19123_v28, %v15504_v21  ;;  %11864 = vpow2.f32 %v4894_v5  ;;  %v4904_v20 = vmul.f32 1.442695, %v4828_v31 }
 0x705   :  { %4794 = vmax.xlane.f32.xlu1 %v4793_v44  ;;  %v4799_v36 = vsel %vm3159_vm5, %v15605_v17, -inf }
 0x706   :  { %v15566_v63 = vpop.xlane.xlu1 %3308  ;;  %v4898_v51 = vmul.f32 1.442695, %v4825_v6  ;;  %v4802_v6 = vsel %vm3159_vm5, %v15598_v8, -inf }
 0x707   :  { %19122 = vst [vmem:[#allocation133_spill] sm:$0xff] %v15566_v63  ;;  %4989 = vadd.xlane.f32.xlu0 %v4988_v14 }
 0x708   :  { %v4696_v60 = vpop.xlane.xlu0 %4695  ;;  %11866 = vpow2.f32 %v4898_v51 }
 0x709   :  { %4992 = vadd.xlane.f32.xlu1 %v4991_v53  ;;  %v4826_v41 = vsub.f32 %v14987_v56, %v4696_v60  ;;  %v4805_v56 = vsel %vm3159_vm5, %v15589_v33, -inf  ;;  %11868 = vpow2.f32 %v4904_v20 }
 0x70a   :  { %v15583_v21 = vpop.xlane.xlu1 %3317 }
 0x70b   :  { %19124 = vst [vmem:[#allocation132_spill] sm:$0xff] %v15583_v21  ;;  %4788 = vmax.xlane.f32.xlu0 %v4787_v1  ;;  %v4900_v54 = vmul.f32 1.442695, %v4826_v41  ;;  %v15615_v60 = vpop.eup %11860 }
 0x70c   :  { %v15591_v44 = vpop.xlane.xlu0 %3500  ;;  %v5018_v31 = vsel %vm3159_vm5, %v15615_v60, 0.0 }
 0x70d   :  { %4791 = vmax.xlane.f32.xlu1 %v4790_v24  ;;  %v15621_v53 = vpop.eup %11862 }
 0x70e   :  { %v4699_v62 = vpop.xlane.xlu1 %4698  ;;  %19129 = vst [vmem:[#allocation201_spill] sm:$0xff] %v15621_v53  ;;  %v15627_v1 = vpop.eup %11864  ;;  %v5024_v24 = vsel %vm3159_vm5, %v15621_v53, 0.0 }
 0x70f   :  { %v4827_v11 = vsub.f32 %v19125_v55, %v4699_v62  ;;  %4797 = vmax.xlane.f32.xlu0 %v4796_v35  ;;  %v5021_v62 = vsel %vm3159_vm5, %v15627_v1, 0.0 }
 0x710   :  { %v15607_v14 = vpop.xlane.xlu0 %3311 }
 0x711   :  { %19126 = vst [vmem:[#allocation140_spill] sm:$0xff] %v15607_v14  ;;  %v4902_v10 = vmul.f32 1.442695, %v4827_v11  ;;  %4806 = vmax.xlane.f32.xlu1 %v4805_v56 }
 0x712   :  { %v15611_v28 = vpop.xlane.xlu1 %3515  ;;  %v15633_v20 = vpop.eup %11866 }
 0x713   :  { %19127 = vst [vmem:[#allocation199_spill] sm:$0xff] %v15611_v28  ;;  %11870 = vpow2.f32 %v4902_v10  ;;  %4803 = vmax.xlane.f32.xlu0 %v4802_v6  ;;  %19132 = vst [vmem:[#allocation204_spill] sm:$0xff] %v15633_v20  ;;  %v15639_v35 = vpop.eup %11868  ;;  %v5027_v11 = vsel %vm3159_vm5, %v15633_v20, 0.0  ;;  %v19166_v28 = vld [vmem:[#allocation180_spill] sm:$0xff] }
 0x714   :  { %v15617_v7 = vpop.xlane.xlu0 %3512  ;;  %11872 = vpow2.f32 %v4900_v54  ;;  %19134 = vst [vmem:[#allocation206_spill] sm:$0xff] %v15639_v35  ;;  %v19136_v54 = vld [vmem:[#allocation148_spill] sm:$0xff] }
 0x715   :  { %19128 = vst [vmem:[#allocation200_spill] sm:$0xff] %v15617_v7  ;;  %4800 = vmax.xlane.f32.xlu1 %v4799_v36  ;;  %v5036_v36 = vsel %vm3159_vm5, %v15639_v35, 0.0  ;;  %v19142_v35 = vld [vmem:[#allocation156_spill] sm:$0xff] }
 0x716   :  { %v15623_v5 = vpop.xlane.xlu1 %3509 }
 0x717   :  { %19130 = vst [vmem:[#allocation202_spill] sm:$0xff] %v15623_v5  ;;  %5019 = vadd.xlane.f32.xlu0 %v5018_v31 }
 0x718   :  { %v15629_v51 = vpop.xlane.xlu0 %3323 }
 0x719   :  { %19131 = vst [vmem:[#allocation203_spill] sm:$0xff] %v15629_v51  ;;  %5025 = vadd.xlane.f32.xlu1 %v5024_v24  ;;  %v19139_v51 = vld [vmem:[#allocation152_spill] sm:$0xff] }
 0x71a   :  { %v15635_v41 = vpop.xlane.xlu1 %3326 }
 0x71b   :  { %19133 = vst [vmem:[#allocation205_spill] sm:$0xff] %v15635_v41  ;;  %5022 = vadd.xlane.f32.xlu0 %v5021_v62 }
 0x71c   :  { %v4732_v55 = vpop.xlane.xlu0 %4731 }
 0x71d   :  { %v15643_v56 = vpop.eup %11870  ;;  %v4838_v10 = vsub.f32 %v19136_v54, %v4732_v55  ;;  %5028 = vadd.xlane.f32.xlu1 %v5027_v11  ;;  %v19140_v54 = vld [vmem:[#allocation153_spill] sm:$0xff] }
 0x71e   :  { %19135 = vst [vmem:[#allocation207_spill] sm:$0xff] %v15643_v56  ;;  %v15646_v6 = vpop.xlane.xlu1 %3320  ;;  %v15650_v31 = vpop.eup %11872  ;;  %v5033_v62 = vsel %vm3159_vm5, %v15643_v56, 0.0 }
 0x71f   :  { %19137 = vst [vmem:[#allocation148_spill] sm:$0xff] %v15646_v6  ;;  %19138 = vst [vmem:[#allocation208_spill] sm:$0xff] %v15650_v31  ;;  %v4924_v24 = vmul.f32 1.442695, %v4838_v10  ;;  %5037 = vadd.xlane.f32.xlu0 %v5036_v36  ;;  %v5030_v55 = vsel %vm3159_vm5, %v15650_v31, 0.0 }
 0x720   :  { %v4726_v41 = vpop.xlane.xlu0 %4725 }
 0x721   :  { %11874 = vpow2.f32 %v4924_v24  ;;  %v4836_v21 = vsub.f32 %v19139_v51, %v4726_v41  ;;  %5034 = vadd.xlane.f32.xlu1 %v5033_v62 }
 0x722   :  { %v4735_v63 = vpop.xlane.xlu1 %4734 }
 0x723   :  { %v4920_v11 = vmul.f32 1.442695, %v4836_v21  ;;  %v4839_v6 = vsub.f32 %v19140_v54, %v4735_v63  ;;  %5031 = vadd.xlane.f32.xlu0 %v5030_v55  ;;  %v19145_v21 = vld [vmem:[#allocation157_spill] sm:$0xff] }
 0x724   :  { %v15658_v14 = vpop.xlane.xlu0 %3524  ;;  %v19147_v54 = vld [vmem:[#allocation161_spill] sm:$0xff] }
 0x725   :  { %19141 = vst [vmem:[#allocation152_spill] sm:$0xff] %v15658_v14  ;;  %11876 = vpow2.f32 %v4920_v11  ;;  %v4926_v10 = vmul.f32 1.442695, %v4839_v6  ;;  %v19149_v14 = vld [vmem:[#allocation162_spill] sm:$0xff] }
 0x726   :  { %v4729_v36 = vpop.xlane.xlu1 %4728 }
 0x727   :  { %11878 = vpow2.f32 %v4926_v10  ;;  %v4837_v56 = vsub.f32 %v19142_v35, %v4729_v36 }
 0x728   :  { %v4744_v24 = vpop.xlane.xlu0 %4743 }
 0x729   :  { %v4922_v53 = vmul.f32 1.442695, %v4837_v56  ;;  %v4842_v55 = vsub.f32 %v19145_v21, %v4744_v24 }
 0x72a   :  { %v15661_v51 = vpop.xlane.xlu1 %3518 }
 0x72b   :  { %19143 = vst [vmem:[#allocation153_spill] sm:$0xff] %v15661_v51  ;;  %v15663_v41 = vpop.eup %11874  ;;  %11880 = vpow2.f32 %v4922_v53  ;;  %v4932_v31 = vmul.f32 1.442695, %v4842_v55  ;;  %v19153_v51 = vld [vmem:[#allocation164_spill] sm:$0xff] }
 0x72c   :  { %19144 = vst [vmem:[#allocation156_spill] sm:$0xff] %v15663_v41  ;;  %v4738_v62 = vpop.xlane.xlu0 %4737  ;;  %v5066_v63 = vsel %vm3159_vm5, %v15663_v41, 0.0 }
 0x72d   :  { %5067 = vadd.xlane.f32.xlu1 %v5066_v63  ;;  %v19151_v63 = vld [vmem:[#allocation160_spill] sm:$0xff] }
 0x72e   :  { %v4669_v11 = vpop.xlane.xlu1 %4668  ;;  %v4840_v21 = vsub.f32 %v19151_v63, %v4738_v62 }
 0x72f   :  { %v15668_v6 = vpop.eup %11876  ;;  %v4817_v10 = vsub.f32 %v19147_v54, %v4669_v11 }
 0x730   :  { %19146 = vst [vmem:[#allocation157_spill] sm:$0xff] %v15668_v6  ;;  %v4672_v35 = vpop.xlane.xlu0 %4671  ;;  %v5060_v56 = vsel %vm3159_vm5, %v15668_v6, 0.0 }
 0x731   :  { %v15673_v36 = vpop.eup %11878  ;;  %v4882_v53 = vmul.f32 1.442695, %v4817_v10  ;;  %v4818_v20 = vsub.f32 %v19149_v14, %v4672_v35  ;;  %5061 = vadd.xlane.f32.xlu1 %v5060_v56  ;;  %v4928_v56 = vmul.f32 1.442695, %v4840_v21 }
 0x732   :  { %19148 = vst [vmem:[#allocation161_spill] sm:$0xff] %v15673_v36  ;;  %v15676_v41 = vpop.xlane.xlu1 %3527  ;;  %v5069_v24 = vsel %vm3159_vm5, %v15673_v36, 0.0 }
 0x733   :  { %19150 = vst [vmem:[#allocation162_spill] sm:$0xff] %v15676_v41  ;;  %11882 = vpow2.f32 %v4882_v53  ;;  %5070 = vadd.xlane.f32.xlu0 %v5069_v24  ;;  %v4884_v6 = vmul.f32 1.442695, %v4818_v20 }
 0x734   :  { %v4666_v11 = vpop.xlane.xlu0 %4665  ;;  %11884 = vpow2.f32 %v4932_v31 }
 0x735   :  { %v15681_v54 = vpop.eup %11880  ;;  %v4816_v55 = vsub.f32 %v19153_v51, %v4666_v11  ;;  %11886 = vpow2.f32 %v4884_v6 }
 0x736   :  { %19152 = vst [vmem:[#allocation160_spill] sm:$0xff] %v15681_v54  ;;  %v4663_v10 = vpop.xlane.xlu1 %4662  ;;  %v5063_v14 = vsel %vm3159_vm5, %v15681_v54, 0.0 }
 0x737   :  { %v4815_v35 = vsub.f32 %v15197_v9, %v4663_v10  ;;  %5064 = vadd.xlane.f32.xlu0 %v5063_v14  ;;  %v4880_v53 = vmul.f32 1.442695, %v4816_v55 }
 0x738   :  { %v15687_v36 = vpop.xlane.xlu0 %3533 }
 0x739   :  { %19154 = vst [vmem:[#allocation164_spill] sm:$0xff] %v15687_v36  ;;  %v4878_v62 = vmul.f32 1.442695, %v4815_v35  ;;  %v19161_v36 = vld [vmem:[#allocation177_spill] sm:$0xff] }
 0x73a   :  { %v15689_v24 = vpop.xlane.xlu1 %3521 }
 0x73b   :  { %19155 = vst [vmem:[#allocation209_spill] sm:$0xff] %v15689_v24  ;;  %11888 = vpow2.f32 %v4878_v62 }
 0x73c   :  { %11890 = vpow2.f32 %v4928_v56  ;;  %v4678_v20 = vpop.xlane.xlu0 %4677 }
 0x73d   :  { %v15691_v31 = vpop.eup %11882  ;;  %11892 = vpow2.f32 %v4880_v53 }
 0x73e   :  { %v4741_v51 = vpop.xlane.xlu1 %4740  ;;  %v5003_v63 = vsel %vm3159_vm5, %v15691_v31, 0.0  ;;  %v15695_v9 = vpop.eup %11884 }
 0x73f   :  { %19156 = vst [vmem:[#allocation210_spill] sm:$0xff] %v15695_v9  ;;  %v4841_v21 = vsub.f32 %v15239_v37, %v4741_v51  ;;  %5004 = vadd.xlane.f32.xlu0 %v5003_v63  ;;  %v5078_v10 = vsel %vm3159_vm5, %v15695_v9, 0.0  ;;  %v15702_v14 = vpop.eup %11886 }
 0x740   :  { %v4774_v6 = vpop.xlane.xlu0 %4773  ;;  %v5006_v51 = vsel %vm3159_vm5, %v15702_v14, 0.0 }
 0x741   :  { %v4930_v11 = vmul.f32 1.442695, %v4841_v21 }
 0x742   :  { %v15698_v55 = vpop.xlane.xlu1 %3536 }
 0x743   :  { %19157 = vst [vmem:[#allocation211_spill] sm:$0xff] %v15698_v55  ;;  %11894 = vpow2.f32 %v4930_v11  ;;  %5079 = vadd.xlane.f32.xlu0 %v5078_v10  ;;  %v4820_v11 = vsub.f32 %v15229_v38, %v4678_v20 }
 0x744   :  { %v4768_v35 = vpop.xlane.xlu0 %4767 }
 0x745   :  { %v15704_v56 = vpop.eup %11888 }
 0x746   :  { %v15706_v53 = vpop.eup %11890  ;;  %v15708_v62 = vpop.xlane.xlu1 %3530  ;;  %v4997_v37 = vsel %vm3159_vm5, %v15704_v56, 0.0 }
 0x747   :  { %19158 = vst [vmem:[#allocation212_spill] sm:$0xff] %v15706_v53  ;;  %19159 = vst [vmem:[#allocation213_spill] sm:$0xff] %v15708_v62  ;;  %v15714_v63 = vpop.eup %11892  ;;  %4998 = vadd.xlane.f32.xlu1 %v4997_v37  ;;  %5007 = vadd.xlane.f32.xlu0 %v5006_v51  ;;  %v5072_v9 = vsel %vm3159_vm5, %v15706_v53, 0.0  ;;  %v19162_v62 = vld [vmem:[#allocation169_spill] sm:$0xff]  ;;  %v4888_v51 = vmul.f32 1.442695, %v4820_v11 }
 0x748   :  { %v15716_v21 = vpop.xlane.xlu0 %3545  ;;  %v5000_v54 = vsel %vm3159_vm5, %v15714_v63, 0.0  ;;  %v4852_v41 = vsub.f32 %v19162_v62, %v4774_v6  ;;  %v19167_v62 = vld [vmem:[#allocation181_spill] sm:$0xff] }
 0x749   :  { %19160 = vst [vmem:[#allocation214_spill] sm:$0xff] %v15716_v21  ;;  %v19165_v21 = vld [vmem:[#allocation172_spill] sm:$0xff] }
 0x74a   :  { %v4681_v10 = vpop.xlane.xlu1 %4680  ;;  %v4850_v38 = vsub.f32 %v19165_v21, %v4768_v35 }
 0x74b   :  { %v4821_v55 = vsub.f32 %v19161_v36, %v4681_v10  ;;  %5073 = vadd.xlane.f32.xlu1 %v5072_v9  ;;  %5001 = vadd.xlane.f32.xlu0 %v5000_v54  ;;  %v4952_v36 = vmul.f32 1.442695, %v4852_v41 }
 0x74c   :  { %v15725_v24 = vpop.xlane.xlu0 %3539  ;;  %v4948_v9 = vmul.f32 1.442695, %v4850_v38 }
 0x74d   :  { %19163 = vst [vmem:[#allocation177_spill] sm:$0xff] %v15725_v24  ;;  %v15727_v37 = vpop.eup %11894  ;;  %v4890_v20 = vmul.f32 1.442695, %v4821_v55 }
 0x74e   :  { %19164 = vst [vmem:[#allocation169_spill] sm:$0xff] %v15727_v37  ;;  %v4675_v7 = vpop.xlane.xlu1 %4674  ;;  %v5075_v53 = vsel %vm3159_vm5, %v15727_v37, 0.0 }
 0x74f   :  { %11896 = vpow2.f32 %v4890_v20  ;;  %v4819_v5 = vsub.f32 %v19166_v28, %v4675_v7  ;;  %5076 = vadd.xlane.f32.xlu0 %v5075_v53 }
 0x750   :  { %v4786_v54 = vpop.xlane.xlu0 %4785  ;;  %11898 = vpow2.f32 %v4888_v51 }
 0x751   :  { %v4886_v6 = vmul.f32 1.442695, %v4819_v5  ;;  %v4856_v10 = vsub.f32 %v19167_v62, %v4786_v54 }
 0x752   :  { %v4777_v24 = vpop.xlane.xlu1 %4776 }
 0x753   :  { %11900 = vpow2.f32 %v4886_v6  ;;  %v4853_v35 = vsub.f32 %v15316_v0, %v4777_v24  ;;  %v4960_v55 = vmul.f32 1.442695, %v4856_v10 }
 0x754   :  { %11902 = vpow2.f32 %v4952_v36  ;;  %v15735_v21 = vpop.xlane.xlu0 %3548 }
 0x755   :  { %11904 = vpow2.f32 %v4948_v9  ;;  %v4954_v11 = vmul.f32 1.442695, %v4853_v35 }
 0x756   :  { %v4771_v20 = vpop.xlane.xlu1 %4770  ;;  %11906 = vpow2.f32 %v4960_v55 }
 0x757   :  { %v4851_v28 = vsub.f32 %v15334_v25, %v4771_v20  ;;  %11908 = vpow2.f32 %v4954_v11 }
 0x758   :  { %v4780_v7 = vpop.xlane.xlu0 %4779 }
 0x759   :  { %v15738_v41 = vpop.eup %11896  ;;  %v4950_v5 = vmul.f32 1.442695, %v4851_v28  ;;  %v4854_v38 = vsub.f32 %v15344_v43, %v4780_v7 }
 0x75a   :  { %v4711_v53 = vpop.xlane.xlu1 %4710  ;;  %v5015_v51 = vsel %vm3159_vm5, %v15738_v41, 0.0  ;;  %v15742_v0 = vpop.eup %11898 }
 0x75b   :  { %v4831_v24 = vsub.f32 %v15356_v30, %v4711_v53  ;;  %5016 = vadd.xlane.f32.xlu1 %v5015_v51  ;;  %11910 = vpow2.f32 %v4950_v5  ;;  %v5012_v35 = vsel %vm3159_vm5, %v15742_v0, 0.0  ;;  %v4956_v55 = vmul.f32 1.442695, %v4854_v38 }
 0x75c   :  { %v4714_v36 = vpop.xlane.xlu0 %4713 }
 0x75d   :  { %v15746_v54 = vpop.eup %11900  ;;  %v4910_v25 = vmul.f32 1.442695, %v4831_v24  ;;  %v4832_v9 = vsub.f32 %v15362_v49, %v4714_v36 }
 0x75e   :  { %v15749_v6 = vpop.eup %11902  ;;  %v4705_v62 = vpop.xlane.xlu1 %4704  ;;  %v5009_v10 = vsel %vm3159_vm5, %v15746_v54, 0.0 }
 0x75f   :  { %19168 = vst [vmem:[#allocation172_spill] sm:$0xff] %v15749_v6  ;;  %v15755_v30 = vpop.eup %11904  ;;  %v4829_v43 = vsub.f32 %v15370_v47, %v4705_v62  ;;  %5010 = vadd.xlane.f32.xlu0 %v5009_v10  ;;  %5013 = vadd.xlane.f32.xlu1 %v5012_v35  ;;  %11912 = vpow2.f32 %v4910_v25  ;;  %v4912_v20 = vmul.f32 1.442695, %v4832_v9  ;;  %v5108_v53 = vsel %vm3159_vm5, %v15749_v6, 0.0 }
 0x760   :  { %19169 = vst [vmem:[#allocation180_spill] sm:$0xff] %v15755_v30  ;;  %v4708_v11 = vpop.xlane.xlu0 %4707  ;;  %v15759_v7 = vpop.eup %11906  ;;  %v5102_v51 = vsel %vm3159_vm5, %v15755_v30, 0.0 }
 0x761   :  { %v4906_v49 = vmul.f32 1.442695, %v4829_v43  ;;  %v4830_v28 = vsub.f32 %v15379_v19, %v4708_v11  ;;  %19170 = vst [vmem:[#allocation181_spill] sm:$0xff] %v15759_v7  ;;  %v15767_v47 = vpop.eup %11908  ;;  %v5120_v25 = vsel %vm3159_vm5, %v15759_v7, 0.0 }
 0x762   :  { %v15761_v5 = vpop.xlane.xlu1 %3542  ;;  %19171 = vst [vmem:[#allocation215_spill] sm:$0xff] %v15767_v47  ;;  %v5111_v36 = vsel %vm3159_vm5, %v15767_v47, 0.0 }
 0x763   :  { %11914 = vpow2.f32 %v4906_v49  ;;  %5109 = vadd.xlane.f32.xlu1 %v5108_v53  ;;  %5103 = vadd.xlane.f32.xlu0 %v5102_v51  ;;  %v4908_v19 = vmul.f32 1.442695, %v4830_v28 }
 0x764   :  { %11916 = vpow2.f32 %v4956_v55  ;;  %v15769_v24 = vpop.xlane.xlu0 %3557 }
 0x765   :  { %11918 = vpow2.f32 %v4912_v20  ;;  %v15775_v9 = vpop.eup %11910 }
 0x766   :  { %v4783_v38 = vpop.xlane.xlu1 %4782  ;;  %19172 = vst [vmem:[#allocation216_spill] sm:$0xff] %v15775_v9  ;;  %11920 = vpow2.f32 %v4908_v19  ;;  %v5105_v55 = vsel %vm3159_vm5, %v15775_v9, 0.0 }
 0x767   :  { %v4855_v62 = vsub.f32 %v15397_v12, %v4783_v38  ;;  %5112 = vadd.xlane.f32.xlu1 %v5111_v36  ;;  %5121 = vadd.xlane.f32.xlu0 %v5120_v25 }
 0x768   :  { %v15778_v10 = vpop.xlane.xlu0 %3554 }
 0x769   :  { %v4958_v35 = vmul.f32 1.442695, %v4855_v62  ;;  %v15784_v11 = vpop.eup %11912 }
 0x76a   :  { %v15780_v43 = vpop.xlane.xlu1 %3551  ;;  %v5045_v51 = vsel %vm3159_vm5, %v15784_v11, 0.0 }
 0x76b   :  { %5106 = vadd.xlane.f32.xlu1 %v5105_v55  ;;  %11922 = vpow2.f32 %v4958_v35 }
 0x76c   :  { %v4720_v20 = vpop.xlane.xlu0 %4719 }
 0x76d   :  { %v15786_v49 = vpop.eup %11914  ;;  %v4834_v12 = vsub.f32 %v15419_v4, %v4720_v20 }
 0x76e   :  { %v15789_v28 = vpop.eup %11916  ;;  %v4723_v53 = vpop.xlane.xlu1 %4722  ;;  %v5039_v19 = vsel %vm3159_vm5, %v15786_v49, 0.0 }
 0x76f   :  { %19173 = vst [vmem:[#allocation217_spill] sm:$0xff] %v15789_v28  ;;  %v15795_v38 = vpop.eup %11918  ;;  %v4835_v36 = vsub.f32 %v15425_v40, %v4723_v53  ;;  %5046 = vadd.xlane.f32.xlu1 %v5045_v51  ;;  %5040 = vadd.xlane.f32.xlu0 %v5039_v19  ;;  %v4916_v62 = vmul.f32 1.442695, %v4834_v12  ;;  %v5114_v55 = vsel %vm3159_vm5, %v15789_v28, 0.0 }
 0x770   :  { %v15798_v25 = vpop.xlane.xlu0 %3560  ;;  %v5048_v20 = vsel %vm3159_vm5, %v15795_v38, 0.0  ;;  %v15804_v30 = vpop.eup %11920 }
 0x771   :  { %v4918_v35 = vmul.f32 1.442695, %v4835_v36  ;;  %v5042_v19 = vsel %vm3159_vm5, %v15804_v30, 0.0 }
 0x772   :  { %v4717_v4 = vpop.xlane.xlu1 %4716 }
 0x773   :  { %11924 = vpow2.f32 %v4918_v35  ;;  %v4833_v9 = vsub.f32 %v15435_v26, %v4717_v4  ;;  %5115 = vadd.xlane.f32.xlu0 %v5114_v55  ;;  %5049 = vadd.xlane.f32.xlu1 %v5048_v20 }
 0x774   :  { %v4753_v40 = vpop.xlane.xlu0 %4752  ;;  %11926 = vpow2.f32 %v4916_v62 }
 0x775   :  { %v4914_v53 = vmul.f32 1.442695, %v4833_v9  ;;  %v4845_v12 = vsub.f32 %v15443_v15, %v4753_v40  ;;  %v15812_v36 = vpop.eup %11922 }
 0x776   :  { %v15808_v51 = vpop.xlane.xlu1 %3566  ;;  %19174 = vst [vmem:[#allocation218_spill] sm:$0xff] %v15812_v36  ;;  %v5117_v9 = vsel %vm3159_vm5, %v15812_v36, 0.0 }
 0x777   :  { %11928 = vpow2.f32 %v4914_v53  ;;  %v4938_v28 = vmul.f32 1.442695, %v4845_v12  ;;  %5043 = vadd.xlane.f32.xlu1 %v5042_v19 }
 0x778   :  { %v15814_v35 = vpop.xlane.xlu0 %3569 }
 0x779   :  { %11930 = vpow2.f32 %v4938_v28 }
 0x77a   :  { %v15816_v26 = vpop.xlane.xlu1 %3563 }
 0x77b   :  { %5118 = vadd.xlane.f32.xlu1 %v5117_v9 }
 0x77c   :  { %v4747_v15 = vpop.xlane.xlu0 %4746 }
 0x77d   :  { %v15820_v62 = vpop.eup %11924  ;;  %v4843_v4 = vsub.f32 %v15469_v23, %v4747_v15 }
 0x77e   :  { %v4756_v55 = vpop.xlane.xlu1 %4755  ;;  %v5057_v20 = vsel %vm3159_vm5, %v15820_v62, 0.0  ;;  %v15825_v40 = vpop.eup %11926 }
 0x77f   :  { %v4934_v53 = vmul.f32 1.442695, %v4843_v4  ;;  %v4846_v28 = vsub.f32 %v15476_v22, %v4756_v55  ;;  %5058 = vadd.xlane.f32.xlu1 %v5057_v20  ;;  %v5054_v15 = vsel %vm3159_vm5, %v15825_v40, 0.0 }
 0x780   :  { %v4765_v12 = vpop.xlane.xlu0 %4764 }
 0x781   :  { %v15828_v19 = vpop.eup %11928  ;;  %11932 = vpow2.f32 %v4934_v53  ;;  %v4940_v9 = vmul.f32 1.442695, %v4846_v28  ;;  %v4849_v36 = vsub.f32 %v15485_v50, %v4765_v12 }
 0x782   :  { %v4750_v7 = vpop.xlane.xlu1 %4749  ;;  %v5051_v23 = vsel %vm3159_vm5, %v15828_v19, 0.0 }
 0x783   :  { %v15835_v6 = vpop.eup %11930  ;;  %11934 = vpow2.f32 %v4940_v9  ;;  %v4844_v22 = vsub.f32 %v15493_v16, %v4750_v7  ;;  %5052 = vadd.xlane.f32.xlu0 %v5051_v23  ;;  %5055 = vadd.xlane.f32.xlu1 %v5054_v15  ;;  %v4946_v55 = vmul.f32 1.442695, %v4849_v36 }
 0x784   :  { %19175 = vst [vmem:[#allocation219_spill] sm:$0xff] %v15835_v6  ;;  %v4759_v4 = vpop.xlane.xlu0 %4758  ;;  %v5087_v28 = vsel %vm3159_vm5, %v15835_v6, 0.0 }
 0x785   :  { %v4936_v20 = vmul.f32 1.442695, %v4844_v22  ;;  %v4847_v53 = vsub.f32 %v15502_v42, %v4759_v4 }
 0x786   :  { %v4762_v50 = vpop.xlane.xlu1 %4761 }
 0x787   :  { %11936 = vpow2.f32 %v4936_v20  ;;  %5088 = vadd.xlane.f32.xlu1 %v5087_v28  ;;  %v4942_v47 = vmul.f32 1.442695, %v4847_v53  ;;  %v4848_v9 = vsub.f32 %v15511_v18, %v4762_v50 }
 0x788   :  { %v4984_v12 = vpop.xlane.xlu0 %4983  ;;  %11938 = vpow2.f32 %v4946_v55 }
 0x789   :  { %11940 = vpow2.f32 %v4942_v47  ;;  %v4944_v42 = vmul.f32 1.442695, %v4848_v9 }
 0x78a   :  { %v4987_v23 = vpop.xlane.xlu1 %4986 }
 0x78b   :  { %v15842_v37 = vpop.eup %11932  ;;  %11942 = vrcp.f32 %v4987_v23 }
 0x78c   :  { %19176 = vst [vmem:[#allocation220_spill] sm:$0xff] %v15842_v37  ;;  %v4978_v16 = vpop.xlane.xlu0 %4977  ;;  %v5081_v7 = vsel %vm3159_vm5, %v15842_v37, 0.0  ;;  %11944 = vpow2.f32 %v4944_v42 }
 0x78d   :  { %v15846_v36 = vpop.eup %11934  ;;  %5082 = vadd.xlane.f32.xlu0 %v5081_v7  ;;  %11946 = vrcp.f32 %v4984_v12 }
 0x78e   :  { %19177 = vst [vmem:[#allocation221_spill] sm:$0xff] %v15846_v36  ;;  %v5090_v15 = vsel %vm3159_vm5, %v15846_v36, 0.0  ;;  %v4981_v20 = vpop.xlane.xlu1 %4980 }
 0x78f   :  { %5091 = vadd.xlane.f32.xlu1 %v5090_v15  ;;  %11948 = vrcp.f32 %v4981_v20 }
 0x790   :  { %v4996_v22 = vpop.xlane.xlu0 %4995  ;;  %11950 = vrcp.f32 %v4978_v16 }
 0x791   :  { %v15850_v4 = vpop.eup %11936  ;;  %11952 = vrcp.f32 %v4996_v22 }
 0x792   :  { %19178 = vst [vmem:[#allocation222_spill] sm:$0xff] %v15850_v4  ;;  %v5084_v18 = vsel %vm3159_vm5, %v15850_v4, 0.0  ;;  %v15854_v55 = vpop.eup %11938  ;;  %v4795_v23 = vpop.xlane.xlu1 %4794 }
 0x793   :  { %19179 = vst [vmem:[#allocation223_spill] sm:$0xff] %v15854_v55  ;;  %5085 = vadd.xlane.f32.xlu1 %v5084_v18  ;;  %v5099_v53 = vsel %vm3159_vm5, %v15854_v55, 0.0  ;;  %v15858_v50 = vpop.eup %11940 }
 0x794   :  { %v4990_v47 = vpop.xlane.xlu0 %4989  ;;  %19180 = vst [vmem:[#allocation224_spill] sm:$0xff] %v15858_v50  ;;  %v5093_v12 = vsel %vm3159_vm5, %v15858_v50, 0.0 }
 0x795   :  { %v11943_v28 = vpop.eup %11942 }
 0x796   :  { %v15864_v7 = vpop.eup %11944  ;;  %v5203_v15 = vmul.f32 %v11943_v28, %v15523_v52  ;;  %v4993_v50 = vpop.xlane.xlu1 %4992 }
 0x797   :  { %5100 = vadd.xlane.f32.xlu1 %v5099_v53  ;;  %19181 = vst [vmem:[#allocation225_spill] sm:$0xff] %v15864_v7  ;;  %v11947_v42 = vpop.eup %11946  ;;  %v5096_v18 = vsel %vm3159_vm5, %v15864_v7, 0.0  ;;  %11954 = vrcp.f32 %v4993_v50 }
 0x798   :  { %v15860_v9 = vpop.xlane.xlu0 %4788  ;;  %v5202_v53 = vmul.f32 %v11947_v42, %v15519_v13  ;;  %11956 = vrcp.f32 %v4990_v47 }
 0x799   :  { %v11949_v20 = vpop.eup %11948 }
 0x79a   :  { %v5257_v6 = vpack.c.bf16 %v5203_v15, %v5202_v53  ;;  %v11951_v52 = vpop.eup %11950  ;;  %v5201_v28 = vmul.f32 %v11949_v20, %v15533_v61  ;;  %v4792_v16 = vpop.xlane.xlu1 %4791 }
 0x79b   :  { %5094 = vadd.xlane.f32.xlu1 %v5093_v12  ;;  %v11953_v7 = vpop.eup %11952  ;;  %v5200_v22 = vmul.f32 %v11951_v52, %v15529_v27  ;;  %v4858_v50 = vsub.f32 %v15574_v3, %v4792_v16  ;;  %v19182_v3 = vld [vmem:[#allocation80_spill] sm:$0xff] }
 0x79c   :  { %v15870_v55 = vpop.xlane.xlu0 %4797  ;;  %v5206_v15 = vmul.f32 %v11953_v7, %v15539_v32  ;;  %v3354_v52 = vsub.f32 %v19182_v3, %v15405_v2 }
 0x79d   :  { %v5256_v42 = vpack.c.bf16 %v5201_v28, %v5200_v22 }
 0x79e   :  { %v4807_v36 = vpop.xlane.xlu1 %4806  ;;  %v5259_v20 = vpack.c.bf16 %v5206_v15, %v5206_v15  ;;  %v3436_v22 = vmul.f32 1.442695, %v3354_v52 }
 0x79f   :  { %5097 = vadd.xlane.f32.xlu1 %v5096_v18  ;;  %v4859_v18 = vsub.f32 %v15543_v59, %v4795_v23  ;;  %v4964_v23 = vmul.f32 1.442695, %v4858_v50  ;;  %v4863_v27 = vsub.f32 %v15589_v33, %v4807_v36 }
 0x7a0   :  { %v4804_v12 = vpop.xlane.xlu0 %4803 }
 0x7a1   :  { %v11955_v53 = vpop.eup %11954  ;;  %v4974_v28 = vmul.f32 1.442695, %v4863_v27  ;;  %v4862_v2 = vsub.f32 %v15598_v8, %v4804_v12  ;;  %v4857_v8 = vsub.f32 %v15564_v39, %v15860_v9 }
 0x7a2   :  { %v11957_v47 = vpop.eup %11956  ;;  %v5205_v59 = vmul.f32 %v11955_v53, %v15559_v46  ;;  %v19183_v46 = vld [vmem:[#allocation77_spill] sm:$0xff]  ;;  %v4801_v33 = vpop.xlane.xlu1 %4800 }
 0x7a3   :  { %5322 = vrot.lane.b32.xlu0 %v5257_v6, %s12507_s18  ;;  %v4966_v6 = vmul.f32 1.442695, %v4859_v18  ;;  %v5204_v32 = vmul.f32 %v11957_v47, %v15552_v57  ;;  %v3355_v18 = vsub.f32 %v19183_v46, %v15372_v45  ;;  %v4972_v45 = vmul.f32 1.442695, %v4862_v2 }
 0x7a4   :  { %v15875_v13 = vpop.xlane.xlu0 %5019 }
 0x7a5   :  { %11958 = vpow2.f32 %v4966_v6  ;;  %v5258_v7 = vpack.c.bf16 %v5205_v59, %v5204_v32  ;;  %v3438_v57 = vmul.f32 1.442695, %v3355_v18  ;;  %v4962_v32 = vmul.f32 1.442695, %v4857_v8 }
 0x7a6   :  { %11960 = vpow2.f32 %v4964_v23  ;;  %v15903_v6 = vpop.xlane.xlu1 %5025 }
 0x7a7   :  { %11962 = vpow2.f32 %v4974_v28  ;;  %v4861_v28 = vsub.f32 %v15605_v17, %v4801_v33 }
 0x7a8   :  { %v15881_v61 = vpop.xlane.xlu0 %5022  ;;  %11964 = vpow2.f32 %v3436_v22 }
 0x7a9   :  { %11966 = vpow2.f32 %v3438_v57  ;;  %v4970_v2 = vmul.f32 1.442695, %v4861_v28 }
 0x7aa   :  { %11968 = vpow2.f32 %v4972_v45  ;;  %v15913_v12 = vpop.xlane.xlu1 %5028 }
 0x7ab   :  { %11970 = vpow2.f32 %v4962_v32 }
 0x7ac   :  { %v15889_v16 = vpop.xlane.xlu0 %5037 }
 0x7ae   :  { %v15928_v46 = vpop.xlane.xlu1 %5034 }
 0x7af   :  { %v15894_v36 = vpop.eup %11958 }
 0x7b0   :  { %5320 = vrot.lane.b32.xlu1 %v5256_v42, %s12507_s18  ;;  %19184 = vst [vmem:[#allocation80_spill] sm:$0xff] %v15894_v36  ;;  %v15896_v42 = vpop.xlane.xlu0 %5031  ;;  %v5129_v15 = vsel %vm3159_vm5, %v15894_v36, 0.0  ;;  %v15901_v53 = vpop.eup %11960 }
 0x7b1   :  { %19185 = vst [vmem:[#allocation77_spill] sm:$0xff] %v15901_v53  ;;  %v5126_v47 = vsel %vm3159_vm5, %v15901_v53, 0.0  ;;  %v19192_v53 = vld [vmem:[#allocation89_spill] sm:$0xff] }
 0x7b4   :  { %5326 = vrot.lane.b32.xlu1 %v5259_v20, %s12507_s18  ;;  %v15909_v20 = vpop.eup %11962 }
 0x7b5   :  { %19186 = vst [vmem:[#allocation226_spill] sm:$0xff] %v15909_v20  ;;  %v5141_v23 = vsel %vm3159_vm5, %v15909_v20, 0.0  ;;  %v15919_v27 = vpop.eup %11964 }
 0x7b6   :  { %v3574_v39 = vsel %vm3159_vm5, %v15919_v27, 0.0  ;;  %v15925_v9 = vpop.eup %11966 }
 0x7b7   :  { %v3577_v22 = vsel %vm3159_vm5, %v15925_v9, 0.0 }
 0x7b8   :  { %5324 = vrot.lane.b32.xlu1 %v5258_v7, %s12507_s18  ;;  %v4860_v7 = vsub.f32 %v15581_v34, %v15870_v55  ;;  %v15934_v34 = vpop.eup %11968  ;;  %v19188_v55 = vld [vmem:[#allocation79_spill] sm:$0xff] }
 0x7b9   :  { %19187 = vst [vmem:[#allocation227_spill] sm:$0xff] %v15934_v34  ;;  %v3353_v57 = vsub.f32 %v19188_v55, %v15383_v58  ;;  %v5138_v17 = vsel %vm3159_vm5, %v15934_v34, 0.0 }
 0x7ba   :  { %v4968_v52 = vmul.f32 1.442695, %v4860_v7 }
 0x7bb   :  { %v3434_v33 = vmul.f32 1.442695, %v3353_v57 }
 0x7bc   :  { %11972 = vpow2.f32 %v4968_v52 }
 0x7bd   :  { %11974 = vpow2.f32 %v4970_v2 }
 0x7c0   :  { %v15905_v50 = vpop.xlane.xlu0 %5070 }
 0x7c2   :  { %5130 = vadd.xlane.f32.xlu0 %v5129_v15  ;;  %v15938_v15 = vpop.xlane.xlu1 %5067 }
 0x7c4   :  { %v15915_v59 = vpop.xlane.xlu0 %5064 }
 0x7c6   :  { %5127 = vadd.xlane.f32.xlu0 %v5126_v47  ;;  %v15942_v47 = vpop.eup %11970  ;;  %v15944_v8 = vpop.xlane.xlu1 %5061 }
 0x7c7   :  { %19189 = vst [vmem:[#allocation79_spill] sm:$0xff] %v15942_v47  ;;  %v5123_v58 = vsel %vm3159_vm5, %v15942_v47, 0.0  ;;  %v15948_v32 = vpop.eup %11972  ;;  %v5528_v47 = vrot.slane %v19192_v53, 4 }
 0x7c8   :  { %19190 = vst [vmem:[#allocation228_spill] sm:$0xff] %v15948_v32  ;;  %v15952_v52 = vpop.eup %11974 }
 0x7c9   :  { %19191 = vst [vmem:[#allocation229_spill] sm:$0xff] %v15952_v52 }
 0x7ca   :  { %5142 = vadd.xlane.f32.xlu0 %v5141_v23 }
 0x7cc   :  { %v5005_v3 = vpop.xlane.xlu0 %5004 }
 0x7ce   :  { %3575 = vadd.xlane.f32.xlu0 %v3574_v39  ;;  %v5132_v39 = vsel %vm3159_vm5, %v15948_v32, 0.0 }
 0x7d0   :  { %v15930_v18 = vpop.xlane.xlu0 %5079 }
 0x7d2   :  { %3578 = vadd.xlane.f32.xlu0 %v3577_v22  ;;  %v5135_v22 = vsel %vm3159_vm5, %v15952_v52, 0.0 }
 0x7d4   :  { %v5008_v45 = vpop.xlane.xlu0 %5007  ;;  %v4999_v7 = vpop.xlane.xlu1 %4998 }
 0x7d5   :  { %11976 = vrcp.f32 %v5008_v45 }
 0x7d6   :  { %5139 = vadd.xlane.f32.xlu0 %v5138_v17  ;;  %11978 = vpow2.f32 %v3434_v33 }
 0x7d7   :  { %11980 = vrcp.f32 %v5005_v3 }
 0x7d8   :  { %v5002_v23 = vpop.xlane.xlu0 %5001  ;;  %v15958_v55 = vpop.xlane.xlu1 %5073 }
 0x7d9   :  { %11982 = vrcp.f32 %v5002_v23 }
 0x7da   :  { %11984 = vrcp.f32 %v4999_v7 }
 0x7dc   :  { %5124 = vadd.xlane.f32.xlu1 %v5123_v58  ;;  %v15965_v34 = vpop.xlane.xlu0 %5076 }
 0x7df   :  { %v11977_v28 = vpop.eup %11976 }
 0x7e0   :  { %5133 = vadd.xlane.f32.xlu1 %v5132_v39  ;;  %v15956_v3 = vpop.eup %11978  ;;  %v5210_v2 = vmul.f32 %v11977_v28, %v15702_v14 }
 0x7e1   :  { %v11981_v57 = vpop.eup %11980  ;;  %v3571_v17 = vsel %vm3159_vm5, %v15956_v3, 0.0 }
 0x7e2   :  { %v5209_v23 = vmul.f32 %v11981_v57, %v15691_v31  ;;  %v19194_v31 = vld [vmem:[#allocation70_spill] sm:$0xff] }
 0x7e3   :  { %v11983_v45 = vpop.eup %11982 }
 0x7e4   :  { %5136 = vadd.xlane.f32.xlu1 %v5135_v22  ;;  %v11985_v58 = vpop.eup %11984  ;;  %v5261_v7 = vpack.c.bf16 %v5210_v2, %v5209_v23  ;;  %v5208_v39 = vmul.f32 %v11983_v45, %v15714_v63  ;;  %v19195_v63 = vrot.slane %v19194_v31, 4 }
 0x7e5   :  { %v5207_v22 = vmul.f32 %v11985_v58, %v15704_v56 }
 0x7e6   :  { %v5529_v57 = vsel %vm346_vm0, %v19195_v63, %v5528_v47  ;;  %v19201_v47 = vld [vmem:[#allocation95_spill] sm:$0xff] }
 0x7e7   :  { %v5260_v14 = vpack.c.bf16 %v5208_v39, %v5207_v22  ;;  %v19200_v39 = vld [vmem:[#allocation85_spill] sm:$0xff] }
 0x7e8   :  { %v5017_v33 = vpop.xlane.xlu1 %5016  ;;  %3572 = vadd.xlane.f32.xlu1 %v3571_v17  ;;  %v19198_v17 = vld [vmem:[#allocation61_spill] sm:$0xff] }
 0x7e9   :  { %11986 = vrcp.f32 %v5017_v33 }
 0x7ec   :  { %v5014_v52 = vpop.xlane.xlu1 %5013  ;;  %5330 = vrot.lane.b32.xlu0 %v5261_v7, %s12507_s18  ;;  %v5011_v28 = vpop.xlane.xlu0 %5010  ;;  %v19199_v7 = vld [vmem:[#allocation147_spill] sm:$0xff] }
 0x7ed   :  { %11988 = vrcp.f32 %v5014_v52  ;;  %v3356_v22 = vsub.f32 %v19200_v39, %v19199_v7  ;;  %v19202_v7 = vld [vmem:[#allocation71_spill] sm:$0xff] }
 0x7ee   :  { %11990 = vrcp.f32 %v5011_v28  ;;  %v18754_v39 = vrot.slane %v19202_v7, 4 }
 0x7f0   :  { %v15970_v20 = vpop.xlane.xlu1 %5109  ;;  %5328 = vrot.lane.b32.xlu0 %v5260_v14, %s12507_s18 }
 0x7f1   :  { %19193 = vst [vmem:[#allocation89_spill] sm:$0xff] %v15970_v20 }
 0x7f3   :  { %v11987_v56 = vpop.eup %11986 }
 0x7f4   :  { %v15976_v2 = vpop.xlane.xlu1 %5112  ;;  %5591 = vrot.lane.b32.xlu0 %v5529_v57, %s12503_s12  ;;  %v5213_v23 = vmul.f32 %v11987_v56, %v15738_v41 }
 0x7f5   :  { %19196 = vst [vmem:[#allocation70_spill] sm:$0xff] %v15976_v2 }
 0x7f6   :  { %v5263_v14 = vpack.c.bf16 %v5213_v23, %v5213_v23 }
 0x7f7   :  { %v11989_v33 = vpop.eup %11988 }
 0x7f8   :  { %v15979_v45 = vpop.xlane.xlu1 %5106  ;;  %v11991_v58 = vpop.eup %11990  ;;  %v5212_v63 = vmul.f32 %v11989_v33, %v15742_v0 }
 0x7f9   :  { %19197 = vst [vmem:[#allocation230_spill] sm:$0xff] %v15979_v45  ;;  %5905 = vrot.lane.b32.xlu1 %v19198_v17, %s12506_s15  ;;  %v5211_v28 = vmul.f32 %v11991_v58, %v15746_v54  ;;  %v3440_v17 = vmul.f32 1.442695, %v3356_v22  ;;  %v16008_v33 = vpop.xlane.xlu0 %5103  ;;  %v19206_v22 = vld [vmem:[#allocation155_spill] sm:$0xff] }
 0x7fa   :  { %19205 = vst [vmem:[#allocation85_spill] sm:$0xff] %v16008_v33 }
 0x7fb   :  { %v5262_v41 = vpack.c.bf16 %v5212_v63, %v5211_v28  ;;  %11992 = vpow2.f32 %v3440_v17 }
 0x7fc   :  { %v15984_v52 = vpop.xlane.xlu1 %5046  ;;  %11994 = vrcp.f32 %v15881_v61 }
 0x7fd   :  { %5819 = vrot.lane.b32.xlu1 %v19201_v47, %s12506_s15  ;;  %v19207_v47 = vld [vmem:[#allocation90_spill] sm:$0xff]  ;;  %v16017_v28 = vpop.xlane.xlu0 %5121  ;;  %11996 = vrcp.f32 %v15875_v13 }
 0x7fe   :  { %19208 = vst [vmem:[#allocation95_spill] sm:$0xff] %v16017_v28 }
 0x800   :  { %v15992_v57 = vpop.xlane.xlu1 %5049 }
 0x801   :  { %5334 = vrot.lane.b32.xlu1 %v5263_v14, %s12507_s18  ;;  %v3357_v14 = vsub.f32 %v19207_v47, %v19206_v22  ;;  %v19211_v22 = vld [vmem:[#allocation125_spill] sm:$0xff] }
 0x803   :  { %v3442_v17 = vmul.f32 1.442695, %v3357_v14 }
 0x804   :  { %v15995_v56 = vpop.xlane.xlu1 %5043 }
 0x805   :  { %5332 = vrot.lane.b32.xlu1 %v5262_v41, %s12507_s18  ;;  %v16006_v54 = vpop.eup %11992  ;;  %v16022_v41 = vpop.xlane.xlu0 %5040  ;;  %11998 = vpow2.f32 %v3442_v17  ;;  %v19214_v17 = vld [vmem:[#allocation202_spill] sm:$0xff] }
 0x806   :  { %19204 = vst [vmem:[#allocation147_spill] sm:$0xff] %v16006_v54  ;;  %v3580_v58 = vsel %vm3159_vm5, %v16006_v54, 0.0  ;;  %12000 = vrcp.f32 %v15591_v44 }
 0x807   :  { %12002 = vrcp.f32 %v15555_v29 }
 0x808   :  { %v15999_v36 = vpop.xlane.xlu1 %5118  ;;  %12004 = vrcp.f32 %v15535_v48  ;;  %v19216_v48 = vld [vmem:[#allocation199_spill] sm:$0xff] }
 0x809   :  { %19203 = vst [vmem:[#allocation61_spill] sm:$0xff] %v15999_v36  ;;  %5593 = vrot.lane.b32.xlu1 %v18754_v39, %s12503_s12  ;;  %12006 = vrcp.f32 %v19211_v22  ;;  %v16032_v13 = vpop.xlane.xlu0 %5115  ;;  %v19217_v22 = vld [vmem:[#allocation200_spill] sm:$0xff] }
 0x80a   :  { %19212 = vst [vmem:[#allocation90_spill] sm:$0xff] %v16032_v13  ;;  %12008 = vrcp.f32 %v19214_v17  ;;  %v19220_v17 = vld [vmem:[#allocation136_spill] sm:$0xff] }
 0x80b   :  { %12010 = vrcp.f32 %v19216_v48 }
 0x80c   :  { %v16004_v0 = vpop.xlane.xlu1 %5058  ;;  %12012 = vrcp.f32 %v19217_v22  ;;  %v19223_v22 = vld [vmem:[#allocation134_spill] sm:$0xff] }
 0x810   :  { %v16010_v23 = vpop.xlane.xlu1 %5055  ;;  %v16037_v36 = vpop.xlane.xlu0 %5052 }
 0x813   :  { %3581 = vadd.xlane.f32.xlu0 %v3580_v58  ;;  %v11995_v58 = vpop.eup %11994 }
 0x814   :  { %v16020_v63 = vpop.xlane.xlu1 %5088  ;;  %v11997_v47 = vpop.eup %11996  ;;  %v5215_v14 = vmul.f32 %v11995_v58, %v15627_v1 }
 0x815   :  { %19209 = vst [vmem:[#allocation71_spill] sm:$0xff] %v16020_v63  ;;  %v5214_v44 = vmul.f32 %v11997_v47, %v15615_v60  ;;  %v16041_v29 = vpop.eup %11998  ;;  %v19219_v60 = vld [vmem:[#allocation139_spill] sm:$0xff] }
 0x816   :  { %19215 = vst [vmem:[#allocation202_spill] sm:$0xff] %v16041_v29  ;;  %v12001_v33 = vpop.eup %12000 }
 0x817   :  { %v5264_v45 = vpack.c.bf16 %v5215_v14, %v5214_v44  ;;  %v12003_v28 = vpop.eup %12002  ;;  %v3721_v47 = vmul.f32 %v12001_v33, %v19219_v60  ;;  %v3583_v14 = vsel %vm3159_vm5, %v16041_v29, 0.0  ;;  %v19222_v44 = vld [vmem:[#allocation121_spill] sm:$0xff]  ;;  %v19224_v60 = vld [vmem:[#allocation150_spill] sm:$0xff] }
 0x818   :  { %v12005_v58 = vpop.eup %12004  ;;  %v3723_v2 = vmul.f32 %v12003_v28, %v19220_v17  ;;  %v19225_v17 = vld [vmem:[#allocation87_spill] sm:$0xff] }
 0x819   :  { %v12007_v20 = vpop.eup %12006  ;;  %v3720_v48 = vmul.f32 %v12005_v58, %v19222_v44  ;;  %v19229_v44 = vld [vmem:[#allocation88_spill] sm:$0xff] }
 0x81a   :  { %v16047_v1 = vpop.xlane.xlu0 %5082  ;;  %v3722_v54 = vmul.f32 %v12007_v20, %v19223_v22  ;;  %v19226_v20 = vld [vmem:[#allocation144_spill] sm:$0xff] }
 0x81b   :  { %v3776_v63 = vpack.c.bf16 %v3721_v47, %v3720_v48  ;;  %v19227_v47 = vld [vmem:[#allocation81_spill] sm:$0xff] }
 0x81c   :  { %v16024_v39 = vpop.xlane.xlu1 %5091 }
 0x81d   :  { %19210 = vst [vmem:[#allocation155_spill] sm:$0xff] %v16024_v39  ;;  %v3777_v39 = vpack.c.bf16 %v3723_v2, %v3722_v54 }
 0x820   :  { %v16029_v61 = vpop.xlane.xlu1 %5085 }
 0x824   :  { %v16035_v32 = vpop.xlane.xlu1 %5100 }
 0x825   :  { %19213 = vst [vmem:[#allocation125_spill] sm:$0xff] %v16035_v32 }
 0x828   :  { %v16045_v13 = vpop.xlane.xlu1 %5094 }
 0x829   :  { %19218 = vst [vmem:[#allocation199_spill] sm:$0xff] %v16045_v13  ;;  %5336 = vrot.lane.b32.xlu0 %v5264_v45, %s12507_s18  ;;  %v5323_v13 = vpop.permute.xlu0 %5322  ;;  %v12009_v45 = vpop.eup %12008 }
 0x82a   :  { %v12011_v4 = vpop.eup %12010  ;;  %v5389_v29 = vsel %vm3159_vm5, %v3777_v39, %v5323_v13  ;;  %v3724_v58 = vmul.f32 %v12009_v45, %v19226_v20 }
 0x82b   :  { %v12013_v28 = vpop.eup %12012 }
 0x82c   :  { %v16052_v32 = vpop.xlane.xlu1 %5097 }
 0x82d   :  { %19221 = vst [vmem:[#allocation200_spill] sm:$0xff] %v16052_v32  ;;  %3584 = vadd.xlane.f32.xlu1 %v3583_v14  ;;  %v3358_v32 = vsub.f32 %v19225_v17, %v19224_v60  ;;  %v19228_v14 = vld [vmem:[#allocation142_spill] sm:$0xff]  ;;  %v19235_v17 = vld [vmem:[#allocation123_spill] sm:$0xff] }
 0x82e   :  { %v3726_v2 = vmul.f32 %v12011_v4, %v19228_v14  ;;  %v19232_v4 = vld [vmem:[#allocation92_spill] sm:$0xff]  ;;  %v19238_v14 = vld [vmem:[#allocation151_spill] sm:$0xff] }
 0x82f   :  { %v3444_v48 = vmul.f32 1.442695, %v3358_v32  ;;  %v19233_v32 = vld [vmem:[#allocation72_spill] sm:$0xff] }
 0x830   :  { %v5321_v37 = vpop.permute.xlu1 %5320  ;;  %v3779_v60 = vpack.c.bf16 %v3726_v2, %v3726_v2  ;;  %v19239_v2 = vld [vmem:[#allocation83_spill] sm:$0xff] }
 0x831   :  { %v5386_v33 = vsel %vm3159_vm5, %v3776_v63, %v5321_v37  ;;  %v19230_v37 = vld [vmem:[#allocation143_spill] sm:$0xff]  ;;  %12014 = vpow2.f32 %v3444_v48 }
 0x832   :  { %11168 = vmatprep.mubr.msk.bf16.mxu0 %vm5639_vm6, %v5386_v33  ;;  %v3725_v63 = vmul.f32 %v12013_v28, %v19230_v37  ;;  %v5608_v33 = vsel %vm346_vm0, %v19233_v32, %v19232_v4  ;;  %v19234_v28 = vld [vmem:[#allocation118_spill] sm:$0xff]  ;;  %12016 = vrcp.f32 %v15913_v12  ;;  %v19245_v12 = vld [vmem:[#allocation209_spill] sm:$0xff] }
 0x833   :  { %11169 = vmatmul.mubr.msk.bf16.vlgmr.msra.gmra.mrb[164].mxu0 %vm5639_vm6, %v5389_v29  ;;  %v19231_v29 = vld [vmem:[#allocation86_spill] sm:$0xff]  ;;  %12018 = vrcp.f32 %v15903_v6  ;;  %v19247_v4 = vld [vmem:[#allocation201_spill] sm:$0xff] }
 0x834   :  { %11199 = vmatpush3.bf16.msra.mxu0 %v19227_v47  ;;  %v5327_v54 = vpop.permute.xlu1 %5326  ;;  %v3778_v22 = vpack.c.bf16 %v3725_v63, %v3724_v58  ;;  %v19237_v58 = vld [vmem:[#allocation126_spill] sm:$0xff] }
 0x835   :  { %11200 = vmatprep.subr.bf16.mxu0 %v19229_v44  ;;  %v5395_v45 = vsel %vm3159_vm5, %v3779_v60, %v5327_v54  ;;  %v3359_v54 = vsub.f32 %v19239_v2, %v19238_v14  ;;  %v19251_v2 = vrot.slane %v19202_v7, 4 }
 0x837   :  { %v3446_v37 = vmul.f32 1.442695, %v3359_v54 }
 0x838   :  { %11201 = vmatpush3.bf16.msra.mxu0 %v19229_v44  ;;  %v5325_v39 = vpop.permute.xlu1 %5324 }
 0x839   :  { %v5392_v13 = vsel %vm3159_vm5, %v3778_v22, %v5325_v39  ;;  %11202 = vmatprep.subr.bf16.mxu0 %v19231_v29  ;;  %12020 = vpow2.f32 %v3446_v37  ;;  %v19243_v39 = vld [vmem:[#allocation153_spill] sm:$0xff] }
 0x83a   :  { %11172 = vmatprep.mubr.msk.bf16.mxu0 %vm5639_vm6, %v5392_v13  ;;  %12022 = vrcp.f32 %v19243_v39  ;;  %v19244_v13 = vld [vmem:[#allocation204_spill] sm:$0xff] }
 0x83b   :  { %11173 = vmatmul.mubr.msk.bf16.gmra.mrb[168].mxu0 %vm5639_vm6, %v5395_v45  ;;  %v16083_v20 = vpop.eup %12014  ;;  %12024 = vrcp.f32 %v19245_v12  ;;  %v19246_v45 = vld [vmem:[#allocation162_spill] sm:$0xff] }
 0x83c   :  { %11203 = vmatpush3.bf16.msra.mxu0 %v19231_v29  ;;  %19236 = vst [vmem:[#allocation139_spill] sm:$0xff] %v16083_v20  ;;  %v3586_v47 = vsel %vm3159_vm5, %v16083_v20, 0.0  ;;  %v12017_v48 = vpop.eup %12016  ;;  %12026 = vrcp.f32 %v19246_v45 }
 0x83d   :  { %11204 = vmatprep.subr.bf16.mxu0 %v19234_v28  ;;  %v12019_v22 = vpop.eup %12018  ;;  %v5217_v29 = vmul.f32 %v12017_v48, %v19244_v13  ;;  %12028 = vrcp.f32 %v15889_v16 }
 0x83e   :  { %5907 = vrot.lane.b32.xlu1 %v5608_v33, %s12506_s15  ;;  %v5216_v6 = vmul.f32 %v12019_v22, %v19247_v4  ;;  %v19248_v33 = vld [vmem:[#allocation152_spill] sm:$0xff]  ;;  %v19254_v4 = vld [vmem:[#allocation62_spill] sm:$0xff] }
 0x83f   :  { %12030 = vrcp.f32 %v19248_v33 }
 0x840   :  { %11205 = vmatpush3.bf16.msra.mxu0 %v19234_v28  ;;  %v5265_v28 = vpack.c.bf16 %v5217_v29, %v5216_v6  ;;  %v19253_v29 = vld [vmem:[#allocation74_spill] sm:$0xff]  ;;  %v19255_v6 = vld [vmem:[#allocation167_spill] sm:$0xff]  ;;  %12032 = vrcp.f32 %v15896_v42 }
 0x841   :  { %11206 = vmatprep.subr.bf16.mxu0 %v19235_v17  ;;  %v18762_v12 = vrot.slane %v19253_v29, 4  ;;  %12034 = vrcp.f32 %v15928_v46  ;;  %v19262_v46 = vld [vmem:[#allocation94_spill] sm:$0xff] }
 0x844   :  { %11207 = vmatpush3.bf16.msra.mxu0 %v19235_v17  ;;  %v19249_v17 = vld [vmem:[#allocation73_spill] sm:$0xff] }
 0x845   :  { %11208 = vmatprep.subr.bf16.mxu0 %v19237_v58 }
 0x848   :  { %11209 = vmatpush3.bf16.msra.mxu0 %v19237_v58  ;;  %3587 = vadd.xlane.f32.xlu0 %v3586_v47  ;;  %v5531_v58 = vrot.slane %v19249_v17, 4  ;;  %v16110_v47 = vpop.eup %12020 }
 0x849   :  { %19250 = vst [vmem:[#allocation150_spill] sm:$0xff] %v16110_v47  ;;  %v3589_v16 = vsel %vm3159_vm5, %v16110_v47, 0.0  ;;  %v12023_v37 = vpop.eup %12022 }
 0x84a   :  { %v5532_v54 = vsel %vm346_vm0, %v19251_v2, %v5531_v58  ;;  %v12025_v48 = vpop.eup %12024  ;;  %v5534_v17 = vsel %vm346_vm0, %v5531_v58, %v18762_v12  ;;  %v19261_v58 = vld [vmem:[#allocation93_spill] sm:$0xff] }
 0x84b   :  { %v12027_v39 = vpop.eup %12026  ;;  %v3728_v33 = vmul.f32 %v12025_v48, %v19255_v6  ;;  %v19267_v6 = vld [vmem:[#allocation164_spill] sm:$0xff] }
 0x84c   :  { %v12029_v13 = vpop.eup %12028 }
 0x84d   :  { %v12031_v45 = vpop.eup %12030 }
 0x84f   :  { %v16094_v44 = vpop.xlane.xlu0 %5130 }
 0x850   :  { %19240 = vst [vmem:[#allocation136_spill] sm:$0xff] %v16094_v44 }
 0x853   :  { %v16096_v63 = vpop.xlane.xlu0 %5127 }
 0x854   :  { %19241 = vst [vmem:[#allocation121_spill] sm:$0xff] %v16096_v63 }
 0x857   :  { %v16098_v60 = vpop.xlane.xlu0 %5142 }
 0x858   :  { %19242 = vst [vmem:[#allocation134_spill] sm:$0xff] %v16098_v60  ;;  %v19258_v60 = vld [vmem:[#allocation206_spill] sm:$0xff] }
 0x859   :  { %v5220_v44 = vmul.f32 %v12029_v13, %v19258_v60 }
 0x85b   :  { %v16106_v32 = vpop.xlane.xlu0 %3575 }
 0x85e   :  { %5338 = vrot.lane.b32.xlu0 %v5265_v28, %s12507_s18  ;;  %v19256_v28 = vld [vmem:[#allocation163_spill] sm:$0xff] }
 0x85f   :  { %v16113_v14 = vpop.xlane.xlu0 %3578  ;;  %v3730_v2 = vmul.f32 %v12027_v39, %v19256_v28  ;;  %v19268_v28 = vld [vmem:[#allocation208_spill] sm:$0xff] }
 0x862   :  { %5595 = vrot.lane.b32.xlu0 %v5532_v54, %s12503_s12  ;;  %3590 = vadd.xlane.f32.xlu1 %v3589_v16  ;;  %v19257_v54 = vld [vmem:[#allocation159_spill] sm:$0xff] }
 0x863   :  { %v16121_v22 = vpop.xlane.xlu0 %5139  ;;  %v3727_v16 = vmul.f32 %v12023_v37, %v19257_v54  ;;  %v5267_v37 = vpack.c.bf16 %v5220_v44, %v5220_v44  ;;  %v19265_v44 = vld [vmem:[#allocation63_spill] sm:$0xff]  ;;  %v19269_v54 = vld [vmem:[#allocation168_spill] sm:$0xff] }
 0x864   :  { %19252 = vst [vmem:[#allocation87_spill] sm:$0xff] %v16121_v22  ;;  %v19259_v22 = vld [vmem:[#allocation154_spill] sm:$0xff] }
 0x865   :  { %v3729_v20 = vmul.f32 %v12031_v45, %v19259_v22  ;;  %v3780_v48 = vpack.c.bf16 %v3728_v33, %v3727_v16  ;;  %v19264_v22 = vld [vmem:[#allocation213_spill] sm:$0xff]  ;;  %v19266_v45 = vld [vmem:[#allocation211_spill] sm:$0xff]  ;;  %v19270_v16 = vld [vmem:[#allocation98_spill] sm:$0xff] }
 0x866   :  { %5997 = vrot.lane.b32.xlu0 %v19254_v4, %s12506_s15  ;;  %12036 = vrcp.f32 %v19264_v22 }
 0x867   :  { %v5331_v63 = vpop.permute.xlu0 %5330  ;;  %v3781_v39 = vpack.c.bf16 %v3730_v2, %v3729_v20  ;;  %v12033_v20 = vpop.eup %12032  ;;  %12038 = vrcp.f32 %v19266_v45  ;;  %v19273_v45 = vld [vmem:[#allocation99_spill] sm:$0xff] }
 0x868   :  { %12040 = vrcp.f32 %v19267_v6  ;;  %v5218_v2 = vmul.f32 %v12033_v20, %v19268_v28  ;;  %v19274_v6 = vld [vmem:[#allocation175_spill] sm:$0xff] }
 0x869   :  { %v16132_v47 = vpop.xlane.xlu1 %5124  ;;  %v5401_v60 = vsel %vm3159_vm5, %v3781_v39, %v5331_v63  ;;  %v12035_v63 = vpop.eup %12034  ;;  %v19271_v39 = vld [vmem:[#allocation100_spill] sm:$0xff] }
 0x86a   :  { %19260 = vst [vmem:[#allocation144_spill] sm:$0xff] %v16132_v47  ;;  %5597 = vrot.lane.b32.xlu0 %v5534_v17, %s12503_s12 }
 0x86b   :  { %v5329_v4 = vpop.permute.xlu0 %5328 }
 0x86c   :  { %v5398_v42 = vsel %vm3159_vm5, %v3780_v48, %v5329_v4  ;;  %v3361_v48 = vsub.f32 %v19270_v16, %v19269_v54  ;;  %v19272_v4 = vld [vmem:[#allocation207_spill] sm:$0xff]  ;;  %v19276_v16 = vld [vmem:[#allocation166_spill] sm:$0xff] }
 0x86d   :  { %v16141_v13 = vpop.xlane.xlu1 %5133  ;;  %11190 = vmatprep.mubr.msk.bf16.mxu1 %vm5639_vm6, %v5398_v42  ;;  %v5219_v42 = vmul.f32 %v12035_v63, %v19272_v4  ;;  %v19275_v63 = vld [vmem:[#allocation171_spill] sm:$0xff] }
 0x86e   :  { %5342 = vrot.lane.b32.xlu0 %v5267_v37, %s12507_s18  ;;  %11191 = vmatmul.mubr.msk.bf16.vlgmr.msra.gmra.mrb[132].mxu1 %vm5639_vm6, %v5401_v60 }
 0x86f   :  { %11221 = vmatpush3.bf16.msra.mxu1 %v19261_v58  ;;  %v5266_v60 = vpack.c.bf16 %v5219_v42, %v5218_v2  ;;  %v3450_v58 = vmul.f32 1.442695, %v3361_v48 }
 0x870   :  { %11222 = vmatprep.subr.bf16.mxu1 %v19262_v46 }
 0x871   :  { %v16148_v17 = vpop.xlane.xlu1 %5136  ;;  %12042 = vpow2.f32 %v3450_v58 }
 0x872   :  { %19263 = vst [vmem:[#allocation81_spill] sm:$0xff] %v16148_v17  ;;  %12044 = vrcp.f32 %v15761_v5 }
 0x873   :  { %11223 = vmatpush3.bf16.msra.mxu1 %v19262_v46  ;;  %5995 = vrot.lane.b32.xlu1 %v19265_v44, %s12506_s15  ;;  %v12037_v46 = vpop.eup %12036 }
 0x874   :  { %v12039_v44 = vpop.eup %12038  ;;  %v3731_v28 = vmul.f32 %v12037_v46, %v19274_v6  ;;  %v19280_v6 = vld [vmem:[#allocation91_spill] sm:$0xff] }
 0x875   :  { %v16156_v33 = vpop.xlane.xlu1 %3572  ;;  %v12041_v20 = vpop.eup %12040  ;;  %v3733_v54 = vmul.f32 %v12039_v44, %v19275_v63  ;;  %v19278_v44 = vld [vmem:[#allocation97_spill] sm:$0xff] }
 0x876   :  { %v3732_v48 = vmul.f32 %v12041_v20, %v19276_v16  ;;  %v19279_v20 = vld [vmem:[#allocation158_spill] sm:$0xff] }
 0x877   :  { %5909 = vrot.lane.b32.xlu1 %v19271_v39, %s12506_s15  ;;  %v3783_v4 = vpack.c.bf16 %v3733_v54, %v3733_v54  ;;  %v19281_v54 = vld [vmem:[#allocation177_spill] sm:$0xff] }
 0x878   :  { %v3782_v39 = vpack.c.bf16 %v3732_v48, %v3731_v28  ;;  %v3362_v28 = vsub.f32 %v19280_v6, %v19279_v20  ;;  %12046 = vrcp.f32 %v19281_v54  ;;  %v16184_v48 = vpop.permute.xlu0 %5591  ;;  %v19286_v54 = vld [vmem:[#allocation101_spill] sm:$0xff] }
 0x879   :  { %v5906_v37 = vpop.permute.xlu1 %5905  ;;  %19282 = vst [vmem:[#allocation142_spill] sm:$0xff] %v16184_v48 }
 0x87a   :  { %11224 = vmatprep.subr.bf16.mxu1 %v5906_v37 }
 0x87b   :  { %5340 = vrot.lane.b32.xlu1 %v5266_v60, %s12507_s18  ;;  %11225 = vmatpush3.bf16.msra.mxu1 %v5906_v37  ;;  %v16174_v58 = vpop.eup %12042 }
 0x87c   :  { %v3595_v46 = vsel %vm3159_vm5, %v16174_v58, 0.0  ;;  %v12045_v16 = vpop.eup %12044 }
 0x87d   :  { %v5820_v22 = vpop.permute.xlu1 %5819 }
 0x87e   :  { %11210 = vmatprep.subr.bf16.mxu0 %v5820_v22 }
 0x87f   :  { %5911 = vrot.lane.b32.xlu1 %v19273_v45, %s12506_s15  ;;  %11211 = vmatpush3.bf16.msra.mxu0 %v5820_v22  ;;  %v19277_v22 = vld [vmem:[#allocation165_spill] sm:$0xff] }
 0x880   :  { %v3360_v45 = vsub.f32 %v19278_v44, %v19277_v22 }
 0x881   :  { %v5335_v2 = vpop.permute.xlu1 %5334 }
 0x882   :  { %v5407_v60 = vsel %vm3159_vm5, %v3783_v4, %v5335_v2  ;;  %v3448_v63 = vmul.f32 1.442695, %v3360_v45  ;;  %v3452_v2 = vmul.f32 1.442695, %v3362_v28  ;;  %v19285_v45 = vld [vmem:[#allocation65_spill] sm:$0xff] }
 0x884   :  { %12048 = vpow2.f32 %v3448_v63 }
 0x885   :  { %v5333_v42 = vpop.permute.xlu1 %5332  ;;  %12050 = vpow2.f32 %v3452_v2  ;;  %v19287_v2 = vld [vmem:[#allocation82_spill] sm:$0xff] }
 0x886   :  { %v5404_v37 = vsel %vm3159_vm5, %v3782_v39, %v5333_v42  ;;  %v12047_v39 = vpop.eup %12046  ;;  %v19283_v42 = vld [vmem:[#allocation186_spill] sm:$0xff] }
 0x887   :  { %11194 = vmatprep.mubr.msk.bf16.mxu1 %vm5639_vm6, %v5404_v37  ;;  %v3735_v37 = vmul.f32 %v12045_v16, %v19283_v42  ;;  %v19288_v16 = vld [vmem:[#allocation131_spill] sm:$0xff]  ;;  %v19289_v42 = vld [vmem:[#allocation96_spill] sm:$0xff] }
 0x888   :  { %11195 = vmatmul.mubr.msk.bf16.gmra.mrb[136].mxu1 %vm5639_vm6, %v5407_v60 }
 0x889   :  { %v16209_v12 = vpop.permute.xlu1 %5593 }
 0x88a   :  { %19292 = vst [vmem:[#allocation88_spill] sm:$0xff] %v16209_v12 }
 0x88d   :  { %3596 = vadd.xlane.f32.xlu0 %v3595_v46  ;;  %v19284_v46 = vld [vmem:[#allocation179_spill] sm:$0xff] }
 0x88e   :  { %v16186_v4 = vpop.eup %12048  ;;  %v3734_v22 = vmul.f32 %v12047_v39, %v19284_v46  ;;  %v3364_v39 = vsub.f32 %v19288_v16, %v19287_v2  ;;  %v5535_v46 = vrot.slane %v19289_v42, 4 }
 0x88f   :  { %v3592_v5 = vsel %vm3159_vm5, %v16186_v4, 0.0  ;;  %v16194_v44 = vpop.eup %12050 }
 0x890   :  { %v3784_v20 = vpack.c.bf16 %v3735_v37, %v3734_v22  ;;  %v3598_v63 = vsel %vm3159_vm5, %v16194_v44, 0.0  ;;  %v3456_v22 = vmul.f32 1.442695, %v3364_v39 }
 0x892   :  { %12052 = vpow2.f32 %v3456_v22 }
 0x89c   :  { %v16217_v2 = vpop.eup %12052 }
 0x89d   :  { %19294 = vst [vmem:[#allocation143_spill] sm:$0xff] %v16217_v2  ;;  %v3604_v16 = vsel %vm3159_vm5, %v16217_v2, 0.0  ;;  %v19301_v2 = vld [vmem:[#allocation183_spill] sm:$0xff] }
 0x8a0   :  { %v16189_v60 = vpop.xlane.xlu0 %3581 }
 0x8a3   :  { %5999 = vrot.lane.b32.xlu0 %v19285_v45, %s12506_s15  ;;  %3593 = vadd.xlane.f32.xlu1 %v3592_v5  ;;  %v19290_v45 = vld [vmem:[#allocation191_spill] sm:$0xff] }
 0x8a4   :  { %v5337_v6 = vpop.permute.xlu0 %5336  ;;  %v19291_v5 = vld [vmem:[#allocation127_spill] sm:$0xff] }
 0x8a5   :  { %v5410_v28 = vsel %vm3159_vm5, %v3784_v20, %v5337_v6  ;;  %v3365_v37 = vsub.f32 %v19291_v5, %v19290_v45  ;;  %v19293_v20 = vrot.slane %v19253_v29, 4  ;;  %v19296_v45 = vld [vmem:[#allocation195_spill] sm:$0xff]  ;;  %v19297_v5 = vld [vmem:[#allocation130_spill] sm:$0xff] }
 0x8a6   :  { %11212 = vmatprep.mubr.msk.bf16.mxu0 %vm5639_vm6, %v5410_v28 }
 0x8a7   :  { %5913 = vrot.lane.b32.xlu0 %v19286_v54, %s12506_s15  ;;  %3599 = vadd.xlane.f32.xlu1 %v3598_v63  ;;  %v5536_v6 = vsel %vm346_vm0, %v19293_v20, %v5535_v46  ;;  %v3458_v28 = vmul.f32 1.442695, %v3365_v37  ;;  %v3363_v46 = vsub.f32 %v19297_v5, %v19296_v45  ;;  %v19298_v37 = vld [vmem:[#allocation214_spill] sm:$0xff]  ;;  %v19299_v20 = vld [vmem:[#allocation192_spill] sm:$0xff] }
 0x8a9   :  { %12054 = vpow2.f32 %v3458_v28 }
 0x8aa   :  { %12056 = vrcp.f32 %v15735_v21  ;;  %v19302_v21 = vld [vmem:[#allocation176_spill] sm:$0xff] }
 0x8ab   :  { %12058 = vrcp.f32 %v19298_v37 }
 0x8b3   :  { %v16221_v39 = vpop.eup %12054 }
 0x8b4   :  { %19295 = vst [vmem:[#allocation86_spill] sm:$0xff] %v16221_v39  ;;  %v3607_v22 = vsel %vm3159_vm5, %v16221_v39, 0.0  ;;  %v12057_v12 = vpop.eup %12056 }
 0x8b5   :  { %v12059_v17 = vpop.eup %12058  ;;  %v3737_v45 = vmul.f32 %v12057_v12, %v19301_v2  ;;  %v19303_v12 = vld [vmem:[#allocation102_spill] sm:$0xff] }
 0x8b6   :  { %v3736_v5 = vmul.f32 %v12059_v17, %v19302_v21 }
 0x8b8   :  { %5599 = vrot.lane.b32.xlu1 %v5536_v6, %s12503_s12  ;;  %v19300_v6 = vld [vmem:[#allocation122_spill] sm:$0xff]  ;;  %v3785_v47 = vpack.c.bf16 %v3737_v45, %v3736_v5  ;;  %v19307_v5 = vld [vmem:[#allocation129_spill] sm:$0xff] }
 0x8b9   :  { %v3366_v28 = vsub.f32 %v19300_v6, %v19299_v20 }
 0x8ba   :  { %v16215_v63 = vpop.xlane.xlu1 %3584 }
 0x8bb   :  { %v3460_v42 = vmul.f32 1.442695, %v3366_v28 }
 0x8be   :  { %v5908_v54 = vpop.permute.xlu1 %5907 }
 0x8bf   :  { %11226 = vmatprep.subr.bf16.mxu1 %v5908_v54 }
 0x8c0   :  { %11227 = vmatpush3.bf16.msra.mxu1 %v5908_v54  ;;  %v3454_v54 = vmul.f32 1.442695, %v3363_v46 }
 0x8c2   :  { %12060 = vpow2.f32 %v3454_v54 }
 0x8c3   :  { %12062 = vpow2.f32 %v3460_v42  ;;  %v19304_v42 = vld [vmem:[#allocation78_spill] sm:$0xff] }
 0x8c4   :  { %12064 = vrcp.f32 %v15995_v56  ;;  %v5610_v17 = vsel %vm346_vm0, %v19304_v42, %v19303_v12 }
 0x8c5   :  { %12066 = vrcp.f32 %v16022_v41 }
 0x8c6   :  { %3605 = vadd.xlane.f32.xlu0 %v3604_v16  ;;  %12068 = vrcp.f32 %v15992_v57 }
 0x8c7   :  { %12070 = vrcp.f32 %v15984_v52 }
 0x8c8   :  { %12072 = vrcp.f32 %v15780_v43 }
 0x8c9   :  { %12074 = vrcp.f32 %v15769_v24 }
 0x8ca   :  { %3608 = vadd.xlane.f32.xlu0 %v3607_v22  ;;  %12076 = vrcp.f32 %v15778_v10 }
 0x8cc   :  { %v16235_v37 = vpop.eup %12060 }
 0x8cd   :  { %v3601_v46 = vsel %vm3159_vm5, %v16235_v37, 0.0  ;;  %v16241_v22 = vpop.eup %12062 }
 0x8ce   :  { %v3610_v2 = vsel %vm3159_vm5, %v16241_v22, 0.0  ;;  %v12065_v56 = vpop.eup %12064 }
 0x8cf   :  { %v12067_v20 = vpop.eup %12066  ;;  %v5222_v57 = vmul.f32 %v12065_v56, %v15804_v30 }
 0x8d0   :  { %v12069_v41 = vpop.eup %12068  ;;  %v5221_v52 = vmul.f32 %v12067_v20, %v15786_v49 }
 0x8d1   :  { %v12071_v6 = vpop.eup %12070  ;;  %v5224_v21 = vmul.f32 %v12069_v41, %v15795_v38  ;;  %v19311_v38 = vld [vmem:[#allocation189_spill] sm:$0xff] }
 0x8d2   :  { %v5268_v45 = vpack.c.bf16 %v5222_v57, %v5221_v52  ;;  %v5223_v24 = vmul.f32 %v12071_v6, %v15784_v11  ;;  %v12073_v10 = vpop.eup %12072  ;;  %v19312_v57 = vld [vmem:[#allocation187_spill] sm:$0xff]  ;;  %v19313_v52 = vld [vmem:[#allocation188_spill] sm:$0xff] }
 0x8d3   :  { %v12075_v42 = vpop.eup %12074  ;;  %v3738_v20 = vmul.f32 %v12073_v10, %v19311_v38 }
 0x8d4   :  { %v5269_v30 = vpack.c.bf16 %v5224_v21, %v5223_v24  ;;  %v12077_v49 = vpop.eup %12076  ;;  %v3740_v11 = vmul.f32 %v12075_v42, %v19312_v57  ;;  %v19314_v21 = vld [vmem:[#allocation103_spill] sm:$0xff] }
 0x8d5   :  { %v16232_v16 = vpop.xlane.xlu0 %3587  ;;  %v3739_v6 = vmul.f32 %v12077_v49, %v19313_v52 }
 0x8d9   :  { %v5339_v39 = vpop.permute.xlu0 %5338 }
 0x8da   :  { %v5413_v48 = vsel %vm3159_vm5, %v3785_v47, %v5339_v39  ;;  %v19305_v47 = vld [vmem:[#allocation66_spill] sm:$0xff]  ;;  %v19306_v39 = vld [vmem:[#allocation64_spill] sm:$0xff] }
 0x8db   :  { %11213 = vmatmul.mubr.msk.bf16.vlgmr.msra.gmra.mrb[172].mxu0 %vm5639_vm6, %v5413_v48 }
 0x8dc   :  { %3602 = vadd.xlane.f32.xlu1 %v3601_v46  ;;  %v19308_v46 = vld [vmem:[#allocation120_spill] sm:$0xff] }
 0x8dd   :  { %v16255_v48 = vpop.permute.xlu0 %5595  ;;  %v3368_v43 = vsub.f32 %v19308_v46, %v19307_v5  ;;  %v3786_v46 = vpack.c.bf16 %v3739_v6, %v3738_v20 }
 0x8e0   :  { %6001 = vrot.lane.b32.xlu0 %v5610_v17, %s12506_s15  ;;  %3611 = vadd.xlane.f32.xlu1 %v3610_v2  ;;  %v19309_v2 = vld [vmem:[#allocation124_spill] sm:$0xff] }
 0x8e1   :  { %v5998_v28 = vpop.permute.xlu0 %5997 }
 0x8e4   :  { %6089 = vrot.lane.b32.xlu0 %v19305_v47, %s12506_s15  ;;  %v19310_v47 = vld [vmem:[#allocation128_spill] sm:$0xff] }
 0x8e5   :  { %v16271_v17 = vpop.permute.xlu0 %5597  ;;  %v3369_v56 = vsub.f32 %v19310_v47, %v19309_v2  ;;  %v19317_v47 = vld [vmem:[#allocation197_spill] sm:$0xff] }
 0x8e8   :  { %6091 = vrot.lane.b32.xlu0 %v19306_v39, %s12506_s15  ;;  %v3464_v39 = vmul.f32 1.442695, %v3368_v43  ;;  %v3787_v43 = vpack.c.bf16 %v3740_v11, %v3740_v11 }
 0x8e9   :  { %v5343_v5 = vpop.permute.xlu0 %5342 }
 0x8ea   :  { %12078 = vpow2.f32 %v3464_v39  ;;  %v5419_v10 = vsel %vm3159_vm5, %v3787_v43, %v5343_v5 }
 0x8ef   :  { %v16264_v54 = vpop.xlane.xlu1 %3590 }
 0x8f1   :  { %5344 = vrot.lane.b32.xlu1 %v5268_v45, %s12507_s18  ;;  %v3466_v45 = vmul.f32 1.442695, %v3369_v56  ;;  %v19318_v56 = vld [vmem:[#allocation119_spill] sm:$0xff] }
 0x8f2   :  { %v3367_v39 = vsub.f32 %v19318_v56, %v19317_v47  ;;  %v19323_v47 = vld [vmem:[#allocation106_spill] sm:$0xff]  ;;  %v19325_v56 = vld [vmem:[#allocation76_spill] sm:$0xff] }
 0x8f3   :  { %v5996_v12 = vpop.permute.xlu1 %5995  ;;  %12080 = vpow2.f32 %v3466_v45 }
 0x8f4   :  { %11242 = vmatprep.subr.bf16.mxu0 %v5996_v12  ;;  %v16285_v42 = vpop.eup %12078  ;;  %12082 = vrcp.f32 %v16010_v23 }
 0x8f5   :  { %5346 = vrot.lane.b32.xlu1 %v5269_v30, %s12507_s18  ;;  %11243 = vmatpush3.bf16.msra.mxu0 %v5996_v12  ;;  %19315 = vst [vmem:[#allocation92_spill] sm:$0xff] %v16285_v42  ;;  %12084 = vrcp.f32 %v16037_v36 }
 0x8f6   :  { %11244 = vmatprep.subr.bf16.mxu0 %v5998_v28 }
 0x8f7   :  { %v5910_v41 = vpop.permute.xlu1 %5909 }
 0x8f8   :  { %11228 = vmatprep.subr.bf16.mxu1 %v5910_v41 }
 0x8f9   :  { %6003 = vrot.lane.b32.xlu1 %v19314_v21, %s12506_s15  ;;  %11229 = vmatpush3.bf16.msra.mxu1 %v5910_v41  ;;  %v3462_v41 = vmul.f32 1.442695, %v3367_v39 }
 0x8fa   :  { %11245 = vmatpush3.bf16.msra.mxu0 %v5998_v28  ;;  %v3616_v28 = vsel %vm3159_vm5, %v16285_v42, 0.0 }
 0x8fb   :  { %v5341_v24 = vpop.permute.xlu1 %5340  ;;  %12086 = vpow2.f32 %v3462_v41 }
 0x8fc   :  { %v5416_v12 = vsel %vm3159_vm5, %v3786_v46, %v5341_v24  ;;  %12088 = vrcp.f32 %v16004_v0  ;;  %v19329_v0 = vld [vmem:[#allocation67_spill] sm:$0xff] }
 0x8fd   :  { %11216 = vmatprep.mubr.msk.bf16.mxu0 %vm5639_vm6, %v5416_v12  ;;  %v16291_v2 = vpop.eup %12080 }
 0x8fe   :  { %11217 = vmatmul.mubr.msk.bf16.gmra.mrb[176].mxu0 %vm5639_vm6, %v5419_v10  ;;  %19316 = vst [vmem:[#allocation72_spill] sm:$0xff] %v16291_v2  ;;  %v3619_v11 = vsel %vm3159_vm5, %v16291_v2, 0.0  ;;  %v12083_v5 = vpop.eup %12082 }
 0x8ff   :  { %v5912_v30 = vpop.permute.xlu1 %5911  ;;  %v12085_v46 = vpop.eup %12084  ;;  %v5226_v23 = vmul.f32 %v12083_v5, %v15825_v40  ;;  %v19324_v40 = vld [vmem:[#allocation178_spill] sm:$0xff]  ;;  %v19328_v5 = vld [vmem:[#allocation75_spill] sm:$0xff] }
 0x900   :  { %11230 = vmatprep.subr.bf16.mxu1 %v5912_v30  ;;  %v5225_v12 = vmul.f32 %v12085_v46, %v15828_v19  ;;  %v3371_v39 = vsub.f32 %v19325_v56, %v19324_v40  ;;  %v19335_v40 = vld [vmem:[#allocation174_spill] sm:$0xff] }
 0x901   :  { %11231 = vmatpush3.bf16.msra.mxu1 %v5912_v30  ;;  %v19336_v56 = vld [vmem:[#allocation114_spill] sm:$0xff] }
 0x902   :  { %v5270_v30 = vpack.c.bf16 %v5226_v23, %v5225_v12  ;;  %v3470_v12 = vmul.f32 1.442695, %v3371_v39  ;;  %v3370_v39 = vsub.f32 %v19336_v56, %v19335_v40 }
 0x904   :  { %12090 = vpow2.f32 %v3470_v12  ;;  %v3468_v12 = vmul.f32 1.442695, %v3370_v39 }
 0x905   :  { %v16311_v43 = vpop.eup %12086 }
 0x906   :  { %v16287_v49 = vpop.f32.mrb[164].mxu0  ;;  %v3613_v36 = vsel %vm3159_vm5, %v16311_v43, 0.0  ;;  %v12089_v19 = vpop.eup %12088 }
 0x907   :  { %3617 = vadd.xlane.f32.xlu0 %v3616_v28  ;;  %v16295_v38 = vpop.f32.mrb[165].mxu0  ;;  %v5227_v41 = vmul.f32 %v12089_v19, %v15820_v62 }
 0x908   :  { %19319 = vst [vmem:[#allocation118_spill] sm:$0xff] %v16295_v38  ;;  %v16297_v20 = vpop.f32.mrb[166].mxu0  ;;  %v19354_v38 = vld [vmem:[#allocation184_spill] sm:$0xff] }
 0x909   :  { %19320 = vst [vmem:[#allocation123_spill] sm:$0xff] %v16297_v20  ;;  %v16299_v57 = vpop.f32.mrb[167].mxu0  ;;  %v5271_v23 = vpack.c.bf16 %v5227_v41, %v5227_v41 }
 0x90b   :  { %3620 = vadd.xlane.f32.xlu0 %v3619_v11  ;;  %v19326_v11 = vld [vmem:[#allocation105_spill] sm:$0xff] }
 0x90e   :  { %v16305_v52 = vpop.f32.mrb[168].mxu0 }
 0x90f   :  { %19321 = vst [vmem:[#allocation126_spill] sm:$0xff] %v16305_v52  ;;  %v16307_v6 = vpop.f32.mrb[169].mxu0 }
 0x910   :  { %v11175_v45 = vpop.f32.mrb[170].mxu0 }
 0x911   :  { %v16309_v21 = vpop.f32.mrb[171].mxu0  ;;  %v19327_v45 = vld [vmem:[#allocation170_spill] sm:$0xff] }
 0x912   :  { %19322 = vst [vmem:[#allocation151_spill] sm:$0xff] %v16309_v21  ;;  %v3372_v46 = vsub.f32 %v19328_v5, %v19327_v45  ;;  %v19338_v45 = vld [vmem:[#allocation173_spill] sm:$0xff]  ;;  %v19339_v5 = vld [vmem:[#allocation112_spill] sm:$0xff] }
 0x91a   :  { %v16313_v24 = vpop.xlane.xlu0 %3596 }
 0x91d   :  { %3614 = vadd.xlane.f32.xlu1 %v3613_v36  ;;  %v3472_v36 = vmul.f32 1.442695, %v3372_v46  ;;  %v3373_v46 = vsub.f32 %v19339_v5, %v19338_v45  ;;  %v19344_v5 = vld [vmem:[#allocation104_spill] sm:$0xff] }
 0x91e   :  { %v6000_v10 = vpop.permute.xlu0 %5999 }
 0x91f   :  { %11246 = vmatprep.subr.bf16.mxu0 %v6000_v10  ;;  %12092 = vpow2.f32 %v3472_v36 }
 0x920   :  { %11247 = vmatpush3.bf16.msra.mxu0 %v6000_v10  ;;  %v16333_v10 = vpop.eup %12090  ;;  %12094 = vpow2.f32 %v3468_v12 }
 0x921   :  { %5348 = vrot.lane.b32.xlu0 %v5270_v30, %s12507_s18  ;;  %19330 = vst [vmem:[#allocation83_spill] sm:$0xff] %v16333_v10 }
 0x922   :  { %v5914_v28 = vpop.permute.xlu0 %5913 }
 0x923   :  { %11232 = vmatprep.subr.bf16.mxu1 %v5914_v28 }
 0x924   :  { %11233 = vmatpush3.bf16.msra.mxu1 %v5914_v28 }
 0x925   :  { %6007 = vrot.lane.b32.xlu0 %v19323_v47, %s12506_s15  ;;  %v3625_v47 = vsel %vm3159_vm5, %v16333_v10, 0.0 }
 0x929   :  { %v16343_v19 = vpop.eup %12092 }
 0x92a   :  { %19334 = vst [vmem:[#allocation162_spill] sm:$0xff] %v16343_v19  ;;  %v3628_v41 = vsel %vm3159_vm5, %v16343_v19, 0.0  ;;  %v16355_v36 = vpop.eup %12094 }
 0x92b   :  { %19340 = vst [vmem:[#allocation152_spill] sm:$0xff] %v16355_v36  ;;  %v3622_v40 = vsel %vm3159_vm5, %v16355_v36, 0.0 }
 0x92e   :  { %6005 = vrot.lane.b32.xlu1 %v19326_v11, %s12506_s15 }
 0x932   :  { %6093 = vrot.lane.b32.xlu1 %v19329_v0, %s12506_s15  ;;  %v3474_v0 = vmul.f32 1.442695, %v3373_v46  ;;  %v19345_v46 = vld [vmem:[#allocation84_spill] sm:$0xff] }
 0x933   :  { %v5612_v12 = vsel %vm346_vm0, %v19345_v46, %v19344_v5 }
 0x934   :  { %12096 = vpow2.f32 %v3474_v0 }
 0x935   :  { %12098 = vrcp.f32 %v15915_v59 }
 0x936   :  { %5350 = vrot.lane.b32.xlu1 %v5271_v23, %s12507_s18  ;;  %12100 = vrcp.f32 %v15944_v8 }
 0x937   :  { %12102 = vrcp.f32 %v15816_v26 }
 0x938   :  { %12104 = vrcp.f32 %v15905_v50 }
 0x939   :  { %12106 = vrcp.f32 %v15798_v25  ;;  %v19349_v25 = vld [vmem:[#allocation160_spill] sm:$0xff] }
 0x93a   :  { %12108 = vrcp.f32 %v15938_v15 }
 0x93b   :  { %12110 = vrcp.f32 %v15814_v35  ;;  %v19351_v35 = vld [vmem:[#allocation196_spill] sm:$0xff] }
 0x93c   :  { %12112 = vrcp.f32 %v15808_v51 }
 0x93e   :  { %v16363_v56 = vpop.eup %12096 }
 0x93f   :  { %19341 = vst [vmem:[#allocation74_spill] sm:$0xff] %v16363_v56  ;;  %v3631_v19 = vsel %vm3159_vm5, %v16363_v56, 0.0  ;;  %v12099_v26 = vpop.eup %12098  ;;  %v19350_v56 = vld [vmem:[#allocation157_spill] sm:$0xff] }
 0x940   :  { %v12101_v5 = vpop.eup %12100 }
 0x941   :  { %v16335_v30 = vpop.f32.mrb[132].mxu1  ;;  %v12103_v50 = vpop.eup %12102 }
 0x942   :  { %19331 = vst [vmem:[#allocation153_spill] sm:$0xff] %v16335_v30  ;;  %v16337_v28 = vpop.f32.mrb[133].mxu1  ;;  %v12105_v15 = vpop.eup %12104 }
 0x943   :  { %19332 = vst [vmem:[#allocation204_spill] sm:$0xff] %v16337_v28  ;;  %v16339_v62 = vpop.f32.mrb[134].mxu1  ;;  %v19352_v28 = vld [vmem:[#allocation161_spill] sm:$0xff] }
 0x944   :  { %19333 = vst [vmem:[#allocation209_spill] sm:$0xff] %v16339_v62  ;;  %3626 = vadd.xlane.f32.xlu0 %v3625_v47  ;;  %v16347_v11 = vpop.f32.mrb[135].mxu1  ;;  %v16359_v47 = vpop.xlane.xlu1 %3593  ;;  %v5231_v21 = vmul.f32 %v12105_v15, %v19352_v28  ;;  %v19355_v62 = vld [vmem:[#allocation111_spill] sm:$0xff]  ;;  %v19359_v15 = vld [vmem:[#allocation182_spill] sm:$0xff] }
 0x945   :  { %19337 = vst [vmem:[#allocation201_spill] sm:$0xff] %v16347_v11  ;;  %v3375_v11 = vsub.f32 %v19355_v62, %v19354_v38 }
 0x947   :  { %v3478_v28 = vmul.f32 1.442695, %v3375_v11 }
 0x948   :  { %3629 = vadd.xlane.f32.xlu0 %v3628_v41  ;;  %v16380_v59 = vpop.xlane.xlu1 %3599 }
 0x949   :  { %12114 = vpow2.f32 %v3478_v28 }
 0x94c   :  { %v16389_v8 = vpop.permute.xlu1 %5599 }
 0x953   :  { %v16353_v23 = vpop.xlane.xlu0 %3605 }
 0x957   :  { %v16357_v10 = vpop.xlane.xlu0 %3608 }
 0x95a   :  { %3623 = vadd.xlane.f32.xlu1 %v3622_v40 }
 0x95b   :  { %v16365_v45 = vpop.f32.mrb[136].mxu1  ;;  %v6002_v39 = vpop.permute.xlu0 %6001 }
 0x95c   :  { %19342 = vst [vmem:[#allocation62_spill] sm:$0xff] %v16365_v45  ;;  %v16368_v41 = vpop.f32.mrb[137].mxu1  ;;  %11248 = vmatprep.subr.bf16.mxu0 %v6002_v39  ;;  %v3742_v45 = vmul.f32 %v12103_v50, %v19351_v35 }
 0x95d   :  { %19343 = vst [vmem:[#allocation167_spill] sm:$0xff] %v16368_v41  ;;  %v11197_v0 = vpop.f32.mrb[138].mxu1  ;;  %11249 = vmatpush3.bf16.msra.mxu0 %v6002_v39  ;;  %v19347_v39 = vld [vmem:[#allocation69_spill] sm:$0xff] }
 0x95e   :  { %3632 = vadd.xlane.f32.xlu1 %v3631_v19  ;;  %6095 = vrot.lane.b32.xlu0 %v5612_v12, %s12506_s15  ;;  %v16377_v40 = vpop.f32.mrb[139].mxu1  ;;  %v19348_v19 = vld [vmem:[#allocation68_spill] sm:$0xff]  ;;  %v5229_v12 = vmul.f32 %v12099_v26, %v19349_v25  ;;  %v12107_v0 = vpop.eup %12106 }
 0x95f   :  { %19346 = vst [vmem:[#allocation163_spill] sm:$0xff] %v16377_v40  ;;  %v6090_v36 = vpop.permute.xlu0 %6089  ;;  %v12109_v2 = vpop.eup %12108  ;;  %v19356_v26 = vld [vmem:[#allocation156_spill] sm:$0xff] }
 0x960   :  { %11264 = vmatprep.subr.bf16.mxu1 %v6090_v36  ;;  %v12111_v51 = vpop.eup %12110  ;;  %v5230_v25 = vmul.f32 %v12109_v2, %v19356_v26 }
 0x961   :  { %v12113_v40 = vpop.eup %12112 }
 0x962   :  { %6183 = vrot.lane.b32.xlu0 %v19347_v39, %s12506_s15  ;;  %v5228_v39 = vmul.f32 %v12101_v5, %v19350_v56  ;;  %v19357_v5 = vld [vmem:[#allocation194_spill] sm:$0xff]  ;;  %v5273_v35 = vpack.c.bf16 %v5231_v21, %v5230_v25  ;;  %v19361_v21 = vld [vmem:[#allocation107_spill] sm:$0xff] }
 0x963   :  { %v3744_v52 = vmul.f32 %v12111_v51, %v19357_v5  ;;  %v6092_v62 = vpop.permute.xlu0 %6091  ;;  %v19363_v51 = vld [vmem:[#allocation113_spill] sm:$0xff] }
 0x964   :  { %v5272_v30 = vpack.c.bf16 %v5229_v12, %v5228_v39  ;;  %v19358_v12 = vld [vmem:[#allocation193_spill] sm:$0xff] }
 0x965   :  { %v3743_v39 = vmul.f32 %v12113_v40, %v19358_v12  ;;  %v19362_v40 = vld [vmem:[#allocation185_spill] sm:$0xff] }
 0x966   :  { %6185 = vrot.lane.b32.xlu0 %v19348_v19, %s12506_s15  ;;  %v19353_v19 = vld [vmem:[#allocation190_spill] sm:$0xff]  ;;  %v3374_v26 = vsub.f32 %v19363_v51, %v19362_v40  ;;  %v19370_v51 = vld [vmem:[#allocation140_spill] sm:$0xff] }
 0x967   :  { %v3741_v20 = vmul.f32 %v12107_v0, %v19353_v19  ;;  %v19360_v0 = vld [vmem:[#allocation117_spill] sm:$0xff]  ;;  %v3789_v38 = vpack.c.bf16 %v3744_v52, %v3743_v39 }
 0x968   :  { %v3376_v19 = vsub.f32 %v19360_v0, %v19359_v15  ;;  %v3476_v25 = vmul.f32 1.442695, %v3374_v26  ;;  %v19371_v26 = vld [vmem:[#allocation141_spill] sm:$0xff] }
 0x969   :  { %v16393_v46 = vpop.xlane.xlu1 %3602  ;;  %v3788_v56 = vpack.c.bf16 %v3742_v45, %v3741_v20 }
 0x96a   :  { %v3480_v20 = vmul.f32 1.442695, %v3376_v19 }
 0x96c   :  { %12116 = vpow2.f32 %v3480_v20 }
 0x96d   :  { %v16398_v41 = vpop.xlane.xlu1 %3611  ;;  %12118 = vrcp.f32 %v16156_v33 }
 0x96e   :  { %12120 = vrcp.f32 %v16106_v32 }
 0x96f   :  { %5352 = vrot.lane.b32.xlu1 %v5272_v30, %s12507_s18  ;;  %12122 = vpow2.f32 %v3476_v25 }
 0x970   :  { %12124 = vrcp.f32 %v15965_v34 }
 0x971   :  { %v5345_v50 = vpop.permute.xlu1 %5344  ;;  %12126 = vrcp.f32 %v15958_v55 }
 0x972   :  { %v5422_v42 = vsel %vm3159_vm5, %v3788_v56, %v5345_v50  ;;  %12128 = vrcp.f32 %v15930_v18  ;;  %v19366_v18 = vld [vmem:[#allocation169_spill] sm:$0xff] }
 0x973   :  { %5354 = vrot.lane.b32.xlu1 %v5273_v35, %s12507_s18  ;;  %11234 = vmatprep.mubr.msk.bf16.mxu1 %vm5639_vm6, %v5422_v42  ;;  %v16417_v42 = vpop.eup %12114  ;;  %12130 = vrcp.f32 %v16113_v14  ;;  %v19368_v14 = vld [vmem:[#allocation212_spill] sm:$0xff] }
 0x974   :  { %v3637_v52 = vsel %vm3159_vm5, %v16417_v42, 0.0  ;;  %12132 = vrcp.f32 %v16029_v61 }
 0x975   :  { %v5347_v30 = vpop.permute.xlu1 %5346  ;;  %12134 = vrcp.f32 %v16047_v1 }
 0x976   :  { %v5425_v2 = vsel %vm3159_vm5, %v3789_v38, %v5347_v30  ;;  %v16421_v45 = vpop.eup %12116 }
 0x977   :  { %6097 = vrot.lane.b32.xlu1 %v19361_v21, %s12506_s15  ;;  %11235 = vmatmul.mubr.msk.bf16.vlgmr.msra.gmra.mrb[140].mxu1 %vm5639_vm6, %v5425_v2  ;;  %v12119_v56 = vpop.eup %12118  ;;  %v19367_v2 = vld [vmem:[#allocation108_spill] sm:$0xff] }
 0x978   :  { %11265 = vmatpush3.bf16.msra.mxu1 %v6090_v36  ;;  %v3640_v36 = vsel %vm3159_vm5, %v16421_v45, 0.0  ;;  %v12121_v50 = vpop.eup %12120  ;;  %v3745_v12 = vmul.f32 %v12119_v56, %v15956_v3  ;;  %v19365_v3 = vld [vmem:[#allocation109_spill] sm:$0xff] }
 0x979   :  { %11266 = vmatprep.subr.bf16.mxu1 %v6092_v62  ;;  %v6004_v11 = vpop.permute.xlu1 %6003  ;;  %v16431_v35 = vpop.eup %12122  ;;  %v3746_v28 = vmul.f32 %v12121_v50, %v15919_v27  ;;  %v19364_v27 = vld [vmem:[#allocation110_spill] sm:$0xff]  ;;  %v5614_v34 = vsel %vm346_vm0, %v19192_v53, %v19365_v3  ;;  %v19373_v3 = vld [vmem:[#allocation220_spill] sm:$0xff] }
 0x97a   :  { %11250 = vmatprep.subr.bf16.mxu0 %v6004_v11  ;;  %v3634_v15 = vsel %vm3159_vm5, %v16431_v35, 0.0  ;;  %v12125_v19 = vpop.eup %12124 }
 0x97b   :  { %11251 = vmatpush3.bf16.msra.mxu0 %v6004_v11  ;;  %v3790_v33 = vpack.c.bf16 %v3746_v28, %v3745_v12  ;;  %v12127_v55 = vpop.eup %12126  ;;  %v5233_v38 = vmul.f32 %v12125_v19, %v19366_v18  ;;  %v19369_v11 = vld [vmem:[#allocation210_spill] sm:$0xff] }
 0x97c   :  { %11267 = vmatpush3.bf16.msra.mxu1 %v6092_v62  ;;  %v12129_v30 = vpop.eup %12128  ;;  %v5232_v61 = vmul.f32 %v12127_v55, %v19368_v14  ;;  %v19375_v14 = vld [vmem:[#allocation137_spill] sm:$0xff] }
 0x97d   :  { %v12131_v20 = vpop.eup %12130  ;;  %v5234_v1 = vmul.f32 %v12129_v30, %v19369_v11 }
 0x97e   :  { %v5274_v53 = vpack.c.bf16 %v5233_v38, %v5232_v61  ;;  %v3747_v28 = vmul.f32 %v12131_v20, %v15925_v9  ;;  %v19376_v20 = vld [vmem:[#allocation155_spill] sm:$0xff] }
 0x980   :  { %v3791_v19 = vpack.c.bf16 %v3747_v28, %v3747_v28 }
 0x985   :  { %3638 = vadd.xlane.f32.xlu0 %v3637_v52  ;;  %v12133_v52 = vpop.eup %12132 }
 0x986   :  { %v12135_v50 = vpop.eup %12134 }
 0x989   :  { %3641 = vadd.xlane.f32.xlu0 %v3640_v36  ;;  %v3378_v36 = vsub.f32 %v19371_v26, %v19370_v51  ;;  %v19380_v26 = vld [vmem:[#allocation132_spill] sm:$0xff] }
 0x994   :  { %v16429_v5 = vpop.xlane.xlu0 %3617 }
 0x998   :  { %v16434_v39 = vpop.xlane.xlu0 %3620 }
 0x99b   :  { %3635 = vadd.xlane.f32.xlu1 %v3634_v15 }
 0x99c   :  { %v5349_v0 = vpop.permute.xlu0 %5348 }
 0x99d   :  { %v5428_v32 = vsel %vm3159_vm5, %v3790_v33, %v5349_v0  ;;  %v5275_v33 = vpack.c.bf16 %v5234_v1, %v5234_v1  ;;  %v19372_v0 = vld [vmem:[#allocation222_spill] sm:$0xff] }
 0x99e   :  { %11238 = vmatprep.mubr.msk.bf16.mxu1 %vm5639_vm6, %v5428_v32  ;;  %v5236_v32 = vmul.f32 %v12133_v52, %v19372_v0  ;;  %v19379_v52 = vld [vmem:[#allocation71_spill] sm:$0xff] }
 0x99f   :  { %6187 = vrot.lane.b32.xlu0 %v19194_v31, %s12506_s15 }
 0x9a0   :  { %v6008_v25 = vpop.permute.xlu0 %6007 }
 0x9a3   :  { %6101 = vrot.lane.b32.xlu0 %v19364_v27, %s12506_s15  ;;  %v3484_v27 = vmul.f32 1.442695, %v3378_v36  ;;  %v19381_v36 = vld [vmem:[#allocation138_spill] sm:$0xff] }
 0x9a5   :  { %12136 = vpow2.f32 %v3484_v27  ;;  %v19383_v27 = vld [vmem:[#allocation199_spill] sm:$0xff] }
 0x9a6   :  { %12138 = vrcp.f32 %v19376_v20 }
 0x9a7   :  { %6189 = vrot.lane.b32.xlu0 %v5614_v34, %s12506_s15  ;;  %v5235_v34 = vmul.f32 %v12135_v50, %v19373_v3  ;;  %12140 = vrcp.f32 %v19379_v52  ;;  %v19382_v50 = vld [vmem:[#allocation200_spill] sm:$0xff] }
 0x9a9   :  { %v5276_v18 = vpack.c.bf16 %v5236_v32, %v5235_v34 }
 0x9aa   :  { %v16455_v31 = vpop.xlane.xlu1 %3614 }
 0x9ac   :  { %6099 = vrot.lane.b32.xlu1 %v19367_v2, %s12506_s15  ;;  %v19374_v2 = vld [vmem:[#allocation133_spill] sm:$0xff] }
 0x9ad   :  { %v3377_v61 = vsub.f32 %v19375_v14, %v19374_v2  ;;  %v19385_v2 = vld [vmem:[#allocation219_spill] sm:$0xff] }
 0x9ae   :  { %v6006_v21 = vpop.permute.xlu1 %6005  ;;  %v16461_v62 = vpop.f32.mrb[172].mxu0 }
 0x9af   :  { %v16464_v40 = vpop.f32.mrb[173].mxu0  ;;  %11252 = vmatprep.subr.bf16.mxu0 %v6006_v21  ;;  %v16480_v9 = vpop.eup %12136  ;;  %v3482_v1 = vmul.f32 1.442695, %v3377_v61 }
 0x9b0   :  { %5356 = vrot.lane.b32.xlu1 %v5274_v53, %s12507_s18  ;;  %v16469_v56 = vpop.f32.mrb[174].mxu0  ;;  %11253 = vmatpush3.bf16.msra.mxu0 %v6006_v21  ;;  %v3646_v30 = vsel %vm3159_vm5, %v16480_v9, 0.0  ;;  %v19377_v21 = vld [vmem:[#allocation198_spill] sm:$0xff]  ;;  %v19378_v53 = vld [vmem:[#allocation135_spill] sm:$0xff]  ;;  %v12139_v32 = vpop.eup %12138 }
 0x9b1   :  { %v16471_v12 = vpop.f32.mrb[175].mxu0  ;;  %11254 = vmatprep.subr.bf16.mxu0 %v6008_v25  ;;  %v3379_v11 = vsub.f32 %v19378_v53, %v19377_v21  ;;  %12142 = vpow2.f32 %v3482_v1 }
 0x9b2   :  { %v6094_v15 = vpop.permute.xlu1 %6093  ;;  %12144 = vrcp.f32 %v19382_v50  ;;  %v19387_v50 = vld [vmem:[#allocation224_spill] sm:$0xff] }
 0x9b3   :  { %11268 = vmatprep.subr.bf16.mxu1 %v6094_v15  ;;  %v3486_v51 = vmul.f32 1.442695, %v3379_v11 }
 0x9b4   :  { %5358 = vrot.lane.b32.xlu1 %v5275_v33, %s12507_s18  ;;  %11255 = vmatpush3.bf16.msra.mxu0 %v6008_v25  ;;  %v3380_v25 = vsub.f32 %v19381_v36, %v19380_v26 }
 0x9b5   :  { %11269 = vmatpush3.bf16.msra.mxu1 %v6094_v15  ;;  %12146 = vpow2.f32 %v3486_v51  ;;  %v19386_v51 = vld [vmem:[#allocation225_spill] sm:$0xff] }
 0x9b6   :  { %v5351_v55 = vpop.permute.xlu1 %5350  ;;  %v3488_v33 = vmul.f32 1.442695, %v3380_v25  ;;  %12148 = vrcp.f32 %v19383_v27 }
 0x9b7   :  { %v5431_v38 = vsel %vm3159_vm5, %v3791_v19, %v5351_v55  ;;  %v12141_v19 = vpop.eup %12140 }
 0x9b8   :  { %5360 = vrot.lane.b32.xlu1 %v5276_v18, %s12507_s18  ;;  %11239 = vmatmul.mubr.msk.bf16.gmra.mrb[144].mxu1 %vm5639_vm6, %v5431_v38  ;;  %12150 = vpow2.f32 %v3488_v33  ;;  %v19384_v18 = vld [vmem:[#allocation221_spill] sm:$0xff]  ;;  %v5237_v14 = vmul.f32 %v12141_v19, %v19385_v2  ;;  %v19389_v19 = vld [vmem:[#allocation202_spill] sm:$0xff]  ;;  %v19390_v2 = vld [vmem:[#allocation147_spill] sm:$0xff] }
 0x9b9   :  { %v5238_v38 = vmul.f32 %v12139_v32, %v19384_v18  ;;  %12152 = vrcp.f32 %v16215_v63 }
 0x9ba   :  { %12154 = vrcp.f32 %v16189_v60 }
 0x9bb   :  { %v5277_v20 = vpack.c.bf16 %v5238_v38, %v5237_v14  ;;  %12156 = vrcp.f32 %v16264_v54 }
 0x9bc   :  { %12158 = vrcp.f32 %v16232_v16 }
 0x9c6   :  { %3647 = vadd.xlane.f32.xlu0 %v3646_v30  ;;  %v16505_v30 = vpop.eup %12142 }
 0x9c7   :  { %v12145_v21 = vpop.eup %12144  ;;  %v3643_v53 = vsel %vm3159_vm5, %v16505_v30, 0.0 }
 0x9c8   :  { %v16510_v11 = vpop.eup %12146  ;;  %v5240_v26 = vmul.f32 %v12145_v21, %v19386_v51  ;;  %v19392_v51 = vld [vmem:[#allocation139_spill] sm:$0xff] }
 0x9c9   :  { %v12149_v1 = vpop.eup %12148  ;;  %v3649_v36 = vsel %vm3159_vm5, %v16510_v11, 0.0 }
 0x9ca   :  { %v16518_v25 = vpop.eup %12150  ;;  %v5239_v33 = vmul.f32 %v12149_v1, %v19387_v50  ;;  %v19394_v50 = vld [vmem:[#allocation145_spill] sm:$0xff] }
 0x9cb   :  { %v3652_v32 = vsel %vm3159_vm5, %v16518_v25, 0.0  ;;  %v12153_v60 = vpop.eup %12152 }
 0x9cc   :  { %v5278_v63 = vpack.c.bf16 %v5240_v26, %v5239_v33  ;;  %v3749_v18 = vmul.f32 %v12153_v60, %v19389_v19 }
 0x9d1   :  { %v16493_v28 = vpop.f32.mrb[176].mxu0  ;;  %v16495_v15 = vpop.xlane.xlu0 %3626 }
 0x9d2   :  { %v16497_v0 = vpop.f32.mrb[177].mxu0 }
 0x9d3   :  { %v11219_v3 = vpop.f32.mrb[178].mxu0 }
 0x9d4   :  { %v16500_v34 = vpop.f32.mrb[179].mxu0  ;;  %v19388_v3 = vld [vmem:[#allocation73_spill] sm:$0xff] }
 0x9d5   :  { %v16502_v55 = vpop.xlane.xlu0 %3629 }
 0x9d9   :  { %v6096_v61 = vpop.permute.xlu0 %6095 }
 0x9da   :  { %11270 = vmatprep.subr.bf16.mxu1 %v6096_v61 }
 0x9db   :  { %11271 = vmatpush3.bf16.msra.mxu1 %v6096_v61 }
 0x9dc   :  { %5362 = vrot.lane.b32.xlu0 %v5277_v20, %s12507_s18  ;;  %3644 = vadd.xlane.f32.xlu1 %v3643_v53  ;;  %v19391_v20 = vld [vmem:[#allocation150_spill] sm:$0xff] }
 0x9dd   :  { %v6184_v52 = vpop.permute.xlu0 %6183 }
 0x9de   :  { %11286 = vmatprep.subr.bf16.mxu0 %v6184_v52 }
 0x9e0   :  { %6277 = vrot.lane.b32.xlu0 %v19202_v7, %s12506_s15  ;;  %3650 = vadd.xlane.f32.xlu1 %v3649_v36  ;;  %v12155_v7 = vpop.eup %12154  ;;  %v19393_v36 = vld [vmem:[#allocation203_spill] sm:$0xff] }
 0x9e1   :  { %v12157_v38 = vpop.eup %12156  ;;  %v3748_v16 = vmul.f32 %v12155_v7, %v19390_v2  ;;  %v3382_v33 = vsub.f32 %v19394_v50, %v19393_v36  ;;  %v19395_v7 = vld [vmem:[#allocation115_spill] sm:$0xff]  ;;  %v6186_v19 = vpop.permute.xlu0 %6185  ;;  %v19402_v36 = vld [vmem:[#allocation70_spill] sm:$0xff] }
 0x9e2   :  { %v12159_v14 = vpop.eup %12158  ;;  %v3751_v21 = vmul.f32 %v12157_v38, %v19391_v20  ;;  %v19396_v38 = vld [vmem:[#allocation116_spill] sm:$0xff] }
 0x9e3   :  { %v3792_v61 = vpack.c.bf16 %v3749_v18, %v3748_v16  ;;  %v3750_v26 = vmul.f32 %v12159_v14, %v19392_v51  ;;  %v19397_v14 = vld [vmem:[#allocation148_spill] sm:$0xff] }
 0x9e4   :  { %5364 = vrot.lane.b32.xlu0 %v5278_v63, %s12507_s18  ;;  %3653 = vadd.xlane.f32.xlu1 %v3652_v32 }
 0x9e5   :  { %v3793_v63 = vpack.c.bf16 %v3751_v21, %v3750_v26  ;;  %v19399_v21 = vld [vmem:[#allocation125_spill] sm:$0xff] }
 0x9e7   :  { %v16528_v27 = vpop.xlane.xlu1 %3623 }
 0x9e8   :  { %6279 = vrot.lane.b32.xlu0 %v19388_v3, %s12506_s15  ;;  %v3492_v3 = vmul.f32 1.442695, %v3382_v33 }
 0x9ea   :  { %12160 = vpow2.f32 %v3492_v3 }
 0x9eb   :  { %v16533_v54 = vpop.xlane.xlu1 %3632  ;;  %12162 = vrcp.f32 %v19399_v21 }
 0x9ef   :  { %v5353_v53 = vpop.permute.xlu1 %5352 }
 0x9f0   :  { %v5434_v1 = vsel %vm3159_vm5, %v3792_v61, %v5353_v53  ;;  %v19398_v61 = vld [vmem:[#allocation149_spill] sm:$0xff]  ;;  %v19401_v53 = vld [vmem:[#allocation146_spill] sm:$0xff] }
 0x9f1   :  { %11256 = vmatprep.mubr.msk.bf16.mxu0 %vm5639_vm6, %v5434_v1  ;;  %v3381_v20 = vsub.f32 %v19398_v61, %v19397_v14 }
 0x9f3   :  { %v5355_v32 = vpop.permute.xlu1 %5354  ;;  %v3490_v51 = vmul.f32 1.442695, %v3381_v20 }
 0x9f4   :  { %v5437_v60 = vsel %vm3159_vm5, %v3793_v63, %v5355_v32  ;;  %v16548_v2 = vpop.eup %12160  ;;  %v19403_v63 = vld [vmem:[#allocation89_spill] sm:$0xff] }
 0x9f5   :  { %6191 = vrot.lane.b32.xlu1 %v19395_v7, %s12506_s15  ;;  %11257 = vmatmul.mubr.msk.bf16.vlgmr.msra.gmra.mrb[180].mxu0 %vm5639_vm6, %v5437_v60  ;;  %v3658_v16 = vsel %vm3159_vm5, %v16548_v2, 0.0  ;;  %12164 = vpow2.f32 %v3490_v51  ;;  %v12163_v33 = vpop.eup %12162  ;;  %v19404_v60 = vld [vmem:[#allocation223_spill] sm:$0xff] }
 0x9f6   :  { %11287 = vmatpush3.bf16.msra.mxu0 %v6184_v52  ;;  %v19400_v52 = vld [vmem:[#allocation205_spill] sm:$0xff]  ;;  %12166 = vrcp.f32 %v19402_v36  ;;  %v5241_v3 = vmul.f32 %v12163_v33, %v19404_v60  ;;  %v19409_v33 = vld [vmem:[#allocation230_spill] sm:$0xff] }
 0x9f7   :  { %11288 = vmatprep.subr.bf16.mxu0 %v6186_v19  ;;  %v6098_v18 = vpop.permute.xlu1 %6097  ;;  %v3383_v1 = vsub.f32 %v19401_v53, %v19400_v52  ;;  %v19406_v52 = vld [vmem:[#allocation85_spill] sm:$0xff]  ;;  %v19407_v53 = vld [vmem:[#allocation215_spill] sm:$0xff] }
 0x9f8   :  { %11272 = vmatprep.subr.bf16.mxu1 %v6098_v18 }
 0x9f9   :  { %6193 = vrot.lane.b32.xlu1 %v19396_v38, %s12506_s15  ;;  %11273 = vmatpush3.bf16.msra.mxu1 %v6098_v18  ;;  %v3494_v26 = vmul.f32 1.442695, %v3383_v1  ;;  %v5279_v38 = vpack.c.bf16 %v5241_v3, %v5241_v3  ;;  %v19411_v3 = vld [vmem:[#allocation134_spill] sm:$0xff] }
 0x9fa   :  { %11289 = vmatpush3.bf16.msra.mxu0 %v6186_v19  ;;  %v19405_v19 = vld [vmem:[#allocation95_spill] sm:$0xff] }
 0x9fb   :  { %12168 = vpow2.f32 %v3494_v26  ;;  %v19408_v26 = vld [vmem:[#allocation172_spill] sm:$0xff] }
 0x9fc   :  { %12170 = vrcp.f32 %v19403_v63 }
 0x9fd   :  { %12172 = vrcp.f32 %v19405_v19 }
 0x9fe   :  { %12174 = vrcp.f32 %v16359_v47 }
 0x9ff   :  { %v16564_v7 = vpop.eup %12164  ;;  %12176 = vrcp.f32 %v19406_v52 }
 0xa00   :  { %v3655_v14 = vsel %vm3159_vm5, %v16564_v7, 0.0  ;;  %12178 = vrcp.f32 %v16313_v24  ;;  %v19410_v24 = vld [vmem:[#allocation136_spill] sm:$0xff] }
 0xa01   :  { %12180 = vrcp.f32 %v16141_v13 }
 0xa02   :  { %12182 = vrcp.f32 %v16380_v59 }
 0xa03   :  { %12184 = vrcp.f32 %v19409_v33  ;;  %v19415_v33 = vld [vmem:[#allocation228_spill] sm:$0xff] }
 0xa04   :  { %12186 = vrcp.f32 %v19410_v24  ;;  %v19416_v24 = vld [vmem:[#allocation216_spill] sm:$0xff] }
 0xa05   :  { %12188 = vrcp.f32 %v19411_v3 }
 0xa06   :  { %12190 = vrcp.f32 %v16393_v46 }
 0xa07   :  { %3659 = vadd.xlane.f32.xlu0 %v3658_v16  ;;  %v12167_v16 = vpop.eup %12166  ;;  %12192 = vrcp.f32 %v16353_v23 }
 0xa08   :  { %v16569_v61 = vpop.eup %12168  ;;  %v5245_v1 = vmul.f32 %v12167_v16, %v19407_v53 }
 0xa09   :  { %v12171_v20 = vpop.eup %12170  ;;  %v3661_v51 = vsel %vm3159_vm5, %v16569_v61, 0.0 }
 0xa0a   :  { %v5244_v36 = vmul.f32 %v12171_v20, %v19408_v26  ;;  %v12173_v60 = vpop.eup %12172 }
 0xa0b   :  { %v12175_v19 = vpop.eup %12174 }
 0xa0c   :  { %v5281_v63 = vpack.c.bf16 %v5245_v1, %v5244_v36  ;;  %v3752_v52 = vmul.f32 %v12175_v19, %v16186_v4 }
 0xa12   :  { %v16558_v50 = vpop.xlane.xlu0 %3638 }
 0xa16   :  { %v16561_v32 = vpop.xlane.xlu0 %3641 }
 0xa1a   :  { %v6188_v18 = vpop.permute.xlu0 %6187 }
 0xa1b   :  { %11290 = vmatprep.subr.bf16.mxu0 %v6188_v18 }
 0xa1c   :  { %11291 = vmatpush3.bf16.msra.mxu0 %v6188_v18  ;;  %v12177_v18 = vpop.eup %12176 }
 0xa1d   :  { %5366 = vrot.lane.b32.xlu0 %v5279_v38, %s12507_s18  ;;  %3656 = vadd.xlane.f32.xlu1 %v3655_v14  ;;  %v12179_v38 = vpop.eup %12178  ;;  %v19413_v14 = vld [vmem:[#allocation61_spill] sm:$0xff] }
 0xa1e   :  { %v6102_v21 = vpop.permute.xlu0 %6101  ;;  %v12181_v16 = vpop.eup %12180  ;;  %12194 = vrcp.f32 %v19413_v14  ;;  %v3753_v23 = vmul.f32 %v12179_v38, %v16174_v58  ;;  %v19418_v38 = vld [vmem:[#allocation142_spill] sm:$0xff] }
 0xa1f   :  { %v12183_v53 = vpop.eup %12182 }
 0xa20   :  { %v12185_v1 = vpop.eup %12184  ;;  %v3794_v36 = vpack.c.bf16 %v3753_v23, %v3752_v52  ;;  %v19421_v52 = vld [vmem:[#allocation144_spill] sm:$0xff] }
 0xa21   :  { %6281 = vrot.lane.b32.xlu0 %v19253_v29, %s12506_s15  ;;  %3662 = vadd.xlane.f32.xlu1 %v3661_v51  ;;  %v19412_v29 = vld [vmem:[#allocation181_spill] sm:$0xff]  ;;  %v19414_v51 = vld [vmem:[#allocation90_spill] sm:$0xff]  ;;  %v12187_v26 = vpop.eup %12186  ;;  %v5243_v3 = vmul.f32 %v12185_v1, %v19416_v24  ;;  %v19426_v24 = vld [vmem:[#allocation87_spill] sm:$0xff] }
 0xa22   :  { %v6190_v47 = vpop.permute.xlu0 %6189  ;;  %v5248_v13 = vmul.f32 %v12173_v60, %v19412_v29  ;;  %12196 = vrcp.f32 %v19414_v51 }
 0xa23   :  { %11292 = vmatprep.subr.bf16.mxu0 %v6190_v47  ;;  %12198 = vrcp.f32 %v19421_v52 }
 0xa24   :  { %11293 = vmatpush3.bf16.msra.mxu0 %v6190_v47  ;;  %v5283_v20 = vpack.c.bf16 %v5248_v13, %v5248_v13  ;;  %v3754_v47 = vmul.f32 %v12183_v53, %v16194_v44  ;;  %v19417_v13 = vld [vmem:[#allocation80_spill] sm:$0xff] }
 0xa25   :  { %5370 = vrot.lane.b32.xlu0 %v5281_v63, %s12507_s18  ;;  %v5252_v63 = vmul.f32 %v12181_v16, %v19415_v33  ;;  %v5251_v58 = vmul.f32 %v12187_v26, %v19417_v13  ;;  %v19419_v44 = vld [vmem:[#allocation180_spill] sm:$0xff]  ;;  %v19420_v16 = vld [vmem:[#allocation226_spill] sm:$0xff]  ;;  %v19422_v26 = vld [vmem:[#allocation121_spill] sm:$0xff] }
 0xa26   :  { %v5242_v14 = vmul.f32 %v12177_v18, %v19419_v44  ;;  %v3795_v53 = vpack.c.bf16 %v3754_v47, %v3754_v47  ;;  %12200 = vrcp.f32 %v19422_v26  ;;  %v19423_v33 = vld [vmem:[#allocation143_spill] sm:$0xff] }
 0xa28   :  { %v16590_v59 = vpop.xlane.xlu1 %3635  ;;  %v5280_v51 = vpack.c.bf16 %v5243_v3, %v5242_v14  ;;  %v19427_v3 = vld [vmem:[#allocation88_spill] sm:$0xff] }
 0xa29   :  { %6285 = vrot.lane.b32.xlu0 %v16255_v48, %s12506_s15  ;;  %v12189_v48 = vpop.eup %12188 }
 0xa2a   :  { %v12191_v4 = vpop.eup %12190 }
 0xa2b   :  { %v12193_v19 = vpop.eup %12192  ;;  %v3755_v1 = vmul.f32 %v12191_v4, %v16235_v37  ;;  %v19425_v4 = vld [vmem:[#allocation218_spill] sm:$0xff] }
 0xa2c   :  { %v6100_v46 = vpop.permute.xlu1 %6099  ;;  %v12195_v23 = vpop.eup %12194  ;;  %v3756_v18 = vmul.f32 %v12193_v19, %v19423_v33  ;;  %v19429_v19 = vld [vmem:[#allocation217_spill] sm:$0xff] }
 0xa2d   :  { %5374 = vrot.lane.b32.xlu0 %v5283_v20, %s12507_s18  ;;  %11274 = vmatprep.subr.bf16.mxu1 %v6100_v46  ;;  %v5255_v20 = vmul.f32 %v12189_v48, %v19420_v16  ;;  %v19424_v48 = vld [vmem:[#allocation81_spill] sm:$0xff] }
 0xa2e   :  { %11275 = vmatpush3.bf16.msra.mxu1 %v6100_v46  ;;  %v5285_v46 = vpack.c.bf16 %v5252_v63, %v5251_v58  ;;  %12202 = vrcp.f32 %v19424_v48  ;;  %v3796_v47 = vpack.c.bf16 %v3756_v18, %v3755_v1 }
 0xa2f   :  { %11276 = vmatprep.subr.bf16.mxu1 %v6102_v21  ;;  %v5287_v37 = vpack.c.bf16 %v5255_v20, %v5255_v20  ;;  %12204 = vrcp.f32 %v19426_v24  ;;  %v19430_v20 = vld [vmem:[#allocation79_spill] sm:$0xff]  ;;  %v19436_v24 = vld [vmem:[#allocation86_spill] sm:$0xff] }
 0xa30   :  { %v5357_v60 = vpop.permute.xlu1 %5356  ;;  %12206 = vrcp.f32 %v16398_v41 }
 0xa31   :  { %v5440_v29 = vsel %vm3159_vm5, %v3794_v36, %v5357_v60  ;;  %6289 = vrot.lane.b32.xlu0 %v16389_v8, %s12506_s15  ;;  %v5247_v60 = vmul.f32 %v12195_v23, %v19425_v4  ;;  %v19432_v23 = vld [vmem:[#allocation229_spill] sm:$0xff]  ;;  %12208 = vrcp.f32 %v16357_v10  ;;  %v19434_v10 = vld [vmem:[#allocation8_spill] sm:$0xff] }
 0xa32   :  { %6195 = vrot.lane.b32.xlu1 %v19418_v38, %s12506_s15  ;;  %11260 = vmatprep.mubr.msk.bf16.mxu0 %vm5639_vm6, %v5440_v29  ;;  %v19428_v29 = vld [vmem:[#allocation96_spill] sm:$0xff]  ;;  %12210 = vrcp.f32 %v16455_v31  ;;  %v16654_v4 = vadd.f32 %v16299_v57, %v19434_v10 }
 0xa33   :  { %11277 = vmatpush3.bf16.msra.mxu1 %v6102_v21  ;;  %v12197_v21 = vpop.eup %12196  ;;  %v5616_v13 = vsel %vm346_vm0, %v19428_v29, %v19427_v3  ;;  %12212 = vrcp.f32 %v16429_v5 }
 0xa34   :  { %v5359_v8 = vpop.permute.xlu1 %5358  ;;  %v5246_v38 = vmul.f32 %v12197_v21, %v19429_v19  ;;  %v12199_v14 = vpop.eup %12198  ;;  %19435 = vst [vmem:[#allocation159_spill] sm:$0xff] %v16654_v4  ;;  %v6429_v5 = vsel %vm1099_vm3, %v16654_v4, 0.0  ;;  %12214 = vrcp.f32 %v16434_v39 }
 0xa35   :  { %v5443_v36 = vsel %vm3159_vm5, %v3795_v53, %v5359_v8  ;;  %5378 = vrot.lane.b32.xlu0 %v5285_v46, %s12507_s18  ;;  %v12201_v16 = vpop.eup %12200  ;;  %v5249_v52 = vmul.f32 %v12199_v14, %v19430_v20  ;;  %v19431_v46 = vld [vmem:[#allocation77_spill] sm:$0xff]  ;;  %v19441_v20 = vld [vmem:[#allocation92_spill] sm:$0xff]  ;;  %12216 = vrcp.f32 %v16528_v27 }
 0xa36   :  { %5368 = vrot.lane.b32.xlu1 %v5280_v51, %s12507_s18  ;;  %11261 = vmatmul.mubr.msk.bf16.gmra.mrb[184].mxu0 %vm5639_vm6, %v5443_v36  ;;  %v5282_v44 = vpack.c.bf16 %v5247_v60, %v5246_v38  ;;  %v5250_v1 = vmul.f32 %v12201_v16, %v19431_v46  ;;  %v19433_v36 = vld [vmem:[#allocation227_spill] sm:$0xff]  ;;  %v19442_v46 = vld [vmem:[#allocation9_spill] sm:$0xff]  ;;  %12218 = vrcp.f32 %v16533_v54  ;;  %v19502_v27 = vld [vmem:[#allocation152_spill] sm:$0xff] }
 0xa37   :  { %12220 = vrcp.f32 %v16495_v15  ;;  %v19503_v54 = vld [vmem:[#allocation74_spill] sm:$0xff] }
 0xa38   :  { %v5361_v63 = vpop.permute.xlu1 %5360  ;;  %v12203_v53 = vpop.eup %12202  ;;  %v5284_v51 = vpack.c.bf16 %v5250_v1, %v5249_v52  ;;  %v19443_v1 = vld [vmem:[#allocation126_spill] sm:$0xff]  ;;  %12222 = vrcp.f32 %v16502_v55  ;;  %v19504_v55 = vld [vmem:[#allocation83_spill] sm:$0xff] }
 0xa39   :  { %v5446_v58 = vsel %vm3159_vm5, %v3796_v47, %v5361_v63  ;;  %5382 = vrot.lane.b32.xlu0 %v5287_v37, %s12507_s18  ;;  %v12205_v8 = vpop.eup %12204  ;;  %v5253_v26 = vmul.f32 %v12203_v53, %v19432_v23  ;;  %v19445_v23 = vld [vmem:[#allocation14_spill] sm:$0xff]  ;;  %12224 = vrcp.f32 %v16590_v59 }
 0xa3a   :  { %6283 = vrot.lane.b32.xlu1 %v5616_v13, %s12506_s15  ;;  %11278 = vmatprep.mubr.msk.bf16.mxu1 %vm5639_vm6, %v5446_v58  ;;  %v5254_v33 = vmul.f32 %v12205_v8, %v19433_v36  ;;  %v12207_v41 = vpop.eup %12206  ;;  %v19437_v58 = vld [vmem:[#allocation5_spill] sm:$0xff]  ;;  %v16677_v8 = vadd.f32 %v19443_v1, %v19442_v46  ;;  %v19462_v46 = vld [vmem:[#allocation12_spill] sm:$0xff]  ;;  %v19463_v1 = vld [vmem:[#allocation151_spill] sm:$0xff]  ;;  %12226 = vrcp.f32 %v16561_v32 }
 0xa3b   :  { %v12209_v37 = vpop.eup %12208  ;;  %v3758_v63 = vmul.f32 %v12207_v41, %v16241_v22  ;;  %v16661_v31 = vadd.f32 %v16287_v49, %v19437_v58  ;;  %v19448_v41 = vld [vmem:[#allocation13_spill] sm:$0xff]  ;;  %v19454_v58 = vld [vmem:[#allocation18_spill] sm:$0xff]  ;;  %12228 = vrcp.f32 %v16558_v50 }
 0xa3c   :  { %v5286_v18 = vpack.c.bf16 %v5254_v33, %v5253_v26  ;;  %v3757_v3 = vmul.f32 %v12209_v37, %v19436_v24  ;;  %v12211_v13 = vpop.eup %12210  ;;  %19444 = vst [vmem:[#allocation93_spill] sm:$0xff] %v16677_v8  ;;  %v19446_v26 = vld [vmem:[#allocation201_spill] sm:$0xff]  ;;  %v19451_v24 = vld [vmem:[#allocation6_spill] sm:$0xff] }
 0xa3d   :  { %19438 = vst [vmem:[#allocation206_spill] sm:$0xff] %v16661_v31  ;;  %v12213_v38 = vpop.eup %12212  ;;  %v3759_v57 = vmul.f32 %v12211_v13, %v16311_v43  ;;  %v6432_v49 = vsel %vm1099_vm3, %v16661_v31, 0.0  ;;  %v16685_v36 = vadd.f32 %v19446_v26, %v19445_v23  ;;  %v19449_v37 = vld [vmem:[#allocation209_spill] sm:$0xff]  ;;  %v19465_v23 = vld [vmem:[#allocation22_spill] sm:$0xff] }
 0xa3e   :  { %5372 = vrot.lane.b32.xlu1 %v5282_v44, %s12507_s18  ;;  %v3797_v29 = vpack.c.bf16 %v3758_v63, %v3757_v3  ;;  %v19439_v44 = vld [vmem:[#allocation10_spill] sm:$0xff]  ;;  %v3760_v52 = vmul.f32 %v12213_v38, %v19441_v20  ;;  %v16691_v63 = vadd.f32 %v19449_v37, %v19448_v41  ;;  %v19457_v38 = vld [vmem:[#allocation7_spill] sm:$0xff]  ;;  %v19460_v20 = vld [vmem:[#allocation17_spill] sm:$0xff]  ;;  %v16731_v26 = vadd.f32 %v16461_v62, %v19465_v23 }
 0xa3f   :  { %v16670_v14 = vadd.f32 %v16307_v6, %v19439_v44  ;;  %19447 = vst [vmem:[#allocation94_spill] sm:$0xff] %v16685_v36  ;;  %v6450_v10 = vsel %vm1099_vm3, %v16685_v36, 0.0  ;;  %v19452_v3 = vld [vmem:[#allocation118_spill] sm:$0xff]  ;;  %v19479_v23 = vld [vmem:[#allocation25_spill] sm:$0xff] }
 0xa40   :  { %v3798_v53 = vpack.c.bf16 %v3760_v52, %v3759_v57  ;;  %19450 = vst [vmem:[#allocation213_spill] sm:$0xff] %v16691_v63  ;;  %v19458_v57 = vld [vmem:[#allocation123_spill] sm:$0xff]  ;;  %v16717_v52 = vadd.f32 %v16464_v40, %v19460_v20  ;;  %19466 = vst [vmem:[#allocation98_spill] sm:$0xff] %v16731_v26  ;;  %v6474_v62 = vsel %vm1099_vm3, %v16731_v26, 0.0  ;;  %v19505_v59 = vld [vmem:[#allocation162_spill] sm:$0xff] }
 0xa41   :  { %19440 = vst [vmem:[#allocation154_spill] sm:$0xff] %v16670_v14  ;;  %v6438_v43 = vsel %vm1099_vm3, %v16670_v14, 0.0  ;;  %v16709_v44 = vadd.f32 %v19458_v57, %v19457_v38 }
 0xa42   :  { %6287 = vrot.lane.b32.xlu1 %v16271_v17, %s12506_s15  ;;  %19461 = vst [vmem:[#allocation208_spill] sm:$0xff] %v16717_v52  ;;  %v6468_v40 = vsel %vm1099_vm3, %v16717_v52, 0.0 }
 0xa43   :  { %19459 = vst [vmem:[#allocation164_spill] sm:$0xff] %v16709_v44 }
 0xa46   :  { %5376 = vrot.lane.b32.xlu1 %v5284_v51, %s12507_s18 }
 0xa4a   :  { %5380 = vrot.lane.b32.xlu1 %v5286_v18, %s12507_s18  ;;  %v16641_v21 = vpop.f32.mrb[140].mxu1  ;;  %v6444_v18 = vsel %vm1099_vm3, %v16677_v8, 0.0 }
 0xa4b   :  { %v16643_v17 = vpop.f32.mrb[141].mxu1 }
 0xa4c   :  { %v16645_v48 = vpop.f32.mrb[142].mxu1 }
 0xa4d   :  { %v16648_v47 = vpop.f32.mrb[143].mxu1 }
 0xa53   :  { %v16656_v60 = vpop.xlane.xlu0 %3647 }
 0xa57   :  { %v5363_v19 = vpop.permute.xlu0 %5362 }
 0xa58   :  { %v5449_v22 = vsel %vm3159_vm5, %v3797_v29, %v5363_v19  ;;  %6430 = vadd.xlane.f32.xlu0 %v6429_v5  ;;  %v16697_v29 = vadd.f32 %v19452_v3, %v19451_v24  ;;  %v19455_v19 = vld [vmem:[#allocation163_spill] sm:$0xff]  ;;  %v19470_v24 = vld [vmem:[#allocation21_spill] sm:$0xff] }
 0xa59   :  { %11279 = vmatmul.mubr.msk.bf16.vlgmr.msra.gmra.mrb[148].mxu1 %vm5639_vm6, %v5449_v22  ;;  %v16703_v5 = vadd.f32 %v19455_v19, %v19454_v58  ;;  %v6456_v22 = vsel %vm1099_vm3, %v16691_v63, 0.0  ;;  %v16743_v3 = vadd.f32 %v16497_v0, %v19470_v24  ;;  %v19471_v58 = vld [vmem:[#allocation16_spill] sm:$0xff]  ;;  %v19472_v19 = vld [vmem:[#allocation153_spill] sm:$0xff]  ;;  %v19484_v24 = vld [vmem:[#allocation30_spill] sm:$0xff] }
 0xa5a   :  { %19453 = vst [vmem:[#allocation63_spill] sm:$0xff] %v16697_v29 }
 0xa5b   :  { %v6278_v16 = vpop.permute.xlu0 %6277  ;;  %19456 = vst [vmem:[#allocation211_spill] sm:$0xff] %v16703_v5  ;;  %v6480_v0 = vsel %vm1099_vm3, %v16743_v3, 0.0 }
 0xa5c   :  { %6433 = vadd.xlane.f32.xlu0 %v6432_v49  ;;  %11308 = vmatprep.subr.bf16.mxu1 %v6278_v16  ;;  %v6426_v49 = vsel %vm1099_vm3, %v16697_v29, 0.0 }
 0xa5d   :  { %11309 = vmatpush3.bf16.msra.mxu1 %v6278_v16 }
 0xa5f   :  { %v5365_v51 = vpop.permute.xlu0 %5364 }
 0xa60   :  { %v5452_v6 = vsel %vm3159_vm5, %v3798_v53, %v5365_v51  ;;  %6439 = vadd.xlane.f32.xlu0 %v6438_v43  ;;  %v6462_v53 = vsel %vm1099_vm3, %v16703_v5, 0.0  ;;  %v16723_v51 = vadd.f32 %v19463_v1, %v19462_v46  ;;  %v19477_v46 = vld [vmem:[#allocation167_spill] sm:$0xff] }
 0xa61   :  { %11282 = vmatprep.mubr.msk.bf16.mxu1 %vm5639_vm6, %v5452_v6  ;;  %v6435_v6 = vsel %vm1099_vm3, %v16709_v44, 0.0 }
 0xa62   :  { %19464 = vst [vmem:[#allocation168_spill] sm:$0xff] %v16723_v51 }
 0xa63   :  { %v6280_v33 = vpop.permute.xlu0 %6279 }
 0xa64   :  { %6445 = vadd.xlane.f32.xlu0 %v6444_v18  ;;  %11310 = vmatprep.subr.bf16.mxu1 %v6280_v33  ;;  %v19468_v18 = vld [vmem:[#allocation204_spill] sm:$0xff] }
 0xa65   :  { %11311 = vmatpush3.bf16.msra.mxu1 %v6280_v33  ;;  %v19467_v33 = vld [vmem:[#allocation11_spill] sm:$0xff] }
 0xa66   :  { %v16737_v41 = vadd.f32 %v19468_v18, %v19467_v33  ;;  %v19481_v33 = vld [vmem:[#allocation20_spill] sm:$0xff]  ;;  %v19482_v18 = vld [vmem:[#allocation62_spill] sm:$0xff] }
 0xa68   :  { %6451 = vadd.xlane.f32.xlu0 %v6450_v10  ;;  %19469 = vst [vmem:[#allocation100_spill] sm:$0xff] %v16737_v41  ;;  %v6441_v10 = vsel %vm1099_vm3, %v16723_v51, 0.0  ;;  %v6447_v57 = vsel %vm1099_vm3, %v16737_v41, 0.0 }
 0xa69   :  { %v16699_v13 = vpop.xlane.xlu1 %3644 }
 0xa6a   :  { %12230 = vrcp.f32 %v16699_v13 }
 0xa6b   :  { %12232 = vrcp.f32 %v16656_v60 }
 0xa6c   :  { %6457 = vadd.xlane.f32.xlu0 %v6456_v22  ;;  %v16749_v22 = vadd.f32 %v19472_v19, %v19471_v58  ;;  %v19486_v58 = vld [vmem:[#allocation19_spill] sm:$0xff] }
 0xa6d   :  { %v16711_v16 = vpop.xlane.xlu1 %3650  ;;  %v16785_v19 = vadd.f32 %v16471_v12, %v19486_v58  ;;  %v19495_v58 = vld [vmem:[#allocation72_spill] sm:$0xff] }
 0xa6e   :  { %6427 = vadd.xlane.f32.xlu1 %v6426_v49  ;;  %19473 = vst [vmem:[#allocation207_spill] sm:$0xff] %v16749_v22  ;;  %v19474_v49 = vld [vmem:[#allocation26_spill] sm:$0xff] }
 0xa6f   :  { %v16755_v20 = vadd.f32 %v16493_v28, %v19474_v49  ;;  %19487 = vst [vmem:[#allocation97_spill] sm:$0xff] %v16785_v19 }
 0xa70   :  { %6463 = vadd.xlane.f32.xlu0 %v6462_v53  ;;  %v19476_v53 = vld [vmem:[#allocation15_spill] sm:$0xff] }
 0xa71   :  { %v16725_v43 = vpop.xlane.xlu1 %3653  ;;  %19475 = vst [vmem:[#allocation99_spill] sm:$0xff] %v16755_v20  ;;  %v16761_v1 = vadd.f32 %v19477_v46, %v19476_v53  ;;  %v6486_v28 = vsel %vm1099_vm3, %v16755_v20, 0.0  ;;  %v19490_v46 = vld [vmem:[#allocation23_spill] sm:$0xff] }
 0xa72   :  { %6436 = vadd.xlane.f32.xlu1 %v6435_v6  ;;  %v6453_v6 = vsel %vm1099_vm3, %v16749_v22, 0.0  ;;  %12234 = vrcp.f32 %v16725_v43 }
 0xa73   :  { %19478 = vst [vmem:[#allocation175_spill] sm:$0xff] %v16761_v1 }
 0xa74   :  { %6469 = vadd.xlane.f32.xlu0 %v6468_v40  ;;  %v16767_v40 = vadd.f32 %v16648_v47, %v19479_v23 }
 0xa75   :  { %v6192_v37 = vpop.permute.xlu1 %6191 }
 0xa76   :  { %6442 = vadd.xlane.f32.xlu1 %v6441_v10  ;;  %11294 = vmatprep.subr.bf16.mxu0 %v6192_v37  ;;  %19480 = vst [vmem:[#allocation171_spill] sm:$0xff] %v16767_v40  ;;  %v6459_v10 = vsel %vm1099_vm3, %v16761_v1, 0.0  ;;  %v6492_v47 = vsel %vm1099_vm3, %v16767_v40, 0.0 }
 0xa77   :  { %11295 = vmatpush3.bf16.msra.mxu0 %v6192_v37  ;;  %v16773_v37 = vadd.f32 %v19482_v18, %v19481_v33  ;;  %v19491_v33 = vld [vmem:[#allocation29_spill] sm:$0xff] }
 0xa78   :  { %6475 = vadd.xlane.f32.xlu0 %v6474_v62  ;;  %v16779_v62 = vadd.f32 %v16645_v48, %v19484_v24  ;;  %v19488_v48 = vld [vmem:[#allocation24_spill] sm:$0xff] }
 0xa79   :  { %v6194_v38 = vpop.permute.xlu1 %6193  ;;  %19483 = vst [vmem:[#allocation166_spill] sm:$0xff] %v16773_v37  ;;  %v16794_v49 = vadd.f32 %v16469_v56, %v19488_v48  ;;  %v12215_v56 = vpop.eup %12214  ;;  %v19496_v48 = vld [vmem:[#allocation27_spill] sm:$0xff] }
 0xa7a   :  { %6448 = vadd.xlane.f32.xlu1 %v6447_v57  ;;  %11296 = vmatprep.subr.bf16.mxu0 %v6194_v38  ;;  %19485 = vst [vmem:[#allocation165_spill] sm:$0xff] %v16779_v62  ;;  %v6498_v57 = vsel %vm1099_vm3, %v16779_v62, 0.0 }
 0xa7b   :  { %11297 = vmatpush3.bf16.msra.mxu0 %v6194_v38  ;;  %v6465_v38 = vsel %vm1099_vm3, %v16773_v37, 0.0  ;;  %19489 = vst [vmem:[#allocation158_spill] sm:$0xff] %v16794_v49  ;;  %v6477_v23 = vsel %vm1099_vm3, %v16794_v49, 0.0 }
 0xa7c   :  { %6481 = vadd.xlane.f32.xlu0 %v6480_v0  ;;  %v6471_v0 = vsel %vm1099_vm3, %v16785_v19, 0.0 }
 0xa7e   :  { %6454 = vadd.xlane.f32.xlu1 %v6453_v6  ;;  %v16800_v6 = vadd.f32 %v16500_v34, %v19490_v46 }
 0xa80   :  { %6487 = vadd.xlane.f32.xlu0 %v6486_v28 }
 0xa82   :  { %6460 = vadd.xlane.f32.xlu1 %v6459_v10  ;;  %v19493_v10 = vld [vmem:[#allocation28_spill] sm:$0xff] }
 0xa83   :  { %v16809_v24 = vadd.f32 %v16643_v17, %v19493_v10 }
 0xa84   :  { %6493 = vadd.xlane.f32.xlu0 %v6492_v47  ;;  %v6483_v47 = vsel %vm1099_vm3, %v16800_v6, 0.0 }
 0xa85   :  { %19494 = vst [vmem:[#allocation177_spill] sm:$0xff] %v16809_v24  ;;  %v6489_v46 = vsel %vm1099_vm3, %v16809_v24, 0.0 }
 0xa86   :  { %6466 = vadd.xlane.f32.xlu1 %v6465_v38  ;;  %v3761_v38 = vmul.f32 %v12215_v56, %v19495_v58  ;;  %v12217_v58 = vpop.eup %12216 }
 0xa88   :  { %6499 = vadd.xlane.f32.xlu0 %v6498_v57  ;;  %v3799_v17 = vpack.c.bf16 %v3761_v38, %v3761_v38 }
 0xa8a   :  { %6472 = vadd.xlane.f32.xlu1 %v6471_v0  ;;  %v16818_v0 = vadd.f32 %v16641_v21, %v19496_v48  ;;  %v19500_v21 = vld [vmem:[#allocation31_spill] sm:$0xff]  ;;  %v12219_v48 = vpop.eup %12218 }
 0xa8b   :  { %v11240_v12 = vpop.f32.mrb[144].mxu1 }
 0xa8c   :  { %v5980_v53 = vpop.f32.mrb[145].mxu1  ;;  %19497 = vst [vmem:[#allocation186_spill] sm:$0xff] %v16818_v0  ;;  %v6495_v10 = vsel %vm1099_vm3, %v16818_v0, 0.0 }
 0xa8d   :  { %v11241_v39 = vpop.f32.mrb[146].mxu1 }
 0xa8e   :  { %6478 = vadd.xlane.f32.xlu1 %v6477_v23  ;;  %v5983_v28 = vpop.f32.mrb[147].mxu1  ;;  %v19498_v23 = vld [vmem:[#allocation32_spill] sm:$0xff] }
 0xa8f   :  { %v16805_v18 = vadd.f32 %v5983_v28, %v19491_v33  ;;  %v16823_v28 = vadd.f32 %v5980_v53, %v19498_v23  ;;  %v3762_v23 = vmul.f32 %v12217_v58, %v19502_v27 }
 0xa91   :  { %19492 = vst [vmem:[#allocation91_spill] sm:$0xff] %v16805_v18  ;;  %v6504_v34 = vsel %vm1099_vm3, %v16805_v18, 0.0  ;;  %19499 = vst [vmem:[#allocation179_spill] sm:$0xff] %v16823_v28 }
 0xa92   :  { %6484 = vadd.xlane.f32.xlu1 %v6483_v47  ;;  %6505 = vadd.xlane.f32.xlu0 %v6504_v34  ;;  %v16830_v47 = vadd.f32 %v11240_v12, %v19500_v21  ;;  %v6501_v34 = vsel %vm1099_vm3, %v16823_v28, 0.0 }
 0xa94   :  { %v3660_v57 = vpop.xlane.xlu0 %3659  ;;  %19501 = vst [vmem:[#allocation65_spill] sm:$0xff] %v16830_v47  ;;  %v6507_v53 = vsel %vm1099_vm3, %v16830_v47, 0.0 }
 0xa96   :  { %6490 = vadd.xlane.f32.xlu1 %v6489_v46 }
 0xa98   :  { %v5367_v39 = vpop.permute.xlu0 %5366 }
 0xa99   :  { %v5455_v33 = vsel %vm3159_vm5, %v3799_v17, %v5367_v39  ;;  %v12221_v17 = vpop.eup %12220 }
 0xa9a   :  { %6496 = vadd.xlane.f32.xlu1 %v6495_v10  ;;  %11283 = vmatmul.mubr.msk.bf16.gmra.mrb[152].mxu1 %vm5639_vm6, %v5455_v33  ;;  %v12223_v39 = vpop.eup %12222  ;;  %v3765_v33 = vmul.f32 %v12219_v48, %v19503_v54  ;;  %v3763_v10 = vmul.f32 %v12221_v17, %v19504_v55 }
 0xa9b   :  { %v3764_v32 = vmul.f32 %v12223_v39, %v19505_v59  ;;  %v12225_v21 = vpop.eup %12224 }
 0xa9c   :  { %v6282_v56 = vpop.permute.xlu0 %6281  ;;  %v3800_v50 = vpack.c.bf16 %v3763_v10, %v3762_v23  ;;  %v12227_v47 = vpop.eup %12226  ;;  %v3766_v13 = vmul.f32 %v12225_v21, %v16431_v35 }
 0xa9d   :  { %11312 = vmatprep.subr.bf16.mxu1 %v6282_v56  ;;  %v12229_v48 = vpop.eup %12228  ;;  %v3768_v60 = vmul.f32 %v12227_v47, %v16421_v45 }
 0xa9e   :  { %6502 = vadd.xlane.f32.xlu1 %v6501_v34  ;;  %11313 = vmatpush3.bf16.msra.mxu1 %v6282_v56  ;;  %v3801_v34 = vpack.c.bf16 %v3765_v33, %v3764_v32  ;;  %v3767_v43 = vmul.f32 %v12229_v48, %v16417_v42 }
 0xa9f   :  { %v3803_v23 = vpack.c.bf16 %v3768_v60, %v3768_v60  ;;  %v19506_v60 = vld [vmem:[#allocation34_spill] sm:$0xff] }
 0xaa0   :  { %v5371_v46 = vpop.permute.xlu0 %5370 }
 0xaa1   :  { %v5461_v17 = vsel %vm3159_vm5, %v3801_v34, %v5371_v46  ;;  %v12231_v46 = vpop.eup %12230 }
 0xaa2   :  { %6508 = vadd.xlane.f32.xlu1 %v6507_v53  ;;  %v12233_v33 = vpop.eup %12232  ;;  %v3769_v42 = vmul.f32 %v12231_v46, %v16505_v30 }
 0xaa3   :  { %v12235_v45 = vpop.eup %12234  ;;  %v3770_v55 = vmul.f32 %v12233_v33, %v16480_v9  ;;  %v19512_v33 = vld [vmem:[#allocation35_spill] sm:$0xff] }
 0xaa4   :  { %v6286_v56 = vpop.permute.xlu0 %6285  ;;  %v3772_v59 = vmul.f32 %v12235_v45, %v16518_v25 }
 0xaa5   :  { %v3804_v32 = vpack.c.bf16 %v3770_v55, %v3769_v42 }
 0xaa8   :  { %v5375_v27 = vpop.permute.xlu0 %5374 }
 0xaa9   :  { %v5467_v35 = vsel %vm3159_vm5, %v3803_v23, %v5375_v27  ;;  %v19510_v23 = vld [vmem:[#allocation36_spill] sm:$0xff] }
 0xaaa   :  { %v3657_v12 = vpop.xlane.xlu1 %3656 }
 0xaab   :  { %12236 = vrcp.f32 %v3657_v12  ;;  %v3802_v12 = vpack.c.bf16 %v3767_v43, %v3766_v13 }
 0xaac   :  { %12238 = vrcp.f32 %v16711_v16 }
 0xaad   :  { %12240 = vrcp.f32 %v3660_v57  ;;  %v6290_v57 = vpop.permute.xlu0 %6289 }
 0xaae   :  { %v3663_v38 = vpop.xlane.xlu1 %3662 }
 0xaaf   :  { %12242 = vrcp.f32 %v3663_v38 }
 0xab2   :  { %v6196_v15 = vpop.permute.xlu1 %6195 }
 0xab3   :  { %11298 = vmatprep.subr.bf16.mxu0 %v6196_v15 }
 0xab4   :  { %11299 = vmatpush3.bf16.msra.mxu0 %v6196_v15 }
 0xab5   :  { %v12237_v47 = vpop.eup %12236 }
 0xab6   :  { %v5369_v53 = vpop.permute.xlu1 %5368  ;;  %v12239_v15 = vpop.eup %12238 }
 0xab7   :  { %v5458_v58 = vsel %vm3159_vm5, %v3800_v50, %v5369_v53  ;;  %v12241_v10 = vpop.eup %12240  ;;  %v3771_v50 = vmul.f32 %v12239_v15, %v16510_v11  ;;  %v5379_v53 = vpop.permute.xlu0 %5378 }
 0xab8   :  { %11300 = vmatprep.mubr.msk.bf16.mxu0 %vm5639_vm6, %v5458_v58  ;;  %v3774_v58 = vmul.f32 %v12241_v10, %v16548_v2  ;;  %v19508_v2 = vld [vmem:[#allocation33_spill] sm:$0xff]  ;;  %v19514_v10 = vld [vmem:[#allocation38_spill] sm:$0xff] }
 0xab9   :  { %11301 = vmatmul.mubr.msk.bf16.vlgmr.msra.gmra.mrb[188].mxu0 %vm5639_vm6, %v5461_v17  ;;  %v12243_v34 = vpop.eup %12242  ;;  %v3805_v48 = vpack.c.bf16 %v3772_v59, %v3771_v50  ;;  %v19516_v50 = vld [vmem:[#allocation37_spill] sm:$0xff] }
 0xaba   :  { %v6284_v39 = vpop.permute.xlu1 %6283 }
 0xabb   :  { %11314 = vmatprep.subr.bf16.mxu1 %v6284_v39  ;;  %v5473_v13 = vsel %vm3159_vm5, %v3805_v48, %v5379_v53  ;;  %v5383_v42 = vpop.permute.xlu0 %5382 }
 0xabc   :  { %11315 = vmatpush3.bf16.msra.mxu1 %v6284_v39 }
 0xabd   :  { %11316 = vmatprep.subr.bf16.mxu1 %v6286_v56 }
 0xabe   :  { %v5373_v54 = vpop.permute.xlu1 %5372 }
 0xabf   :  { %v5464_v16 = vsel %vm3159_vm5, %v3802_v12, %v5373_v54 }
 0xac0   :  { %11304 = vmatprep.mubr.msk.bf16.mxu0 %vm5639_vm6, %v5464_v16  ;;  %11317 = vmatpush3.bf16.msra.mxu1 %v6286_v56  ;;  %v3773_v56 = vmul.f32 %v12237_v47, %v16564_v7  ;;  %v3775_v7 = vmul.f32 %v12243_v34, %v16569_v61  ;;  %v19518_v34 = vld [vmem:[#allocation40_spill] sm:$0xff] }
 0xac1   :  { %11305 = vmatmul.mubr.msk.bf16.gmra.mrb[192].mxu0 %vm5639_vm6, %v5467_v35 }
 0xac2   :  { %v6288_v38 = vpop.permute.xlu1 %6287  ;;  %v3806_v25 = vpack.c.bf16 %v3774_v58, %v3773_v56  ;;  %v3807_v16 = vpack.c.bf16 %v3775_v7, %v3775_v7  ;;  %v19520_v7 = vld [vmem:[#allocation39_spill] sm:$0xff] }
 0xac3   :  { %11318 = vmatprep.subr.bf16.mxu1 %v6288_v38 }
 0xac4   :  { %11319 = vmatpush3.bf16.msra.mxu1 %v6288_v38  ;;  %v5479_v47 = vsel %vm3159_vm5, %v3807_v16, %v5383_v42 }
 0xac5   :  { %11320 = vmatprep.subr.bf16.mxu1 %v6290_v57 }
 0xac6   :  { %v5377_v21 = vpop.permute.xlu1 %5376 }
 0xac7   :  { %v5470_v30 = vsel %vm3159_vm5, %v3804_v32, %v5377_v21 }
 0xac8   :  { %v11258_v17 = vpop.f32.mrb[180].mxu0  ;;  %11321 = vmatpush3.bf16.msra.mxu1 %v6290_v57  ;;  %11322 = vmatprep.mubr.msk.bf16.mxu1 %vm5639_vm6, %v5470_v30 }
 0xac9   :  { %v6058_v9 = vpop.f32.mrb[181].mxu0  ;;  %v16878_v46 = vadd.f32 %v11258_v17, %v19508_v2  ;;  %v19524_v2 = vld [vmem:[#allocation42_spill] sm:$0xff] }
 0xaca   :  { %v16873_v11 = vadd.f32 %v6058_v9, %v19506_v60  ;;  %v5381_v39 = vpop.permute.xlu1 %5380  ;;  %v11259_v27 = vpop.f32.mrb[182].mxu0 }
 0xacb   :  { %v5476_v43 = vsel %vm3159_vm5, %v3806_v25, %v5381_v39  ;;  %v6061_v12 = vpop.f32.mrb[183].mxu0  ;;  %11323 = vmatmul.mubr.msk.bf16.vlgmr.msra.gmra.mrb[156].mxu1 %vm5639_vm6, %v5473_v13  ;;  %19509 = vst [vmem:[#allocation82_spill] sm:$0xff] %v16878_v46  ;;  %v16887_v35 = vadd.f32 %v11259_v27, %v19512_v33  ;;  %v6516_v57 = vsel %vm1099_vm3, %v16878_v46, 0.0  ;;  %v19526_v33 = vld [vmem:[#allocation41_spill] sm:$0xff] }
 0xacc   :  { %19507 = vst [vmem:[#allocation101_spill] sm:$0xff] %v16873_v11  ;;  %v16881_v54 = vadd.f32 %v6061_v12, %v19510_v23  ;;  %11326 = vmatprep.mubr.msk.bf16.mxu1 %vm5639_vm6, %v5476_v43  ;;  %v6510_v61 = vsel %vm1099_vm3, %v16873_v11, 0.0  ;;  %v19522_v43 = vld [vmem:[#allocation44_spill] sm:$0xff] }
 0xacd   :  { %6511 = vadd.xlane.f32.xlu0 %v6510_v61  ;;  %19513 = vst [vmem:[#allocation191_spill] sm:$0xff] %v16887_v35  ;;  %v6519_v38 = vsel %vm1099_vm3, %v16887_v35, 0.0 }
 0xace   :  { %19511 = vst [vmem:[#allocation131_spill] sm:$0xff] %v16881_v54  ;;  %v6513_v45 = vsel %vm1099_vm3, %v16881_v54, 0.0 }
 0xacf   :  { %6514 = vadd.xlane.f32.xlu1 %v6513_v45 }
 0xad1   :  { %6517 = vadd.xlane.f32.xlu0 %v6516_v57 }
 0xad3   :  { %6520 = vadd.xlane.f32.xlu1 %v6519_v38  ;;  %11327 = vmatmul.mubr.msk.bf16.gmra.mrb[160].mxu1 %vm5639_vm6, %v5479_v47 }
 0xafb   :  { %v6428_v17 = vpop.xlane.xlu1 %6427 }
 0xafc   :  { %v6594_v13 = vmul.f32 0.1, %v6428_v17  ;;  %v19528_v17 = vld [vmem:[#allocation43_spill] sm:$0xff] }
 0xafe   :  { %v16924_v16 = vsub.f32 %v16697_v29, %v6594_v13 }
 0xb00   :  { %v6706_v38 = vmul.f32 %v16924_v16, %v16924_v16 }
 0xb09   :  { %v11262_v15 = vpop.f32.mrb[184].mxu0 }
 0xb0a   :  { %v6074_v55 = vpop.f32.mrb[185].mxu0  ;;  %v16901_v21 = vadd.f32 %v11262_v15, %v19516_v50  ;;  %v6762_v15 = vsel %vm1099_vm3, %v6706_v38, 0.0 }
 0xb0b   :  { %v16898_v59 = vadd.f32 %v6074_v55, %v19514_v10  ;;  %v11263_v32 = vpop.f32.mrb[186].mxu0  ;;  %v6431_v55 = vpop.xlane.xlu0 %6430 }
 0xb0c   :  { %v6077_v56 = vpop.f32.mrb[187].mxu0  ;;  %19517 = vst [vmem:[#allocation195_spill] sm:$0xff] %v16901_v21  ;;  %v6528_v48 = vsel %vm1099_vm3, %v16901_v21, 0.0  ;;  %v6595_v32 = vmul.f32 0.1, %v6431_v55 }
 0xb0d   :  { %19515 = vst [vmem:[#allocation127_spill] sm:$0xff] %v16898_v59  ;;  %v16904_v53 = vadd.f32 %v6077_v56, %v19518_v34  ;;  %v6522_v30 = vsel %vm1099_vm3, %v16898_v59, 0.0 }
 0xb0e   :  { %6523 = vadd.xlane.f32.xlu0 %v6522_v30  ;;  %v16939_v50 = vsub.f32 %v16654_v4, %v6595_v32  ;;  %v6437_v30 = vpop.xlane.xlu1 %6436 }
 0xb0f   :  { %19519 = vst [vmem:[#allocation130_spill] sm:$0xff] %v16904_v53  ;;  %v6525_v58 = vsel %vm1099_vm3, %v16904_v53, 0.0  ;;  %v6434_v10 = vpop.xlane.xlu0 %6433 }
 0xb10   :  { %6526 = vadd.xlane.f32.xlu1 %v6525_v58  ;;  %v6596_v56 = vmul.f32 0.1, %v6434_v10 }
 0xb12   :  { %6529 = vadd.xlane.f32.xlu0 %v6528_v48  ;;  %v16942_v48 = vsub.f32 %v16661_v31, %v6596_v56 }
 0xb13   :  { %v6440_v56 = vpop.xlane.xlu0 %6439 }
 0xb2c   :  { %v11280_v9 = vpop.f32.mrb[148].mxu1 }
 0xb2d   :  { %v6152_v25 = vpop.f32.mrb[149].mxu1  ;;  %v16916_v12 = vadd.f32 %v11280_v9, %v19522_v43 }
 0xb2e   :  { %v16913_v60 = vadd.f32 %v6152_v25, %v19520_v7  ;;  %v11281_v39 = vpop.f32.mrb[150].mxu1  ;;  %v6597_v7 = vmul.f32 0.1, %v6437_v30  ;;  %v6443_v30 = vpop.xlane.xlu1 %6442 }
 0xb2f   :  { %v6155_v27 = vpop.f32.mrb[151].mxu1  ;;  %19523 = vst [vmem:[#allocation192_spill] sm:$0xff] %v16916_v12  ;;  %v16927_v45 = vadd.f32 %v11281_v39, %v19526_v33  ;;  %v6537_v42 = vsel %vm1099_vm3, %v16916_v12, 0.0  ;;  %v19530_v39 = vld [vmem:[#allocation46_spill] sm:$0xff]  ;;  %v6708_v33 = vmul.f32 %v16942_v48, %v16942_v48 }
 0xb30   :  { %19521 = vst [vmem:[#allocation214_spill] sm:$0xff] %v16913_v60  ;;  %v16919_v23 = vadd.f32 %v6155_v27, %v19524_v2  ;;  %v6531_v61 = vsel %vm1099_vm3, %v16913_v60, 0.0  ;;  %v6707_v2 = vmul.f32 %v16939_v50, %v16939_v50 }
 0xb31   :  { %6532 = vadd.xlane.f32.xlu1 %v6531_v61  ;;  %19527 = vst [vmem:[#allocation183_spill] sm:$0xff] %v16927_v45  ;;  %v6540_v47 = vsel %vm1099_vm3, %v16927_v45, 0.0 }
 0xb32   :  { %19525 = vst [vmem:[#allocation122_spill] sm:$0xff] %v16919_v23  ;;  %v6534_v57 = vsel %vm1099_vm3, %v16919_v23, 0.0  ;;  %v6765_v38 = vsel %vm1099_vm3, %v6707_v2, 0.0  ;;  %v19536_v2 = vld [vmem:[#allocation45_spill] sm:$0xff] }
 0xb33   :  { %6535 = vadd.xlane.f32.xlu0 %v6534_v57  ;;  %v16959_v57 = vsub.f32 %v16709_v44, %v6597_v7 }
 0xb35   :  { %6538 = vadd.xlane.f32.xlu1 %v6537_v42  ;;  %v19532_v42 = vld [vmem:[#allocation48_spill] sm:$0xff]  ;;  %v6709_v10 = vmul.f32 %v16959_v57, %v16959_v57 }
 0xb37   :  { %6541 = vadd.xlane.f32.xlu0 %v6540_v47  ;;  %v6771_v32 = vsel %vm1099_vm3, %v6709_v10, 0.0 }
 0xb3b   :  { %6763 = vadd.xlane.f32.xlu0 %v6762_v15  ;;  %v6768_v15 = vsel %vm1099_vm3, %v6708_v33, 0.0 }
 0xb6d   :  { %v11284_v34 = vpop.f32.mrb[152].mxu1 }
 0xb6e   :  { %v6168_v58 = vpop.f32.mrb[153].mxu1  ;;  %v16962_v47 = vadd.f32 %v11284_v34, %v19532_v42  ;;  %v6598_v34 = vmul.f32 0.1, %v6440_v56 }
 0xb6f   :  { %v16945_v9 = vadd.f32 %v6168_v58, %v19528_v17  ;;  %v11285_v25 = vpop.f32.mrb[154].mxu1  ;;  %v6446_v58 = vpop.xlane.xlu0 %6445  ;;  %v6599_v17 = vmul.f32 0.1, %v6443_v30 }
 0xb70   :  { %v6171_v13 = vpop.f32.mrb[155].mxu1  ;;  %19533 = vst [vmem:[#allocation78_spill] sm:$0xff] %v16962_v47  ;;  %v6549_v55 = vsel %vm1099_vm3, %v16962_v47, 0.0  ;;  %v6449_v25 = vpop.xlane.xlu1 %6448 }
 0xb71   :  { %19529 = vst [vmem:[#allocation176_spill] sm:$0xff] %v16945_v9  ;;  %v16948_v27 = vadd.f32 %v6171_v13, %v19530_v39  ;;  %v6543_v43 = vsel %vm1099_vm3, %v16945_v9, 0.0  ;;  %v16972_v13 = vsub.f32 %v16670_v14, %v6598_v34  ;;  %v6601_v34 = vmul.f32 0.1, %v6449_v25 }
 0xb72   :  { %6544 = vadd.xlane.f32.xlu1 %v6543_v43  ;;  %v16975_v43 = vsub.f32 %v16723_v51, %v6599_v17 }
 0xb73   :  { %19531 = vst [vmem:[#allocation102_spill] sm:$0xff] %v16948_v27  ;;  %v6546_v61 = vsel %vm1099_vm3, %v16948_v27, 0.0  ;;  %19534 = vst [vmem:[#allocation66_spill] sm:$0xff] %v16972_v13  ;;  %v6452_v42 = vpop.xlane.xlu0 %6451  ;;  %v6710_v56 = vmul.f32 %v16972_v13, %v16972_v13  ;;  %v16999_v25 = vsub.f32 %v16737_v41, %v6601_v34 }
 0xb74   :  { %6547 = vadd.xlane.f32.xlu0 %v6546_v61  ;;  %19535 = vst [vmem:[#allocation64_spill] sm:$0xff] %v16975_v43  ;;  %v6455_v30 = vpop.xlane.xlu1 %6454 }
 0xb75   :  { %v6774_v51 = vsel %vm1099_vm3, %v6710_v56, 0.0  ;;  %19543 = vst [vmem:[#allocation189_spill] sm:$0xff] %v16999_v25 }
 0xb76   :  { %6766 = vadd.xlane.f32.xlu1 %v6765_v38 }
 0xb77   :  { %v6458_v14 = vpop.xlane.xlu0 %6457 }
 0xb78   :  { %6769 = vadd.xlane.f32.xlu0 %v6768_v15  ;;  %v6600_v15 = vmul.f32 0.1, %v6446_v58 }
 0xb7a   :  { %6550 = vadd.xlane.f32.xlu1 %v6549_v55  ;;  %v19538_v55 = vld [vmem:[#allocation47_spill] sm:$0xff]  ;;  %v16992_v58 = vsub.f32 %v16677_v8, %v6600_v15  ;;  %v6461_v15 = vpop.xlane.xlu1 %6460 }
 0xb7c   :  { %19540 = vst [vmem:[#allocation124_spill] sm:$0xff] %v16992_v58  ;;  %v6712_v56 = vmul.f32 %v16992_v58, %v16992_v58 }
 0xb7e   :  { %6772 = vadd.xlane.f32.xlu1 %v6771_v32  ;;  %v6467_v41 = vpop.xlane.xlu1 %6466 }
 0xb8c   :  { %v11302_v7 = vpop.f32.mrb[188].mxu0 }
 0xb8d   :  { %v6246_v39 = vpop.f32.mrb[189].mxu0 }
 0xb8e   :  { %v16978_v61 = vadd.f32 %v6246_v39, %v19536_v2  ;;  %v11303_v33 = vpop.f32.mrb[190].mxu0  ;;  %v6711_v39 = vmul.f32 %v16975_v43, %v16975_v43  ;;  %v19541_v2 = vld [vmem:[#allocation50_spill] sm:$0xff] }
 0xb8f   :  { %v6249_v38 = vpop.f32.mrb[191].mxu0 }
 0xb90   :  { %19537 = vst [vmem:[#allocation129_spill] sm:$0xff] %v16978_v61  ;;  %v16981_v10 = vadd.f32 %v6249_v38, %v19538_v55  ;;  %v6552_v32 = vsel %vm1099_vm3, %v16978_v61, 0.0  ;;  %v16995_v38 = vadd.f32 %v11302_v7, %v19541_v2  ;;  %v6602_v7 = vmul.f32 0.1, %v6452_v42  ;;  %v19547_v42 = vld [vmem:[#allocation49_spill] sm:$0xff] }
 0xb91   :  { %6553 = vadd.xlane.f32.xlu0 %v6552_v32  ;;  %v19544_v32 = vld [vmem:[#allocation52_spill] sm:$0xff] }
 0xb92   :  { %19539 = vst [vmem:[#allocation120_spill] sm:$0xff] %v16981_v10  ;;  %v6555_v17 = vsel %vm1099_vm3, %v16981_v10, 0.0  ;;  %19542 = vst [vmem:[#allocation128_spill] sm:$0xff] %v16995_v38  ;;  %v17002_v29 = vadd.f32 %v11303_v33, %v19544_v32  ;;  %v6558_v2 = vsel %vm1099_vm3, %v16995_v38, 0.0  ;;  %v6464_v33 = vpop.xlane.xlu0 %6463 }
 0xb93   :  { %6556 = vadd.xlane.f32.xlu1 %v6555_v17  ;;  %v6777_v17 = vsel %vm1099_vm3, %v6711_v39, 0.0  ;;  %v17014_v39 = vsub.f32 %v16685_v36, %v6602_v7  ;;  %v6604_v7 = vmul.f32 0.1, %v6458_v14 }
 0xb94   :  { %v11306_v55 = vpop.f32.mrb[192].mxu0  ;;  %19545 = vst [vmem:[#allocation187_spill] sm:$0xff] %v17002_v29  ;;  %v6561_v34 = vsel %vm1099_vm3, %v17002_v29, 0.0 }
 0xb95   :  { %v6262_v4 = vpop.f32.mrb[193].mxu0  ;;  %6775 = vadd.xlane.f32.xlu0 %v6774_v51  ;;  %v6603_v51 = vmul.f32 0.1, %v6455_v30  ;;  %19546 = vst [vmem:[#allocation188_spill] sm:$0xff] %v17014_v39  ;;  %v17041_v36 = vsub.f32 %v16691_v63, %v6604_v7  ;;  %v6606_v7 = vmul.f32 0.1, %v6464_v33 }
 0xb96   :  { %v11307_v44 = vpop.f32.mrb[194].mxu0  ;;  %v17017_v32 = vadd.f32 %v6262_v4, %v19547_v42  ;;  %v11678_v4 = vld [vmem:[%s18525_s1 + $0x18] sm:$0x1f]  }
 0xb97   :  { %v6265_v8 = vpop.f32.mrb[195].mxu0  ;;  %6778 = vadd.xlane.f32.xlu1 %v6777_v17  ;;  %v6713_v44 = vmul.f32 %v16999_v25, %v16999_v25  ;;  %v6780_v17 = vsel %vm1099_vm3, %v6712_v56, 0.0  ;;  %v17021_v30 = vsub.f32 %v16749_v22, %v6603_v51  ;;  %v6714_v51 = vmul.f32 %v17014_v39, %v17014_v39  ;;  %11633 = vmatprep.subr.msk.bf16.mxu0 %vm347_vm1, %v11678_v4  ;;  %v6473_v22 = vpop.xlane.xlu1 %6472  ;;  %v19553_v39 = vld [vmem:[#allocation54_spill] sm:$0xff] }
 0xb98   :  { %19548 = vst [vmem:[#allocation103_spill] sm:$0xff] %v17017_v32  ;;  %v6564_v56 = vsel %vm1099_vm3, %v17017_v32, 0.0  ;;  %19552 = vst [vmem:[#allocation106_spill] sm:$0xff] %v17041_v36  ;;  %v17044_v43 = vadd.f32 %v11306_v55, %v19553_v39  ;;  %v6716_v39 = vmul.f32 %v17041_v36, %v17041_v36  ;;  %v17063_v33 = vsub.f32 %v16703_v5, %v6606_v7 }
 0xb99   :  { %6559 = vadd.xlane.f32.xlu0 %v6558_v2  ;;  %19549 = vst [vmem:[#allocation197_spill] sm:$0xff] %v17021_v30  ;;  %v19550_v2 = vld [vmem:[#allocation51_spill] sm:$0xff]  ;;  %v6783_v25 = vsel %vm1099_vm3, %v6713_v44, 0.0  ;;  %v7396_v44 = vsel %vm347_vm1, %v11678_v4, 0  ;;  %v6715_v14 = vmul.f32 %v17021_v30, %v17021_v30  ;;  %v19556_v4 = vld [vmem:[#allocation56_spill] sm:$0xff] }
 0xb9a   :  { %v17024_v31 = vadd.f32 %v6265_v8, %v19550_v2  ;;  %11331 = vmatpush3.bf16.msra.mxu0 %v7396_v44  ;;  %19554 = vst [vmem:[#allocation178_spill] sm:$0xff] %v17044_v43  ;;  %v6570_v55 = vsel %vm1099_vm3, %v17044_v43, 0.0 }
 0xb9b   :  { %6562 = vadd.xlane.f32.xlu1 %v6561_v34  ;;  %v6789_v44 = vsel %vm1099_vm3, %v6715_v14, 0.0 }
 0xb9c   :  { %19551 = vst [vmem:[#allocation119_spill] sm:$0xff] %v17024_v31  ;;  %v6567_v2 = vsel %vm1099_vm3, %v17024_v31, 0.0 }
 0xb9d   :  { %6781 = vadd.xlane.f32.xlu0 %v6780_v17  ;;  %v6470_v17 = vpop.xlane.xlu0 %6469 }
 0xb9e   :  { %v11324_v58 = vpop.f32.mrb[156].mxu1 }
 0xb9f   :  { %v6340_v34 = vpop.f32.mrb[157].mxu1  ;;  %6784 = vadd.xlane.f32.xlu1 %v6783_v25  ;;  %v6605_v25 = vmul.f32 0.1, %v6461_v15 }
 0xba0   :  { %v11325_v42 = vpop.f32.mrb[158].mxu1  ;;  %v17051_v31 = vadd.f32 %v6340_v34, %v19556_v4 }
 0xba1   :  { %v6343_v8 = vpop.f32.mrb[159].mxu1  ;;  %6565 = vadd.xlane.f32.xlu0 %v6564_v56  ;;  %v6786_v56 = vsel %vm1099_vm3, %v6714_v51, 0.0  ;;  %v17048_v15 = vsub.f32 %v16761_v1, %v6605_v25  ;;  %v6476_v30 = vpop.xlane.xlu0 %6475 }
 0xba2   :  { %19557 = vst [vmem:[#allocation105_spill] sm:$0xff] %v17051_v31  ;;  %v6479_v51 = vpop.xlane.xlu1 %6478  ;;  %v6573_v34 = vsel %vm1099_vm3, %v17051_v31, 0.0 }
 0xba3   :  { %6568 = vadd.xlane.f32.xlu1 %v6567_v2  ;;  %19555 = vst [vmem:[#allocation76_spill] sm:$0xff] %v17048_v15  ;;  %v6717_v14 = vmul.f32 %v17048_v15, %v17048_v15 }
 0xba5   :  { %6787 = vadd.xlane.f32.xlu0 %v6786_v56  ;;  %v6607_v56 = vmul.f32 0.1, %v6467_v41  ;;  %v6482_v1 = vpop.xlane.xlu0 %6481  ;;  %v19560_v41 = vld [vmem:[#allocation55_spill] sm:$0xff]  ;;  %v6795_v31 = vsel %vm1099_vm3, %v6717_v14, 0.0 }
 0xba6   :  { %v11328_v13 = vpop.f32.mrb[160].mxu1  ;;  %v17073_v36 = vadd.f32 %v11324_v58, %v19560_v41  ;;  %v6485_v15 = vpop.xlane.xlu1 %6484 }
 0xba7   :  { %v6356_v2 = vpop.f32.mrb[161].mxu1  ;;  %6790 = vadd.xlane.f32.xlu1 %v6789_v44  ;;  %v6792_v44 = vsel %vm1099_vm3, %v6716_v39, 0.0  ;;  %v6609_v39 = vmul.f32 0.1, %v6473_v22 }
 0xba8   :  { %v11329_v63 = vpop.f32.mrb[162].mxu1  ;;  %19561 = vst [vmem:[#allocation75_spill] sm:$0xff] %v17073_v36 }
 0xba9   :  { %v6359_v25 = vpop.f32.mrb[163].mxu1  ;;  %6571 = vadd.xlane.f32.xlu0 %v6570_v55  ;;  %v19558_v63 = vld [vmem:[#allocation53_spill] sm:$0xff]  ;;  %v17070_v55 = vsub.f32 %v16773_v37, %v6607_v56  ;;  %v6579_v56 = vsel %vm1099_vm3, %v17073_v36, 0.0  ;;  %v17092_v22 = vsub.f32 %v16785_v19, %v6609_v39 }
 0xbaa   :  { %v17066_v4 = vadd.f32 %v6343_v8, %v19558_v63  ;;  %v6718_v8 = vmul.f32 %v17063_v33, %v17063_v33  ;;  %v6488_v63 = vpop.xlane.xlu0 %6487  ;;  %v6491_v41 = vpop.xlane.xlu1 %6490 }
 0xbab   :  { %6574 = vadd.xlane.f32.xlu1 %v6573_v34  ;;  %v6608_v34 = vmul.f32 0.1, %v6470_v17  ;;  %v6719_v58 = vmul.f32 %v17070_v55, %v17070_v55  ;;  %19565 = vst [vmem:[#allocation114_spill] sm:$0xff] %v17092_v22 }
 0xbac   :  { %19559 = vst [vmem:[#allocation170_spill] sm:$0xff] %v17066_v4  ;;  %v6576_v7 = vsel %vm1099_vm3, %v17066_v4, 0.0 }
 0xbad   :  { %6793 = vadd.xlane.f32.xlu0 %v6792_v44  ;;  %v17085_v14 = vsub.f32 %v16717_v52, %v6608_v34  ;;  %v6798_v44 = vsel %vm1099_vm3, %v6718_v8, 0.0  ;;  %v6801_v5 = vsel %vm1099_vm3, %v6719_v58, 0.0  ;;  %v6611_v8 = vmul.f32 0.1, %v6479_v51  ;;  %v19568_v58 = vld [vmem:[#allocation57_spill] sm:$0xff]  ;;  %v19570_v52 = vld [vmem:[#allocation59_spill] sm:$0xff] }
 0xbaf   :  { %6796 = vadd.xlane.f32.xlu1 %v6795_v31  ;;  %19562 = vst [vmem:[#allocation67_spill] sm:$0xff] %v17085_v14  ;;  %v19563_v31 = vld [vmem:[#allocation58_spill] sm:$0xff]  ;;  %v17114_v51 = vsub.f32 %v16794_v49, %v6611_v8 }
 0xbb0   :  { %v17088_v17 = vadd.f32 %v11325_v42, %v19563_v31  ;;  %v6720_v42 = vmul.f32 %v17085_v14, %v17085_v14  ;;  %v6494_v31 = vpop.xlane.xlu0 %6493  ;;  %v17117_v14 = vadd.f32 %v11328_v13, %v19570_v52  ;;  %v6615_v52 = vmul.f32 0.1, %v6491_v41 }
 0xbb1   :  { %6577 = vadd.xlane.f32.xlu0 %v6576_v7  ;;  %v19566_v7 = vld [vmem:[#allocation60_spill] sm:$0xff] }
 0xbb2   :  { %19564 = vst [vmem:[#allocation174_spill] sm:$0xff] %v17088_v17  ;;  %v17095_v37 = vadd.f32 %v6356_v2, %v19566_v7  ;;  %v6582_v34 = vsel %vm1099_vm3, %v17088_v17, 0.0  ;;  %v6721_v2 = vmul.f32 %v17092_v22, %v17092_v22  ;;  %v17110_v7 = vadd.f32 %v6359_v25, %v19568_v58  ;;  %19571 = vst [vmem:[#allocation104_spill] sm:$0xff] %v17117_v14 }
 0xbb3   :  { %6580 = vadd.xlane.f32.xlu1 %v6579_v56  ;;  %v6610_v56 = vmul.f32 0.1, %v6476_v30  ;;  %v6612_v30 = vmul.f32 0.1, %v6482_v1  ;;  %v6804_v19 = vsel %vm1099_vm3, %v6720_v42, 0.0  ;;  %v6591_v13 = vsel %vm1099_vm3, %v17117_v14, 0.0 }
 0xbb4   :  { %19567 = vst [vmem:[#allocation173_spill] sm:$0xff] %v17095_v37  ;;  %v6585_v39 = vsel %vm1099_vm3, %v17095_v37, 0.0  ;;  %19569 = vst [vmem:[#allocation112_spill] sm:$0xff] %v17110_v7  ;;  %v6807_v22 = vsel %vm1099_vm3, %v6721_v2, 0.0  ;;  %v6614_v1 = vmul.f32 0.1, %v6488_v63  ;;  %v17141_v41 = vsub.f32 %v16809_v24, %v6615_v52 }
 0xbb5   :  { %6799 = vadd.xlane.f32.xlu0 %v6798_v44  ;;  %v6497_v44 = vpop.xlane.xlu1 %6496  ;;  %v6588_v25 = vsel %vm1099_vm3, %v17110_v7, 0.0  ;;  %v6616_v2 = vmul.f32 0.1, %v6494_v31 }
 0xbb6   :  { %v17135_v63 = vsub.f32 %v16755_v20, %v6614_v1  ;;  %v6727_v24 = vmul.f32 %v17141_v41, %v17141_v41 }
 0xbb7   :  { %6802 = vadd.xlane.f32.xlu1 %v6801_v5  ;;  %v17107_v5 = vsub.f32 %v16731_v26, %v6610_v56  ;;  %v17121_v56 = vsub.f32 %v16743_v3, %v6612_v30  ;;  %v17147_v31 = vsub.f32 %v16767_v40, %v6616_v2 }
 0xbb9   :  { %6583 = vadd.xlane.f32.xlu0 %v6582_v34  ;;  %v6613_v34 = vmul.f32 0.1, %v6485_v15  ;;  %v6503_v42 = vpop.xlane.xlu1 %6502  ;;  %v6724_v58 = vmul.f32 %v17121_v56, %v17121_v56 }
 0xbba   :  { %v6619_v52 = vmul.f32 0.1, %v6503_v42 }
 0xbbb   :  { %6586 = vadd.xlane.f32.xlu1 %v6585_v39  ;;  %v6500_v39 = vpop.xlane.xlu0 %6499  ;;  %v17128_v15 = vsub.f32 %v16800_v6, %v6613_v34  ;;  %v6617_v34 = vmul.f32 0.1, %v6497_v44 }
 0xbbc   :  { %v6618_v1 = vmul.f32 0.1, %v6500_v39  ;;  %v17165_v42 = vsub.f32 %v16823_v28, %v6619_v52  ;;  %v19572_v52 = vld [vmem:[#allocation65_spill] sm:$0xff] }
 0xbbd   :  { %6805 = vadd.xlane.f32.xlu0 %v6804_v19  ;;  %v6722_v19 = vmul.f32 %v17107_v5, %v17107_v5  ;;  %v6725_v49 = vmul.f32 %v17128_v15, %v17128_v15  ;;  %v17153_v44 = vsub.f32 %v16818_v0, %v6617_v34  ;;  %v6825_v34 = vsel %vm1099_vm3, %v6727_v24, 0.0 }
 0xbbe   :  { %v17159_v2 = vsub.f32 %v16779_v62, %v6618_v1 }
 0xbbf   :  { %6808 = vadd.xlane.f32.xlu1 %v6807_v22  ;;  %v6723_v22 = vmul.f32 %v17114_v51, %v17114_v51  ;;  %v6506_v8 = vpop.xlane.xlu0 %6505  ;;  %v6810_v30 = vsel %vm1099_vm3, %v6722_v19, 0.0  ;;  %v6816_v19 = vsel %vm1099_vm3, %v6724_v58, 0.0 }
 0xbc0   :  { %v6620_v39 = vmul.f32 0.1, %v6506_v8  ;;  %v6730_v62 = vmul.f32 %v17159_v2, %v17159_v2 }
 0xbc1   :  { %6589 = vadd.xlane.f32.xlu0 %v6588_v25  ;;  %v6813_v25 = vsel %vm1099_vm3, %v6723_v22, 0.0  ;;  %v6819_v22 = vsel %vm1099_vm3, %v6725_v49, 0.0 }
 0xbc2   :  { %v17171_v1 = vsub.f32 %v16805_v18, %v6620_v39 }
 0xbc3   :  { %6592 = vadd.xlane.f32.xlu1 %v6591_v13  ;;  %v6509_v13 = vpop.xlane.xlu1 %6508  ;;  %v6512_v26 = vpop.xlane.xlu0 %6511 }
 0xbc4   :  { %v6621_v49 = vmul.f32 0.1, %v6509_v13  ;;  %v6622_v8 = vmul.f32 0.1, %v6512_v26  ;;  %v6732_v18 = vmul.f32 %v17171_v1, %v17171_v1 }
 0xbc5   :  { %6811 = vadd.xlane.f32.xlu0 %v6810_v30  ;;  %v6726_v30 = vmul.f32 %v17135_v63, %v17135_v63 }
 0xbc6   :  { %v17177_v13 = vsub.f32 %v19572_v52, %v6621_v49  ;;  %v17183_v26 = vsub.f32 %v16873_v11, %v6622_v8  ;;  %v6840_v8 = vsel %vm1099_vm3, %v6732_v18, 0.0 }
 0xbc7   :  { %6814 = vadd.xlane.f32.xlu1 %v6813_v25  ;;  %v6515_v25 = vpop.xlane.xlu1 %6514  ;;  %v6822_v58 = vsel %vm1099_vm3, %v6726_v30, 0.0  ;;  %v6518_v20 = vpop.xlane.xlu0 %6517 }
 0xbc8   :  { %v6623_v24 = vmul.f32 0.1, %v6515_v25  ;;  %v6624_v39 = vmul.f32 0.1, %v6518_v20 }
 0xbc9   :  { %6817 = vadd.xlane.f32.xlu0 %v6816_v19  ;;  %v6728_v19 = vmul.f32 %v17147_v31, %v17147_v31 }
 0xbca   :  { %v17189_v49 = vsub.f32 %v16881_v54, %v6623_v24  ;;  %v17195_v20 = vsub.f32 %v16878_v46, %v6624_v39 }
 0xbcb   :  { %6820 = vadd.xlane.f32.xlu1 %v6819_v22  ;;  %v6729_v22 = vmul.f32 %v17153_v44, %v17153_v44  ;;  %v6828_v30 = vsel %vm1099_vm3, %v6728_v19, 0.0  ;;  %v6524_v0 = vpop.xlane.xlu0 %6523  ;;  %v6834_v19 = vsel %vm1099_vm3, %v6730_v62, 0.0 }
 0xbcc   :  { %v6626_v62 = vmul.f32 0.1, %v6524_v0 }
 0xbcd   :  { %6823 = vadd.xlane.f32.xlu0 %v6822_v58  ;;  %v6521_v58 = vpop.xlane.xlu1 %6520  ;;  %v6831_v28 = vsel %vm1099_vm3, %v6729_v22, 0.0 }
 0xbce   :  { %v6625_v25 = vmul.f32 0.1, %v6521_v58  ;;  %v17207_v0 = vsub.f32 %v16898_v59, %v6626_v62 }
 0xbcf   :  { %6826 = vadd.xlane.f32.xlu1 %v6825_v34  ;;  %v6731_v34 = vmul.f32 %v17165_v42, %v17165_v42  ;;  %v6530_v52 = vpop.xlane.xlu0 %6529 }
 0xbd0   :  { %v17201_v58 = vsub.f32 %v16887_v35, %v6625_v25  ;;  %v6628_v18 = vmul.f32 0.1, %v6530_v52 }
 0xbd1   :  { %6829 = vadd.xlane.f32.xlu0 %v6828_v30  ;;  %v6527_v30 = vpop.xlane.xlu1 %6526  ;;  %v6837_v22 = vsel %vm1099_vm3, %v6731_v34, 0.0 }
 0xbd2   :  { %v6627_v24 = vmul.f32 0.1, %v6527_v30  ;;  %v6737_v35 = vmul.f32 %v17201_v58, %v17201_v58  ;;  %v17219_v62 = vsub.f32 %v16901_v21, %v6628_v18 }
 0xbd3   :  { %6832 = vadd.xlane.f32.xlu1 %v6831_v28  ;;  %v6733_v28 = vmul.f32 %v17177_v13, %v17177_v13  ;;  %v6536_v54 = vpop.xlane.xlu0 %6535 }
 0xbd4   :  { %v17213_v25 = vsub.f32 %v16904_v53, %v6627_v24  ;;  %v6630_v52 = vmul.f32 0.1, %v6536_v54  ;;  %v6740_v53 = vmul.f32 %v17219_v62, %v17219_v62 }
 0xbd5   :  { %6835 = vadd.xlane.f32.xlu0 %v6834_v19  ;;  %v6734_v19 = vmul.f32 %v17183_v26, %v17183_v26  ;;  %v6533_v11 = vpop.xlane.xlu1 %6532  ;;  %v6843_v34 = vsel %vm1099_vm3, %v6733_v28, 0.0 }
 0xbd6   :  { %v6629_v30 = vmul.f32 0.1, %v6533_v11  ;;  %v17231_v18 = vsub.f32 %v16919_v23, %v6630_v52 }
 0xbd7   :  { %6838 = vadd.xlane.f32.xlu1 %v6837_v22  ;;  %v6735_v22 = vmul.f32 %v17189_v49, %v17189_v49  ;;  %v6846_v39 = vsel %vm1099_vm3, %v6734_v19, 0.0  ;;  %v6542_v59 = vpop.xlane.xlu0 %6541 }
 0xbd8   :  { %v17225_v11 = vsub.f32 %v16913_v60, %v6629_v30  ;;  %v6632_v54 = vmul.f32 0.1, %v6542_v59  ;;  %v6864_v59 = vsel %vm1099_vm3, %v6740_v53, 0.0  ;;  %v6742_v52 = vmul.f32 %v17231_v18, %v17231_v18  ;;  %v19574_v60 = vld [vmem:[#allocation119_spill] sm:$0xff] }
 0xbd9   :  { %6841 = vadd.xlane.f32.xlu0 %v6840_v8  ;;  %v6736_v8 = vmul.f32 %v17195_v20, %v17195_v20  ;;  %v6849_v28 = vsel %vm1099_vm3, %v6735_v22, 0.0  ;;  %v6855_v22 = vsel %vm1099_vm3, %v6737_v35, 0.0 }
 0xbda   :  { %v6741_v35 = vmul.f32 %v17225_v11, %v17225_v11 }
 0xbdb   :  { %6844 = vadd.xlane.f32.xlu1 %v6843_v34  ;;  %v6539_v34 = vpop.xlane.xlu1 %6538  ;;  %v6852_v19 = vsel %vm1099_vm3, %v6736_v8, 0.0 }
 0xbdc   :  { %v6631_v24 = vmul.f32 0.1, %v6539_v34 }
 0xbdd   :  { %6847 = vadd.xlane.f32.xlu0 %v6846_v39  ;;  %v6738_v39 = vmul.f32 %v17207_v0, %v17207_v0 }
 0xbde   :  { %v17237_v30 = vsub.f32 %v16916_v12, %v6631_v24 }
 0xbdf   :  { %6850 = vadd.xlane.f32.xlu1 %v6849_v28  ;;  %v6739_v28 = vmul.f32 %v17213_v25, %v17213_v25  ;;  %v6858_v8 = vsel %vm1099_vm3, %v6738_v39, 0.0  ;;  %v6867_v39 = vsel %vm1099_vm3, %v6741_v35, 0.0 }
 0xbe0   :  { %v6743_v24 = vmul.f32 %v17237_v30, %v17237_v30 }
 0xbe1   :  { %6853 = vadd.xlane.f32.xlu0 %v6852_v19  ;;  %v6861_v34 = vsel %vm1099_vm3, %v6739_v28, 0.0  ;;  %v17243_v19 = vsub.f32 %v16927_v45, %v6632_v54 }
 0xbe2   :  { %v6873_v54 = vsel %vm1099_vm3, %v6743_v24, 0.0 }
 0xbe3   :  { %6856 = vadd.xlane.f32.xlu1 %v6855_v22  ;;  %v6870_v22 = vsel %vm1099_vm3, %v6742_v52, 0.0  ;;  %v6744_v28 = vmul.f32 %v17243_v19, %v17243_v19 }
 0xbe5   :  { %6859 = vadd.xlane.f32.xlu0 %v6858_v8  ;;  %v6876_v53 = vsel %vm1099_vm3, %v6744_v28, 0.0  ;;  %v6764_v8 = vpop.xlane.xlu0 %6763 }
 0xbe7   :  { %6862 = vadd.xlane.f32.xlu1 %v6861_v34  ;;  %v6930_v34 = vmul.f32 0.1, %v6764_v8 }
 0xbe9   :  { %6865 = vadd.xlane.f32.xlu0 %v6864_v59  ;;  %v6986_v59 = vadd.f32 1e-05, %v6930_v34 }
 0xbeb   :  { %6868 = vadd.xlane.f32.xlu1 %v6867_v39  ;;  %12244 = vrsqrt.f32 %v6986_v59 }
 0xbed   :  { %6871 = vadd.xlane.f32.xlu0 %v6870_v22 }
 0xbef   :  { %6874 = vadd.xlane.f32.xlu1 %v6873_v54 }
 0xbf1   :  { %6877 = vadd.xlane.f32.xlu0 %v6876_v53 }
 0xbff   :  { %v6545_v35 = vpop.xlane.xlu1 %6544 }
 0xc00   :  { %v6633_v12 = vmul.f32 0.1, %v6545_v35 }
 0xc01   :  { %v6548_v23 = vpop.xlane.xlu0 %6547 }
 0xc02   :  { %v17257_v39 = vsub.f32 %v16945_v9, %v6633_v12  ;;  %v6634_v52 = vmul.f32 0.1, %v6548_v23 }
 0xc03   :  { %v6767_v45 = vpop.xlane.xlu1 %6766 }
 0xc04   :  { %v17260_v22 = vsub.f32 %v16948_v27, %v6634_v52  ;;  %v6931_v24 = vmul.f32 0.1, %v6767_v45  ;;  %v6745_v28 = vmul.f32 %v17257_v39, %v17257_v39 }
 0xc05   :  { %v6770_v54 = vpop.xlane.xlu0 %6769 }
 0xc06   :  { %v6987_v53 = vadd.f32 1e-05, %v6931_v24  ;;  %v6932_v8 = vmul.f32 0.1, %v6770_v54  ;;  %v6879_v34 = vsel %vm1099_vm3, %v6745_v28, 0.0  ;;  %v6746_v59 = vmul.f32 %v17260_v22, %v17260_v22  ;;  %v12245_v24 = vpop.eup %12244 }
 0xc07   :  { %6880 = vadd.xlane.f32.xlu1 %v6879_v34  ;;  %v6551_v12 = vpop.xlane.xlu1 %6550 }
 0xc08   :  { %12246 = vrsqrt.f32 %v6987_v53  ;;  %v6988_v23 = vadd.f32 1e-05, %v6932_v8  ;;  %v6635_v35 = vmul.f32 0.1, %v6551_v12  ;;  %v6882_v52 = vsel %vm1099_vm3, %v6746_v59, 0.0 }
 0xc09   :  { %6883 = vadd.xlane.f32.xlu0 %v6882_v52  ;;  %v7098_v53 = vmul.f32 %v12245_v24, %v16924_v16  ;;  %v17278_v8 = vld [vmem:[%s18526_s2 + $0x75] ss:$0 sm:$0xff] }
 0xc0a   :  { %12248 = vrsqrt.f32 %v6988_v23  ;;  %v17269_v45 = vsub.f32 %v16962_v47, %v6635_v35  ;;  %v17285_v35 = vld [vmem:[%s18526_s2 + $0x76] ss:$0 sm:$0xff] }
 0xc0b   :  { %v6773_v27 = vpop.xlane.xlu1 %6772 }
 0xc0c   :  { %v6933_v54 = vmul.f32 0.1, %v6773_v27  ;;  %v6747_v28 = vmul.f32 %v17269_v45, %v17269_v45  ;;  %v7158_v27 = vmul.f32 %v17278_v8, %v7098_v53 }
 0xc0e   :  { %v6989_v9 = vadd.f32 1e-05, %v6933_v54  ;;  %v6885_v34 = vsel %vm1099_vm3, %v6747_v28, 0.0  ;;  %v7218_v24 = vadd.f32 %v17285_v35, %v7158_v27 }
 0xc0f   :  { %6886 = vadd.xlane.f32.xlu1 %v6885_v34 }
 0xc10   :  { %12250 = vrsqrt.f32 %v6989_v9 }
 0xc12   :  { %v12247_v59 = vpop.eup %12246 }
 0xc13   :  { %v7099_v12 = vmul.f32 %v12247_v59, %v16939_v50 }
 0xc14   :  { %v12249_v23 = vpop.eup %12248 }
 0xc15   :  { %v7159_v52 = vmul.f32 %v17278_v8, %v7099_v12  ;;  %v7100_v16 = vmul.f32 %v12249_v23, %v16942_v48 }
 0xc17   :  { %v7219_v54 = vadd.f32 %v17285_v35, %v7159_v52  ;;  %v7160_v50 = vmul.f32 %v17278_v8, %v7100_v16 }
 0xc19   :  { %v7274_v9 = vpack.c.bf16 %v7219_v54, %v7218_v24  ;;  %v7220_v47 = vadd.f32 %v17285_v35, %v7160_v50 }
 0xc1a   :  { %v12251_v28 = vpop.eup %12250 }
 0xc1b   :  { %v7101_v34 = vmul.f32 %v12251_v28, %v16959_v57  ;;  %11332 = vmatprep.mubr.msk.bf16.mxu0 %vm1099_vm3, %v7274_v9 }
 0xc1d   :  { %v7161_v53 = vmul.f32 %v17278_v8, %v7101_v34 }
 0xc1e   :  { %v6554_v59 = vpop.xlane.xlu0 %6553 }
 0xc1f   :  { %v7221_v12 = vadd.f32 %v17285_v35, %v7161_v53  ;;  %v6636_v48 = vmul.f32 0.1, %v6554_v59 }
 0xc20   :  { %v6557_v23 = vpop.xlane.xlu1 %6556 }
 0xc21   :  { %v17298_v27 = vsub.f32 %v16978_v61, %v6636_v48  ;;  %v6637_v52 = vmul.f32 0.1, %v6557_v23  ;;  %v7275_v24 = vpack.c.bf16 %v7221_v12, %v7220_v47 }
 0xc22   :  { %v6776_v54 = vpop.xlane.xlu0 %6775 }
 0xc23   :  { %v17301_v16 = vsub.f32 %v16981_v10, %v6637_v52  ;;  %v6934_v57 = vmul.f32 0.1, %v6776_v54  ;;  %11333 = vmatmul.mubr.msk.bf16.vlgmr.msra.gmra.mrb[196].mxu0 %vm1099_vm3, %v7275_v24  ;;  %v6748_v9 = vmul.f32 %v17298_v27, %v17298_v27 }
 0xc24   :  { %v6779_v28 = vpop.xlane.xlu1 %6778 }
 0xc25   :  { %v6990_v50 = vadd.f32 1e-05, %v6934_v57  ;;  %v6935_v34 = vmul.f32 0.1, %v6779_v28  ;;  %v6888_v53 = vsel %vm1099_vm3, %v6748_v9, 0.0  ;;  %v6749_v59 = vmul.f32 %v17301_v16, %v17301_v16 }
 0xc26   :  { %6889 = vadd.xlane.f32.xlu0 %v6888_v53  ;;  %v6560_v47 = vpop.xlane.xlu0 %6559 }
 0xc27   :  { %12252 = vrsqrt.f32 %v6990_v50  ;;  %v6991_v12 = vadd.f32 1e-05, %v6935_v34  ;;  %v6638_v48 = vmul.f32 0.1, %v6560_v47  ;;  %v6891_v23 = vsel %vm1099_vm3, %v6749_v59, 0.0 }
 0xc28   :  { %6892 = vadd.xlane.f32.xlu1 %v6891_v23  ;;  %v6563_v52 = vpop.xlane.xlu1 %6562 }
 0xc29   :  { %12254 = vrsqrt.f32 %v6991_v12  ;;  %v17311_v24 = vsub.f32 %v16995_v38, %v6638_v48  ;;  %v6639_v54 = vmul.f32 0.1, %v6563_v52 }
 0xc2a   :  { %v6782_v57 = vpop.xlane.xlu0 %6781 }
 0xc2b   :  { %v17314_v9 = vsub.f32 %v17002_v29, %v6639_v54  ;;  %v6936_v28 = vmul.f32 0.1, %v6782_v57  ;;  %v6750_v53 = vmul.f32 %v17311_v24, %v17311_v24 }
 0xc2c   :  { %v6785_v50 = vpop.xlane.xlu1 %6784 }
 0xc2d   :  { %v6992_v34 = vadd.f32 1e-05, %v6936_v28  ;;  %v6937_v47 = vmul.f32 0.1, %v6785_v50  ;;  %v6894_v59 = vsel %vm1099_vm3, %v6750_v53, 0.0  ;;  %v6751_v12 = vmul.f32 %v17314_v9, %v17314_v9  ;;  %v19573_v53 = vld [vmem:[#allocation66_spill] sm:$0xff] }
 0xc2e   :  { %6895 = vadd.xlane.f32.xlu0 %v6894_v59  ;;  %v6566_v48 = vpop.xlane.xlu0 %6565 }
 0xc2f   :  { %12256 = vrsqrt.f32 %v6992_v34  ;;  %v6993_v23 = vadd.f32 1e-05, %v6937_v47  ;;  %v6640_v52 = vmul.f32 0.1, %v6566_v48  ;;  %v6897_v54 = vsel %vm1099_vm3, %v6751_v12, 0.0  ;;  %v19575_v48 = vld [vmem:[#allocation64_spill] sm:$0xff] }
 0xc30   :  { %6898 = vadd.xlane.f32.xlu1 %v6897_v54  ;;  %v6569_v57 = vpop.xlane.xlu1 %6568 }
 0xc31   :  { %v12253_v29 = vpop.eup %12252  ;;  %12258 = vrsqrt.f32 %v6993_v23  ;;  %v17323_v38 = vsub.f32 %v17017_v32, %v6640_v52  ;;  %v6641_v28 = vmul.f32 0.1, %v6569_v57 }
 0xc32   :  { %v6788_v50 = vpop.xlane.xlu0 %6787  ;;  %v7102_v10 = vmul.f32 %v12253_v29, %v19573_v53 }
 0xc33   :  { %v12255_v61 = vpop.eup %12254  ;;  %v17327_v59 = vsub.f32 %v19574_v60, %v6641_v28  ;;  %v6938_v34 = vmul.f32 0.1, %v6788_v50  ;;  %v6752_v47 = vmul.f32 %v17323_v38, %v17323_v38 }
 0xc34   :  { %v6791_v12 = vpop.xlane.xlu1 %6790  ;;  %v7103_v54 = vmul.f32 %v12255_v61, %v19575_v48  ;;  %v7162_v23 = vmul.f32 %v17278_v8, %v7102_v10 }
 0xc35   :  { %v6994_v21 = vadd.f32 1e-05, %v6938_v34  ;;  %v6939_v52 = vmul.f32 0.1, %v6791_v12  ;;  %v6900_v57 = vsel %vm1099_vm3, %v6752_v47, 0.0  ;;  %v6753_v29 = vmul.f32 %v17327_v59, %v17327_v59 }
 0xc36   :  { %6901 = vadd.xlane.f32.xlu0 %v6900_v57  ;;  %v6572_v53 = vpop.xlane.xlu0 %6571  ;;  %v7163_v28 = vmul.f32 %v17278_v8, %v7103_v54  ;;  %v7222_v10 = vadd.f32 %v17285_v35, %v7162_v23  ;;  %v19576_v54 = vld [vmem:[#allocation124_spill] sm:$0xff] }
 0xc37   :  { %12260 = vrsqrt.f32 %v6994_v21  ;;  %v6995_v50 = vadd.f32 1e-05, %v6939_v52  ;;  %v6642_v60 = vmul.f32 0.1, %v6572_v53  ;;  %v6903_v32 = vsel %vm1099_vm3, %v6753_v29, 0.0  ;;  %v19577_v53 = vld [vmem:[#allocation105_spill] sm:$0xff] }
 0xc38   :  { %6904 = vadd.xlane.f32.xlu1 %v6903_v32  ;;  %v6575_v61 = vpop.xlane.xlu1 %6574  ;;  %v7223_v34 = vadd.f32 %v17285_v35, %v7163_v28  ;;  %v19578_v28 = vld [vmem:[#allocation189_spill] sm:$0xff] }
 0xc39   :  { %v12257_v12 = vpop.eup %12256  ;;  %12262 = vrsqrt.f32 %v6995_v50  ;;  %v17341_v47 = vsub.f32 %v17044_v43, %v6642_v60  ;;  %v6643_v48 = vmul.f32 0.1, %v6575_v61 }
 0xc3a   :  { %v6794_v57 = vpop.xlane.xlu0 %6793  ;;  %v7276_v46 = vpack.c.bf16 %v7223_v34, %v7222_v10  ;;  %v7104_v21 = vmul.f32 %v12257_v12, %v19576_v54 }
 0xc3b   :  { %v12259_v52 = vpop.eup %12258  ;;  %v17345_v40 = vsub.f32 %v19577_v53, %v6643_v48  ;;  %v6940_v32 = vmul.f32 0.1, %v6794_v57  ;;  %v6754_v23 = vmul.f32 %v17341_v47, %v17341_v47 }
 0xc3c   :  { %v6797_v29 = vpop.xlane.xlu1 %6796  ;;  %11336 = vmatprep.mubr.msk.bf16.mxu0 %vm1099_vm3, %v7276_v46  ;;  %v7105_v50 = vmul.f32 %v12259_v52, %v19578_v28  ;;  %v7164_v60 = vmul.f32 %v17278_v8, %v7104_v21 }
 0xc3d   :  { %v6996_v61 = vadd.f32 1e-05, %v6940_v32  ;;  %v6941_v43 = vmul.f32 0.1, %v6797_v29  ;;  %v6906_v10 = vsel %vm1099_vm3, %v6754_v23, 0.0  ;;  %v6755_v34 = vmul.f32 %v17345_v40, %v17345_v40 }
 0xc3e   :  { %6907 = vadd.xlane.f32.xlu0 %v6906_v10  ;;  %v6578_v12 = vpop.xlane.xlu0 %6577  ;;  %v7165_v48 = vmul.f32 %v17278_v8, %v7105_v50  ;;  %v7224_v21 = vadd.f32 %v17285_v35, %v7164_v60  ;;  %v19579_v50 = vld [vmem:[#allocation188_spill] sm:$0xff] }
 0xc3f   :  { %12264 = vrsqrt.f32 %v6996_v61  ;;  %v6997_v57 = vadd.f32 1e-05, %v6941_v43  ;;  %v6644_v54 = vmul.f32 0.1, %v6578_v12  ;;  %v6909_v46 = vsel %vm1099_vm3, %v6755_v34, 0.0 }
 0xc40   :  { %6910 = vadd.xlane.f32.xlu1 %v6909_v46  ;;  %v6581_v52 = vpop.xlane.xlu1 %6580  ;;  %v7225_v32 = vadd.f32 %v17285_v35, %v7165_v48  ;;  %v19580_v48 = vld [vmem:[#allocation197_spill] sm:$0xff] }
 0xc41   :  { %v12261_v29 = vpop.eup %12260  ;;  %12266 = vrsqrt.f32 %v6997_v57  ;;  %v17360_v23 = vsub.f32 %v17066_v4, %v6644_v54  ;;  %v6645_v28 = vmul.f32 0.1, %v6581_v52 }
 0xc42   :  { %v6800_v10 = vpop.xlane.xlu0 %6799  ;;  %v7277_v53 = vpack.c.bf16 %v7225_v32, %v7224_v21  ;;  %v7106_v61 = vmul.f32 %v12261_v29, %v19579_v50 }
 0xc43   :  { %v12263_v43 = vpop.eup %12262  ;;  %v17364_v12 = vsub.f32 %v17073_v36, %v6645_v28  ;;  %v6942_v34 = vmul.f32 0.1, %v6800_v10  ;;  %v6756_v60 = vmul.f32 %v17360_v23, %v17360_v23 }
 0xc44   :  { %v6803_v46 = vpop.xlane.xlu1 %6802  ;;  %11337 = vmatmul.mubr.msk.bf16.gmra.mrb[200].mxu0 %vm1099_vm3, %v7277_v53  ;;  %v7107_v57 = vmul.f32 %v12263_v43, %v19580_v48  ;;  %v7166_v54 = vmul.f32 %v17278_v8, %v7106_v61 }
 0xc45   :  { %v6998_v52 = vadd.f32 1e-05, %v6942_v34  ;;  %v6943_v4 = vmul.f32 0.1, %v6803_v46  ;;  %v6912_v21 = vsel %vm1099_vm3, %v6756_v60, 0.0  ;;  %v6757_v32 = vmul.f32 %v17364_v12, %v17364_v12 }
 0xc46   :  { %6913 = vadd.xlane.f32.xlu0 %v6912_v21  ;;  %v6584_v29 = vpop.xlane.xlu0 %6583  ;;  %v7167_v28 = vmul.f32 %v17278_v8, %v7107_v57  ;;  %v7226_v61 = vadd.f32 %v17285_v35, %v7166_v54  ;;  %v19581_v57 = vld [vmem:[#allocation106_spill] sm:$0xff] }
 0xc47   :  { %12268 = vrsqrt.f32 %v6998_v52  ;;  %v6999_v10 = vadd.f32 1e-05, %v6943_v4  ;;  %v6646_v50 = vmul.f32 0.1, %v6584_v29  ;;  %v6915_v53 = vsel %vm1099_vm3, %v6757_v32, 0.0 }
 0xc48   :  { %6916 = vadd.xlane.f32.xlu1 %v6915_v53  ;;  %v6587_v43 = vpop.xlane.xlu1 %6586  ;;  %v7227_v34 = vadd.f32 %v17285_v35, %v7167_v28  ;;  %v19582_v28 = vld [vmem:[#allocation76_spill] sm:$0xff] }
 0xc49   :  { %v12265_v46 = vpop.eup %12264  ;;  %12270 = vrsqrt.f32 %v6999_v10  ;;  %v17379_v60 = vsub.f32 %v17088_v17, %v6646_v50  ;;  %v6647_v48 = vmul.f32 0.1, %v6587_v43 }
 0xc4a   :  { %v6806_v21 = vpop.xlane.xlu0 %6805  ;;  %v7278_v36 = vpack.c.bf16 %v7227_v34, %v7226_v61  ;;  %v7108_v52 = vmul.f32 %v12265_v46, %v19581_v57 }
 0xc4b   :  { %v12267_v4 = vpop.eup %12266  ;;  %v17383_v29 = vsub.f32 %v17095_v37, %v6647_v48  ;;  %v6944_v32 = vmul.f32 0.1, %v6806_v21  ;;  %v6758_v54 = vmul.f32 %v17379_v60, %v17379_v60  ;;  %v19583_v37 = vld [vmem:[#allocation67_spill] sm:$0xff] }
 0xc4c   :  { %v6809_v53 = vpop.xlane.xlu1 %6808  ;;  %11340 = vmatprep.mubr.msk.bf16.mxu0 %vm1099_vm3, %v7278_v36  ;;  %v7109_v10 = vmul.f32 %v12267_v4, %v19582_v28  ;;  %v7168_v50 = vmul.f32 %v17278_v8, %v7108_v52 }
 0xc4d   :  { %v7000_v43 = vadd.f32 1e-05, %v6944_v32  ;;  %v6945_v17 = vmul.f32 0.1, %v6809_v53  ;;  %v6918_v61 = vsel %vm1099_vm3, %v6758_v54, 0.0  ;;  %v6759_v34 = vmul.f32 %v17383_v29, %v17383_v29 }
 0xc4e   :  { %6919 = vadd.xlane.f32.xlu0 %v6918_v61  ;;  %v6590_v46 = vpop.xlane.xlu0 %6589  ;;  %v7169_v48 = vmul.f32 %v17278_v8, %v7109_v10  ;;  %v7228_v52 = vadd.f32 %v17285_v35, %v7168_v50 }
 0xc4f   :  { %12272 = vrsqrt.f32 %v7000_v43  ;;  %v7001_v21 = vadd.f32 1e-05, %v6945_v17  ;;  %v6648_v57 = vmul.f32 0.1, %v6590_v46  ;;  %v6921_v36 = vsel %vm1099_vm3, %v6759_v34, 0.0 }
 0xc50   :  { %6922 = vadd.xlane.f32.xlu1 %v6921_v36  ;;  %v6593_v4 = vpop.xlane.xlu1 %6592  ;;  %v7229_v32 = vadd.f32 %v17285_v35, %v7169_v48 }
 0xc51   :  { %v12269_v53 = vpop.eup %12268  ;;  %12274 = vrsqrt.f32 %v7001_v21  ;;  %v17398_v54 = vsub.f32 %v17110_v7, %v6648_v57  ;;  %v6649_v28 = vmul.f32 0.1, %v6593_v4 }
 0xc52   :  { %v7110_v61 = vmul.f32 %v12269_v53, %v17063_v33  ;;  %v6812_v10 = vpop.xlane.xlu0 %6811  ;;  %v7279_v43 = vpack.c.bf16 %v7229_v32, %v7228_v52 }
 0xc53   :  { %v12271_v17 = vpop.eup %12270  ;;  %v17402_v46 = vsub.f32 %v17117_v14, %v6649_v28  ;;  %v6946_v34 = vmul.f32 0.1, %v6812_v10  ;;  %v6760_v50 = vmul.f32 %v17398_v54, %v17398_v54 }
 0xc54   :  { %v6815_v36 = vpop.xlane.xlu1 %6814  ;;  %11341 = vmatmul.mubr.msk.bf16.gmra.mrb[204].mxu0 %vm1099_vm3, %v7279_v43  ;;  %v7111_v48 = vmul.f32 %v12271_v17, %v17070_v55  ;;  %v7170_v21 = vmul.f32 %v17278_v8, %v7110_v61 }
 0xc55   :  { %v7002_v57 = vadd.f32 1e-05, %v6946_v34  ;;  %v6947_v4 = vmul.f32 0.1, %v6815_v36  ;;  %v6924_v33 = vsel %vm1099_vm3, %v6760_v50, 0.0  ;;  %v6761_v52 = vmul.f32 %v17402_v46, %v17402_v46 }
 0xc56   :  { %6925 = vadd.xlane.f32.xlu0 %v6924_v33  ;;  %v6818_v32 = vpop.xlane.xlu0 %6817  ;;  %v7171_v53 = vmul.f32 %v17278_v8, %v7111_v48  ;;  %v7230_v61 = vadd.f32 %v17285_v35, %v7170_v21 }
 0xc57   :  { %12276 = vrsqrt.f32 %v7002_v57  ;;  %v7003_v28 = vadd.f32 1e-05, %v6947_v4  ;;  %v6948_v10 = vmul.f32 0.1, %v6818_v32  ;;  %v6927_v43 = vsel %vm1099_vm3, %v6761_v52, 0.0  ;;  %v19584_v52 = vld [vmem:[#allocation114_spill] sm:$0xff] }
 0xc58   :  { %6928 = vadd.xlane.f32.xlu1 %v6927_v43  ;;  %v6821_v55 = vpop.xlane.xlu1 %6820  ;;  %v7231_v17 = vadd.f32 %v17285_v35, %v7171_v53 }
 0xc59   :  { %v12273_v34 = vpop.eup %12272  ;;  %12278 = vrsqrt.f32 %v7003_v28  ;;  %v7004_v50 = vadd.f32 1e-05, %v6948_v10  ;;  %v6949_v36 = vmul.f32 0.1, %v6821_v55 }
 0xc5a   :  { %v7112_v33 = vmul.f32 %v12273_v34, %v19583_v37  ;;  %v6824_v14 = vpop.xlane.xlu0 %6823  ;;  %v7280_v7 = vpack.c.bf16 %v7231_v17, %v7230_v61 }
 0xc5b   :  { %v12275_v48 = vpop.eup %12274  ;;  %12280 = vrsqrt.f32 %v7004_v50  ;;  %v7005_v57 = vadd.f32 1e-05, %v6949_v36  ;;  %v6950_v4 = vmul.f32 0.1, %v6824_v14 }
 0xc5c   :  { %v6827_v32 = vpop.xlane.xlu1 %6826  ;;  %11344 = vmatprep.mubr.msk.bf16.mxu0 %vm1099_vm3, %v7280_v7  ;;  %v7113_v43 = vmul.f32 %v12275_v48, %v19584_v52  ;;  %v7172_v21 = vmul.f32 %v17278_v8, %v7112_v33 }
 0xc5d   :  { %12282 = vrsqrt.f32 %v7005_v57  ;;  %v7006_v53 = vadd.f32 1e-05, %v6950_v4  ;;  %v6951_v28 = vmul.f32 0.1, %v6827_v32 }
 0xc5e   :  { %v6830_v10 = vpop.xlane.xlu0 %6829  ;;  %v7173_v55 = vmul.f32 %v17278_v8, %v7113_v43  ;;  %v7232_v34 = vadd.f32 %v17285_v35, %v7172_v21 }
 0xc5f   :  { %12284 = vrsqrt.f32 %v7006_v53  ;;  %v7007_v37 = vadd.f32 1e-05, %v6951_v28  ;;  %v6952_v61 = vmul.f32 0.1, %v6830_v10 }
 0xc60   :  { %v6833_v17 = vpop.xlane.xlu1 %6832  ;;  %v7233_v14 = vadd.f32 %v17285_v35, %v7173_v55 }
 0xc61   :  { %v12277_v50 = vpop.eup %12276  ;;  %12286 = vrsqrt.f32 %v7007_v37  ;;  %v7008_v7 = vadd.f32 1e-05, %v6952_v61  ;;  %v6953_v36 = vmul.f32 0.1, %v6833_v17 }
 0xc62   :  { %v7114_v33 = vmul.f32 %v12277_v50, %v17107_v5  ;;  %v6836_v48 = vpop.xlane.xlu0 %6835  ;;  %v7281_v57 = vpack.c.bf16 %v7233_v14, %v7232_v34 }
 0xc63   :  { %v12279_v4 = vpop.eup %12278  ;;  %12288 = vrsqrt.f32 %v7008_v7  ;;  %v7009_v32 = vadd.f32 1e-05, %v6953_v36  ;;  %v6954_v52 = vmul.f32 0.1, %v6836_v48 }
 0xc64   :  { %v6839_v43 = vpop.xlane.xlu1 %6838  ;;  %11345 = vmatmul.mubr.msk.bf16.gmra.mrb[208].mxu0 %vm1099_vm3, %v7281_v57  ;;  %v7115_v53 = vmul.f32 %v12279_v4, %v17114_v51  ;;  %v7174_v21 = vmul.f32 %v17278_v8, %v7114_v33 }
 0xc65   :  { %v12281_v28 = vpop.eup %12280  ;;  %12290 = vrsqrt.f32 %v7009_v32  ;;  %v7010_v10 = vadd.f32 1e-05, %v6954_v52  ;;  %v6955_v55 = vmul.f32 0.1, %v6839_v43 }
 0xc66   :  { %v7116_v37 = vmul.f32 %v12281_v28, %v17121_v56  ;;  %v6842_v5 = vpop.xlane.xlu0 %6841  ;;  %v7175_v61 = vmul.f32 %v17278_v8, %v7115_v53  ;;  %v7234_v7 = vadd.f32 %v17285_v35, %v7174_v21 }
 0xc67   :  { %v12283_v17 = vpop.eup %12282  ;;  %12292 = vrsqrt.f32 %v7010_v10  ;;  %v7011_v34 = vadd.f32 1e-05, %v6955_v55  ;;  %v6956_v14 = vmul.f32 0.1, %v6842_v5 }
 0xc68   :  { %v6845_v50 = vpop.xlane.xlu1 %6844  ;;  %v7235_v51 = vadd.f32 %v17285_v35, %v7175_v61  ;;  %v7117_v36 = vmul.f32 %v12283_v17, %v17128_v15  ;;  %v7176_v33 = vmul.f32 %v17278_v8, %v7116_v37 }
 0xc69   :  { %v12285_v48 = vpop.eup %12284  ;;  %12294 = vrsqrt.f32 %v7011_v34  ;;  %v7012_v57 = vadd.f32 1e-05, %v6956_v14  ;;  %v6957_v56 = vmul.f32 0.1, %v6845_v50 }
 0xc6a   :  { %v7118_v4 = vmul.f32 %v12285_v48, %v17135_v63  ;;  %v6848_v32 = vpop.xlane.xlu0 %6847  ;;  %v7282_v52 = vpack.c.bf16 %v7235_v51, %v7234_v7  ;;  %v7177_v43 = vmul.f32 %v17278_v8, %v7117_v36  ;;  %v7236_v15 = vadd.f32 %v17285_v35, %v7176_v33 }
 0xc6b   :  { %v12287_v53 = vpop.eup %12286  ;;  %12296 = vrsqrt.f32 %v7012_v57  ;;  %v7013_v28 = vadd.f32 1e-05, %v6957_v56  ;;  %v6958_v21 = vmul.f32 0.1, %v6848_v32 }
 0xc6c   :  { %v7119_v10 = vmul.f32 %v12287_v53, %v17141_v41  ;;  %v6851_v55 = vpop.xlane.xlu1 %6850  ;;  %11348 = vmatprep.mubr.msk.bf16.mxu0 %vm1099_vm3, %v7282_v52  ;;  %v7237_v37 = vadd.f32 %v17285_v35, %v7177_v43  ;;  %v7178_v5 = vmul.f32 %v17278_v8, %v7118_v4 }
 0xc6d   :  { %v12289_v63 = vpop.eup %12288  ;;  %12298 = vrsqrt.f32 %v7013_v28  ;;  %v7014_v61 = vadd.f32 1e-05, %v6958_v21  ;;  %v6959_v17 = vmul.f32 0.1, %v6851_v55 }
 0xc6e   :  { %v7120_v34 = vmul.f32 %v12289_v63, %v17147_v31  ;;  %v6854_v14 = vpop.xlane.xlu0 %6853  ;;  %v7283_v50 = vpack.c.bf16 %v7237_v37, %v7236_v15  ;;  %v7179_v7 = vmul.f32 %v17278_v8, %v7119_v10  ;;  %v7238_v57 = vadd.f32 %v17285_v35, %v7178_v5 }
 0xc6f   :  { %v12291_v41 = vpop.eup %12290  ;;  %12300 = vrsqrt.f32 %v7014_v61  ;;  %v7015_v51 = vadd.f32 1e-05, %v6959_v17  ;;  %v6960_v36 = vmul.f32 0.1, %v6854_v14 }
 0xc70   :  { %v7121_v33 = vmul.f32 %v12291_v41, %v17153_v44  ;;  %v6857_v48 = vpop.xlane.xlu1 %6856  ;;  %11349 = vmatmul.mubr.msk.bf16.gmra.mrb[212].mxu0 %vm1099_vm3, %v7283_v50  ;;  %v7239_v56 = vadd.f32 %v17285_v35, %v7179_v7  ;;  %v7180_v4 = vmul.f32 %v17278_v8, %v7120_v34 }
 0xc71   :  { %v12293_v31 = vpop.eup %12292  ;;  %12302 = vrsqrt.f32 %v7015_v51  ;;  %v7016_v32 = vadd.f32 1e-05, %v6960_v36  ;;  %v6961_v52 = vmul.f32 0.1, %v6857_v48 }
 0xc72   :  { %v7122_v43 = vmul.f32 %v12293_v31, %v17159_v2  ;;  %v6860_v53 = vpop.xlane.xlu0 %6859  ;;  %v7284_v28 = vpack.c.bf16 %v7239_v56, %v7238_v57  ;;  %v7181_v21 = vmul.f32 %v17278_v8, %v7121_v33  ;;  %v7240_v5 = vadd.f32 %v17285_v35, %v7180_v4 }
 0xc73   :  { %v12295_v44 = vpop.eup %12294  ;;  %12304 = vrsqrt.f32 %v7016_v32  ;;  %v7017_v10 = vadd.f32 1e-05, %v6961_v52  ;;  %v6962_v55 = vmul.f32 0.1, %v6860_v53 }
 0xc74   :  { %v7123_v15 = vmul.f32 %v12295_v44, %v17165_v42  ;;  %v6863_v37 = vpop.xlane.xlu1 %6862  ;;  %11352 = vmatprep.mubr.msk.bf16.mxu0 %vm1099_vm3, %v7284_v28  ;;  %v7241_v63 = vadd.f32 %v17285_v35, %v7181_v21  ;;  %v7182_v61 = vmul.f32 %v17278_v8, %v7122_v43 }
 0xc75   :  { %v12297_v2 = vpop.eup %12296  ;;  %12306 = vrsqrt.f32 %v7017_v10  ;;  %v7018_v17 = vadd.f32 1e-05, %v6962_v55  ;;  %v6963_v34 = vmul.f32 0.1, %v6863_v37 }
 0xc76   :  { %v7124_v14 = vmul.f32 %v12297_v2, %v17171_v1  ;;  %v6866_v50 = vpop.xlane.xlu0 %6865  ;;  %v7285_v7 = vpack.c.bf16 %v7241_v63, %v7240_v5  ;;  %v7183_v41 = vmul.f32 %v17278_v8, %v7123_v15  ;;  %v7242_v57 = vadd.f32 %v17285_v35, %v7182_v61 }
 0xc77   :  { %v12299_v42 = vpop.eup %12298  ;;  %12308 = vrsqrt.f32 %v7018_v17  ;;  %v7019_v51 = vadd.f32 1e-05, %v6963_v34  ;;  %v6964_v36 = vmul.f32 0.1, %v6866_v50 }
 0xc78   :  { %v7125_v33 = vmul.f32 %v12299_v42, %v17177_v13  ;;  %v6869_v48 = vpop.xlane.xlu1 %6868  ;;  %11353 = vmatmul.mubr.msk.bf16.gmra.mrb[216].mxu0 %vm1099_vm3, %v7285_v7  ;;  %v7243_v56 = vadd.f32 %v17285_v35, %v7183_v41  ;;  %v7184_v4 = vmul.f32 %v17278_v8, %v7124_v14 }
 0xc79   :  { %v12301_v1 = vpop.eup %12300  ;;  %12310 = vrsqrt.f32 %v7019_v51  ;;  %v7020_v31 = vadd.f32 1e-05, %v6964_v36  ;;  %v6965_v32 = vmul.f32 0.1, %v6869_v48 }
 0xc7a   :  { %v7126_v52 = vmul.f32 %v12301_v1, %v17183_v26  ;;  %v6872_v43 = vpop.xlane.xlu0 %6871  ;;  %v7286_v53 = vpack.c.bf16 %v7243_v56, %v7242_v57  ;;  %v7185_v28 = vmul.f32 %v17278_v8, %v7125_v33  ;;  %v7244_v15 = vadd.f32 %v17285_v35, %v7184_v4 }
 0xc7b   :  { %v12303_v13 = vpop.eup %12302  ;;  %12312 = vrsqrt.f32 %v7020_v31  ;;  %v7021_v21 = vadd.f32 1e-05, %v6965_v32  ;;  %v6966_v44 = vmul.f32 0.1, %v6872_v43 }
 0xc7c   :  { %v7127_v10 = vmul.f32 %v12303_v13, %v17189_v49  ;;  %v6875_v55 = vpop.xlane.xlu1 %6874  ;;  %11356 = vmatprep.mubr.msk.bf16.mxu0 %vm1099_vm3, %v7286_v53  ;;  %v7245_v37 = vadd.f32 %v17285_v35, %v7185_v28  ;;  %v7186_v5 = vmul.f32 %v17278_v8, %v7126_v52 }
 0xc7d   :  { %v12305_v26 = vpop.eup %12304  ;;  %12314 = vrsqrt.f32 %v7021_v21  ;;  %v7022_v63 = vadd.f32 1e-05, %v6966_v44  ;;  %v6967_v61 = vmul.f32 0.1, %v6875_v55 }
 0xc7e   :  { %v7128_v2 = vmul.f32 %v12305_v26, %v17195_v20  ;;  %v7287_v17 = vpack.c.bf16 %v7245_v37, %v7244_v15  ;;  %v7187_v34 = vmul.f32 %v17278_v8, %v7127_v10  ;;  %v7246_v7 = vadd.f32 %v17285_v35, %v7186_v5  ;;  %v6878_v53 = vpop.xlane.xlu0 %6877 }
 0xc7f   :  { %v12307_v14 = vpop.eup %12306  ;;  %12316 = vrsqrt.f32 %v7022_v63  ;;  %v7023_v49 = vadd.f32 1e-05, %v6967_v61  ;;  %v6968_v15 = vmul.f32 0.1, %v6878_v53 }
 0xc80   :  { %v7129_v50 = vmul.f32 %v12307_v14, %v17201_v58  ;;  %11357 = vmatmul.mubr.msk.bf16.gmra.mrb[220].mxu0 %vm1099_vm3, %v7287_v17  ;;  %v7247_v41 = vadd.f32 %v17285_v35, %v7187_v34  ;;  %v7188_v42 = vmul.f32 %v17278_v8, %v7128_v2  ;;  %v11680_v14 = vld [vmem:[%s18525_s1 + $0x28] sm:$0xff]  }
 0xc81   :  { %v12309_v51 = vpop.eup %12308  ;;  %12318 = vrsqrt.f32 %v7023_v49  ;;  %v7024_v2 = vadd.f32 1e-05, %v6968_v15 }
 0xc82   :  { %v7130_v20 = vmul.f32 %v12309_v51, %v17207_v0  ;;  %v7288_v36 = vpack.c.bf16 %v7247_v41, %v7246_v7  ;;  %v7189_v33 = vmul.f32 %v17278_v8, %v7129_v50  ;;  %v7248_v58 = vadd.f32 %v17285_v35, %v7188_v42  ;;  %v11681_v41 = vld [vmem:[%s18525_s1 + $0x30] ss:$0 sps:$4 sm:$0xff]  }
 0xc83   :  { %v12311_v48 = vpop.eup %12310  ;;  %12320 = vrsqrt.f32 %v7024_v2 }
 0xc84   :  { %v7131_v57 = vmul.f32 %v12311_v48, %v17213_v25  ;;  %11360 = vmatprep.mubr.msk.bf16.mxu0 %vm1099_vm3, %v7288_v36  ;;  %v7249_v56 = vadd.f32 %v17285_v35, %v7189_v33  ;;  %v7190_v4 = vmul.f32 %v17278_v8, %v7130_v20  ;;  %v8292_v20 = vsel %vm346_vm0, %v11681_v41, 0 }
 0xc85   :  { %v12313_v1 = vpop.eup %12312 }
 0xc86   :  { %v7132_v31 = vmul.f32 %v12313_v1, %v17219_v62  ;;  %v7289_v32 = vpack.c.bf16 %v7249_v56, %v7248_v58  ;;  %v7191_v0 = vmul.f32 %v17278_v8, %v7131_v57  ;;  %v7250_v25 = vadd.f32 %v17285_v35, %v7190_v4 }
 0xc87   :  { %v12315_v52 = vpop.eup %12314 }
 0xc88   :  { %v7133_v43 = vmul.f32 %v12315_v52, %v17225_v11  ;;  %11361 = vmatmul.mubr.msk.bf16.gmra.mrb[224].mxu0 %vm1099_vm3, %v7289_v32  ;;  %v7251_v28 = vadd.f32 %v17285_v35, %v7191_v0  ;;  %v7192_v13 = vmul.f32 %v17278_v8, %v7132_v31 }
 0xc89   :  { %v12317_v21 = vpop.eup %12316 }
 0xc8a   :  { %v7134_v44 = vmul.f32 %v12317_v21, %v17231_v18  ;;  %v7290_v10 = vpack.c.bf16 %v7251_v28, %v7250_v25  ;;  %v7193_v62 = vmul.f32 %v17278_v8, %v7133_v43  ;;  %v7252_v11 = vadd.f32 %v17285_v35, %v7192_v13  ;;  %v11679_v18 = vld [vmem:[%s18525_s1 + $0x20] sm:$0xff]  }
 0xc8b   :  { %v12319_v55 = vpop.eup %12318  ;;  %11388 = vmatprep.subr.bf16.mxu1 %v11679_v18 }
 0xc8c   :  { %v7135_v37 = vmul.f32 %v12319_v55, %v17237_v30  ;;  %11364 = vmatprep.mubr.msk.bf16.mxu0 %vm1099_vm3, %v7290_v10  ;;  %v7253_v5 = vadd.f32 %v17285_v35, %v7193_v62  ;;  %v7194_v26 = vmul.f32 %v17278_v8, %v7134_v44  ;;  %11389 = vmatpush3.bf16.msra.mxu1 %v11679_v18 }
 0xc8d   :  { %11390 = vmatprep.subr.bf16.mxu1 %v11680_v14  ;;  %v12321_v48 = vpop.eup %12320 }
 0xc8e   :  { %v7291_v63 = vpack.c.bf16 %v7253_v5, %v7252_v11  ;;  %v7195_v61 = vmul.f32 %v17278_v8, %v7135_v37  ;;  %v7254_v30 = vadd.f32 %v17285_v35, %v7194_v26  ;;  %v7136_v56 = vmul.f32 %v12321_v48, %v17243_v19 }
 0xc90   :  { %11365 = vmatmul.mubr.msk.bf16.gmra.mrb[228].mxu0 %vm1099_vm3, %v7291_v63  ;;  %v7255_v17 = vadd.f32 %v17285_v35, %v7195_v61  ;;  %11391 = vmatpush3.bf16.msra.mxu1 %v11680_v14  ;;  %v7196_v31 = vmul.f32 %v17278_v8, %v7136_v56 }
 0xc91   :  { %11634 = vmatprep.subr.msk.bf16.mxu1 %vm346_vm0, %v11681_v41  ;;  %vm9939_vm0 = vcmask 1043459  }
 0xc92   :  { %v7292_v34 = vpack.c.bf16 %v7255_v17, %v7254_v30  ;;  %v7256_v43 = vadd.f32 %v17285_v35, %v7196_v31 }
 0xc94   :  { %v6881_v49 = vpop.xlane.xlu1 %6880  ;;  %11368 = vmatprep.mubr.msk.bf16.mxu0 %vm1099_vm3, %v7292_v34  ;;  %11393 = vmatpush3.bf16.msra.mxu1 %v8292_v20 }
 0xc95   :  { %v6969_v50 = vmul.f32 0.1, %v6881_v49 }
 0xc96   :  { %v6884_v7 = vpop.xlane.xlu0 %6883 }
 0xc97   :  { %v7025_v42 = vadd.f32 1e-05, %v6969_v50  ;;  %v6970_v51 = vmul.f32 0.1, %v6884_v7 }
 0xc99   :  { %12322 = vrsqrt.f32 %v7025_v42  ;;  %v7026_v36 = vadd.f32 1e-05, %v6970_v51 }
 0xc9b   :  { %12324 = vrsqrt.f32 %v7026_v36 }
 0xc9c   :  { %v6887_v33 = vpop.xlane.xlu1 %6886 }
 0xc9d   :  { %v6971_v57 = vmul.f32 0.1, %v6887_v33 }
 0xc9f   :  { %v7027_v58 = vadd.f32 1e-05, %v6971_v57 }
 0xca1   :  { %12326 = vrsqrt.f32 %v7027_v58 }
 0xca3   :  { %v12323_v4 = vpop.eup %12322 }
 0xca4   :  { %v7137_v1 = vmul.f32 %v12323_v4, %v17257_v39 }
 0xca5   :  { %v12325_v32 = vpop.eup %12324 }
 0xca6   :  { %v7197_v0 = vmul.f32 %v17278_v8, %v7137_v1  ;;  %v7138_v52 = vmul.f32 %v12325_v32, %v17260_v22 }
 0xca8   :  { %v7257_v53 = vadd.f32 %v17285_v35, %v7197_v0  ;;  %v7198_v19 = vmul.f32 %v17278_v8, %v7138_v52 }
 0xcaa   :  { %v7293_v25 = vpack.c.bf16 %v7257_v53, %v7256_v43  ;;  %v7258_v21 = vadd.f32 %v17285_v35, %v7198_v19 }
 0xcab   :  { %v12327_v28 = vpop.eup %12326 }
 0xcac   :  { %v7139_v13 = vmul.f32 %v12327_v28, %v17269_v45  ;;  %11369 = vmatmul.mubr.msk.bf16.gmra.mrb[232].mxu0 %vm1099_vm3, %v7293_v25 }
 0xcae   :  { %v7199_v39 = vmul.f32 %v17278_v8, %v7139_v13 }
 0xcb0   :  { %v7259_v44 = vadd.f32 %v17285_v35, %v7199_v39 }
 0xcb2   :  { %v7294_v10 = vpack.c.bf16 %v7259_v44, %v7258_v21 }
 0xcb3   :  { %v6890_v22 = vpop.xlane.xlu0 %6889 }
 0xcb4   :  { %v6972_v62 = vmul.f32 0.1, %v6890_v22  ;;  %11372 = vmatprep.mubr.msk.bf16.mxu0 %vm1099_vm3, %v7294_v10 }
 0xcb5   :  { %v6893_v55 = vpop.xlane.xlu1 %6892 }
 0xcb6   :  { %v7028_v15 = vadd.f32 1e-05, %v6972_v62  ;;  %v6973_v37 = vmul.f32 0.1, %v6893_v55 }
 0xcb8   :  { %12328 = vrsqrt.f32 %v7028_v15  ;;  %v7029_v45 = vadd.f32 1e-05, %v6973_v37 }
 0xcba   :  { %12330 = vrsqrt.f32 %v7029_v45 }
 0xcbb   :  { %v6896_v11 = vpop.xlane.xlu0 %6895 }
 0xcbc   :  { %v6974_v5 = vmul.f32 0.1, %v6896_v11 }
 0xcbd   :  { %v6899_v26 = vpop.xlane.xlu1 %6898 }
 0xcbe   :  { %v7030_v63 = vadd.f32 1e-05, %v6974_v5  ;;  %v6975_v61 = vmul.f32 0.1, %v6899_v26 }
 0xcc0   :  { %12332 = vrsqrt.f32 %v7030_v63  ;;  %v7031_v18 = vadd.f32 1e-05, %v6975_v61 }
 0xcc2   :  { %v12329_v2 = vpop.eup %12328  ;;  %12334 = vrsqrt.f32 %v7031_v18 }
 0xcc3   :  { %v7140_v30 = vmul.f32 %v12329_v2, %v17298_v27  ;;  %v6902_v17 = vpop.xlane.xlu0 %6901 }
 0xcc4   :  { %v12331_v34 = vpop.eup %12330  ;;  %v6976_v14 = vmul.f32 0.1, %v6902_v17 }
 0xcc5   :  { %v7141_v49 = vmul.f32 %v12331_v34, %v17301_v16  ;;  %v6905_v50 = vpop.xlane.xlu1 %6904  ;;  %v7200_v7 = vmul.f32 %v17278_v8, %v7140_v30 }
 0xcc6   :  { %v7032_v41 = vadd.f32 1e-05, %v6976_v14  ;;  %v6977_v42 = vmul.f32 0.1, %v6905_v50 }
 0xcc7   :  { %v7201_v51 = vmul.f32 %v17278_v8, %v7141_v49  ;;  %v7260_v36 = vadd.f32 %v17285_v35, %v7200_v7 }
 0xcc8   :  { %12336 = vrsqrt.f32 %v7032_v41  ;;  %v7033_v20 = vadd.f32 1e-05, %v6977_v42 }
 0xcc9   :  { %v7261_v33 = vadd.f32 %v17285_v35, %v7201_v51 }
 0xcca   :  { %v12333_v48 = vpop.eup %12332  ;;  %12338 = vrsqrt.f32 %v7033_v20 }
 0xccb   :  { %v7142_v27 = vmul.f32 %v12333_v48, %v17311_v24  ;;  %v6908_v57 = vpop.xlane.xlu0 %6907  ;;  %v7295_v58 = vpack.c.bf16 %v7261_v33, %v7260_v36 }
 0xccc   :  { %v12335_v16 = vpop.eup %12334  ;;  %v6978_v56 = vmul.f32 0.1, %v6908_v57 }
 0xccd   :  { %v7143_v4 = vmul.f32 %v12335_v16, %v17314_v9  ;;  %v6911_v1 = vpop.xlane.xlu1 %6910  ;;  %11373 = vmatmul.mubr.msk.bf16.gmra.mrb[236].mxu0 %vm1099_vm3, %v7295_v58  ;;  %v7202_v31 = vmul.f32 %v17278_v8, %v7142_v27 }
 0xcce   :  { %v7034_v32 = vadd.f32 1e-05, %v6978_v56  ;;  %v6979_v0 = vmul.f32 0.1, %v6911_v1 }
 0xccf   :  { %v7203_v52 = vmul.f32 %v17278_v8, %v7143_v4  ;;  %v7262_v53 = vadd.f32 %v17285_v35, %v7202_v31  ;;  %v17545_v8 = vld [vmem:[%s18526_s2 + $0x75] ss:$0 sm:$0xff] }
 0xcd0   :  { %12340 = vrsqrt.f32 %v7034_v32  ;;  %v7035_v43 = vadd.f32 1e-05, %v6979_v0 }
 0xcd1   :  { %v7263_v24 = vadd.f32 %v17285_v35, %v7203_v52 }
 0xcd2   :  { %v12337_v25 = vpop.eup %12336  ;;  %12342 = vrsqrt.f32 %v7035_v43 }
 0xcd3   :  { %v7144_v28 = vmul.f32 %v12337_v25, %v17323_v38  ;;  %v6914_v9 = vpop.xlane.xlu0 %6913  ;;  %v7296_v13 = vpack.c.bf16 %v7263_v24, %v7262_v53 }
 0xcd4   :  { %v12339_v19 = vpop.eup %12338  ;;  %v6980_v39 = vmul.f32 0.1, %v6914_v9 }
 0xcd5   :  { %v7145_v21 = vmul.f32 %v12339_v19, %v17327_v59  ;;  %v6917_v44 = vpop.xlane.xlu1 %6916  ;;  %11376 = vmatprep.mubr.msk.bf16.mxu0 %vm1099_vm3, %v7296_v13  ;;  %v7204_v35 = vmul.f32 %v17545_v8, %v7144_v28  ;;  %v17552_v59 = vld [vmem:[%s18526_s2 + $0x76] ss:$0 sm:$0xff] }
 0xcd6   :  { %v7036_v10 = vadd.f32 1e-05, %v6980_v39  ;;  %v6981_v22 = vmul.f32 0.1, %v6917_v44 }
 0xcd7   :  { %v7205_v38 = vmul.f32 %v17545_v8, %v7145_v21  ;;  %v7264_v55 = vadd.f32 %v17552_v59, %v7204_v35 }
 0xcd8   :  { %12344 = vrsqrt.f32 %v7036_v10  ;;  %v7037_v62 = vadd.f32 1e-05, %v6981_v22 }
 0xcd9   :  { %v7265_v15 = vadd.f32 %v17552_v59, %v7205_v38 }
 0xcda   :  { %v12341_v37 = vpop.eup %12340  ;;  %12346 = vrsqrt.f32 %v7037_v62 }
 0xcdb   :  { %v7146_v45 = vmul.f32 %v12341_v37, %v17341_v47  ;;  %v6920_v11 = vpop.xlane.xlu0 %6919  ;;  %v7297_v5 = vpack.c.bf16 %v7265_v15, %v7264_v55 }
 0xcdc   :  { %v12343_v26 = vpop.eup %12342  ;;  %v6982_v63 = vmul.f32 0.1, %v6920_v11 }
 0xcdd   :  { %v7147_v61 = vmul.f32 %v12343_v26, %v17345_v40  ;;  %v6923_v18 = vpop.xlane.xlu1 %6922  ;;  %11377 = vmatmul.mubr.msk.bf16.gmra.mrb[240].mxu0 %vm1099_vm3, %v7297_v5  ;;  %v7206_v2 = vmul.f32 %v17545_v8, %v7146_v45 }
 0xcde   :  { %v7038_v30 = vadd.f32 1e-05, %v6982_v63  ;;  %v6983_v17 = vmul.f32 0.1, %v6923_v18 }
 0xcdf   :  { %v7207_v34 = vmul.f32 %v17545_v8, %v7147_v61  ;;  %v7266_v49 = vadd.f32 %v17552_v59, %v7206_v2 }
 0xce0   :  { %12348 = vrsqrt.f32 %v7038_v30  ;;  %v7039_v14 = vadd.f32 1e-05, %v6983_v17 }
 0xce1   :  { %v7267_v47 = vadd.f32 %v17552_v59, %v7207_v34 }
 0xce2   :  { %v12345_v50 = vpop.eup %12344  ;;  %12350 = vrsqrt.f32 %v7039_v14 }
 0xce3   :  { %v7148_v7 = vmul.f32 %v12345_v50, %v17360_v23  ;;  %v6926_v40 = vpop.xlane.xlu0 %6925  ;;  %v7298_v41 = vpack.c.bf16 %v7267_v47, %v7266_v49 }
 0xce4   :  { %v12347_v42 = vpop.eup %12346  ;;  %v6984_v51 = vmul.f32 0.1, %v6926_v40 }
 0xce5   :  { %v7149_v20 = vmul.f32 %v12347_v42, %v17364_v12  ;;  %v6929_v36 = vpop.xlane.xlu1 %6928  ;;  %11380 = vmatprep.mubr.msk.bf16.mxu0 %vm1099_vm3, %v7298_v41  ;;  %v7208_v33 = vmul.f32 %v17545_v8, %v7148_v7 }
 0xce6   :  { %v7040_v48 = vadd.f32 1e-05, %v6984_v51  ;;  %v6985_v27 = vmul.f32 0.1, %v6929_v36 }
 0xce7   :  { %v7209_v57 = vmul.f32 %v17545_v8, %v7149_v20  ;;  %v7268_v16 = vadd.f32 %v17552_v59, %v7208_v33 }
 0xce8   :  { %12352 = vrsqrt.f32 %v7040_v48  ;;  %v7041_v58 = vadd.f32 1e-05, %v6985_v27 }
 0xce9   :  { %v7269_v23 = vadd.f32 %v17552_v59, %v7209_v57 }
 0xcea   :  { %v12349_v56 = vpop.eup %12348  ;;  %12354 = vrsqrt.f32 %v7041_v58 }
 0xceb   :  { %v7150_v4 = vmul.f32 %v12349_v56, %v17379_v60  ;;  %v7299_v12 = vpack.c.bf16 %v7269_v23, %v7268_v16  ;;  %v17581_v60 = vld [vmem:[%s18526_s2 + $0x73] ss:$0 sm:$0xff] }
 0xcec   :  { %v12351_v1 = vpop.eup %12350 }
 0xced   :  { %v7151_v31 = vmul.f32 %v12351_v1, %v17383_v29  ;;  %11381 = vmatmul.mubr.msk.bf16.gmra.mrb[244].mxu0 %vm1099_vm3, %v7299_v12  ;;  %v7210_v32 = vmul.f32 %v17545_v8, %v7150_v4 }
 0xcef   :  { %v7211_v0 = vmul.f32 %v17545_v8, %v7151_v31  ;;  %v7270_v52 = vadd.f32 %v17552_v59, %v7210_v32 }
 0xcf1   :  { %v7271_v43 = vadd.f32 %v17552_v59, %v7211_v0 }
 0xcf2   :  { %v12353_v53 = vpop.eup %12352 }
 0xcf3   :  { %v7152_v24 = vmul.f32 %v12353_v53, %v17398_v54  ;;  %v7300_v25 = vpack.c.bf16 %v7271_v43, %v7270_v52 }
 0xcf4   :  { %v12355_v28 = vpop.eup %12354 }
 0xcf5   :  { %v7153_v29 = vmul.f32 %v12355_v28, %v17402_v46  ;;  %11384 = vmatprep.mubr.msk.bf16.mxu0 %vm1099_vm3, %v7300_v25  ;;  %v7212_v9 = vmul.f32 %v17545_v8, %v7152_v24 }
 0xcf6   :  { %v11334_v13 = vpop.f32.mrb[196].mxu0 }
 0xcf7   :  { %v7441_v19 = vadd.f32 %v11334_v13, %v17581_v60  ;;  %v7432_v39 = vpop.f32.mrb[197].mxu0  ;;  %v7213_v21 = vmul.f32 %v17545_v8, %v7153_v29  ;;  %v7272_v38 = vadd.f32 %v17552_v59, %v7212_v9 }
 0xcf8   :  { %v7433_v54 = vadd.f32 %v17581_v60, %v7432_v39  ;;  %v11335_v44 = vpop.f32.mrb[198].mxu0 }
 0xcf9   :  { %v7657_v35 = vmul.f32 %v7441_v19, %v7441_v19  ;;  %v7444_v10 = vadd.f32 %v11335_v44, %v17581_v60  ;;  %v7435_v22 = vpop.f32.mrb[199].mxu0  ;;  %v7273_v46 = vadd.f32 %v17552_v59, %v7213_v21 }
 0xcfa   :  { %v7655_v62 = vmul.f32 %v7433_v54, %v7433_v54  ;;  %v7436_v55 = vadd.f32 %v17581_v60, %v7435_v22 }
 0xcfb   :  { %v7713_v15 = vmul.f32 %v7657_v35, %v7441_v19  ;;  %v7658_v37 = vmul.f32 %v7444_v10, %v7444_v10  ;;  %v7301_v45 = vpack.c.bf16 %v7273_v46, %v7272_v38 }
 0xcfc   :  { %v7711_v11 = vmul.f32 %v7655_v62, %v7433_v54  ;;  %v7656_v5 = vmul.f32 %v7436_v55, %v7436_v55 }
 0xcfd   :  { %v7769_v8 = vmul.f32 0.044715, %v7713_v15  ;;  %v7714_v26 = vmul.f32 %v7658_v37, %v7444_v10  ;;  %11385 = vmatmul.mubr.msk.bf16.gmra.mrb[248].mxu0 %vm1099_vm3, %v7301_v45 }
 0xcfe   :  { %v7767_v63 = vmul.f32 0.044715, %v7711_v11  ;;  %v7712_v61 = vmul.f32 %v7656_v5, %v7436_v55 }
 0xcff   :  { %v7825_v18 = vadd.f32 %v7769_v8, %v7441_v19  ;;  %v7770_v2 = vmul.f32 0.044715, %v7714_v26 }
 0xd00   :  { %v7823_v30 = vadd.f32 %v7767_v63, %v7433_v54  ;;  %v7768_v17 = vmul.f32 0.044715, %v7712_v61 }
 0xd01   :  { %v7881_v34 = vmul.f32 0.7978846, %v7825_v18  ;;  %v7826_v59 = vadd.f32 %v7770_v2, %v7444_v10 }
 0xd02   :  { %v7879_v14 = vmul.f32 0.7978846, %v7823_v30  ;;  %v7824_v49 = vadd.f32 %v7768_v17, %v7436_v55 }
 0xd03   :  { %12356 = vtanh.f32 %v7881_v34  ;;  %v7882_v47 = vmul.f32 0.7978846, %v7826_v59 }
 0xd04   :  { %12358 = vtanh.f32 %v7879_v14  ;;  %v7880_v50 = vmul.f32 0.7978846, %v7824_v49 }
 0xd05   :  { %12360 = vtanh.f32 %v7882_v47 }
 0xd06   :  { %12362 = vtanh.f32 %v7880_v50 }
 0xd0d   :  { %v12357_v7 = vpop.eup %12356 }
 0xd0e   :  { %v12359_v40 = vpop.eup %12358  ;;  %v7993_v41 = vadd.f32 1.0, %v12357_v7 }
 0xd0f   :  { %v12361_v42 = vpop.eup %12360  ;;  %v7991_v51 = vadd.f32 1.0, %v12359_v40 }
 0xd10   :  { %v12363_v20 = vpop.eup %12362  ;;  %v8049_v36 = vmul.f32 0.5, %v7993_v41  ;;  %v7994_v33 = vadd.f32 1.0, %v12361_v42 }
 0xd11   :  { %v8047_v48 = vmul.f32 0.5, %v7991_v51  ;;  %v7992_v27 = vadd.f32 1.0, %v12363_v20 }
 0xd12   :  { %v8050_v57 = vmul.f32 0.5, %v7994_v33  ;;  %v8105_v16 = vmul.f32 %v8049_v36, %v7441_v19 }
 0xd13   :  { %v8048_v58 = vmul.f32 0.5, %v7992_v27  ;;  %v8103_v56 = vmul.f32 %v8047_v48, %v7433_v54 }
 0xd14   :  { %v8106_v23 = vmul.f32 %v8050_v57, %v7444_v10 }
 0xd15   :  { %v8104_v4 = vmul.f32 %v8048_v58, %v7436_v55 }
 0xd16   :  { %v8160_v12 = vpack.c.bf16 %v8106_v23, %v8105_v16 }
 0xd17   :  { %v11338_v1 = vpop.f32.mrb[200].mxu0  ;;  %v8159_v31 = vpack.c.bf16 %v8104_v4, %v8103_v56 }
 0xd18   :  { %v17595_v32 = vadd.f32 %v11338_v1, %v17581_v60  ;;  %v7448_v0 = vpop.f32.mrb[201].mxu0 }
 0xd19   :  { %v17598_v52 = vadd.f32 %v17581_v60, %v7448_v0  ;;  %v11339_v43 = vpop.f32.mrb[202].mxu0  ;;  %11394 = vmatprep.mubr.msk.bf16.mxu1 %vm8206_vm7, %v8159_v31 }
 0xd1a   :  { %v7661_v53 = vmul.f32 %v17595_v32, %v17595_v32  ;;  %v17604_v24 = vadd.f32 %v11339_v43, %v17581_v60  ;;  %v7451_v25 = vpop.f32.mrb[203].mxu0  ;;  %11395 = vmatmul.mubr.msk.bf16.vlgmr.msra.gmra.mrb[164].mxu1 %vm8206_vm7, %v8160_v12 }
 0xd1b   :  { %v7659_v28 = vmul.f32 %v17598_v52, %v17598_v52  ;;  %v17610_v29 = vadd.f32 %v17581_v60, %v7451_v25 }
 0xd1c   :  { %v7717_v9 = vmul.f32 %v7661_v53, %v17595_v32  ;;  %v7662_v13 = vmul.f32 %v17604_v24, %v17604_v24 }
 0xd1d   :  { %v7715_v19 = vmul.f32 %v7659_v28, %v17598_v52  ;;  %v7660_v39 = vmul.f32 %v17610_v29, %v17610_v29 }
 0xd1e   :  { %v7773_v21 = vmul.f32 0.044715, %v7717_v9  ;;  %v7718_v54 = vmul.f32 %v7662_v13, %v17604_v24 }
 0xd1f   :  { %v7771_v44 = vmul.f32 0.044715, %v7715_v19  ;;  %v7716_v35 = vmul.f32 %v7660_v39, %v17610_v29 }
 0xd20   :  { %v7829_v10 = vadd.f32 %v7773_v21, %v17595_v32  ;;  %v7774_v22 = vmul.f32 0.044715, %v7718_v54 }
 0xd21   :  { %v7827_v38 = vadd.f32 %v7771_v44, %v17598_v52  ;;  %v7772_v46 = vmul.f32 0.044715, %v7716_v35 }
 0xd22   :  { %v7885_v62 = vmul.f32 0.7978846, %v7829_v10  ;;  %v7830_v55 = vadd.f32 %v7774_v22, %v17604_v24 }
 0xd23   :  { %v7883_v15 = vmul.f32 0.7978846, %v7827_v38  ;;  %v7828_v37 = vadd.f32 %v7772_v46, %v17610_v29 }
 0xd24   :  { %12364 = vtanh.f32 %v7885_v62  ;;  %v7886_v45 = vmul.f32 0.7978846, %v7830_v55 }
 0xd25   :  { %12366 = vtanh.f32 %v7883_v15  ;;  %v7884_v11 = vmul.f32 0.7978846, %v7828_v37 }
 0xd26   :  { %12368 = vtanh.f32 %v7886_v45 }
 0xd27   :  { %12370 = vtanh.f32 %v7884_v11  ;;  %v11342_v5 = vpop.f32.mrb[204].mxu0 }
 0xd28   :  { %v17625_v8 = vadd.f32 %v11342_v5, %v17581_v60  ;;  %v7464_v26 = vpop.f32.mrb[205].mxu0 }
 0xd29   :  { %v17628_v63 = vadd.f32 %v17581_v60, %v7464_v26  ;;  %v11343_v61 = vpop.f32.mrb[206].mxu0 }
 0xd2a   :  { %v7665_v18 = vmul.f32 %v17625_v8, %v17625_v8  ;;  %v17633_v2 = vadd.f32 %v11343_v61, %v17581_v60  ;;  %v7467_v30 = vpop.f32.mrb[207].mxu0 }
 0xd2b   :  { %v7663_v17 = vmul.f32 %v17628_v63, %v17628_v63  ;;  %v17638_v34 = vadd.f32 %v17581_v60, %v7467_v30 }
 0xd2c   :  { %v7721_v59 = vmul.f32 %v7665_v18, %v17625_v8  ;;  %v7666_v14 = vmul.f32 %v17633_v2, %v17633_v2 }
 0xd2d   :  { %v7719_v49 = vmul.f32 %v7663_v17, %v17628_v63  ;;  %v7664_v47 = vmul.f32 %v17638_v34, %v17638_v34 }
 0xd2e   :  { %v12365_v50 = vpop.eup %12364  ;;  %v7777_v7 = vmul.f32 0.044715, %v7721_v59  ;;  %v7722_v40 = vmul.f32 %v7666_v14, %v17633_v2 }
 0xd2f   :  { %v12367_v41 = vpop.eup %12366  ;;  %v7997_v42 = vadd.f32 1.0, %v12365_v50  ;;  %v7775_v51 = vmul.f32 0.044715, %v7719_v49  ;;  %v7720_v20 = vmul.f32 %v7664_v47, %v17638_v34 }
 0xd30   :  { %v12369_v36 = vpop.eup %12368  ;;  %v7995_v33 = vadd.f32 1.0, %v12367_v41  ;;  %v7833_v48 = vadd.f32 %v7777_v7, %v17625_v8  ;;  %v7778_v27 = vmul.f32 0.044715, %v7722_v40 }
 0xd31   :  { %v12371_v57 = vpop.eup %12370  ;;  %v8053_v58 = vmul.f32 0.5, %v7997_v42  ;;  %v7998_v16 = vadd.f32 1.0, %v12369_v36  ;;  %v7831_v23 = vadd.f32 %v7775_v51, %v17628_v63  ;;  %v7776_v56 = vmul.f32 0.044715, %v7720_v20 }
 0xd32   :  { %v8051_v4 = vmul.f32 0.5, %v7995_v33  ;;  %v7996_v12 = vadd.f32 1.0, %v12371_v57  ;;  %v7889_v1 = vmul.f32 0.7978846, %v7833_v48  ;;  %v7834_v31 = vadd.f32 %v7778_v27, %v17633_v2 }
 0xd33   :  { %v8054_v0 = vmul.f32 0.5, %v7998_v16  ;;  %v7887_v43 = vmul.f32 0.7978846, %v7831_v23  ;;  %v7832_v53 = vadd.f32 %v7776_v56, %v17638_v34  ;;  %v8109_v9 = vmul.f32 %v8053_v58, %v17595_v32 }
 0xd34   :  { %v8052_v25 = vmul.f32 0.5, %v7996_v12  ;;  %12372 = vtanh.f32 %v7889_v1  ;;  %v7890_v28 = vmul.f32 0.7978846, %v7834_v31  ;;  %v8107_v39 = vmul.f32 %v8051_v4, %v17598_v52 }
 0xd35   :  { %v8110_v13 = vmul.f32 %v8054_v0, %v17604_v24  ;;  %12374 = vtanh.f32 %v7887_v43  ;;  %v7888_v19 = vmul.f32 0.7978846, %v7832_v53 }
 0xd36   :  { %v8108_v21 = vmul.f32 %v8052_v25, %v17610_v29  ;;  %12376 = vtanh.f32 %v7890_v28 }
 0xd37   :  { %12378 = vtanh.f32 %v7888_v19  ;;  %v11346_v54 = vpop.f32.mrb[208].mxu0  ;;  %v8162_v44 = vpack.c.bf16 %v8110_v13, %v8109_v9 }
 0xd38   :  { %v17657_v35 = vadd.f32 %v11346_v54, %v17581_v60  ;;  %v7480_v10 = vpop.f32.mrb[209].mxu0  ;;  %v8161_v22 = vpack.c.bf16 %v8108_v21, %v8107_v39 }
 0xd39   :  { %v17660_v38 = vadd.f32 %v17581_v60, %v7480_v10  ;;  %v11347_v32 = vpop.f32.mrb[210].mxu0 }
 0xd3a   :  { %v7669_v24 = vmul.f32 %v17657_v35, %v17657_v35  ;;  %v17665_v52 = vadd.f32 %v11347_v32, %v17581_v60  ;;  %v7483_v29 = vpop.f32.mrb[211].mxu0  ;;  %11398 = vmatprep.mubr.msk.bf16.mxu1 %vm8206_vm7, %v8161_v22 }
 0xd3b   :  { %v7667_v46 = vmul.f32 %v17660_v38, %v17660_v38  ;;  %v17671_v62 = vadd.f32 %v17581_v60, %v7483_v29  ;;  %11399 = vmatmul.mubr.msk.bf16.gmra.mrb[168].mxu1 %vm8206_vm7, %v8162_v44 }
 0xd3c   :  { %v7725_v55 = vmul.f32 %v7669_v24, %v17657_v35  ;;  %v7670_v15 = vmul.f32 %v17665_v52, %v17665_v52 }
 0xd3d   :  { %v7723_v37 = vmul.f32 %v7667_v46, %v17660_v38  ;;  %v7668_v45 = vmul.f32 %v17671_v62, %v17671_v62 }
 0xd3e   :  { %v12373_v11 = vpop.eup %12372  ;;  %v7781_v5 = vmul.f32 0.044715, %v7725_v55  ;;  %v7726_v26 = vmul.f32 %v7670_v15, %v17665_v52 }
 0xd3f   :  { %v12375_v61 = vpop.eup %12374  ;;  %v8001_v18 = vadd.f32 1.0, %v12373_v11  ;;  %v7779_v30 = vmul.f32 0.044715, %v7723_v37  ;;  %v7724_v17 = vmul.f32 %v7668_v45, %v17671_v62 }
 0xd40   :  { %v12377_v59 = vpop.eup %12376  ;;  %v7999_v14 = vadd.f32 1.0, %v12375_v61  ;;  %v7837_v49 = vadd.f32 %v7781_v5, %v17657_v35  ;;  %v7782_v47 = vmul.f32 0.044715, %v7726_v26 }
 0xd41   :  { %v12379_v50 = vpop.eup %12378  ;;  %v8057_v7 = vmul.f32 0.5, %v8001_v18  ;;  %v8002_v40 = vadd.f32 1.0, %v12377_v59  ;;  %v7835_v41 = vadd.f32 %v7779_v30, %v17660_v38  ;;  %v7780_v42 = vmul.f32 0.044715, %v7724_v17 }
 0xd42   :  { %v8055_v51 = vmul.f32 0.5, %v7999_v14  ;;  %v8000_v20 = vadd.f32 1.0, %v12379_v50  ;;  %v7893_v36 = vmul.f32 0.7978846, %v7837_v49  ;;  %v7838_v33 = vadd.f32 %v7782_v47, %v17665_v52 }
 0xd43   :  { %v8113_v48 = vmul.f32 %v8057_v7, %v17625_v8  ;;  %v8058_v27 = vmul.f32 0.5, %v8002_v40  ;;  %v7891_v57 = vmul.f32 0.7978846, %v7835_v41  ;;  %v7836_v58 = vadd.f32 %v7780_v42, %v17671_v62  ;;  %v11350_v16 = vpop.f32.mrb[212].mxu0 }
 0xd44   :  { %v8111_v23 = vmul.f32 %v8055_v51, %v17628_v63  ;;  %v8056_v56 = vmul.f32 0.5, %v8000_v20  ;;  %12380 = vtanh.f32 %v7893_v36  ;;  %v7894_v4 = vmul.f32 0.7978846, %v7838_v33  ;;  %v7496_v12 = vpop.f32.mrb[213].mxu0 }
 0xd45   :  { %v8114_v1 = vmul.f32 %v8058_v27, %v17633_v2  ;;  %12382 = vtanh.f32 %v7891_v57  ;;  %v7892_v31 = vmul.f32 0.7978846, %v7836_v58  ;;  %v17690_v0 = vadd.f32 %v11350_v16, %v17581_v60  ;;  %v11351_v43 = vpop.f32.mrb[214].mxu0 }
 0xd46   :  { %v8112_v8 = vmul.f32 %v8056_v56, %v17638_v34  ;;  %12384 = vtanh.f32 %v7894_v4  ;;  %v17694_v53 = vadd.f32 %v17581_v60, %v7496_v12  ;;  %v17697_v63 = vadd.f32 %v11351_v43, %v17581_v60  ;;  %v7499_v25 = vpop.f32.mrb[215].mxu0 }
 0xd47   :  { %12386 = vtanh.f32 %v7892_v31  ;;  %v7673_v2 = vmul.f32 %v17690_v0, %v17690_v0  ;;  %v17702_v28 = vadd.f32 %v17581_v60, %v7499_v25  ;;  %v8164_v9 = vpack.c.bf16 %v8114_v1, %v8113_v48 }
 0xd48   :  { %v7671_v13 = vmul.f32 %v17694_v53, %v17694_v53  ;;  %v7674_v34 = vmul.f32 %v17697_v63, %v17697_v63  ;;  %v8163_v19 = vpack.c.bf16 %v8112_v8, %v8111_v23 }
 0xd49   :  { %v7729_v39 = vmul.f32 %v7673_v2, %v17690_v0  ;;  %v7672_v21 = vmul.f32 %v17702_v28, %v17702_v28 }
 0xd4a   :  { %v7727_v54 = vmul.f32 %v7671_v13, %v17694_v53  ;;  %v7730_v44 = vmul.f32 %v7674_v34, %v17697_v63  ;;  %11402 = vmatprep.mubr.msk.bf16.mxu1 %vm8206_vm7, %v8163_v19 }
 0xd4b   :  { %v7785_v10 = vmul.f32 0.044715, %v7729_v39  ;;  %v7728_v22 = vmul.f32 %v7672_v21, %v17702_v28  ;;  %v11354_v32 = vpop.f32.mrb[216].mxu0  ;;  %11403 = vmatmul.mubr.msk.bf16.gmra.mrb[172].mxu1 %vm8206_vm7, %v8164_v9 }
 0xd4c   :  { %v7783_v24 = vmul.f32 0.044715, %v7727_v54  ;;  %v7786_v29 = vmul.f32 0.044715, %v7730_v44  ;;  %v17717_v46 = vadd.f32 %v11354_v32, %v17581_v60  ;;  %v7512_v55 = vpop.f32.mrb[217].mxu0 }
 0xd4d   :  { %v7841_v15 = vadd.f32 %v7785_v10, %v17690_v0  ;;  %v7784_v37 = vmul.f32 0.044715, %v7728_v22  ;;  %v17721_v45 = vadd.f32 %v17581_v60, %v7512_v55  ;;  %v11355_v11 = vpop.f32.mrb[218].mxu0 }
 0xd4e   :  { %v12381_v5 = vpop.eup %12380  ;;  %v7839_v26 = vadd.f32 %v7783_v24, %v17694_v53  ;;  %v7842_v61 = vadd.f32 %v7786_v29, %v17697_v63  ;;  %v7677_v18 = vmul.f32 %v17717_v46, %v17717_v46  ;;  %v17728_v30 = vadd.f32 %v11355_v11, %v17581_v60  ;;  %v7515_v17 = vpop.f32.mrb[219].mxu0 }
 0xd4f   :  { %v12383_v59 = vpop.eup %12382  ;;  %v8005_v14 = vadd.f32 1.0, %v12381_v5  ;;  %v7897_v49 = vmul.f32 0.7978846, %v7841_v15  ;;  %v7840_v47 = vadd.f32 %v7784_v37, %v17702_v28  ;;  %v7675_v50 = vmul.f32 %v17721_v45, %v17721_v45 }
 0xd50   :  { %v12385_v7 = vpop.eup %12384  ;;  %v8003_v40 = vadd.f32 1.0, %v12383_v59  ;;  %v7895_v41 = vmul.f32 0.7978846, %v7839_v26  ;;  %v7898_v42 = vmul.f32 0.7978846, %v7842_v61  ;;  %v7733_v51 = vmul.f32 %v7677_v18, %v17717_v46 }
 0xd51   :  { %v12387_v20 = vpop.eup %12386  ;;  %v8061_v36 = vmul.f32 0.5, %v8005_v14  ;;  %v8006_v33 = vadd.f32 1.0, %v12385_v7  ;;  %12388 = vtanh.f32 %v7897_v49  ;;  %v7896_v48 = vmul.f32 0.7978846, %v7840_v47 }
 0xd52   :  { %v8059_v27 = vmul.f32 0.5, %v8003_v40  ;;  %v8004_v57 = vadd.f32 1.0, %v12387_v20  ;;  %12390 = vtanh.f32 %v7895_v41  ;;  %v7789_v58 = vmul.f32 0.044715, %v7733_v51 }
 0xd53   :  { %v17735_v16 = vmul.f32 %v8061_v36, %v17657_v35  ;;  %12392 = vtanh.f32 %v7898_v42  ;;  %v7731_v23 = vmul.f32 %v7675_v50, %v17721_v45  ;;  %v11358_v56 = vpop.f32.mrb[220].mxu0  ;;  %v8062_v4 = vmul.f32 0.5, %v8006_v33 }
 0xd54   :  { %v8060_v12 = vmul.f32 0.5, %v8004_v57  ;;  %12394 = vtanh.f32 %v7896_v48  ;;  %v7845_v1 = vadd.f32 %v7789_v58, %v17717_v46  ;;  %v7528_v31 = vpop.f32.mrb[221].mxu0  ;;  %v8115_v43 = vmul.f32 %v8059_v27, %v17660_v38 }
 0xd55   :  { %v7787_v8 = vmul.f32 0.044715, %v7731_v23  ;;  %v7678_v25 = vmul.f32 %v17728_v30, %v17728_v30  ;;  %v17743_v2 = vadd.f32 %v17581_v60, %v7515_v17  ;;  %v11359_v35 = vpop.f32.mrb[222].mxu0  ;;  %v17747_v34 = vadd.f32 %v11358_v56, %v17581_v60 }
 0xd56   :  { %v8116_v9 = vmul.f32 %v8060_v12, %v17671_v62  ;;  %v7901_v13 = vmul.f32 0.7978846, %v7845_v1  ;;  %v17750_v19 = vadd.f32 %v17581_v60, %v7528_v31  ;;  %v7531_v39 = vpop.f32.mrb[223].mxu0  ;;  %v17757_v44 = vadd.f32 %v11359_v35, %v17581_v60 }
 0xd57   :  { %v7843_v38 = vadd.f32 %v7787_v8, %v17721_v45  ;;  %v7734_v21 = vmul.f32 %v7678_v25, %v17728_v30  ;;  %v7676_v54 = vmul.f32 %v17743_v2, %v17743_v2  ;;  %v7681_v62 = vmul.f32 %v17747_v34, %v17747_v34 }
 0xd58   :  { %12396 = vtanh.f32 %v7901_v13  ;;  %v7679_v10 = vmul.f32 %v17750_v19, %v17750_v19  ;;  %v17764_v22 = vadd.f32 %v17581_v60, %v7531_v39  ;;  %v7682_v55 = vmul.f32 %v17757_v44, %v17757_v44 }
 0xd59   :  { %v7899_v32 = vmul.f32 0.7978846, %v7843_v38  ;;  %v7790_v24 = vmul.f32 0.044715, %v7734_v21  ;;  %v7732_v29 = vmul.f32 %v7676_v54, %v17743_v2  ;;  %v7737_v15 = vmul.f32 %v7681_v62, %v17747_v34 }
 0xd5a   :  { %v7735_v37 = vmul.f32 %v7679_v10, %v17750_v19  ;;  %v7680_v11 = vmul.f32 %v17764_v22, %v17764_v22  ;;  %v8165_v5 = vpack.c.bf16 %v8116_v9, %v8115_v43  ;;  %v7738_v17 = vmul.f32 %v7682_v55, %v17757_v44 }
 0xd5b   :  { %v12389_v26 = vpop.eup %12388  ;;  %12398 = vtanh.f32 %v7899_v32  ;;  %v7846_v61 = vadd.f32 %v7790_v24, %v17728_v30  ;;  %v7788_v18 = vmul.f32 0.044715, %v7732_v29  ;;  %v11362_v59 = vpop.f32.mrb[224].mxu0  ;;  %v7793_v47 = vmul.f32 0.044715, %v7737_v15 }
 0xd5c   :  { %v12391_v14 = vpop.eup %12390  ;;  %v8009_v49 = vadd.f32 1.0, %v12389_v26  ;;  %v7791_v50 = vmul.f32 0.044715, %v7735_v37  ;;  %v7736_v7 = vmul.f32 %v7680_v11, %v17764_v22  ;;  %11406 = vmatprep.mubr.msk.bf16.mxu1 %vm8206_vm7, %v8165_v5  ;;  %v7544_v40 = vpop.f32.mrb[225].mxu0  ;;  %v7794_v36 = vmul.f32 0.044715, %v7738_v17 }
 0xd5d   :  { %v12393_v41 = vpop.eup %12392  ;;  %v8007_v42 = vadd.f32 1.0, %v12391_v14  ;;  %v7902_v51 = vmul.f32 0.7978846, %v7846_v61  ;;  %v7844_v20 = vadd.f32 %v7788_v18, %v17743_v2  ;;  %v11363_v33 = vpop.f32.mrb[226].mxu0  ;;  %v7849_v58 = vadd.f32 %v7793_v47, %v17747_v34 }
 0xd5e   :  { %v12395_v48 = vpop.eup %12394  ;;  %v8065_v27 = vmul.f32 0.5, %v8009_v49  ;;  %v8010_v57 = vadd.f32 1.0, %v12393_v41  ;;  %v7847_v23 = vadd.f32 %v7791_v50, %v17750_v19  ;;  %v7547_v56 = vpop.f32.mrb[227].mxu0  ;;  %v8118_v43 = vmul.f32 %v8062_v4, %v17665_v52 }
 0xd5f   :  { %v8063_v12 = vmul.f32 0.5, %v8007_v42  ;;  %v8008_v1 = vadd.f32 1.0, %v12395_v48  ;;  %12400 = vtanh.f32 %v7902_v51  ;;  %v7900_v31 = vmul.f32 0.7978846, %v7844_v20 }
 0xd60   :  { %v8066_v8 = vmul.f32 0.5, %v8010_v57  ;;  %v7905_v25 = vmul.f32 0.7978846, %v7849_v58  ;;  %v7903_v35 = vmul.f32 0.7978846, %v7847_v23  ;;  %v17782_v9 = vmul.f32 %v8065_v27, %v17690_v0 }
 0xd61   :  { %v17785_v13 = vmul.f32 %v8063_v12, %v17694_v53  ;;  %12402 = vtanh.f32 %v7900_v31  ;;  %v7850_v39 = vadd.f32 %v7794_v36, %v17757_v44  ;;  %v8064_v21 = vmul.f32 0.5, %v8008_v1 }
 0xd62   :  { %v12397_v38 = vpop.eup %12396  ;;  %12404 = vtanh.f32 %v7905_v25  ;;  %v7792_v54 = vmul.f32 0.044715, %v7736_v7  ;;  %v17789_v62 = vadd.f32 %v11362_v59, %v17581_v60  ;;  %v17792_v52 = vmul.f32 %v8066_v8, %v17697_v63 }
 0xd63   :  { %v8013_v4 = vadd.f32 1.0, %v12397_v38  ;;  %12406 = vtanh.f32 %v7903_v35  ;;  %v7906_v0 = vmul.f32 0.7978846, %v7850_v39  ;;  %v11366_v10 = vpop.f32.mrb[228].mxu0  ;;  %v8166_v24 = vpack.c.bf16 %v8118_v43, %v17735_v16 }
 0xd64   :  { %v7848_v53 = vadd.f32 %v7792_v54, %v17764_v22  ;;  %v7685_v32 = vmul.f32 %v17789_v62, %v17789_v62  ;;  %v17799_v29 = vadd.f32 %v17581_v60, %v7544_v40  ;;  %v7560_v55 = vpop.f32.mrb[229].mxu0  ;;  %v17802_v63 = vadd.f32 %v11363_v33, %v17581_v60 }
 0xd65   :  { %v12399_v15 = vpop.eup %12398  ;;  %v8069_v37 = vmul.f32 0.5, %v8013_v4  ;;  %12408 = vtanh.f32 %v7906_v0  ;;  %v17805_v11 = vadd.f32 %v17581_v60, %v7547_v56  ;;  %v11367_v5 = vpop.f32.mrb[230].mxu0  ;;  %11407 = vmatmul.mubr.msk.bf16.gmra.mrb[176].mxu1 %vm8206_vm7, %v8166_v24  ;;  %v17812_v59 = vmul.f32 %v8064_v21, %v17702_v28 }
 0xd66   :  { %v8011_v26 = vadd.f32 1.0, %v12399_v15  ;;  %v7904_v61 = vmul.f32 0.7978846, %v7848_v53  ;;  %v7741_v18 = vmul.f32 %v7685_v32, %v17789_v62  ;;  %v7683_v16 = vmul.f32 %v17799_v29, %v17799_v29  ;;  %v7563_v17 = vpop.f32.mrb[231].mxu0 }
 0xd67   :  { %v7686_v14 = vmul.f32 %v17802_v63, %v17802_v63  ;;  %v7684_v49 = vmul.f32 %v17805_v11, %v17805_v11  ;;  %v17819_v47 = vadd.f32 %v11366_v10, %v17581_v60  ;;  %v17822_v50 = vmul.f32 %v8069_v37, %v17717_v46 }
 0xd68   :  { %12410 = vtanh.f32 %v7904_v61  ;;  %v7797_v7 = vmul.f32 0.044715, %v7741_v18  ;;  %v7739_v40 = vmul.f32 %v7683_v16, %v17799_v29  ;;  %v17830_v20 = vadd.f32 %v17581_v60, %v7560_v55 }
 0xd69   :  { %v12401_v41 = vpop.eup %12400  ;;  %v7742_v28 = vmul.f32 %v7686_v14, %v17802_v63  ;;  %v7740_v42 = vmul.f32 %v7684_v49, %v17805_v11  ;;  %v7689_v51 = vmul.f32 %v17819_v47, %v17819_v47  ;;  %v8067_v36 = vmul.f32 0.5, %v8011_v26 }
 0xd6a   :  { %v8014_v33 = vadd.f32 1.0, %v12401_v41  ;;  %v7853_v46 = vadd.f32 %v7797_v7, %v17789_v62  ;;  %v7795_v48 = vmul.f32 0.044715, %v7739_v40  ;;  %v7687_v56 = vmul.f32 %v17830_v20, %v17830_v20 }
 0xd6b   :  { %v12403_v27 = vpop.eup %12402  ;;  %v7798_v57 = vmul.f32 0.044715, %v7742_v28  ;;  %v7796_v58 = vmul.f32 0.044715, %v7740_v42  ;;  %v7745_v23 = vmul.f32 %v7689_v51, %v17819_v47  ;;  %v8123_v54 = vmul.f32 %v8067_v36, %v17721_v45 }
 0xd6c   :  { %v12405_v12 = vpop.eup %12404  ;;  %v8070_v1 = vmul.f32 0.5, %v8014_v33  ;;  %v8012_v31 = vadd.f32 1.0, %v12403_v27  ;;  %v7909_v43 = vmul.f32 0.7978846, %v7853_v46  ;;  %v7851_v8 = vadd.f32 %v7795_v48, %v17799_v29 }
 0xd6d   :  { %v12407_v25 = vpop.eup %12406  ;;  %v8017_v35 = vadd.f32 1.0, %v12405_v12  ;;  %v7854_v39 = vadd.f32 %v7798_v57, %v17802_v63  ;;  %v7852_v38 = vadd.f32 %v7796_v58, %v17805_v11  ;;  %v7801_v21 = vmul.f32 0.044715, %v7745_v23 }
 0xd6e   :  { %v8068_v4 = vmul.f32 0.5, %v8012_v31  ;;  %v8015_v0 = vadd.f32 1.0, %v12407_v25  ;;  %12412 = vtanh.f32 %v7909_v43  ;;  %v7907_v32 = vmul.f32 0.7978846, %v7851_v8 }
 0xd6f   :  { %v12409_v10 = vpop.eup %12408  ;;  %v8073_v53 = vmul.f32 0.5, %v8017_v35  ;;  %v7910_v24 = vmul.f32 0.7978846, %v7854_v39  ;;  %v7857_v55 = vadd.f32 %v7801_v21, %v17819_v47  ;;  %v8126_v15 = vmul.f32 %v8070_v1, %v17728_v30 }
 0xd70   :  { %v8071_v37 = vmul.f32 0.5, %v8015_v0  ;;  %v8018_v26 = vadd.f32 1.0, %v12409_v10  ;;  %v7908_v61 = vmul.f32 0.7978846, %v7852_v38  ;;  %v8124_v18 = vmul.f32 %v8068_v4, %v17743_v2 }
 0xd71   :  { %v17844_v16 = vmul.f32 %v8073_v53, %v17747_v34  ;;  %12414 = vtanh.f32 %v7907_v32  ;;  %v7743_v45 = vmul.f32 %v7687_v56, %v17830_v20  ;;  %v7913_v7 = vmul.f32 0.7978846, %v7857_v55 }
 0xd72   :  { %v12411_v14 = vpop.eup %12410  ;;  %v8074_v49 = vmul.f32 0.5, %v8018_v26  ;;  %12416 = vtanh.f32 %v7910_v24  ;;  %v17848_v40 = vadd.f32 %v11367_v5, %v17581_v60  ;;  %v17851_v28 = vadd.f32 %v17581_v60, %v7563_v17 }
 0xd73   :  { %v8016_v41 = vadd.f32 1.0, %v12411_v14  ;;  %12418 = vtanh.f32 %v7908_v61  ;;  %v7799_v30 = vmul.f32 0.044715, %v7743_v45  ;;  %v8127_v2 = vmul.f32 %v8071_v37, %v17750_v19  ;;  %v11682_v19 = vld [vmem:[%s18525_s1 + $0x38] sm:$0x1f]  }
 0xd74   :  { %v17855_v34 = vmul.f32 %v8074_v49, %v17757_v44  ;;  %v7690_v42 = vmul.f32 %v17848_v40, %v17848_v40  ;;  %v8167_v51 = vpack.c.bf16 %v17812_v59, %v17785_v13  ;;  %v7688_v33 = vmul.f32 %v17851_v28, %v17851_v28  ;;  %11635 = vmatprep.subr.msk.bf16.mxu0 %vm347_vm1, %v11682_v19 }
 0xd75   :  { %v8072_v36 = vmul.f32 0.5, %v8016_v41  ;;  %v7855_v5 = vadd.f32 %v7799_v30, %v17830_v20  ;;  %v8168_v17 = vpack.c.bf16 %v17792_v52, %v17782_v9  ;;  %v8169_v46 = vpack.c.bf16 %v8124_v18, %v8123_v54 }
 0xd76   :  { %v7746_v44 = vmul.f32 %v7690_v42, %v17848_v40  ;;  %11410 = vmatprep.mubr.msk.bf16.mxu1 %vm8206_vm7, %v8167_v51  ;;  %v8170_v13 = vpack.c.bf16 %v8126_v15, %v17822_v50  ;;  %v8172_v59 = vpack.c.bf16 %v17855_v34, %v17844_v16  ;;  %v7744_v57 = vmul.f32 %v7688_v33, %v17851_v28 }
 0xd77   :  { %v8128_v48 = vmul.f32 %v8072_v36, %v17764_v22  ;;  %v7911_v27 = vmul.f32 0.7978846, %v7855_v5  ;;  %11411 = vmatmul.mubr.msk.bf16.gmra.mrb[180].mxu1 %vm8206_vm7, %v8168_v17  ;;  %v8729_v9 = vsel %vm347_vm1, %v11682_v19, 0  ;;  %12420 = vtanh.f32 %v7913_v7 }
 0xd78   :  { %v12413_v52 = vpop.eup %12412  ;;  %v7802_v58 = vmul.f32 0.044715, %v7746_v44  ;;  %11414 = vmatprep.mubr.msk.bf16.mxu1 %vm8206_vm7, %v8169_v46  ;;  %11451 = vmatpush3.bf16.msra.mxu0 %v8729_v9  ;;  %v7800_v23 = vmul.f32 0.044715, %v7744_v57 }
 0xd79   :  { %v8021_v50 = vadd.f32 1.0, %v12413_v52  ;;  %12422 = vtanh.f32 %v7911_v27  ;;  %v8171_v56 = vpack.c.bf16 %v8128_v48, %v8127_v2 }
 0xd7a   :  { %v7858_v22 = vadd.f32 %v7802_v58, %v17848_v40  ;;  %v7856_v1 = vadd.f32 %v7800_v23, %v17851_v28 }
 0xd7b   :  { %v12415_v12 = vpop.eup %12414  ;;  %v8077_v35 = vmul.f32 0.5, %v8021_v50 }
 0xd7c   :  { %v12417_v31 = vpop.eup %12416  ;;  %v8019_v43 = vadd.f32 1.0, %v12415_v12  ;;  %v7914_v8 = vmul.f32 0.7978846, %v7858_v22  ;;  %v7912_v38 = vmul.f32 0.7978846, %v7856_v1 }
 0xd7d   :  { %v12419_v25 = vpop.eup %12418  ;;  %v8022_v39 = vadd.f32 1.0, %v12417_v31  ;;  %v8133_v24 = vmul.f32 %v8077_v35, %v17789_v62 }
 0xd7e   :  { %v8075_v21 = vmul.f32 0.5, %v8019_v43  ;;  %v8020_v54 = vadd.f32 1.0, %v12419_v25  ;;  %12424 = vtanh.f32 %v7914_v8 }
 0xd7f   :  { %v8078_v4 = vmul.f32 0.5, %v8022_v39  ;;  %12426 = vtanh.f32 %v7912_v38  ;;  %11415 = vmatmul.mubr.msk.bf16.gmra.mrb[184].mxu1 %vm8206_vm7, %v8170_v13  ;;  %v11370_v0 = vpop.f32.mrb[232].mxu0 }
 0xd80   :  { %v8076_v10 = vmul.f32 0.5, %v8020_v54  ;;  %11418 = vmatprep.mubr.msk.bf16.mxu1 %vm8206_vm7, %v8171_v56  ;;  %v17885_v53 = vadd.f32 %v11370_v0, %v17581_v60  ;;  %v7576_v32 = vpop.f32.mrb[233].mxu0  ;;  %v8131_v61 = vmul.f32 %v8075_v21, %v17799_v29 }
 0xd81   :  { %v8134_v55 = vmul.f32 %v8078_v4, %v17802_v63  ;;  %v17890_v15 = vadd.f32 %v17581_v60, %v7576_v32  ;;  %v11371_v37 = vpop.f32.mrb[234].mxu0  ;;  %v12421_v26 = vpop.eup %12420 }
 0xd82   :  { %v8132_v18 = vmul.f32 %v8076_v10, %v17805_v11  ;;  %v7693_v16 = vmul.f32 %v17885_v53, %v17885_v53  ;;  %v17897_v45 = vadd.f32 %v11371_v37, %v17581_v60  ;;  %v7579_v14 = vpop.f32.mrb[235].mxu0  ;;  %v8025_v11 = vadd.f32 1.0, %v12421_v26 }
 0xd83   :  { %v12423_v49 = vpop.eup %12422  ;;  %v8174_v62 = vpack.c.bf16 %v8134_v55, %v8133_v24  ;;  %v7691_v63 = vmul.f32 %v17890_v15, %v17890_v15  ;;  %v7580_v7 = vadd.f32 %v17581_v60, %v7579_v14  ;;  %v17925_v14 = vld [vmem:[%s18526_s2 + $0x73] ss:$0 sm:$0xff] }
 0xd84   :  { %v8173_v41 = vpack.c.bf16 %v8132_v18, %v8131_v61  ;;  %v7749_v30 = vmul.f32 %v7693_v16, %v17885_v53  ;;  %v7694_v29 = vmul.f32 %v17897_v45, %v17897_v45  ;;  %v8023_v42 = vadd.f32 1.0, %v12423_v49 }
 0xd85   :  { %v7747_v2 = vmul.f32 %v7691_v63, %v17890_v15  ;;  %v7692_v34 = vmul.f32 %v7580_v7, %v7580_v7  ;;  %v8081_v46 = vmul.f32 0.5, %v8025_v11 }
 0xd86   :  { %v7805_v51 = vmul.f32 0.044715, %v7749_v30  ;;  %v7750_v36 = vmul.f32 %v7694_v29, %v17897_v45  ;;  %v8079_v57 = vmul.f32 0.5, %v8023_v42 }
 0xd87   :  { %11419 = vmatmul.mubr.msk.bf16.gmra.mrb[188].mxu1 %vm8206_vm7, %v8172_v59  ;;  %v7803_v5 = vmul.f32 0.044715, %v7747_v2  ;;  %v7748_v33 = vmul.f32 %v7692_v34, %v7580_v7  ;;  %v8137_v12 = vmul.f32 %v8081_v46, %v17819_v47 }
 0xd88   :  { %v12425_v17 = vpop.eup %12424  ;;  %11422 = vmatprep.mubr.msk.bf16.mxu1 %vm8206_vm7, %v8173_v41  ;;  %v7861_v60 = vadd.f32 %v7805_v51, %v17885_v53  ;;  %v7806_v19 = vmul.f32 0.044715, %v7750_v36  ;;  %v8135_v43 = vmul.f32 %v8079_v57, %v17830_v20 }
 0xd89   :  { %v12427_v44 = vpop.eup %12426  ;;  %v8026_v13 = vadd.f32 1.0, %v12425_v17  ;;  %v7859_v48 = vadd.f32 %v7803_v5, %v17890_v15  ;;  %v7804_v27 = vmul.f32 0.044715, %v7748_v33 }
 0xd8a   :  { %v8024_v9 = vadd.f32 1.0, %v12427_v44  ;;  %v7917_v52 = vmul.f32 0.7978846, %v7861_v60  ;;  %v7862_v58 = vadd.f32 %v7806_v19, %v17897_v45 }
 0xd8b   :  { %v8082_v59 = vmul.f32 0.5, %v8026_v13  ;;  %v7915_v50 = vmul.f32 0.7978846, %v7859_v48  ;;  %v7860_v23 = vadd.f32 %v7804_v27, %v7580_v7 }
 0xd8c   :  { %v8080_v56 = vmul.f32 0.5, %v8024_v9  ;;  %12428 = vtanh.f32 %v7917_v52  ;;  %v7918_v22 = vmul.f32 0.7978846, %v7862_v58 }
 0xd8d   :  { %v8138_v1 = vmul.f32 %v8082_v59, %v17848_v40  ;;  %12430 = vtanh.f32 %v7915_v50  ;;  %v7916_v31 = vmul.f32 0.7978846, %v7860_v23 }
 0xd8e   :  { %v8136_v8 = vmul.f32 %v8080_v56, %v17851_v28  ;;  %12432 = vtanh.f32 %v7918_v22 }
 0xd8f   :  { %11423 = vmatmul.mubr.msk.bf16.gmra.mrb[192].mxu1 %vm8206_vm7, %v8174_v62  ;;  %12434 = vtanh.f32 %v7916_v31  ;;  %v8176_v25 = vpack.c.bf16 %v8138_v1, %v8137_v12 }
 0xd90   :  { %v8175_v35 = vpack.c.bf16 %v8136_v8, %v8135_v43 }
 0xd92   :  { %11426 = vmatprep.mubr.msk.bf16.mxu1 %vm8206_vm7, %v8175_v35 }
 0xd96   :  { %v12429_v39 = vpop.eup %12428 }
 0xd97   :  { %v12431_v38 = vpop.eup %12430  ;;  %v8029_v21 = vadd.f32 1.0, %v12429_v39  ;;  %11427 = vmatmul.mubr.msk.bf16.gmra.mrb[196].mxu1 %vm8206_vm7, %v8176_v25 }
 0xd98   :  { %v12433_v47 = vpop.eup %12432  ;;  %v8027_v40 = vadd.f32 1.0, %v12431_v38 }
 0xd99   :  { %v12435_v54 = vpop.eup %12434  ;;  %v8085_v4 = vmul.f32 0.5, %v8029_v21  ;;  %v8030_v20 = vadd.f32 1.0, %v12433_v47 }
 0xd9a   :  { %v8083_v0 = vmul.f32 0.5, %v8027_v40  ;;  %v8028_v28 = vadd.f32 1.0, %v12435_v54 }
 0xd9b   :  { %v8086_v10 = vmul.f32 0.5, %v8030_v20  ;;  %v8141_v24 = vmul.f32 %v8085_v4, %v17885_v53 }
 0xd9c   :  { %v8084_v32 = vmul.f32 0.5, %v8028_v28  ;;  %v8139_v37 = vmul.f32 %v8083_v0, %v17890_v15 }
 0xd9d   :  { %v8142_v55 = vmul.f32 %v8086_v10, %v17897_v45 }
 0xd9e   :  { %v8140_v26 = vmul.f32 %v8084_v32, %v7580_v7 }
 0xd9f   :  { %v8178_v61 = vpack.c.bf16 %v8142_v55, %v8141_v24 }
 0xda0   :  { %v11374_v18 = vpop.f32.mrb[236].mxu0  ;;  %v8177_v16 = vpack.c.bf16 %v8140_v26, %v8139_v37 }
 0xda1   :  { %v17928_v49 = vadd.f32 %v17925_v14, %v11374_v18  ;;  %v7592_v62 = vpop.f32.mrb[237].mxu0 }
 0xda2   :  { %v17931_v63 = vadd.f32 %v17925_v14, %v7592_v62  ;;  %v11375_v53 = vpop.f32.mrb[238].mxu0  ;;  %11430 = vmatprep.mubr.msk.bf16.mxu1 %vm8206_vm7, %v8177_v16 }
 0xda3   :  { %v7697_v15 = vmul.f32 %v17928_v49, %v17928_v49  ;;  %v17937_v45 = vadd.f32 %v17925_v14, %v11375_v53  ;;  %v7595_v7 = vpop.f32.mrb[239].mxu0  ;;  %11431 = vmatmul.mubr.msk.bf16.gmra.mrb[200].mxu1 %vm8206_vm7, %v8178_v61 }
 0xda4   :  { %v7695_v41 = vmul.f32 %v17931_v63, %v17931_v63  ;;  %v17943_v30 = vadd.f32 %v17925_v14, %v7595_v7 }
 0xda5   :  { %v7753_v29 = vmul.f32 %v7697_v15, %v17928_v49  ;;  %v7698_v11 = vmul.f32 %v17937_v45, %v17937_v45 }
 0xda6   :  { %v7751_v2 = vmul.f32 %v7695_v41, %v17931_v63  ;;  %v7696_v34 = vmul.f32 %v17943_v30, %v17943_v30 }
 0xda7   :  { %v7809_v42 = vmul.f32 0.044715, %v7753_v29  ;;  %v7754_v51 = vmul.f32 %v7698_v11, %v17937_v45 }
 0xda8   :  { %v7807_v36 = vmul.f32 0.044715, %v7751_v2  ;;  %v7752_v5 = vmul.f32 %v7696_v34, %v17943_v30 }
 0xda9   :  { %v7865_v33 = vadd.f32 %v7809_v42, %v17928_v49  ;;  %v7810_v17 = vmul.f32 0.044715, %v7754_v51 }
 0xdaa   :  { %v7863_v60 = vadd.f32 %v7807_v36, %v17931_v63  ;;  %v7808_v19 = vmul.f32 0.044715, %v7752_v5 }
 0xdab   :  { %v7921_v44 = vmul.f32 0.7978846, %v7865_v33  ;;  %v7866_v46 = vadd.f32 %v7810_v17, %v17937_v45 }
 0xdac   :  { %v7919_v13 = vmul.f32 0.7978846, %v7863_v60  ;;  %v7864_v48 = vadd.f32 %v7808_v19, %v17943_v30 }
 0xdad   :  { %12436 = vtanh.f32 %v7921_v44  ;;  %v7922_v27 = vmul.f32 0.7978846, %v7866_v46 }
 0xdae   :  { %12438 = vtanh.f32 %v7919_v13  ;;  %v7920_v57 = vmul.f32 0.7978846, %v7864_v48 }
 0xdaf   :  { %12440 = vtanh.f32 %v7922_v27 }
 0xdb0   :  { %12442 = vtanh.f32 %v7920_v57  ;;  %v11378_v9 = vpop.f32.mrb[240].mxu0 }
 0xdb1   :  { %v17958_v52 = vadd.f32 %v17925_v14, %v11378_v9  ;;  %v7608_v58 = vpop.f32.mrb[241].mxu0 }
 0xdb2   :  { %v17961_v59 = vadd.f32 %v17925_v14, %v7608_v58  ;;  %v11379_v50 = vpop.f32.mrb[242].mxu0 }
 0xdb3   :  { %v7701_v23 = vmul.f32 %v17958_v52, %v17958_v52  ;;  %v17966_v56 = vadd.f32 %v17925_v14, %v11379_v50  ;;  %v7611_v22 = vpop.f32.mrb[243].mxu0 }
 0xdb4   :  { %v7699_v12 = vmul.f32 %v17961_v59, %v17961_v59  ;;  %v17971_v1 = vadd.f32 %v17925_v14, %v7611_v22 }
 0xdb5   :  { %v7757_v31 = vmul.f32 %v7701_v23, %v17958_v52  ;;  %v7702_v43 = vmul.f32 %v17966_v56, %v17966_v56 }
 0xdb6   :  { %v7755_v8 = vmul.f32 %v7699_v12, %v17961_v59  ;;  %v7700_v25 = vmul.f32 %v17971_v1, %v17971_v1 }
 0xdb7   :  { %v12437_v35 = vpop.eup %12436  ;;  %v7813_v39 = vmul.f32 0.044715, %v7757_v31  ;;  %v7758_v38 = vmul.f32 %v7702_v43, %v17966_v56 }
 0xdb8   :  { %v12439_v21 = vpop.eup %12438  ;;  %v8033_v47 = vadd.f32 1.0, %v12437_v35  ;;  %v7811_v40 = vmul.f32 0.044715, %v7755_v8  ;;  %v7756_v54 = vmul.f32 %v7700_v25, %v17971_v1 }
 0xdb9   :  { %v12441_v4 = vpop.eup %12440  ;;  %v8031_v20 = vadd.f32 1.0, %v12439_v21  ;;  %v7869_v0 = vadd.f32 %v7813_v39, %v17958_v52  ;;  %v7814_v28 = vmul.f32 0.044715, %v7758_v38 }
 0xdba   :  { %v12443_v10 = vpop.eup %12442  ;;  %v8089_v32 = vmul.f32 0.5, %v8033_v47  ;;  %v8034_v24 = vadd.f32 1.0, %v12441_v4  ;;  %v7867_v55 = vadd.f32 %v7811_v40, %v17961_v59  ;;  %v7812_v37 = vmul.f32 0.044715, %v7756_v54 }
 0xdbb   :  { %v8087_v26 = vmul.f32 0.5, %v8031_v20  ;;  %v8032_v61 = vadd.f32 1.0, %v12443_v10  ;;  %v7925_v18 = vmul.f32 0.7978846, %v7869_v0  ;;  %v7870_v16 = vadd.f32 %v7814_v28, %v17966_v56 }
 0xdbc   :  { %v8090_v62 = vmul.f32 0.5, %v8034_v24  ;;  %v7923_v53 = vmul.f32 0.7978846, %v7867_v55  ;;  %v7868_v15 = vadd.f32 %v7812_v37, %v17971_v1  ;;  %v8145_v29 = vmul.f32 %v8089_v32, %v17928_v49 }
 0xdbd   :  { %v8088_v7 = vmul.f32 0.5, %v8032_v61  ;;  %12444 = vtanh.f32 %v7925_v18  ;;  %v7926_v41 = vmul.f32 0.7978846, %v7870_v16  ;;  %v8143_v34 = vmul.f32 %v8087_v26, %v17931_v63 }
 0xdbe   :  { %v8146_v11 = vmul.f32 %v8090_v62, %v17937_v45  ;;  %12446 = vtanh.f32 %v7923_v53  ;;  %v7924_v2 = vmul.f32 0.7978846, %v7868_v15 }
 0xdbf   :  { %v8144_v42 = vmul.f32 %v8088_v7, %v17943_v30  ;;  %12448 = vtanh.f32 %v7926_v41 }
 0xdc0   :  { %12450 = vtanh.f32 %v7924_v2  ;;  %v11382_v51 = vpop.f32.mrb[244].mxu0  ;;  %v8180_v36 = vpack.c.bf16 %v8146_v11, %v8145_v29 }
 0xdc1   :  { %v17990_v5 = vadd.f32 %v17925_v14, %v11382_v51  ;;  %v7624_v33 = vpop.f32.mrb[245].mxu0  ;;  %v8179_v17 = vpack.c.bf16 %v8144_v42, %v8143_v34 }
 0xdc2   :  { %v17993_v60 = vadd.f32 %v17925_v14, %v7624_v33  ;;  %v11383_v49 = vpop.f32.mrb[246].mxu0 }
 0xdc3   :  { %v7705_v45 = vmul.f32 %v17990_v5, %v17990_v5  ;;  %v17998_v63 = vadd.f32 %v17925_v14, %v11383_v49  ;;  %v7627_v30 = vpop.f32.mrb[247].mxu0  ;;  %11434 = vmatprep.mubr.msk.bf16.mxu1 %vm8206_vm7, %v8179_v17 }
 0xdc4   :  { %v7703_v19 = vmul.f32 %v17993_v60, %v17993_v60  ;;  %v18004_v44 = vadd.f32 %v17925_v14, %v7627_v30  ;;  %11435 = vmatmul.mubr.msk.bf16.gmra.mrb[204].mxu1 %vm8206_vm7, %v8180_v36 }
 0xdc5   :  { %v7761_v46 = vmul.f32 %v7705_v45, %v17990_v5  ;;  %v7706_v13 = vmul.f32 %v17998_v63, %v17998_v63 }
 0xdc6   :  { %v7759_v48 = vmul.f32 %v7703_v19, %v17993_v60  ;;  %v7704_v27 = vmul.f32 %v18004_v44, %v18004_v44 }
 0xdc7   :  { %v12445_v57 = vpop.eup %12444  ;;  %v7817_v9 = vmul.f32 0.044715, %v7761_v46  ;;  %v7762_v58 = vmul.f32 %v7706_v13, %v17998_v63 }
 0xdc8   :  { %v12447_v50 = vpop.eup %12446  ;;  %v8037_v23 = vadd.f32 1.0, %v12445_v57  ;;  %v7815_v22 = vmul.f32 0.044715, %v7759_v48  ;;  %v7760_v12 = vmul.f32 %v7704_v27, %v18004_v44 }
 0xdc9   :  { %v12449_v31 = vpop.eup %12448  ;;  %v8035_v43 = vadd.f32 1.0, %v12447_v50  ;;  %v7873_v8 = vadd.f32 %v7817_v9, %v17990_v5  ;;  %v7818_v25 = vmul.f32 0.044715, %v7762_v58 }
 0xdca   :  { %v12451_v35 = vpop.eup %12450  ;;  %v8093_v39 = vmul.f32 0.5, %v8037_v23  ;;  %v8038_v38 = vadd.f32 1.0, %v12449_v31  ;;  %v7871_v21 = vadd.f32 %v7815_v22, %v17993_v60  ;;  %v7816_v47 = vmul.f32 0.044715, %v7760_v12 }
 0xdcb   :  { %v8091_v40 = vmul.f32 0.5, %v8035_v43  ;;  %v8036_v54 = vadd.f32 1.0, %v12451_v35  ;;  %v7929_v4 = vmul.f32 0.7978846, %v7873_v8  ;;  %v7874_v20 = vadd.f32 %v7818_v25, %v17998_v63 }
 0xdcc   :  { %v8094_v0 = vmul.f32 0.5, %v8038_v38  ;;  %v7927_v28 = vmul.f32 0.7978846, %v7871_v21  ;;  %v7872_v10 = vadd.f32 %v7816_v47, %v18004_v44  ;;  %v8149_v55 = vmul.f32 %v8093_v39, %v17958_v52 }
 0xdcd   :  { %v8092_v32 = vmul.f32 0.5, %v8036_v54  ;;  %12452 = vtanh.f32 %v7929_v4  ;;  %v7930_v24 = vmul.f32 0.7978846, %v7874_v20  ;;  %v8147_v61 = vmul.f32 %v8091_v40, %v17961_v59 }
 0xdce   :  { %v8150_v37 = vmul.f32 %v8094_v0, %v17966_v56  ;;  %12454 = vtanh.f32 %v7927_v28  ;;  %v7928_v26 = vmul.f32 0.7978846, %v7872_v10 }
 0xdcf   :  { %v8148_v18 = vmul.f32 %v8092_v32, %v17971_v1  ;;  %12456 = vtanh.f32 %v7930_v24 }
 0xdd0   :  { %12458 = vtanh.f32 %v7928_v26  ;;  %v11386_v16 = vpop.f32.mrb[248].mxu0  ;;  %v8182_v62 = vpack.c.bf16 %v8150_v37, %v8149_v55 }
 0xdd1   :  { %v18024_v53 = vadd.f32 %v17925_v14, %v11386_v16  ;;  %v7640_v15 = vpop.f32.mrb[249].mxu0  ;;  %v8181_v7 = vpack.c.bf16 %v8148_v18, %v8147_v61 }
 0xdd2   :  { %v18027_v41 = vadd.f32 %v17925_v14, %v7640_v15  ;;  %v11387_v52 = vpop.f32.mrb[250].mxu0 }
 0xdd3   :  { %v7709_v56 = vmul.f32 %v18024_v53, %v18024_v53  ;;  %v18032_v59 = vadd.f32 %v17925_v14, %v11387_v52  ;;  %v7643_v1 = vpop.f32.mrb[251].mxu0  ;;  %11438 = vmatprep.mubr.msk.bf16.mxu1 %vm8206_vm7, %v8181_v7 }
 0xdd4   :  { %v7707_v29 = vmul.f32 %v18027_v41, %v18027_v41  ;;  %v18038_v11 = vadd.f32 %v17925_v14, %v7643_v1  ;;  %11439 = vmatmul.mubr.msk.bf16.gmra.mrb[208].mxu1 %vm8206_vm7, %v8182_v62 }
 0xdd5   :  { %v7765_v2 = vmul.f32 %v7709_v56, %v18024_v53  ;;  %v7710_v34 = vmul.f32 %v18032_v59, %v18032_v59 }
 0xdd6   :  { %v7763_v42 = vmul.f32 %v7707_v29, %v18027_v41  ;;  %v7708_v51 = vmul.f32 %v18038_v11, %v18038_v11 }
 0xdd7   :  { %v12453_v36 = vpop.eup %12452  ;;  %v7821_v33 = vmul.f32 0.044715, %v7765_v2  ;;  %v7766_v17 = vmul.f32 %v7710_v34, %v18032_v59 }
 0xdd8   :  { %v12455_v49 = vpop.eup %12454  ;;  %v8041_v45 = vadd.f32 1.0, %v12453_v36  ;;  %v7819_v14 = vmul.f32 0.044715, %v7763_v42  ;;  %v7764_v30 = vmul.f32 %v7708_v51, %v18038_v11 }
 0xdd9   :  { %v12457_v19 = vpop.eup %12456  ;;  %v8039_v46 = vadd.f32 1.0, %v12455_v49  ;;  %v7877_v13 = vadd.f32 %v7821_v33, %v18024_v53  ;;  %v7822_v48 = vmul.f32 0.044715, %v7766_v17  ;;  %v19587_v49 = vld [vmem:[#allocation63_spill] sm:$0xff] }
 0xdda   :  { %v12459_v27 = vpop.eup %12458  ;;  %v8097_v57 = vmul.f32 0.5, %v8041_v45  ;;  %v8042_v9 = vadd.f32 1.0, %v12457_v19  ;;  %v7875_v58 = vadd.f32 %v7819_v14, %v18027_v41  ;;  %v7820_v50 = vmul.f32 0.044715, %v7764_v30  ;;  %v19588_v14 = vld [vmem:[#allocation159_spill] sm:$0xff] }
 0xddb   :  { %v8095_v23 = vmul.f32 0.5, %v8039_v46  ;;  %v8040_v22 = vadd.f32 1.0, %v12459_v27  ;;  %v7933_v12 = vmul.f32 0.7978846, %v7877_v13  ;;  %v7878_v31 = vadd.f32 %v7822_v48, %v18032_v59 }
 0xddc   :  { %v8098_v43 = vmul.f32 0.5, %v8042_v9  ;;  %v7931_v8 = vmul.f32 0.7978846, %v7875_v58  ;;  %v7876_v25 = vadd.f32 %v7820_v50, %v18038_v11  ;;  %v8153_v38 = vmul.f32 %v8097_v57, %v17990_v5  ;;  %v19589_v50 = vld [vmem:[#allocation93_spill] sm:$0xff] }
 0xddd   :  { %v8096_v35 = vmul.f32 0.5, %v8040_v22  ;;  %12460 = vtanh.f32 %v7933_v12  ;;  %v7934_v39 = vmul.f32 0.7978846, %v7878_v31  ;;  %v8151_v40 = vmul.f32 %v8095_v23, %v17993_v60  ;;  %v19590_v22 = vld [vmem:[#allocation100_spill] sm:$0xff]  ;;  %v19591_v31 = vld [vmem:[#allocation154_spill] sm:$0xff] }
 0xdde   :  { %v8154_v21 = vmul.f32 %v8098_v43, %v17998_v63  ;;  %12462 = vtanh.f32 %v7931_v8  ;;  %v7932_v47 = vmul.f32 0.7978846, %v7876_v25  ;;  %v19592_v8 = vld [vmem:[#allocation168_spill] sm:$0xff] }
 0xddf   :  { %v8152_v54 = vmul.f32 %v8096_v35, %v18004_v44  ;;  %12464 = vtanh.f32 %v7934_v39  ;;  %v18062_v44 = vld [vmem:[%s18526_s2 + $0x74] ss:$0 sm:$0xff] }
 0xde0   :  { %12466 = vtanh.f32 %v7932_v47  ;;  %v8184_v4 = vpack.c.bf16 %v8154_v21, %v8153_v38 }
 0xde1   :  { %v8183_v20 = vpack.c.bf16 %v8152_v54, %v8151_v40 }
 0xde3   :  { %11442 = vmatprep.mubr.msk.bf16.mxu1 %vm8206_vm7, %v8183_v20 }
 0xde4   :  { %11443 = vmatmul.mubr.msk.bf16.gmra.mrb[212].mxu1 %vm8206_vm7, %v8184_v4 }
 0xde7   :  { %v12461_v0 = vpop.eup %12460 }
 0xde8   :  { %v12463_v28 = vpop.eup %12462  ;;  %v8045_v10 = vadd.f32 1.0, %v12461_v0 }
 0xde9   :  { %v12465_v5 = vpop.eup %12464  ;;  %v8043_v32 = vadd.f32 1.0, %v12463_v28  ;;  %v19593_v28 = vld [vmem:[#allocation213_spill] sm:$0xff] }
 0xdea   :  { %v12467_v63 = vpop.eup %12466  ;;  %v8101_v24 = vmul.f32 0.5, %v8045_v10  ;;  %v8046_v55 = vadd.f32 1.0, %v12465_v5  ;;  %v19594_v5 = vld [vmem:[#allocation175_spill] sm:$0xff] }
 0xdeb   :  { %v8099_v37 = vmul.f32 0.5, %v8043_v32  ;;  %v8044_v60 = vadd.f32 1.0, %v12467_v63  ;;  %v19595_v63 = vld [vmem:[#allocation94_spill] sm:$0xff] }
 0xdec   :  { %v8102_v26 = vmul.f32 0.5, %v8046_v55  ;;  %v8157_v16 = vmul.f32 %v8101_v24, %v18024_v53  ;;  %v19585_v53 = vld [vmem:[#allocation206_spill] sm:$0xff]  ;;  %v19596_v55 = vld [vmem:[#allocation207_spill] sm:$0xff] }
 0xded   :  { %v8100_v61 = vmul.f32 0.5, %v8044_v60  ;;  %v11396_v18 = vpop.f32.mrb[164].mxu1  ;;  %v8155_v52 = vmul.f32 %v8099_v37, %v18027_v41 }
 0xdee   :  { %v8158_v62 = vmul.f32 %v8102_v26, %v18032_v59  ;;  %v8337_v15 = vadd.f32 %v11396_v18, %v18062_v44  ;;  %v8328_v7 = vpop.f32.mrb[165].mxu1  ;;  %v19586_v59 = vld [vmem:[#allocation164_spill] sm:$0xff] }
 0xdef   :  { %v8156_v56 = vmul.f32 %v8100_v61, %v18038_v11  ;;  %v8329_v1 = vadd.f32 %v18062_v44, %v8328_v7  ;;  %v11397_v29 = vpop.f32.mrb[166].mxu1 }
 0xdf0   :  { %v8340_v2 = vadd.f32 %v11397_v29, %v18062_v44  ;;  %v8331_v34 = vpop.f32.mrb[167].mxu1  ;;  %v8186_v42 = vpack.c.bf16 %v8158_v62, %v8157_v16  ;;  %v8553_v33 = vadd.f32 %v8337_v15, %v19585_v53 }
 0xdf1   :  { %v8332_v51 = vadd.f32 %v18062_v44, %v8331_v34  ;;  %v8185_v36 = vpack.c.bf16 %v8156_v56, %v8155_v52  ;;  %v8551_v45 = vadd.f32 %v8329_v1, %v19587_v49  ;;  %v19597_v1 = vld [vmem:[#allocation208_spill] sm:$0xff] }
 0xdf2   :  { %v8554_v17 = vadd.f32 %v8340_v2, %v19586_v59  ;;  %v19598_v2 = vld [vmem:[#allocation97_spill] sm:$0xff] }
 0xdf3   :  { %v8552_v41 = vadd.f32 %v8332_v51, %v19588_v14  ;;  %11446 = vmatprep.mubr.msk.bf16.mxu1 %vm8206_vm7, %v8185_v36  ;;  %v19600_v36 = vld [vmem:[#allocation166_spill] sm:$0xff] }
 0xdf4   :  { %v8608_v11 = vpack.c.bf16 %v8554_v17, %v8553_v33  ;;  %11447 = vmatmul.mubr.msk.bf16.gmra.mrb[216].mxu1 %vm8206_vm7, %v8186_v42  ;;  %v19599_v42 = vld [vmem:[#allocation211_spill] sm:$0xff] }
 0xdf5   :  { %v8607_v30 = vpack.c.bf16 %v8552_v41, %v8551_v45 }
 0xdf7   :  { %11452 = vmatprep.mubr.msk.bf16.mxu0 %vm1099_vm3, %v8607_v30 }
 0xdf8   :  { %11453 = vmatmul.mubr.msk.bf16.vlgmr.msra.gmra.mrb[252].mxu0 %vm1099_vm3, %v8608_v11 }
 0xe0e   :  { %v11400_v19 = vpop.f32.mrb[168].mxu1 }
 0xe0f   :  { %v8353_v46 = vadd.f32 %v11400_v19, %v18062_v44  ;;  %v8344_v13 = vpop.f32.mrb[169].mxu1 }
 0xe10   :  { %v8345_v48 = vadd.f32 %v18062_v44, %v8344_v13  ;;  %v11401_v27 = vpop.f32.mrb[170].mxu1 }
 0xe11   :  { %v8356_v57 = vadd.f32 %v11401_v27, %v18062_v44  ;;  %v8347_v9 = vpop.f32.mrb[171].mxu1  ;;  %v8557_v23 = vadd.f32 %v8353_v46, %v19589_v50 }
 0xe12   :  { %v8348_v58 = vadd.f32 %v18062_v44, %v8347_v9  ;;  %v8555_v43 = vadd.f32 %v8345_v48, %v19591_v31  ;;  %v19601_v48 = vld [vmem:[#allocation98_spill] sm:$0xff]  ;;  %v11683_v31 = vld [vmem:[%s18525_s1 + $0x40] sm:$0x1f]  }
 0xe13   :  { %v8558_v12 = vadd.f32 %v8356_v57, %v19590_v22  ;;  %v19602_v57 = vld [vmem:[#allocation158_spill] sm:$0xff]  ;;  %11636 = vmatprep.subr.msk.bf16.mxu1 %vm347_vm1, %v11683_v31 }
 0xe14   :  { %v8556_v25 = vadd.f32 %v8348_v58, %v19592_v8 }
 0xe15   :  { %v8610_v35 = vpack.c.bf16 %v8558_v12, %v8557_v23 }
 0xe16   :  { %v8609_v39 = vpack.c.bf16 %v8556_v25, %v8555_v43  ;;  %v9166_v25 = vsel %vm347_vm1, %v11683_v31, 0  ;;  %v19616_v31 = vld [vmem:[#allocation214_spill] sm:$0xff]  ;;  %vm9941_vm1 = vcmask 1044484  }
 0xe17   :  { %11509 = vmatpush3.bf16.msra.mxu1 %v9166_v25 }
 0xe18   :  { %11456 = vmatprep.mubr.msk.bf16.mxu0 %vm1099_vm3, %v8609_v39  ;;  %v19603_v39 = vld [vmem:[#allocation171_spill] sm:$0xff] }
 0xe19   :  { %11457 = vmatmul.mubr.msk.bf16.gmra.mrb[0].mxu0 %vm1099_vm3, %v8610_v35 }
 0xe1e   :  { %v11404_v38 = vpop.f32.mrb[172].mxu1 }
 0xe1f   :  { %v8369_v21 = vadd.f32 %v11404_v38, %v18062_v44  ;;  %v8360_v47 = vpop.f32.mrb[173].mxu1 }
 0xe20   :  { %v8361_v40 = vadd.f32 %v18062_v44, %v8360_v47  ;;  %v11405_v54 = vpop.f32.mrb[174].mxu1 }
 0xe21   :  { %v8372_v4 = vadd.f32 %v11405_v54, %v18062_v44  ;;  %v8363_v20 = vpop.f32.mrb[175].mxu1  ;;  %v8561_v10 = vadd.f32 %v8369_v21, %v19593_v28  ;;  %v19604_v21 = vld [vmem:[#allocation186_spill] sm:$0xff] }
 0xe22   :  { %v8364_v0 = vadd.f32 %v18062_v44, %v8363_v20  ;;  %v8559_v24 = vadd.f32 %v8361_v40, %v19595_v63  ;;  %v19605_v40 = vld [vmem:[#allocation99_spill] sm:$0xff] }
 0xe23   :  { %v8562_v32 = vadd.f32 %v8372_v4, %v19594_v5  ;;  %v19606_v4 = vld [vmem:[#allocation177_spill] sm:$0xff] }
 0xe24   :  { %v8560_v37 = vadd.f32 %v8364_v0, %v19596_v55 }
 0xe25   :  { %v8612_v60 = vpack.c.bf16 %v8562_v32, %v8561_v10 }
 0xe26   :  { %v8611_v26 = vpack.c.bf16 %v8560_v37, %v8559_v24 }
 0xe28   :  { %11460 = vmatprep.mubr.msk.bf16.mxu0 %vm1099_vm3, %v8611_v26  ;;  %v19607_v26 = vld [vmem:[#allocation91_spill] sm:$0xff] }
 0xe29   :  { %11461 = vmatmul.mubr.msk.bf16.gmra.mrb[4].mxu0 %vm1099_vm3, %v8612_v60 }
 0xe38   :  { %v11408_v61 = vpop.f32.mrb[176].mxu1 }
 0xe39   :  { %v8385_v18 = vadd.f32 %v11408_v61, %v18062_v44  ;;  %v8376_v16 = vpop.f32.mrb[177].mxu1 }
 0xe3a   :  { %v8377_v62 = vadd.f32 %v18062_v44, %v8376_v16  ;;  %v11409_v15 = vpop.f32.mrb[178].mxu1 }
 0xe3b   :  { %v8388_v7 = vadd.f32 %v11409_v15, %v18062_v44  ;;  %v8379_v52 = vpop.f32.mrb[179].mxu1  ;;  %v8565_v29 = vadd.f32 %v8385_v18, %v19597_v1  ;;  %v19608_v18 = vld [vmem:[#allocation65_spill] sm:$0xff] }
 0xe3c   :  { %v8380_v56 = vadd.f32 %v18062_v44, %v8379_v52  ;;  %v8563_v51 = vadd.f32 %v8377_v62, %v19599_v42  ;;  %v19609_v62 = vld [vmem:[#allocation165_spill] sm:$0xff] }
 0xe3d   :  { %v8566_v34 = vadd.f32 %v8388_v7, %v19598_v2  ;;  %v19610_v7 = vld [vmem:[#allocation179_spill] sm:$0xff] }
 0xe3e   :  { %v8564_v53 = vadd.f32 %v8380_v56, %v19600_v36 }
 0xe3f   :  { %v8614_v33 = vpack.c.bf16 %v8566_v34, %v8565_v29 }
 0xe40   :  { %v8613_v59 = vpack.c.bf16 %v8564_v53, %v8563_v51 }
 0xe42   :  { %11464 = vmatprep.mubr.msk.bf16.mxu0 %vm1099_vm3, %v8613_v59  ;;  %v19611_v59 = vld [vmem:[#allocation82_spill] sm:$0xff] }
 0xe43   :  { %11465 = vmatmul.mubr.msk.bf16.gmra.mrb[8].mxu0 %vm1099_vm3, %v8614_v33 }
 0xe4a   :  { %v11412_v17 = vpop.f32.mrb[180].mxu1 }
 0xe4b   :  { %v8401_v49 = vadd.f32 %v11412_v17, %v18062_v44  ;;  %v8392_v45 = vpop.f32.mrb[181].mxu1 }
 0xe4c   :  { %v8393_v14 = vadd.f32 %v18062_v44, %v8392_v45  ;;  %v11413_v41 = vpop.f32.mrb[182].mxu1 }
 0xe4d   :  { %v8404_v11 = vadd.f32 %v11413_v41, %v18062_v44  ;;  %v8395_v30 = vpop.f32.mrb[183].mxu1  ;;  %v8569_v46 = vadd.f32 %v8401_v49, %v16743_v3  ;;  %v19612_v49 = vld [vmem:[#allocation191_spill] sm:$0xff] }
 0xe4e   :  { %v8396_v19 = vadd.f32 %v18062_v44, %v8395_v30  ;;  %v8567_v27 = vadd.f32 %v8393_v14, %v19601_v48  ;;  %v19613_v14 = vld [vmem:[#allocation101_spill] sm:$0xff] }
 0xe4f   :  { %v8570_v13 = vadd.f32 %v8404_v11, %v16800_v6  ;;  %v19614_v11 = vld [vmem:[#allocation131_spill] sm:$0xff] }
 0xe50   :  { %v8568_v9 = vadd.f32 %v8396_v19, %v19602_v57 }
 0xe51   :  { %v8616_v58 = vpack.c.bf16 %v8570_v13, %v8569_v46 }
 0xe52   :  { %v8615_v50 = vpack.c.bf16 %v8568_v9, %v8567_v27  ;;  %v11416_v23 = vpop.f32.mrb[184].mxu1 }
 0xe53   :  { %v8417_v22 = vadd.f32 %v11416_v23, %v18062_v44  ;;  %v8408_v12 = vpop.f32.mrb[185].mxu1 }
 0xe54   :  { %v8409_v43 = vadd.f32 %v18062_v44, %v8408_v12  ;;  %v11417_v8 = vpop.f32.mrb[186].mxu1  ;;  %11468 = vmatprep.mubr.msk.bf16.mxu0 %vm1099_vm3, %v8615_v50 }
 0xe55   :  { %v8420_v3 = vadd.f32 %v11417_v8, %v18062_v44  ;;  %v8411_v6 = vpop.f32.mrb[187].mxu1  ;;  %11469 = vmatmul.mubr.msk.bf16.gmra.mrb[12].mxu0 %vm1099_vm3, %v8616_v58  ;;  %v8573_v38 = vadd.f32 %v8417_v22, %v19603_v39  ;;  %v19615_v22 = vld [vmem:[#allocation195_spill] sm:$0xff] }
 0xe56   :  { %v8412_v35 = vadd.f32 %v18062_v44, %v8411_v6  ;;  %v8571_v54 = vadd.f32 %v8409_v43, %v19605_v40  ;;  %v19617_v8 = vld [vmem:[#allocation127_spill] sm:$0xff]  ;;  %v19618_v6 = vld [vmem:[#allocation130_spill] sm:$0xff] }
 0xe57   :  { %v8574_v47 = vadd.f32 %v8420_v3, %v19604_v21 }
 0xe58   :  { %v8572_v20 = vadd.f32 %v8412_v35, %v19606_v4 }
 0xe59   :  { %v8618_v0 = vpack.c.bf16 %v8574_v47, %v8573_v38 }
 0xe5a   :  { %v8617_v28 = vpack.c.bf16 %v8572_v20, %v8571_v54  ;;  %v11420_v10 = vpop.f32.mrb[188].mxu1 }
 0xe5b   :  { %v8433_v5 = vadd.f32 %v11420_v10, %v18062_v44  ;;  %v8424_v32 = vpop.f32.mrb[189].mxu1 }
 0xe5c   :  { %v8425_v63 = vadd.f32 %v18062_v44, %v8424_v32  ;;  %v11421_v24 = vpop.f32.mrb[190].mxu1  ;;  %11472 = vmatprep.mubr.msk.bf16.mxu0 %vm1099_vm3, %v8617_v28  ;;  %v19619_v28 = vld [vmem:[#allocation183_spill] sm:$0xff] }
 0xe5d   :  { %v8436_v55 = vadd.f32 %v11421_v24, %v18062_v44  ;;  %v8427_v37 = vpop.f32.mrb[191].mxu1  ;;  %11473 = vmatmul.mubr.msk.bf16.gmra.mrb[16].mxu0 %vm1099_vm3, %v8618_v0  ;;  %v8577_v61 = vadd.f32 %v8433_v5, %v19607_v26  ;;  %v19620_v5 = vld [vmem:[#allocation176_spill] sm:$0xff] }
 0xe5e   :  { %v8428_v60 = vadd.f32 %v18062_v44, %v8427_v37  ;;  %v8575_v15 = vadd.f32 %v8425_v63, %v19609_v62  ;;  %v19621_v63 = vld [vmem:[#allocation122_spill] sm:$0xff] }
 0xe5f   :  { %v8578_v16 = vadd.f32 %v8436_v55, %v19608_v18  ;;  %v19622_v55 = vld [vmem:[#allocation192_spill] sm:$0xff] }
 0xe60   :  { %v8576_v52 = vadd.f32 %v8428_v60, %v19610_v7 }
 0xe61   :  { %v8620_v56 = vpack.c.bf16 %v8578_v16, %v8577_v61 }
 0xe62   :  { %v8619_v1 = vpack.c.bf16 %v8576_v52, %v8575_v15  ;;  %v11424_v29 = vpop.f32.mrb[192].mxu1 }
 0xe63   :  { %v8449_v2 = vadd.f32 %v11424_v29, %v18062_v44  ;;  %v8440_v34 = vpop.f32.mrb[193].mxu1 }
 0xe64   :  { %v8441_v42 = vadd.f32 %v18062_v44, %v8440_v34  ;;  %v11425_v51 = vpop.f32.mrb[194].mxu1  ;;  %11476 = vmatprep.mubr.msk.bf16.mxu0 %vm1099_vm3, %v8619_v1  ;;  %v19623_v1 = vld [vmem:[#allocation129_spill] sm:$0xff] }
 0xe65   :  { %v8452_v36 = vadd.f32 %v11425_v51, %v18062_v44  ;;  %v8443_v53 = vpop.f32.mrb[195].mxu1  ;;  %11477 = vmatmul.mubr.msk.bf16.gmra.mrb[20].mxu0 %vm1099_vm3, %v8620_v56  ;;  %v8581_v17 = vadd.f32 %v8449_v2, %v19611_v59  ;;  %v19624_v2 = vld [vmem:[#allocation120_spill] sm:$0xff] }
 0xe66   :  { %v8444_v33 = vadd.f32 %v18062_v44, %v8443_v53  ;;  %v8579_v41 = vadd.f32 %v8441_v42, %v19613_v14  ;;  %v19625_v42 = vld [vmem:[#allocation102_spill] sm:$0xff] }
 0xe67   :  { %v8582_v45 = vadd.f32 %v8452_v36, %v19612_v49  ;;  %v19626_v36 = vld [vmem:[#allocation78_spill] sm:$0xff] }
 0xe68   :  { %v8580_v30 = vadd.f32 %v8444_v33, %v19614_v11 }
 0xe69   :  { %v8622_v19 = vpack.c.bf16 %v8582_v45, %v8581_v17 }
 0xe6a   :  { %v8621_v46 = vpack.c.bf16 %v8580_v30, %v8579_v41  ;;  %v11428_v13 = vpop.f32.mrb[196].mxu1 }
 0xe6b   :  { %v8465_v48 = vadd.f32 %v11428_v13, %v18062_v44  ;;  %v8456_v27 = vpop.f32.mrb[197].mxu1 }
 0xe6c   :  { %v8457_v57 = vadd.f32 %v18062_v44, %v8456_v27  ;;  %v11429_v9 = vpop.f32.mrb[198].mxu1  ;;  %11480 = vmatprep.mubr.msk.bf16.mxu0 %vm1099_vm3, %v8621_v46  ;;  %v19627_v46 = vld [vmem:[#allocation103_spill] sm:$0xff] }
 0xe6d   :  { %v8468_v58 = vadd.f32 %v11429_v9, %v18062_v44  ;;  %v8459_v50 = vpop.f32.mrb[199].mxu1  ;;  %11481 = vmatmul.mubr.msk.bf16.gmra.mrb[24].mxu0 %vm1099_vm3, %v8622_v19  ;;  %v8585_v12 = vadd.f32 %v8465_v48, %v19615_v22  ;;  %v19628_v48 = vld [vmem:[#allocation119_spill] sm:$0xff] }
 0xe6e   :  { %v8460_v23 = vadd.f32 %v18062_v44, %v8459_v50  ;;  %v8583_v3 = vadd.f32 %v8457_v57, %v19617_v8  ;;  %v19629_v57 = vld [vmem:[#allocation128_spill] sm:$0xff] }
 0xe6f   :  { %v8586_v43 = vadd.f32 %v8468_v58, %v19616_v31  ;;  %v19630_v58 = vld [vmem:[#allocation187_spill] sm:$0xff] }
 0xe70   :  { %v8584_v25 = vadd.f32 %v8460_v23, %v19618_v6 }
 0xe71   :  { %v8624_v35 = vpack.c.bf16 %v8586_v43, %v8585_v12 }
 0xe72   :  { %v8623_v39 = vpack.c.bf16 %v8584_v25, %v8583_v3 }
 0xe74   :  { %11484 = vmatprep.mubr.msk.bf16.mxu0 %vm1099_vm3, %v8623_v39  ;;  %v19631_v39 = vld [vmem:[#allocation170_spill] sm:$0xff] }
 0xe75   :  { %11485 = vmatmul.mubr.msk.bf16.gmra.mrb[28].mxu0 %vm1099_vm3, %v8624_v35 }
 0xe76   :  { %v11432_v38 = vpop.f32.mrb[200].mxu1 }
 0xe77   :  { %v8481_v21 = vadd.f32 %v11432_v38, %v18062_v44  ;;  %v8472_v47 = vpop.f32.mrb[201].mxu1 }
 0xe78   :  { %v8473_v40 = vadd.f32 %v18062_v44, %v8472_v47  ;;  %v11433_v54 = vpop.f32.mrb[202].mxu1 }
 0xe79   :  { %v8484_v4 = vadd.f32 %v11433_v54, %v18062_v44  ;;  %v8475_v20 = vpop.f32.mrb[203].mxu1  ;;  %v8589_v10 = vadd.f32 %v8481_v21, %v19619_v28  ;;  %v19632_v21 = vld [vmem:[#allocation75_spill] sm:$0xff] }
 0xe7a   :  { %v8476_v0 = vadd.f32 %v18062_v44, %v8475_v20  ;;  %v8587_v24 = vadd.f32 %v8473_v40, %v19621_v63  ;;  %v19633_v40 = vld [vmem:[#allocation178_spill] sm:$0xff] }
 0xe7b   :  { %v8590_v32 = vadd.f32 %v8484_v4, %v19620_v5  ;;  %v19634_v4 = vld [vmem:[#allocation105_spill] sm:$0xff] }
 0xe7c   :  { %v8588_v37 = vadd.f32 %v8476_v0, %v19622_v55  ;;  %v18210_v55 = vld [vmem:[%s18526_s2 + $0x77] ss:$0 sm:$0xff] }
 0xe7d   :  { %v8626_v60 = vpack.c.bf16 %v8590_v32, %v8589_v10 }
 0xe7e   :  { %v8625_v26 = vpack.c.bf16 %v8588_v37, %v8587_v24 }
 0xe80   :  { %11488 = vmatprep.mubr.msk.bf16.mxu0 %vm1099_vm3, %v8625_v26 }
 0xe81   :  { %11489 = vmatmul.mubr.msk.bf16.gmra.mrb[32].mxu0 %vm1099_vm3, %v8626_v60 }
 0xe97   :  { %v11436_v61 = vpop.f32.mrb[204].mxu1 }
 0xe98   :  { %v8497_v18 = vadd.f32 %v11436_v61, %v18062_v44  ;;  %v8488_v16 = vpop.f32.mrb[205].mxu1 }
 0xe99   :  { %v8489_v62 = vadd.f32 %v18062_v44, %v8488_v16  ;;  %v11437_v15 = vpop.f32.mrb[206].mxu1 }
 0xe9a   :  { %v8500_v7 = vadd.f32 %v11437_v15, %v18062_v44  ;;  %v8491_v52 = vpop.f32.mrb[207].mxu1  ;;  %v8593_v29 = vadd.f32 %v8497_v18, %v19623_v1  ;;  %v19635_v18 = vld [vmem:[#allocation112_spill] sm:$0xff] }
 0xe9b   :  { %v8492_v56 = vadd.f32 %v18062_v44, %v8491_v52  ;;  %v8591_v51 = vadd.f32 %v8489_v62, %v19625_v42  ;;  %v19636_v62 = vld [vmem:[#allocation104_spill] sm:$0xff] }
 0xe9c   :  { %v8594_v34 = vadd.f32 %v8500_v7, %v19624_v2 }
 0xe9d   :  { %v8592_v53 = vadd.f32 %v8492_v56, %v19626_v36  ;;  %v19637_v56 = vld [vmem:[#allocation174_spill] sm:$0xff] }
 0xe9e   :  { %v8628_v33 = vpack.c.bf16 %v8594_v34, %v8593_v29  ;;  %v19638_v29 = vld [vmem:[#allocation173_spill] sm:$0xff] }
 0xe9f   :  { %v8627_v59 = vpack.c.bf16 %v8592_v53, %v8591_v51 }
 0xea1   :  { %11492 = vmatprep.mubr.msk.bf16.mxu0 %vm1099_vm3, %v8627_v59 }
 0xea2   :  { %11493 = vmatmul.mubr.msk.bf16.gmra.mrb[36].mxu0 %vm1099_vm3, %v8628_v33 }
 0xea7   :  { %v11440_v17 = vpop.f32.mrb[208].mxu1 }
 0xea8   :  { %v8513_v49 = vadd.f32 %v11440_v17, %v18062_v44  ;;  %v8504_v45 = vpop.f32.mrb[209].mxu1 }
 0xea9   :  { %v8505_v14 = vadd.f32 %v18062_v44, %v8504_v45  ;;  %v11441_v41 = vpop.f32.mrb[210].mxu1 }
 0xeaa   :  { %v8516_v11 = vadd.f32 %v11441_v41, %v18062_v44  ;;  %v8507_v30 = vpop.f32.mrb[211].mxu1  ;;  %v8597_v13 = vadd.f32 %v8513_v49, %v19627_v46 }
 0xeab   :  { %v8508_v19 = vadd.f32 %v18062_v44, %v8507_v30  ;;  %v8595_v9 = vadd.f32 %v8505_v14, %v19629_v57 }
 0xeac   :  { %v8598_v27 = vadd.f32 %v8516_v11, %v19628_v48 }
 0xead   :  { %v8596_v50 = vadd.f32 %v8508_v19, %v19630_v58 }
 0xeae   :  { %v8630_v23 = vpack.c.bf16 %v8598_v27, %v8597_v13 }
 0xeaf   :  { %v8629_v22 = vpack.c.bf16 %v8596_v50, %v8595_v9 }
 0xeb1   :  { %11496 = vmatprep.mubr.msk.bf16.mxu0 %vm1099_vm3, %v8629_v22 }
 0xeb2   :  { %11497 = vmatmul.mubr.msk.bf16.gmra.mrb[40].mxu0 %vm1099_vm3, %v8630_v23 }
 0xeb7   :  { %v11444_v12 = vpop.f32.mrb[212].mxu1 }
 0xeb8   :  { %v8529_v31 = vadd.f32 %v11444_v12, %v18062_v44  ;;  %v8520_v43 = vpop.f32.mrb[213].mxu1 }
 0xeb9   :  { %v8521_v8 = vadd.f32 %v18062_v44, %v8520_v43  ;;  %v11445_v3 = vpop.f32.mrb[214].mxu1 }
 0xeba   :  { %v8532_v6 = vadd.f32 %v11445_v3, %v18062_v44  ;;  %v8523_v25 = vpop.f32.mrb[215].mxu1  ;;  %v8601_v38 = vadd.f32 %v8529_v31, %v19631_v39 }
 0xebb   :  { %v8524_v35 = vadd.f32 %v18062_v44, %v8523_v25  ;;  %v8599_v54 = vadd.f32 %v8521_v8, %v19633_v40 }
 0xebc   :  { %v8602_v47 = vadd.f32 %v8532_v6, %v19632_v21 }
 0xebd   :  { %v8600_v20 = vadd.f32 %v8524_v35, %v19634_v4 }
 0xebe   :  { %v8632_v0 = vpack.c.bf16 %v8602_v47, %v8601_v38 }
 0xebf   :  { %v8631_v28 = vpack.c.bf16 %v8600_v20, %v8599_v54 }
 0xec1   :  { %11500 = vmatprep.mubr.msk.bf16.mxu0 %vm1099_vm3, %v8631_v28 }
 0xec2   :  { %11501 = vmatmul.mubr.msk.bf16.gmra.mrb[44].mxu0 %vm1099_vm3, %v8632_v0 }
 0xec7   :  { %v11448_v10 = vpop.f32.mrb[216].mxu1 }
 0xec8   :  { %v8545_v5 = vadd.f32 %v11448_v10, %v18062_v44  ;;  %v8536_v32 = vpop.f32.mrb[217].mxu1 }
 0xec9   :  { %v8537_v63 = vadd.f32 %v18062_v44, %v8536_v32  ;;  %v11449_v24 = vpop.f32.mrb[218].mxu1 }
 0xeca   :  { %v8548_v37 = vadd.f32 %v11449_v24, %v18062_v44  ;;  %v8539_v60 = vpop.f32.mrb[219].mxu1  ;;  %v8605_v16 = vadd.f32 %v8545_v5, %v19635_v18 }
 0xecb   :  { %v8540_v26 = vadd.f32 %v18062_v44, %v8539_v60  ;;  %v11454_v61 = vpop.f32.mrb[252].mxu0  ;;  %v8603_v1 = vadd.f32 %v8537_v63, %v19637_v56 }
 0xecc   :  { %v8606_v15 = vadd.f32 %v8548_v37, %v19636_v62  ;;  %v8774_v7 = vadd.f32 %v11454_v61, %v18210_v55  ;;  %v8765_v52 = vpop.f32.mrb[253].mxu0 }
 0xecd   :  { %v8604_v2 = vadd.f32 %v8540_v26, %v19638_v29  ;;  %v8766_v34 = vadd.f32 %v18210_v55, %v8765_v52  ;;  %v11455_v42 = vpop.f32.mrb[254].mxu0 }
 0xece   :  { %v8634_v51 = vpack.c.bf16 %v8606_v15, %v8605_v16  ;;  %v8777_v36 = vadd.f32 %v11455_v42, %v18210_v55  ;;  %v8768_v53 = vpop.f32.mrb[255].mxu0  ;;  %v8990_v59 = vmax.f32 %v8774_v7, 0.0 }
 0xecf   :  { %v8633_v44 = vpack.c.bf16 %v8604_v2, %v8603_v1  ;;  %v8769_v33 = vadd.f32 %v18210_v55, %v8768_v53  ;;  %v8988_v49 = vmax.f32 %v8766_v34, 0.0  ;;  %v12508_v53 = vmov 0  }
 0xed0   :  { %v8991_v17 = vmax.f32 %v8777_v36, 0.0  ;;  %11645 = vset.pattern.permute.xlu1 %v12508_v53  ;;  %11646 = vset.pattern.permute.xlu0 %v12508_v53 }
 0xed1   :  { %v8989_v45 = vmax.f32 %v8769_v33, 0.0  ;;  %11504 = vmatprep.mubr.msk.bf16.mxu0 %vm1099_vm3, %v8633_v44 }
 0xed2   :  { %v9045_v14 = vpack.c.bf16 %v8991_v17, %v8990_v59  ;;  %11505 = vmatmul.mubr.msk.bf16.gmra.mrb[48].mxu0 %vm1099_vm3, %v8634_v51 }
 0xed3   :  { %v9044_v41 = vpack.c.bf16 %v8989_v45, %v8988_v49 }
 0xed5   :  { %11510 = vmatprep.mubr.msk.bf16.mxu1 %vm1099_vm3, %v9044_v41 }
 0xed6   :  { %11511 = vmatmul.mubr.msk.bf16.vlgmr.msra.gmra.mrb[220].mxu1 %vm1099_vm3, %v9045_v14 }
 0xeec   :  { %v11458_v11 = vpop.f32.mrb[0].mxu0 }
 0xeed   :  { %v8790_v30 = vadd.f32 %v11458_v11, %v18210_v55  ;;  %v8781_v19 = vpop.f32.mrb[1].mxu0 }
 0xeee   :  { %v8782_v46 = vadd.f32 %v18210_v55, %v8781_v19  ;;  %v11459_v13 = vpop.f32.mrb[2].mxu0 }
 0xeef   :  { %v8793_v48 = vadd.f32 %v11459_v13, %v18210_v55  ;;  %v8784_v27 = vpop.f32.mrb[3].mxu0  ;;  %v8994_v9 = vmax.f32 %v8790_v30, 0.0 }
 0xef0   :  { %v8785_v57 = vadd.f32 %v18210_v55, %v8784_v27  ;;  %v8992_v50 = vmax.f32 %v8782_v46, 0.0 }
 0xef1   :  { %v8995_v58 = vmax.f32 %v8793_v48, 0.0 }
 0xef2   :  { %v8993_v23 = vmax.f32 %v8785_v57, 0.0 }
 0xef3   :  { %v9047_v22 = vpack.c.bf16 %v8995_v58, %v8994_v9 }
 0xef4   :  { %v9046_v12 = vpack.c.bf16 %v8993_v23, %v8992_v50 }
 0xef6   :  { %11514 = vmatprep.mubr.msk.bf16.mxu1 %vm1099_vm3, %v9046_v12 }
 0xef7   :  { %11515 = vmatmul.mubr.msk.bf16.gmra.mrb[224].mxu1 %vm1099_vm3, %v9047_v22 }
 0xefc   :  { %v11462_v31 = vpop.f32.mrb[4].mxu0 }
 0xefd   :  { %v8806_v43 = vadd.f32 %v11462_v31, %v18210_v55  ;;  %v8797_v8 = vpop.f32.mrb[5].mxu0 }
 0xefe   :  { %v8798_v3 = vadd.f32 %v18210_v55, %v8797_v8  ;;  %v11463_v6 = vpop.f32.mrb[6].mxu0 }
 0xeff   :  { %v8809_v25 = vadd.f32 %v11463_v6, %v18210_v55  ;;  %v8800_v35 = vpop.f32.mrb[7].mxu0  ;;  %v8998_v38 = vmax.f32 %v8806_v43, 0.0 }
 0xf00   :  { %v8801_v39 = vadd.f32 %v18210_v55, %v8800_v35  ;;  %v8996_v47 = vmax.f32 %v8798_v3, 0.0 }
 0xf01   :  { %v8999_v21 = vmax.f32 %v8809_v25, 0.0 }
 0xf02   :  { %v8997_v40 = vmax.f32 %v8801_v39, 0.0 }
 0xf03   :  { %v9049_v54 = vpack.c.bf16 %v8999_v21, %v8998_v38 }
 0xf04   :  { %v9048_v4 = vpack.c.bf16 %v8997_v40, %v8996_v47 }
 0xf06   :  { %11518 = vmatprep.mubr.msk.bf16.mxu1 %vm1099_vm3, %v9048_v4 }
 0xf07   :  { %11519 = vmatmul.mubr.msk.bf16.gmra.mrb[228].mxu1 %vm1099_vm3, %v9049_v54 }
 0xf16   :  { %v11466_v20 = vpop.f32.mrb[8].mxu0 }
 0xf17   :  { %v8822_v0 = vadd.f32 %v11466_v20, %v18210_v55  ;;  %v8813_v28 = vpop.f32.mrb[9].mxu0 }
 0xf18   :  { %v8814_v10 = vadd.f32 %v18210_v55, %v8813_v28  ;;  %v11467_v5 = vpop.f32.mrb[10].mxu0 }
 0xf19   :  { %v8825_v32 = vadd.f32 %v11467_v5, %v18210_v55  ;;  %v8816_v63 = vpop.f32.mrb[11].mxu0  ;;  %v9002_v37 = vmax.f32 %v8822_v0, 0.0 }
 0xf1a   :  { %v8817_v24 = vadd.f32 %v18210_v55, %v8816_v63  ;;  %v9000_v26 = vmax.f32 %v8814_v10, 0.0 }
 0xf1b   :  { %v9003_v60 = vmax.f32 %v8825_v32, 0.0 }
 0xf1c   :  { %v9001_v61 = vmax.f32 %v8817_v24, 0.0 }
 0xf1d   :  { %v9051_v18 = vpack.c.bf16 %v9003_v60, %v9002_v37 }
 0xf1e   :  { %v9050_v16 = vpack.c.bf16 %v9001_v61, %v9000_v26 }
 0xf20   :  { %11522 = vmatprep.mubr.msk.bf16.mxu1 %vm1099_vm3, %v9050_v16 }
 0xf21   :  { %11523 = vmatmul.mubr.msk.bf16.gmra.mrb[232].mxu1 %vm1099_vm3, %v9051_v18 }
 0xf28   :  { %v11470_v62 = vpop.f32.mrb[12].mxu0 }
 0xf29   :  { %v8838_v15 = vadd.f32 %v11470_v62, %v18210_v55  ;;  %v8829_v7 = vpop.f32.mrb[13].mxu0 }
 0xf2a   :  { %v8830_v52 = vadd.f32 %v18210_v55, %v8829_v7  ;;  %v11471_v56 = vpop.f32.mrb[14].mxu0 }
 0xf2b   :  { %v8841_v1 = vadd.f32 %v11471_v56, %v18210_v55  ;;  %v8832_v29 = vpop.f32.mrb[15].mxu0  ;;  %v9006_v34 = vmax.f32 %v8838_v15, 0.0 }
 0xf2c   :  { %v8833_v2 = vadd.f32 %v18210_v55, %v8832_v29  ;;  %v9004_v51 = vmax.f32 %v8830_v52, 0.0 }
 0xf2d   :  { %v9007_v42 = vmax.f32 %v8841_v1, 0.0 }
 0xf2e   :  { %v9005_v36 = vmax.f32 %v8833_v2, 0.0 }
 0xf2f   :  { %v9053_v44 = vpack.c.bf16 %v9007_v42, %v9006_v34 }
 0xf30   :  { %v9052_v33 = vpack.c.bf16 %v9005_v36, %v9004_v51  ;;  %v11474_v59 = vpop.f32.mrb[16].mxu0 }
 0xf31   :  { %v8854_v17 = vadd.f32 %v11474_v59, %v18210_v55  ;;  %v8845_v49 = vpop.f32.mrb[17].mxu0 }
 0xf32   :  { %v8846_v45 = vadd.f32 %v18210_v55, %v8845_v49  ;;  %v11475_v14 = vpop.f32.mrb[18].mxu0  ;;  %11526 = vmatprep.mubr.msk.bf16.mxu1 %vm1099_vm3, %v9052_v33 }
 0xf33   :  { %v8857_v41 = vadd.f32 %v11475_v14, %v18210_v55  ;;  %v8848_v11 = vpop.f32.mrb[19].mxu0  ;;  %11527 = vmatmul.mubr.msk.bf16.gmra.mrb[236].mxu1 %vm1099_vm3, %v9053_v44  ;;  %v9010_v19 = vmax.f32 %v8854_v17, 0.0 }
 0xf34   :  { %v8849_v30 = vadd.f32 %v18210_v55, %v8848_v11  ;;  %v9008_v13 = vmax.f32 %v8846_v45, 0.0 }
 0xf35   :  { %v9011_v46 = vmax.f32 %v8857_v41, 0.0 }
 0xf36   :  { %v9009_v48 = vmax.f32 %v8849_v30, 0.0 }
 0xf37   :  { %v9055_v27 = vpack.c.bf16 %v9011_v46, %v9010_v19 }
 0xf38   :  { %v9054_v57 = vpack.c.bf16 %v9009_v48, %v9008_v13  ;;  %v11478_v9 = vpop.f32.mrb[20].mxu0 }
 0xf39   :  { %v8870_v58 = vadd.f32 %v11478_v9, %v18210_v55  ;;  %v8861_v50 = vpop.f32.mrb[21].mxu0 }
 0xf3a   :  { %v8862_v23 = vadd.f32 %v18210_v55, %v8861_v50  ;;  %v11479_v22 = vpop.f32.mrb[22].mxu0  ;;  %11530 = vmatprep.mubr.msk.bf16.mxu1 %vm1099_vm3, %v9054_v57 }
 0xf3b   :  { %v8873_v12 = vadd.f32 %v11479_v22, %v18210_v55  ;;  %v8864_v31 = vpop.f32.mrb[23].mxu0  ;;  %11531 = vmatmul.mubr.msk.bf16.gmra.mrb[240].mxu1 %vm1099_vm3, %v9055_v27  ;;  %v9014_v8 = vmax.f32 %v8870_v58, 0.0 }
 0xf3c   :  { %v8865_v43 = vadd.f32 %v18210_v55, %v8864_v31  ;;  %v9012_v6 = vmax.f32 %v8862_v23, 0.0 }
 0xf3d   :  { %v9015_v3 = vmax.f32 %v8873_v12, 0.0 }
 0xf3e   :  { %v9013_v25 = vmax.f32 %v8865_v43, 0.0 }
 0xf3f   :  { %v9057_v35 = vpack.c.bf16 %v9015_v3, %v9014_v8 }
 0xf40   :  { %v9056_v39 = vpack.c.bf16 %v9013_v25, %v9012_v6  ;;  %v11482_v38 = vpop.f32.mrb[24].mxu0 }
 0xf41   :  { %v8886_v21 = vadd.f32 %v11482_v38, %v18210_v55  ;;  %v8877_v47 = vpop.f32.mrb[25].mxu0 }
 0xf42   :  { %v8878_v40 = vadd.f32 %v18210_v55, %v8877_v47  ;;  %v11483_v54 = vpop.f32.mrb[26].mxu0  ;;  %11534 = vmatprep.mubr.msk.bf16.mxu1 %vm1099_vm3, %v9056_v39 }
 0xf43   :  { %v8889_v4 = vadd.f32 %v11483_v54, %v18210_v55  ;;  %v8880_v20 = vpop.f32.mrb[27].mxu0  ;;  %11535 = vmatmul.mubr.msk.bf16.gmra.mrb[244].mxu1 %vm1099_vm3, %v9057_v35  ;;  %v9018_v28 = vmax.f32 %v8886_v21, 0.0 }
 0xf44   :  { %v8881_v0 = vadd.f32 %v18210_v55, %v8880_v20  ;;  %v9016_v5 = vmax.f32 %v8878_v40, 0.0 }
 0xf45   :  { %v9019_v10 = vmax.f32 %v8889_v4, 0.0 }
 0xf46   :  { %v9017_v32 = vmax.f32 %v8881_v0, 0.0 }
 0xf47   :  { %v9059_v63 = vpack.c.bf16 %v9019_v10, %v9018_v28 }
 0xf48   :  { %v9058_v24 = vpack.c.bf16 %v9017_v32, %v9016_v5  ;;  %v11486_v37 = vpop.f32.mrb[28].mxu0 }
 0xf49   :  { %v8902_v60 = vadd.f32 %v11486_v37, %v18210_v55  ;;  %v8893_v26 = vpop.f32.mrb[29].mxu0 }
 0xf4a   :  { %v8894_v61 = vadd.f32 %v18210_v55, %v8893_v26  ;;  %v11487_v18 = vpop.f32.mrb[30].mxu0  ;;  %11538 = vmatprep.mubr.msk.bf16.mxu1 %vm1099_vm3, %v9058_v24 }
 0xf4b   :  { %v8905_v16 = vadd.f32 %v11487_v18, %v18210_v55  ;;  %v8896_v62 = vpop.f32.mrb[31].mxu0  ;;  %11539 = vmatmul.mubr.msk.bf16.gmra.mrb[248].mxu1 %vm1099_vm3, %v9059_v63  ;;  %v9022_v7 = vmax.f32 %v8902_v60, 0.0 }
 0xf4c   :  { %v8897_v15 = vadd.f32 %v18210_v55, %v8896_v62  ;;  %v9020_v56 = vmax.f32 %v8894_v61, 0.0 }
 0xf4d   :  { %v9023_v52 = vmax.f32 %v8905_v16, 0.0 }
 0xf4e   :  { %v9021_v1 = vmax.f32 %v8897_v15, 0.0 }
 0xf4f   :  { %v9061_v29 = vpack.c.bf16 %v9023_v52, %v9022_v7 }
 0xf50   :  { %v9060_v2 = vpack.c.bf16 %v9021_v1, %v9020_v56 }
 0xf52   :  { %11542 = vmatprep.mubr.msk.bf16.mxu1 %vm1099_vm3, %v9060_v2 }
 0xf53   :  { %11543 = vmatmul.mubr.msk.bf16.gmra.mrb[252].mxu1 %vm1099_vm3, %v9061_v29  ;;  %v18303_v29 = vld [vmem:[%s18526_s2 + $0x78] ss:$0 sm:$0xff]  ;;  %s12509_s2 = smov [#allocation2]  }
 0xf54   :  { %v11490_v34 = vpop.f32.mrb[32].mxu0  ;;  %s9957_s15 = sshll.u32 %s12509_s2, 4  ;;  %s9958_s15 = int_to_ptr.vmem [resolvable:$true] %s9957_s15 }
 0xf55   :  { %v8918_v42 = vadd.f32 %v11490_v34, %v18210_v55  ;;  %v8909_v51 = vpop.f32.mrb[33].mxu0  ;;  %s12478_s19 = scalar_lea.vmem %s9958_s15, 128  ;;  %p12483_p1 = scmp.lt.s32.totalorder %s9958_s15, %s9958_s15 }
 0xf56   :  { %v8910_v36 = vadd.f32 %v18210_v55, %v8909_v51  ;;  %v11491_v53 = vpop.f32.mrb[34].mxu0  ;;  %p12479_p0 = scmp.ne.s32.totalorder %s9958_s15, %s12478_s19  ;;  %p12484_p2 = scmp.lt.s32.totalorder %s12478_s19, %s12478_s19 }
 0xf57   :  { %v8921_v44 = vadd.f32 %v11491_v53, %v18210_v55  ;;  %v8912_v33 = vpop.f32.mrb[35].mxu0  ;;  %v9026_v17 = vmax.f32 %v8918_v42, 0.0 }
 0xf58   :  { %v8913_v59 = vadd.f32 %v18210_v55, %v8912_v33  ;;  %v9024_v45 = vmax.f32 %v8910_v36, 0.0  ;;  %p12485_p3 = por %p12484_p2, %p12483_p1 }
 0xf59   :  { %v9027_v49 = vmax.f32 %v8921_v44, 0.0 }
 0xf5a   :  { %v9025_v14 = vmax.f32 %v8913_v59, 0.0  ;;  %p12486_p4 = pnand %p12485_p3, %p12479_p0 }
 0xf5b   :  { %v9063_v41 = vpack.c.bf16 %v9027_v49, %v9026_v17 }
 0xf5c   :  { %v9062_v11 = vpack.c.bf16 %v9025_v14, %v9024_v45 }
 0xf5e   :  { %11546 = vmatprep.mubr.msk.bf16.mxu1 %vm1099_vm3, %v9062_v11 }
 0xf5f   :  { %11547 = vmatmul.mubr.msk.bf16.gmra.mrb[0].mxu1 %vm1099_vm3, %v9063_v41 }
 0xf75   :  { %v11494_v30 = vpop.f32.mrb[36].mxu0 }
 0xf76   :  { %v8934_v19 = vadd.f32 %v11494_v30, %v18210_v55  ;;  %v8925_v46 = vpop.f32.mrb[37].mxu0 }
 0xf77   :  { %v8926_v13 = vadd.f32 %v18210_v55, %v8925_v46  ;;  %v11495_v48 = vpop.f32.mrb[38].mxu0 }
 0xf78   :  { %v8937_v27 = vadd.f32 %v11495_v48, %v18210_v55  ;;  %v8928_v57 = vpop.f32.mrb[39].mxu0  ;;  %v9030_v58 = vmax.f32 %v8934_v19, 0.0 }
 0xf79   :  { %v8929_v9 = vadd.f32 %v18210_v55, %v8928_v57  ;;  %v9028_v23 = vmax.f32 %v8926_v13, 0.0 }
 0xf7a   :  { %v9031_v50 = vmax.f32 %v8937_v27, 0.0 }
 0xf7b   :  { %v9029_v22 = vmax.f32 %v8929_v9, 0.0 }
 0xf7c   :  { %v9065_v12 = vpack.c.bf16 %v9031_v50, %v9030_v58 }
 0xf7d   :  { %v9064_v31 = vpack.c.bf16 %v9029_v22, %v9028_v23 }
 0xf7f   :  { %11550 = vmatprep.mubr.msk.bf16.mxu1 %vm1099_vm3, %v9064_v31 }
 0xf80   :  { %11551 = vmatmul.mubr.msk.bf16.gmra.mrb[4].mxu1 %vm1099_vm3, %v9065_v12 }
 0xf85   :  { %v11498_v43 = vpop.f32.mrb[40].mxu0 }
 0xf86   :  { %v8950_v8 = vadd.f32 %v11498_v43, %v18210_v55  ;;  %v8941_v3 = vpop.f32.mrb[41].mxu0 }
 0xf87   :  { %v8942_v6 = vadd.f32 %v18210_v55, %v8941_v3  ;;  %v11499_v25 = vpop.f32.mrb[42].mxu0 }
 0xf88   :  { %v8953_v35 = vadd.f32 %v11499_v25, %v18210_v55  ;;  %v8944_v39 = vpop.f32.mrb[43].mxu0  ;;  %v9034_v21 = vmax.f32 %v8950_v8, 0.0 }
 0xf89   :  { %v8945_v38 = vadd.f32 %v18210_v55, %v8944_v39  ;;  %v9032_v40 = vmax.f32 %v8942_v6, 0.0 }
 0xf8a   :  { %v9035_v47 = vmax.f32 %v8953_v35, 0.0 }
 0xf8b   :  { %v9033_v54 = vmax.f32 %v8945_v38, 0.0 }
 0xf8c   :  { %v9067_v4 = vpack.c.bf16 %v9035_v47, %v9034_v21 }
 0xf8d   :  { %v9066_v20 = vpack.c.bf16 %v9033_v54, %v9032_v40 }
 0xf8f   :  { %11554 = vmatprep.mubr.msk.bf16.mxu1 %vm1099_vm3, %v9066_v20 }
 0xf90   :  { %11555 = vmatmul.mubr.msk.bf16.gmra.mrb[8].mxu1 %vm1099_vm3, %v9067_v4 }
 0xf95   :  { %v11502_v0 = vpop.f32.mrb[44].mxu0 }
 0xf96   :  { %v8966_v28 = vadd.f32 %v11502_v0, %v18210_v55  ;;  %v8957_v10 = vpop.f32.mrb[45].mxu0 }
 0xf97   :  { %v8958_v5 = vadd.f32 %v18210_v55, %v8957_v10  ;;  %v11503_v32 = vpop.f32.mrb[46].mxu0 }
 0xf98   :  { %v8969_v63 = vadd.f32 %v11503_v32, %v18210_v55  ;;  %v8960_v24 = vpop.f32.mrb[47].mxu0  ;;  %v9038_v60 = vmax.f32 %v8966_v28, 0.0 }
 0xf99   :  { %v8961_v37 = vadd.f32 %v18210_v55, %v8960_v24  ;;  %v9036_v61 = vmax.f32 %v8958_v5, 0.0 }
 0xf9a   :  { %v9039_v26 = vmax.f32 %v8969_v63, 0.0 }
 0xf9b   :  { %v9037_v18 = vmax.f32 %v8961_v37, 0.0 }
 0xf9c   :  { %v9069_v16 = vpack.c.bf16 %v9039_v26, %v9038_v60 }
 0xf9d   :  { %v9068_v62 = vpack.c.bf16 %v9037_v18, %v9036_v61 }
 0xf9f   :  { %11558 = vmatprep.mubr.msk.bf16.mxu1 %vm1099_vm3, %v9068_v62 }
 0xfa0   :  { %11559 = vmatmul.mubr.msk.bf16.gmra.mrb[12].mxu1 %vm1099_vm3, %v9069_v16 }
 0xfa5   :  { %v11506_v15 = vpop.f32.mrb[48].mxu0 }
 0xfa6   :  { %v8982_v7 = vadd.f32 %v11506_v15, %v18210_v55  ;;  %v8973_v52 = vpop.f32.mrb[49].mxu0 }
 0xfa7   :  { %v8974_v56 = vadd.f32 %v18210_v55, %v8973_v52  ;;  %v11507_v1 = vpop.f32.mrb[50].mxu0 }
 0xfa8   :  { %v8985_v2 = vadd.f32 %v11507_v1, %v18210_v55  ;;  %v8976_v34 = vpop.f32.mrb[51].mxu0  ;;  %v9042_v36 = vmax.f32 %v8982_v7, 0.0 }
 0xfa9   :  { %v8977_v42 = vadd.f32 %v18210_v55, %v8976_v34  ;;  %v11512_v51 = vpop.f32.mrb[220].mxu1  ;;  %v9040_v59 = vmax.f32 %v8974_v56, 0.0 }
 0xfaa   :  { %v9043_v53 = vmax.f32 %v8985_v2, 0.0  ;;  %v9211_v44 = vadd.f32 %v11512_v51, %v18303_v29  ;;  %v9202_v33 = vpop.f32.mrb[221].mxu1 }
 0xfab   :  { %v9041_v17 = vmax.f32 %v8977_v42, 0.0  ;;  %v9203_v49 = vadd.f32 %v18303_v29, %v9202_v33  ;;  %v11513_v45 = vpop.f32.mrb[222].mxu1  ;;  %v9649_v33 = vlaneseq }
 0xfac   :  { %v9071_v14 = vpack.c.bf16 %v9043_v53, %v9042_v36  ;;  %9488 = vperm.xlu1 %11645, %v9211_v44   ;;  %v9205_v41 = vpop.f32.mrb[223].mxu1  ;;  %v9214_v55 = vadd.f32 %v11513_v45, %v18303_v29 }
 0xfad   :  { %v9070_v11 = vpack.c.bf16 %v9041_v17, %v9040_v59  ;;  %v9206_v30 = vadd.f32 %v18303_v29, %v9205_v41  ;;  %9482 = vperm.xlu0 %11646, %v9203_v49   ;;  %v9650_v49 = vand.u32 127, %v9649_v33 }
 0xfaf   :  { %11562 = vmatprep.mubr.msk.bf16.mxu1 %vm1099_vm3, %v9070_v11 }
 0xfb0   :  { %9485 = vperm.xlu1 %11645, %v9206_v30   ;;  %11563 = vmatmul.mubr.msk.bf16.gmra.mrb[16].mxu1 %vm1099_vm3, %v9071_v14  ;;  %v9652_v30 = vshrl.u32 %v9649_v33, 7  ;;  %vm9945_vm3 = vcmask 1046534  }
 0xfb1   :  { %9491 = vperm.xlu0 %11646, %v9214_v55   ;;  %v9655_v55 = vadd.s32 4294967288, %v9650_v49 }
 0xfca   :  { %v11516_v19 = vpop.f32.mrb[224].mxu1 }
 0xfcb   :  { %v9227_v46 = vadd.f32 %v11516_v19, %v18303_v29  ;;  %v9218_v13 = vpop.f32.mrb[225].mxu1 }
 0xfcc   :  { %v9219_v48 = vadd.f32 %v18303_v29, %v9218_v13  ;;  %v11517_v27 = vpop.f32.mrb[226].mxu1  ;;  %v9662_v13 = vadd.s32 4294967280, %v9650_v49 }
 0xfcd   :  { %v9221_v57 = vpop.f32.mrb[227].mxu1  ;;  %9500 = vperm.xlu0 %11646, %v9227_v46   ;;  %v9230_v9 = vadd.f32 %v11517_v27, %v18303_v29 }
 0xfce   :  { %9494 = vperm.xlu1 %11645, %v9219_v48   ;;  %v9222_v58 = vadd.f32 %v18303_v29, %v9221_v57  ;;  %v9669_v48 = vadd.s32 4294967272, %v9650_v49  ;;  %v18342_v57 = vsub.s32 %v9650_v49, %v9652_v30 }
 0xfd2   :  { %9503 = vperm.xlu1 %11645, %v9230_v9  }
 0xfd6   :  { %9497 = vperm.xlu1 %11645, %v9222_v58   ;;  %v18344_v58 = vsub.s32 %v9655_v55, %v9652_v30 }
 0xfda   :  { %v11520_v50 = vpop.f32.mrb[228].mxu1 }
 0xfdb   :  { %v9243_v23 = vadd.f32 %v11520_v50, %v18303_v29  ;;  %v9234_v22 = vpop.f32.mrb[229].mxu1 }
 0xfdc   :  { %v11521_v12 = vpop.f32.mrb[230].mxu1  ;;  %v9235_v8 = vadd.f32 %v18303_v29, %v9234_v22  ;;  %v18349_v22 = vsub.s32 %v9669_v48, %v9652_v30 }
 0xfdd   :  { %v9246_v31 = vadd.f32 %v11521_v12, %v18303_v29  ;;  %v9237_v43 = vpop.f32.mrb[231].mxu1  ;;  %9512 = vperm.xlu1 %11645, %v9243_v23   ;;  %v18347_v23 = vsub.s32 %v9662_v13, %v9652_v30 }
 0xfde   :  { %v9238_v3 = vadd.f32 %v18303_v29, %v9237_v43 }
 0xfdf   :  { %9515 = vperm.xlu0 %11646, %v9246_v31  }
 0xfe1   :  { %9506 = vperm.xlu1 %11645, %v9235_v8  }
 0xfe5   :  { %9509 = vperm.xlu1 %11645, %v9238_v3  }
 0xff4   :  { %v11524_v6 = vpop.f32.mrb[232].mxu1 }
 0xff5   :  { %v9259_v25 = vadd.f32 %v11524_v6, %v18303_v29  ;;  %v9250_v35 = vpop.f32.mrb[233].mxu1 }
 0xff6   :  { %v9251_v39 = vadd.f32 %v18303_v29, %v9250_v35  ;;  %v11525_v38 = vpop.f32.mrb[234].mxu1 }
 0xff7   :  { %v9253_v21 = vpop.f32.mrb[235].mxu1  ;;  %9524 = vperm.xlu1 %11645, %v9259_v25   ;;  %v9262_v47 = vadd.f32 %v11525_v38, %v18303_v29 }
 0xff8   :  { %9518 = vperm.xlu0 %11646, %v9251_v39   ;;  %v9254_v40 = vadd.f32 %v18303_v29, %v9253_v21 }
 0xffb   :  { %9527 = vperm.xlu1 %11645, %v9262_v47  }
 0xfff   :  { %9521 = vperm.xlu1 %11645, %v9254_v40  }
0x1006   :  { %v11528_v54 = vpop.f32.mrb[236].mxu1 }
0x1007   :  { %v9275_v4 = vadd.f32 %v11528_v54, %v18303_v29  ;;  %v9266_v20 = vpop.f32.mrb[237].mxu1 }
0x1008   :  { %v9267_v0 = vadd.f32 %v18303_v29, %v9266_v20  ;;  %v11529_v28 = vpop.f32.mrb[238].mxu1 }
0x1009   :  { %v9269_v10 = vpop.f32.mrb[239].mxu1  ;;  %9536 = vperm.xlu1 %11645, %v9275_v4   ;;  %v9278_v32 = vadd.f32 %v11529_v28, %v18303_v29 }
0x100a   :  { %v9270_v5 = vadd.f32 %v18303_v29, %v9269_v10  ;;  %9530 = vperm.xlu0 %11646, %v9267_v0  }
0x100d   :  { %9533 = vperm.xlu1 %11645, %v9270_v5   ;;  %v9676_v5 = vadd.s32 4294967264, %v9650_v49 }
0x100e   :  { %v11532_v63 = vpop.f32.mrb[240].mxu1  ;;  %9539 = vperm.xlu0 %11646, %v9278_v32  }
0x100f   :  { %v9291_v24 = vadd.f32 %v11532_v63, %v18303_v29  ;;  %v9282_v37 = vpop.f32.mrb[241].mxu1  ;;  %v18364_v32 = vsub.s32 %v9676_v5, %v9652_v30 }
0x1010   :  { %v11533_v60 = vpop.f32.mrb[242].mxu1  ;;  %v9283_v18 = vadd.f32 %v18303_v29, %v9282_v37  ;;  %v9683_v37 = vadd.s32 4294967256, %v9650_v49 }
0x1011   :  { %v9285_v26 = vpop.f32.mrb[243].mxu1  ;;  %v9294_v7 = vadd.f32 %v11533_v60, %v18303_v29  ;;  %v9690_v60 = vadd.s32 4294967248, %v9650_v49 }
0x1012   :  { %v9286_v61 = vadd.f32 %v18303_v29, %v9285_v26  ;;  %9548 = vperm.xlu0 %11646, %v9291_v24  }
0x1014   :  { %9545 = vperm.xlu1 %11645, %v9286_v61  }
0x1016   :  { %v11536_v16 = vpop.f32.mrb[244].mxu1  ;;  %9542 = vperm.xlu0 %11646, %v9283_v18   ;;  %v18368_v18 = vsub.s32 %v9683_v37, %v9652_v30 }
0x1017   :  { %v9307_v62 = vadd.f32 %v11536_v16, %v18303_v29  ;;  %v9298_v15 = vpop.f32.mrb[245].mxu1  ;;  %v18370_v16 = vsub.s32 %v9690_v60, %v9652_v30 }
0x1018   :  { %v11537_v52 = vpop.f32.mrb[246].mxu1  ;;  %v9299_v2 = vadd.f32 %v18303_v29, %v9298_v15 }
0x1019   :  { %v9301_v56 = vpop.f32.mrb[247].mxu1  ;;  %9560 = vperm.xlu1 %11645, %v9307_v62   ;;  %v9310_v1 = vadd.f32 %v11537_v52, %v18303_v29 }
0x101a   :  { %9551 = vperm.xlu0 %11646, %v9294_v7   ;;  %v9302_v42 = vadd.f32 %v18303_v29, %v9301_v56 }
0x101d   :  { %9563 = vperm.xlu1 %11645, %v9310_v1  }
0x101e   :  { %v11540_v34 = vpop.f32.mrb[248].mxu1  ;;  %9554 = vperm.xlu0 %11646, %v9299_v2  }
0x101f   :  { %v9314_v51 = vpop.f32.mrb[249].mxu1  ;;  %v9323_v59 = vadd.f32 %v11540_v34, %v18303_v29 }
0x1020   :  { %v11541_v36 = vpop.f32.mrb[250].mxu1  ;;  %v9315_v14 = vadd.f32 %v18303_v29, %v9314_v51 }
0x1021   :  { %v9326_v53 = vadd.f32 %v11541_v36, %v18303_v29  ;;  %v9317_v44 = vpop.f32.mrb[251].mxu1  ;;  %9557 = vperm.xlu1 %11645, %v9302_v42  }
0x1022   :  { %v9318_v17 = vadd.f32 %v18303_v29, %v9317_v44 }
0x1023   :  { %9575 = vperm.xlu0 %11646, %v9326_v53  }
0x1025   :  { %9572 = vperm.xlu1 %11645, %v9323_v59  }
0x1026   :  { %v11544_v45 = vpop.f32.mrb[252].mxu1 }
0x1027   :  { %v9330_v41 = vpop.f32.mrb[253].mxu1  ;;  %9569 = vperm.xlu0 %11646, %v9318_v17   ;;  %v9339_v19 = vadd.f32 %v11544_v45, %v18303_v29 }
0x1028   :  { %v11545_v11 = vpop.f32.mrb[254].mxu1  ;;  %v9331_v50 = vadd.f32 %v18303_v29, %v9330_v41 }
0x1029   :  { %v9333_v46 = vpop.f32.mrb[255].mxu1  ;;  %9566 = vperm.xlu1 %11645, %v9315_v14   ;;  %v9342_v3 = vadd.f32 %v11545_v11, %v18303_v29 }
0x102a   :  { %v9334_v4 = vadd.f32 %v18303_v29, %v9333_v46 }
0x102b   :  { %9584 = vperm.xlu0 %11646, %v9339_v19   ;;  %v9489_v27 = vpop.permute.xlu1 %9488 }
0x102c   :  { %v9483_v9 = vpop.permute.xlu0 %9482  ;;  %v9666_v6 = vrot.slane %v9489_v27, %v18347_v23 }
0x102d   :  { %v9654_v31 = vrot.slane %v9483_v9, %v18342_v57 }
0x102f   :  { %9578 = vperm.xlu0 %11646, %v9331_v50   ;;  %v9486_v12 = vpop.permute.xlu1 %9485 }
0x1030   :  { %v9659_v43 = vrot.slane %v9486_v12, %v18344_v58  ;;  %v9492_v8 = vpop.permute.xlu0 %9491 }
0x1031   :  { %v9673_v25 = vrot.slane %v9492_v8, %v18349_v22 }
0x1032   :  { %v9661_v35 = vsel %vm9660_vm8, %v9659_v43, %v9654_v31  ;;  %v11548_v39 = vpop.f32.mrb[0].mxu1 }
0x1033   :  { %9587 = vperm.xlu0 %11646, %v9342_v3   ;;  %v9668_v38 = vsel %vm9667_vm9, %v9666_v6, %v9661_v35  ;;  %v9355_v21 = vadd.f32 %v11548_v39, %v18303_v29  ;;  %v9346_v47 = vpop.f32.mrb[1].mxu1 }
0x1034   :  { %v9675_v40 = vsel %vm9674_vm10, %v9673_v25, %v9668_v38  ;;  %v11549_v54 = vpop.f32.mrb[2].mxu1  ;;  %v9347_v0 = vadd.f32 %v18303_v29, %v9346_v47 }
0x1035   :  { %v9349_v20 = vpop.f32.mrb[3].mxu1  ;;  %9596 = vperm.xlu1 %11645, %v9355_v21   ;;  %v9358_v28 = vadd.f32 %v11549_v54, %v18303_v29 }
0x1036   :  { %v9350_v10 = vadd.f32 %v18303_v29, %v9349_v20 }
0x1037   :  { %9581 = vperm.xlu0 %11646, %v9334_v4  }
0x1039   :  { %9590 = vperm.xlu1 %11645, %v9347_v0  }
0x103d   :  { %9599 = vperm.xlu1 %11645, %v9358_v28  }
0x1041   :  { %9593 = vperm.xlu1 %11645, %v9350_v10  }
0x104c   :  { %v9501_v15 = vpop.permute.xlu0 %9500 }
0x104d   :  { %v9495_v63 = vpop.permute.xlu1 %9494  ;;  %v9694_v51 = vrot.slane %v9501_v15, %v18370_v16 }
0x104e   :  { %v9680_v24 = vrot.slane %v9495_v63, %v18364_v32 }
0x1050   :  { %v9682_v26 = vsel %vm9681_vm11, %v9680_v24, %v9675_v40 }
0x1051   :  { %v9504_v61 = vpop.permute.xlu1 %9503 }
0x1052   :  { %v9700_v49 = vrot.slane %v9504_v61, %v18342_v57 }
0x1053   :  { %v11552_v62 = vpop.f32.mrb[4].mxu1 }
0x1054   :  { %v9371_v7 = vadd.f32 %v11552_v62, %v18303_v29  ;;  %v9362_v52 = vpop.f32.mrb[5].mxu1 }
0x1055   :  { %v9363_v56 = vadd.f32 %v18303_v29, %v9362_v52  ;;  %v11553_v1 = vpop.f32.mrb[6].mxu1  ;;  %v9498_v2 = vpop.permute.xlu1 %9497 }
0x1056   :  { %v9687_v34 = vrot.slane %v9498_v2, %v18368_v18  ;;  %v9365_v42 = vpop.f32.mrb[7].mxu1  ;;  %9608 = vperm.xlu0 %11646, %v9371_v7   ;;  %v9374_v44 = vadd.f32 %v11553_v1, %v18303_v29 }
0x1057   :  { %v9366_v36 = vadd.f32 %v18303_v29, %v9365_v42  ;;  %9602 = vperm.xlu1 %11645, %v9363_v56  }
0x1058   :  { %v9689_v53 = vsel %vm9688_vm12, %v9687_v34, %v9682_v26 }
0x1059   :  { %v9696_v33 = vsel %vm9695_vm13, %v9694_v51, %v9689_v53 }
0x105a   :  { %9605 = vperm.xlu0 %11646, %v9366_v36  }
0x105b   :  { %9611 = vperm.xlu1 %11645, %v9374_v44  }
0x105c   :  { %v9513_v59 = vpop.permute.xlu1 %9512 }
0x105d   :  { %v9714_v48 = vrot.slane %v9513_v59, %v18349_v22 }
0x105e   :  { %v9516_v14 = vpop.permute.xlu0 %9515 }
0x105f   :  { %v9719_v50 = vrot.slane %v9516_v14, %v18364_v32 }
0x1060   :  { %v9507_v17 = vpop.permute.xlu1 %9506 }
0x1061   :  { %v9704_v45 = vrot.slane %v9507_v17, %v18344_v58 }
0x1063   :  { %v9705_v41 = vsel %vm9660_vm8, %v9704_v45, %v9700_v49  ;;  %v11556_v11 = vpop.f32.mrb[8].mxu1 }
0x1064   :  { %v9387_v30 = vadd.f32 %v11556_v11, %v18303_v29  ;;  %v9378_v55 = vpop.f32.mrb[9].mxu1  ;;  %v9510_v19 = vpop.permute.xlu1 %9509 }
0x1065   :  { %v9709_v46 = vrot.slane %v9510_v19, %v18347_v23  ;;  %v11557_v13 = vpop.f32.mrb[10].mxu1  ;;  %v9379_v31 = vadd.f32 %v18303_v29, %v9378_v55 }
0x1066   :  { %v9390_v27 = vadd.f32 %v11557_v13, %v18303_v29  ;;  %v9381_v9 = vpop.f32.mrb[11].mxu1  ;;  %9620 = vperm.xlu0 %11646, %v9387_v30  }
0x1067   :  { %v9710_v12 = vsel %vm9667_vm9, %v9709_v46, %v9705_v41  ;;  %v9382_v3 = vadd.f32 %v18303_v29, %v9381_v9 }
0x1068   :  { %v9715_v43 = vsel %vm9674_vm10, %v9714_v48, %v9710_v12  ;;  %9623 = vperm.xlu1 %11645, %v9390_v27  }
0x1069   :  { %v9720_v8 = vsel %vm9681_vm11, %v9719_v50, %v9715_v43 }
0x106a   :  { %9614 = vperm.xlu0 %11646, %v9379_v31  }
0x106e   :  { %9617 = vperm.xlu0 %11646, %v9382_v3  }
0x1073   :  { %v11560_v6 = vpop.f32.mrb[12].mxu1 }
0x1074   :  { %v9403_v25 = vadd.f32 %v11560_v6, %v18303_v29  ;;  %v9394_v35 = vpop.f32.mrb[13].mxu1 }
0x1075   :  { %v9395_v39 = vadd.f32 %v18303_v29, %v9394_v35  ;;  %v11561_v38 = vpop.f32.mrb[14].mxu1 }
0x1076   :  { %v9397_v21 = vpop.f32.mrb[15].mxu1  ;;  %9632 = vperm.xlu0 %11646, %v9403_v25   ;;  %v9525_v47 = vpop.permute.xlu1 %9524  ;;  %v9406_v4 = vadd.f32 %v11561_v38, %v18303_v29 }
0x1077   :  { %9626 = vperm.xlu1 %11645, %v9395_v39   ;;  %v9519_v40 = vpop.permute.xlu0 %9518  ;;  %v9734_v28 = vrot.slane %v9525_v47, %v18342_v57  ;;  %v9398_v5 = vadd.f32 %v18303_v29, %v9397_v21 }
0x1078   :  { %v9724_v54 = vrot.slane %v9519_v40, %v18368_v18 }
0x107a   :  { %v9725_v20 = vsel %vm9688_vm12, %v9724_v54, %v9720_v8  ;;  %v9528_v0 = vpop.permute.xlu1 %9527 }
0x107b   :  { %9635 = vperm.xlu1 %11645, %v9406_v4   ;;  %v9738_v10 = vrot.slane %v9528_v0, %v18344_v58 }
0x107d   :  { %v9739_v63 = vsel %vm9660_vm8, %v9738_v10, %v9734_v28 }
0x107e   :  { %v9522_v24 = vpop.permute.xlu1 %9521 }
0x107f   :  { %9629 = vperm.xlu1 %11645, %v9398_v5   ;;  %v9729_v37 = vrot.slane %v9522_v24, %v18370_v16 }
0x1081   :  { %v9730_v60 = vsel %vm9695_vm13, %v9729_v37, %v9725_v20 }
0x1082   :  { %v9936_v26 = vsel %vm9935_vm14, %v9730_v60, %v9696_v33 }
0x1083   :  { %v11564_v61 = vpop.f32.mrb[16].mxu1 }
0x1084   :  { %v9410_v62 = vpop.f32.mrb[17].mxu1  ;;  %v9419_v51 = vadd.f32 %v11564_v61, %v18303_v29 }
0x1085   :  { %v9411_v15 = vadd.f32 %v18303_v29, %v9410_v62  ;;  %v11565_v7 = vpop.f32.mrb[18].mxu1 }
0x1086   :  { %v9413_v52 = vpop.f32.mrb[19].mxu1  ;;  %v9422_v34 = vadd.f32 %v11565_v7, %v18303_v29 }
0x1087   :  { %v9414_v56 = vadd.f32 %v18303_v29, %v9413_v52  ;;  %9638 = vperm.xlu1 %11645, %v9411_v15  }
0x1088   :  { %v9537_v1 = vpop.permute.xlu1 %9536 }
0x1089   :  { %v9531_v2 = vpop.permute.xlu0 %9530  ;;  %9641 = vperm.xlu0 %11646, %v9414_v56   ;;  %v9753_v59 = vrot.slane %v9537_v1, %v18364_v32 }
0x108a   :  { %v9743_v42 = vrot.slane %v9531_v2, %v18347_v23 }
0x108b   :  { %9647 = vperm.xlu1 %11645, %v9422_v34  }
0x108c   :  { %v9744_v36 = vsel %vm9667_vm9, %v9743_v42, %v9739_v63  ;;  %v9534_v53 = vpop.permute.xlu1 %9533 }
0x108d   :  { %v9748_v44 = vrot.slane %v9534_v53, %v18349_v22  ;;  %v9540_v33 = vpop.permute.xlu0 %9539  ;;  %9644 = vperm.xlu0 %11646, %v9419_v51  }
0x108e   :  { %v9758_v17 = vrot.slane %v9540_v33, %v18368_v18 }
0x108f   :  { %v9749_v49 = vsel %vm9674_vm10, %v9748_v44, %v9744_v36 }
0x1090   :  { %v9754_v45 = vsel %vm9681_vm11, %v9753_v59, %v9749_v49 }
0x1091   :  { %v9759_v14 = vsel %vm9688_vm12, %v9758_v17, %v9754_v45  ;;  %v9549_v41 = vpop.permute.xlu0 %9548 }
0x1093   :  { %v9546_v19 = vpop.permute.xlu1 %9545 }
0x1094   :  { %v9768_v24 = vrot.slane %v9546_v19, %v18342_v57 }
0x1095   :  { %v9543_v29 = vpop.permute.xlu0 %9542 }
0x1096   :  { %v9763_v11 = vrot.slane %v9543_v29, %v18370_v16 }
0x1098   :  { %v9764_v30 = vsel %vm9695_vm13, %v9763_v11, %v9759_v14  ;;  %v18420_v46 = vpop.permute.xlu1 %9560 }
0x1099   :  { %v18418_v55 = vsel %vm9937_vm15, %v9764_v30, %v9936_v26  ;;  %v9552_v13 = vpop.permute.xlu0 %9551  ;;  %v9772_v26 = vrot.slane %v9549_v41, %v18344_v58  ;;  %v9792_v19 = vrot.slane %v18420_v46, %v18368_v18 }
0x109a   :  { %v9777_v37 = vrot.slane %v9552_v13, %v18347_v23 }
0x109b   :  { %v9773_v52 = vsel %vm9660_vm8, %v9772_v26, %v9768_v24 }
0x109c   :  { %v18422_v48 = vpop.permute.xlu1 %9563  ;;  %v9778_v34 = vsel %vm9667_vm9, %v9777_v37, %v9773_v52 }
0x109d   :  { %v9555_v27 = vpop.permute.xlu0 %9554 }
0x109e   :  { %v9782_v61 = vrot.slane %v9555_v27, %v18349_v22 }
0x10a0   :  { %v9558_v9 = vpop.permute.xlu1 %9557  ;;  %v9783_v53 = vsel %vm9674_vm10, %v9782_v61, %v9778_v34 }
0x10a1   :  { %v9787_v56 = vrot.slane %v9558_v9, %v18364_v32 }
0x10a2   :  { %v9576_v50 = vpop.permute.xlu0 %9575 }
0x10a3   :  { %v9788_v41 = vsel %vm9681_vm11, %v9787_v56, %v9783_v53  ;;  %v9816_v29 = vrot.slane %v9576_v50, %v18349_v22 }
0x10a4   :  { %v9573_v12 = vpop.permute.xlu1 %9572 }
0x10a5   :  { %v9811_v1 = vrot.slane %v9573_v12, %v18347_v23  ;;  %v9797_v12 = vrot.slane %v18422_v48, %v18370_v16 }
0x10a6   :  { %v9570_v31 = vpop.permute.xlu0 %9569 }
0x10a7   :  { %v9806_v60 = vrot.slane %v9570_v31, %v18344_v58 }
0x10a8   :  { %v9567_v43 = vpop.permute.xlu1 %9566 }
0x10a9   :  { %v9802_v5 = vrot.slane %v9567_v43, %v18342_v57 }
0x10aa   :  { %v18424_v8 = vpop.permute.xlu0 %9584 }
0x10ab   :  { %v9807_v62 = vsel %vm9660_vm8, %v9806_v60, %v9802_v5 }
0x10ac   :  { %v9812_v44 = vsel %vm9667_vm9, %v9811_v1, %v9807_v62 }
0x10ad   :  { %v9817_v31 = vsel %vm9674_vm10, %v9816_v29, %v9812_v44 }
0x10ae   :  { %v9579_v6 = vpop.permute.xlu0 %9578 }
0x10af   :  { %v9821_v59 = vrot.slane %v9579_v6, %v18364_v32 }
0x10b1   :  { %v9822_v6 = vsel %vm9681_vm11, %v9821_v59, %v9817_v31 }
0x10b2   :  { %v9588_v35 = vpop.permute.xlu0 %9587 }
0x10b3   :  { %v9836_v42 = vrot.slane %v9588_v35, %v18342_v57 }
0x10b4   :  { %v9597_v3 = vpop.permute.xlu1 %9596 }
0x10b5   :  { %v9850_v27 = vrot.slane %v9597_v3, %v18349_v22 }
0x10b6   :  { %v9582_v38 = vpop.permute.xlu0 %9581 }
0x10b7   :  { %v9826_v13 = vrot.slane %v9582_v38, %v18368_v18 }
0x10b8   :  { %v9591_v25 = vpop.permute.xlu1 %9590 }
0x10b9   :  { %v9840_v15 = vrot.slane %v9591_v25, %v18344_v58 }
0x10bb   :  { %v9841_v17 = vsel %vm9660_vm8, %v9840_v15, %v9836_v42 }
0x10bc   :  { %v18426_v39 = vpop.permute.xlu1 %9599 }
0x10c0   :  { %v9594_v21 = vpop.permute.xlu1 %9593 }
0x10c1   :  { %v9845_v2 = vrot.slane %v9594_v21, %v18347_v23 }
0x10c3   :  { %v9846_v11 = vsel %vm9667_vm9, %v9845_v2, %v9841_v17 }
0x10c4   :  { %v9851_v46 = vsel %vm9674_vm10, %v9850_v27, %v9846_v11 }
0x10d5   :  { %v9609_v47 = vpop.permute.xlu0 %9608 }
0x10d6   :  { %v18428_v40 = vpop.permute.xlu1 %9602  ;;  %v9870_v49 = vrot.slane %v9609_v47, %v18342_v57  ;;  %v9855_v47 = vrot.slane %v18426_v39, %v18364_v32 }
0x10d7   :  { %v9860_v35 = vrot.slane %v18428_v40, %v18368_v18  ;;  %v9831_v40 = vrot.slane %v18424_v8, %v18370_v16 }
0x10d8   :  { %v9856_v37 = vsel %vm9681_vm11, %v9855_v47, %v9851_v46 }
0x10d9   :  { %v18430_v54 = vpop.permute.xlu0 %9605  ;;  %v9861_v60 = vsel %vm9688_vm12, %v9860_v35, %v9856_v37 }
0x10da   :  { %v9612_v4 = vpop.permute.xlu1 %9611 }
0x10db   :  { %v9874_v51 = vrot.slane %v9612_v4, %v18344_v58  ;;  %v9865_v4 = vrot.slane %v18430_v54, %v18370_v16 }
0x10dd   :  { %v9875_v9 = vsel %vm9660_vm8, %v9874_v51, %v9870_v49  ;;  %v9866_v61 = vsel %vm9695_vm13, %v9865_v4, %v9861_v60 }
0x10e5   :  { %v9621_v20 = vpop.permute.xlu0 %9620 }
0x10e6   :  { %v9889_v48 = vrot.slane %v9621_v20, %v18364_v32 }
0x10e7   :  { %v18432_v0 = vpop.permute.xlu1 %9623 }
0x10e8   :  { %v9894_v39 = vrot.slane %v18432_v0, %v18368_v18 }
0x10e9   :  { %v9615_v10 = vpop.permute.xlu0 %9614 }
0x10ea   :  { %v9879_v33 = vrot.slane %v9615_v10, %v18347_v23 }
0x10ec   :  { %v9880_v50 = vsel %vm9667_vm9, %v9879_v33, %v9875_v9 }
0x10ed   :  { %v9618_v7 = vpop.permute.xlu0 %9617 }
0x10ee   :  { %v9884_v45 = vrot.slane %v9618_v7, %v18349_v22 }
0x10f0   :  { %v9885_v25 = vsel %vm9674_vm10, %v9884_v45, %v9880_v50 }
0x10f1   :  { %v9890_v20 = vsel %vm9681_vm11, %v9889_v48, %v9885_v25 }
0x10f5   :  { %v9633_v14 = vpop.permute.xlu0 %9632 }
0x10f6   :  { %v18434_v28 = vpop.permute.xlu1 %9626  ;;  %v9908_v43 = vrot.slane %v9633_v14, %v18344_v58  ;;  %v9827_v58 = vsel %vm9688_vm12, %v9826_v13, %v9822_v6 }
0x10fa   :  { %v9636_v63 = vpop.permute.xlu1 %9635 }
0x10fb   :  { %v9913_v10 = vrot.slane %v9636_v63, %v18347_v23  ;;  %v9832_v63 = vsel %vm9695_vm13, %v9831_v40, %v9827_v58 }
0x10fe   :  { %v9630_v36 = vpop.permute.xlu1 %9629 }
0x10ff   :  { %v9904_v30 = vrot.slane %v9630_v36, %v18342_v57  ;;  %v9793_v57 = vsel %vm9688_vm12, %v9792_v19, %v9788_v41 }
0x1100   :  { %v9798_v24 = vsel %vm9695_vm13, %v9797_v12, %v9793_v57 }
0x1101   :  { %v9909_v38 = vsel %vm9660_vm8, %v9908_v43, %v9904_v30 }
0x1102   :  { %v9914_v54 = vsel %vm9667_vm9, %v9913_v10, %v9909_v38 }
0x1106   :  { %v9639_v3 = vpop.permute.xlu1 %9638 }
0x1107   :  { %v9918_v21 = vrot.slane %v9639_v3, %v18349_v22  ;;  %v9899_v22 = vrot.slane %v18434_v28, %v18370_v16  ;;  %v9895_v28 = vsel %vm9688_vm12, %v9894_v39, %v9890_v20 }
0x1108   :  { %v9642_v5 = vpop.permute.xlu0 %9641 }
0x1109   :  { %v9923_v23 = vrot.slane %v9642_v5, %v18364_v32  ;;  %v9919_v8 = vsel %vm9674_vm10, %v9918_v21, %v9914_v54  ;;  %v9900_v0 = vsel %vm9695_vm13, %v9899_v22, %v9895_v28  ;;  %v9940_v32 = vsel %vm9939_vm0, %v9798_v24, %v18418_v55 }
0x110a   :  { %v9648_v26 = vpop.permute.xlu1 %9647  ;;  %v9942_v56 = vsel %vm9941_vm1, %v9832_v63, %v9940_v32 }
0x110b   :  { %v9924_v7 = vsel %vm9681_vm11, %v9923_v23, %v9919_v8  ;;  %v9933_v52 = vrot.slane %v9648_v26, %v18370_v16  ;;  %v9944_v2 = vsel %vm9943_vm2, %v9866_v61, %v9942_v56 }
0x110c   :  { %v9645_v62 = vpop.permute.xlu0 %9644  ;;  %v9946_v42 = vsel %vm9945_vm3, %v9900_v0, %v9944_v2 }
0x110d   :  { %v9928_v15 = vrot.slane %v9645_v62, %v18368_v18 }
0x110f   :  { %v9929_v1 = vsel %vm9688_vm12, %v9928_v15, %v9924_v7 }
0x1110   :  { %v9934_v34 = vsel %vm9695_vm13, %v9933_v52, %v9929_v1 }
0x1111   :  { %v9948_v18 = vsel %vm9947_vm4, %v9934_v34, %v9946_v42 }
0x1112   :  { %9950 = vst.msk [vmem:[#allocation2] sm:$0xff] %vm3159_vm5, %v9948_v18 }
0x1113   :  { %12489 = shalt.err (!%p12486_p4)
}
0x1114   :  { %s12490_s21 = scalar_lea.hbm %s18527_s3, 128 }
0x1115   :  { %p12491_p5 = scmp.ne.s32.totalorder %s18527_s3, %s12490_s21  ;;  %p12494_p6 = scmp.lt.u32.totalorder %s12490_s21, %s18527_s3 }
0x1117   :  { %p12496_p7 = pnand %p12494_p6, %p12491_p5 }
0x1119   :  { %12499 = shalt.err (!%p12496_p7)
}
0x111a   :  { %9960 = dma.vmem_to_hbm [thread:$0]  %s9958_s15, 128, %s18527_s3, [#allocation3]  }
0x111b   :  { %12500 = dma.done.wait [#allocation3], 128  }
0x111c   :  { %12501 = vsyncadd [#allocation3], 4294967168 }
0x111d   :  { %9964 = vsyncpa [#allocation3], 1 }

</bundles_post_ra>
